<compile_context>
chip_gen: v7x
topology: tpu7x:2x2x1
jax: 0.10.0
libtpu: 0.0.40
codegen_flags: <defaults>
</compile_context>

<pallas_src>
import jax
import jax.numpy as jnp
from jax.experimental import pallas as pl
from jax.experimental.pallas import tpu as pltpu

# Keep f32 matmul accuracy identical between the Pallas kernel and the pure-JAX reference.
jax.config.update("jax_default_matmul_precision", "highest")

# ----------------------------- config --------------------------------------
BATCH = 2
N_EMBED = 32
N_HEADS = 2
RECURRENT_SEQ_LEN = 8
SHORT_CTX_LEN = 8
N_INTERMEDIATE = 2
VOCAB_SIZE = 64
RESID_GATE_MULTIPLIER = 2.0
LN_EPS = 1e-5
SCALE = 1.0 / (N_EMBED ** 0.5)

HE = N_HEADS * N_EMBED     # 64   (flattened head width)
FF_OUT_W = 128             # padded lane-dense width of fused layer-FF output
INT_COL = 64               # column offset of internal-branch block in fused FF output
DEC_W = 128                # padded lane-dense decode output: [token(0:V) | conf(V) | pad]


# ------------------------------ fused kernel --------------------------------
def rnn_ponder_kernel(rec_ref, int_ref,
                      ln_g_ref, ln_b_ref, qkv_w_ref,
                      ff_w1_ref, ff_b1_ref, ff_w2_ref, ff_b2_ref,
                      dln_g_ref, dln_b_ref, qdec_ref, kvd_w_ref,
                      dff_w1_ref, dff_b1_ref, dff_w2_ref, dff_b2_ref,
                      rec_out_ref, int_out_ref, dec_out_ref):
    B, R, E = rec_ref.shape
    S = int_ref.shape[1]
    T = S + R

    def ln(x, g, b):
        mean = jnp.mean(x, axis=-1, keepdims=True)
        var = jnp.mean(jnp.square(x - mean), axis=-1, keepdims=True)
        return (x - mean) * jax.lax.rsqrt(var + LN_EPS) * g + b

    def softmax(s):
        m = jnp.max(s, axis=-1, keepdims=True)
        e = jnp.exp(s - m)
        return e / jnp.sum(e, axis=-1, keepdims=True)

    def act(x):
        # config.get_activation() -> GELU (tanh approximation)
        return jax.nn.gelu(x, approximate=True)

    def batched_attn(q, k, v):
        # q: [B, Lq, E], k/v: [B, Lk, E] -> [B, Lq, E]
        s = jax.lax.dot_general(q, k, (((2,), (2,)), ((0,), (0,))),
                                preferred_element_type=jnp.float32) * SCALE
        p = softmax(s)
        return jax.lax.dot_general(p, v, (((2,), (1,)), ((0,), (0,))),
                                   preferred_element_type=jnp.float32)

    # State stacked along the sequence axis: rows [0:S] = internal, rows [S:T] = recurrent.
    st = jnp.concatenate([int_ref[...], rec_ref[...]], axis=1)          # [B, T, E]

    for l in range(N_INTERMEDIATE):
        g = ln_g_ref[l]                                                 # [1, E]
        b = ln_b_ref[l]
        xn = ln(st, g, b)                                               # one LN pass, [B, T, E]

        # Fused q/k/v projection for BOTH branches (lane-dense 384-wide output).
        qkv = jnp.dot(xn.reshape(B * T, E), qkv_w_ref[l],
                      preferred_element_type=jnp.float32)               # [B*T, 6*HE]
        qkv3 = qkv.reshape(B, T, 6 * HE)

        w1 = ff_w1_ref[l]                                               # [2HE, 2HE] block-diag
        ff_pre = jnp.zeros((B * R, 2 * HE), jnp.float32)
        for h in range(N_HEADS):
            # Recurrent branch: queries = recurrent rows, KV = whole stacked sequence.
            # NOTE: torch uses KV=[internal;recurrent] for the recurrent branch and
            # KV=[recurrent;internal] for the internal branch; unmasked softmax attention
            # is permutation-invariant over KV rows, so one shared stacked buffer is valid.
            o_r = batched_attn(qkv3[:, S:T, h * E:(h + 1) * E],
                               qkv3[:, :, HE + h * E: HE + (h + 1) * E],
                               qkv3[:, :, 2 * HE + h * E: 2 * HE + (h + 1) * E])   # [B, R, E]
            # Internal branch: queries = internal rows.
            o_i = batched_attn(qkv3[:, :S, 3 * HE + h * E: 3 * HE + (h + 1) * E],
                               qkv3[:, :, 4 * HE + h * E: 4 * HE + (h + 1) * E],
                               qkv3[:, :, 5 * HE + h * E: 5 * HE + (h + 1) * E])   # [B, S, E]
            # Fold the head-merge (torch Flatten) into the first FF matmul (no lane concat).
            ff_pre += jnp.dot(o_r.reshape(B * R, E), w1[h * E:(h + 1) * E, :],
                              preferred_element_type=jnp.float32)
            ff_pre += jnp.dot(o_i.reshape(B * S, E), w1[HE + h * E: HE + (h + 1) * E, :],
                              preferred_element_type=jnp.float32)

        hmid = act(ff_pre + ff_b1_ref[l])                               # [B*R, 2HE] (128 lanes)
        out = jnp.dot(hmid, ff_w2_ref[l],
                      preferred_element_type=jnp.float32) + ff_b2_ref[l]  # [B*R, 128]

        rec_resid = out[:, :E] * (jax.nn.sigmoid(out[:, E:E + 1]) * RESID_GATE_MULTIPLIER)
        int_resid = out[:, INT_COL:INT_COL + E] * (
            jax.nn.sigmoid(out[:, INT_COL + E:INT_COL + E + 1]) * RESID_GATE_MULTIPLIER)
        st = st + jnp.concatenate([int_resid.reshape(B, S, E),
                                   rec_resid.reshape(B, R, E)], axis=1)

    # ------------------------- output decode (internal rows) ----------------
    xnd = ln(st[:, :S, :], dln_g_ref[...], dln_b_ref[...])              # [B, S, E]
    kv = jnp.dot(xnd.reshape(B * S, E), kvd_w_ref[...],
                 preferred_element_type=jnp.float32)                    # [B*S, 4E] lane-dense 128
    kv3 = kv.reshape(B, S, 4 * E)
    qd = qdec_ref[...]                                                  # [2, E]: q_out, q_halt

    heads = []
    for i in range(2):                                                  # 0 = out, 1 = halt
        q = jnp.broadcast_to(qd[i:i + 1, :][None, :, :], (B, 1, E))     # [B, 1, E]
        o = batched_attn(q,
                         kv3[:, :, 2 * i * E:(2 * i + 1) * E],
                         kv3[:, :, (2 * i + 1) * E:(2 * i + 2) * E])    # [B, 1, E]
        heads.append(o.reshape(B, E))

    # Fused token/confidence feed-forwards via block-diagonal weights (head fold, no concat).
    w1d = dff_w1_ref[...]                                               # [2E, 2E]
    h_pre = (jnp.dot(heads[0], w1d[:E, :], preferred_element_type=jnp.float32)
             + jnp.dot(heads[1], w1d[E:, :], preferred_element_type=jnp.float32)
             + dff_b1_ref[...])                                         # [B, 2E]
    dec = jnp.dot(act(h_pre), dff_w2_ref[...],
                  preferred_element_type=jnp.float32) + dff_b2_ref[...]  # [B, 128] lane-dense

    dec_out_ref[...] = dec.astype(dec_out_ref.dtype)
    int_out_ref[...] = st[:, :S, :].astype(int_out_ref.dtype)
    rec_out_ref[...] = st[:, S:, :].astype(rec_out_ref.dtype)


# ------------------------------ wrapper --------------------------------------
def rnn_ponder_forward(recurrent, internal, kp):
    B, R, E = recurrent.shape
    S = internal.shape[1]
    # TODO(synk): fused-FF path assumes recurrent_seq_len == short_ctx_len; split branches otherwise.
    assert R == S

    inputs = [recurrent, internal,
              kp['ln_g'], kp['ln_b'], kp['qkv_w'],
              kp['ff_w1'], kp['ff_b1'], kp['ff_w2'], kp['ff_b2'],
              kp['dln_g'], kp['dln_b'], kp['qdec'], kp['kvd_w'],
              kp['dff_w1'], kp['dff_b1'], kp['dff_w2'], kp['dff_b2']]

    def full_spec(a):
        n = a.ndim
        return pl.BlockSpec(a.shape, lambda i, n=n: (0,) * n)

    rec_out, int_out, dec = pl.pallas_call(
        rnn_ponder_kernel,
        grid=(1,),
        in_specs=[full_spec(a) for a in inputs],
        out_specs=[pl.BlockSpec((B, R, E), lambda i: (0, 0, 0)),
                   pl.BlockSpec((B, S, E), lambda i: (0, 0, 0)),
                   pl.BlockSpec((B, DEC_W), lambda i: (0, 0))],
        out_shape=[jax.ShapeDtypeStruct((B, R, E), recurrent.dtype),
                   jax.ShapeDtypeStruct((B, S, E), internal.dtype),
                   jax.ShapeDtypeStruct((B, DEC_W), jnp.float32)],
        compiler_params=pltpu.CompilerParams(dimension_semantics=("arbitrary",)),
    )(*inputs)

    token = dec[:, :VOCAB_SIZE]
    conf = dec[:, VOCAB_SIZE]
    return rec_out, int_out, token, conf


# --------------------- fused/stacked kernel-parameter prep -------------------
def _blockdiag(a, b):
    ra, ca = a.shape
    rb, cb = b.shape
    out = jnp.zeros((ra + rb, ca + cb), a.dtype)
    out = out.at[:ra, :ca].set(a)
    out = out.at[ra:, ca:].set(b)
    return out


def prepare_kernel_params(params):
    E = N_EMBED
    layers = params['intermediate']

    ln_g = jnp.stack([lp['ln_g'] for lp in layers])                       # [L, 1, E]
    ln_b = jnp.stack([lp['ln_b'] for lp in layers])                       # [L, 1, E]
    qkv_w = jnp.stack([jnp.concatenate(
        [lp['rq_w'], lp['rkv_w'], lp['iq_w'], lp['ikv_w']], axis=1)
        for lp in layers])                                                # [L, E, 6*HE]

    ff_w1 = jnp.stack([_blockdiag(lp['rff_w1'], lp['iff_w1']) for lp in layers])   # [L, 2HE, 2HE]
    ff_b1 = jnp.stack([jnp.concatenate([lp['rff_b1'], lp['iff_b1']], axis=1)
                       for lp in layers])                                          # [L, 1, 2HE]

    def w2_big(lp):
        w = jnp.zeros((2 * HE, FF_OUT_W), jnp.float32)
        w = w.at[:HE, :E + 1].set(lp['rff_w2'])
        w = w.at[HE:, INT_COL:INT_COL + E + 1].set(lp['iff_w2'])
        return w

    def b2_big(lp):
        b = jnp.zeros((1, FF_OUT_W), jnp.float32)
        b = b.at[:, :E + 1].set(lp['rff_b2'])
        b = b.at[:, INT_COL:INT_COL + E + 1].set(lp['iff_b2'])
        return b

    ff_w2 = jnp.stack([w2_big(lp) for lp in layers])                      # [L, 2HE, 128]
    ff_b2 = jnp.stack([b2_big(lp) for lp in layers])                      # [L, 1, 128]

    po = params['output']
    qdec = jnp.concatenate([po['q_out'], po['q_halt']], axis=0)           # [2, E]
    kvd_w = jnp.concatenate([po['kv_out_w'], po['kv_halt_w']], axis=1)    # [E, 4E]
    dff_w1 = _blockdiag(po['ffo_w1'], po['ffc_w1'])                       # [2E, 2E]
    dff_b1 = jnp.concatenate([po['ffo_b1'], po['ffc_b1']], axis=1)        # [1, 2E]
    dff_w2 = jnp.zeros((2 * E, DEC_W), jnp.float32)
    dff_w2 = dff_w2.at[:E, :VOCAB_SIZE].set(po['ffo_w2'])
    dff_w2 = dff_w2.at[E:, VOCAB_SIZE:VOCAB_SIZE + 1].set(po['ffc_w2'])
    dff_b2 = jnp.zeros((1, DEC_W), jnp.float32)
    dff_b2 = dff_b2.at[:, :VOCAB_SIZE].set(po['ffo_b2'])
    dff_b2 = dff_b2.at[:, VOCAB_SIZE:VOCAB_SIZE + 1].set(po['ffc_b2'])

    return dict(ln_g=ln_g, ln_b=ln_b, qkv_w=qkv_w,
                ff_w1=ff_w1, ff_b1=ff_b1, ff_w2=ff_w2, ff_b2=ff_b2,
                dln_g=po['ln_g'], dln_b=po['ln_b'],
                qdec=qdec, kvd_w=kvd_w,
                dff_w1=dff_w1, dff_b1=dff_b1, dff_w2=dff_w2, dff_b2=dff_b2)


# -------------------------- pure-JAX reference -------------------------------
def _ref_ln(x, g, b):
    mean = x.mean(-1, keepdims=True)
    var = ((x - mean) ** 2).mean(-1, keepdims=True)
    return (x - mean) / jnp.sqrt(var + LN_EPS) * g + b


def _ref_cross_attn(q_in, kv_seq, q_w, kv_w):
    B, Lq, E = q_in.shape
    q = (q_in @ q_w).reshape(B, Lq, N_HEADS, E).transpose(0, 2, 1, 3)
    kv = (kv_seq @ kv_w).reshape(B, kv_seq.shape[1], 2, N_HEADS, E)
    k = kv[:, :, 0].transpose(0, 2, 1, 3)
    v = kv[:, :, 1].transpose(0, 2, 1, 3)
    s = jnp.einsum('bhqe,bhke->bhqk', q, k) * SCALE
    p = jax.nn.softmax(s, axis=-1)
    o = jnp.einsum('bhqk,bhke->bhqe', p, v)
    return o.transpose(0, 2, 1, 3).reshape(B, Lq, N_HEADS * E)


def _ref_gated_ff(x_flat, w1, b1, w2, b2):
    h = jax.nn.gelu(x_flat @ w1 + b1, approximate=True)
    out = h @ w2 + b2
    gate = jax.nn.sigmoid(out[..., -1]) * RESID_GATE_MULTIPLIER
    return out[..., :N_EMBED] * gate[..., None]


def _ref_intermediate(rec, itn, p):
    rec_n = _ref_ln(rec, p['ln_g'], p['ln_b'])
    int_n = _ref_ln(itn, p['ln_g'], p['ln_b'])
    kv_rec = jnp.concatenate([int_n, rec_n], axis=-2)
    rec_resid = _ref_gated_ff(_ref_cross_attn(rec_n, kv_rec, p['rq_w'], p['rkv_w']),
                              p['rff_w1'], p['rff_b1'], p['rff_w2'], p['rff_b2'])
    kv_int = jnp.concatenate([rec_n, int_n], axis=-2)
    int_resid = _ref_gated_ff(_ref_cross_attn(int_n, kv_int, p['iq_w'], p['ikv_w']),
                              p['iff_w1'], p['iff_b1'], p['iff_w2'], p['iff_b2'])
    return rec + rec_resid, itn + int_resid


def _ref_decode(internal, p):
    x = _ref_ln(internal, p['ln_g'], p['ln_b'])

    def head(q, kv_w):
        kv = x @ kv_w
        k = kv[..., :N_EMBED]
        v = kv[..., N_EMBED:]
        s = jnp.einsum('e,bse->bs', q.reshape(-1), k) * SCALE
        pa = jax.nn.softmax(s, axis=-1)
        return jnp.einsum('bs,bse->be', pa, v)

    a_out = head(p['q_out'], p['kv_out_w'])
    a_halt = head(p['q_halt'], p['kv_halt_w'])
    token = jax.nn.gelu(a_out @ p['ffo_w1'] + p['ffo_b1'], approximate=True) @ p['ffo_w2'] + p['ffo_b2']
    conf = jax.nn.gelu(a_halt @ p['ffc_w1'] + p['ffc_b1'], approximate=True) @ p['ffc_w2'] + p['ffc_b2']
    return token, conf[..., 0]


def rnn_ponder_reference(recurrent, internal, params):
    for lp in params['intermediate']:
        recurrent, internal = _ref_intermediate(recurrent, internal, lp)
    token, conf = _ref_decode(internal, params['output'])
    return recurrent, internal, token, conf


# ------------------------------ parameters ----------------------------------
def init_params(key):
    E, H, V = N_EMBED, N_HEADS, VOCAB_SIZE
    HE_ = H * E

    def normal(k, shape, scale=0.02):
        return (scale * jax.random.normal(k, shape)).astype(jnp.float32)

    layers = []
    for _ in range(N_INTERMEDIATE):
        keys = jax.random.split(key, 14)
        key = keys[0]
        layers.append(dict(
            ln_g=jnp.ones((1, E), jnp.float32),
            ln_b=jnp.zeros((1, E), jnp.float32),
            rq_w=normal(keys[1], (E, HE_)),
            rkv_w=normal(keys[2], (E, 2 * HE_)),
            rff_w1=normal(keys[3], (HE_, HE_)),
            rff_b1=normal(keys[4], (1, HE_)),
            rff_w2=normal(keys[5], (HE_, E + 1)),
            rff_b2=normal(keys[6], (1, E + 1)),
            iq_w=normal(keys[7], (E, HE_)),
            ikv_w=normal(keys[8], (E, 2 * HE_)),
            iff_w1=normal(keys[9], (HE_, HE_)),
            iff_b1=normal(keys[10], (1, HE_)),
            iff_w2=normal(keys[11], (HE_, E + 1)),
            iff_b2=normal(keys[12], (1, E + 1)),
        ))

    keys = jax.random.split(key, 13)
    output = dict(
        ln_g=jnp.ones((1, E), jnp.float32),
        ln_b=jnp.zeros((1, E), jnp.float32),
        q_out=jax.random.normal(keys[1], (1, E), jnp.float32),   # torch.randn
        kv_out_w=normal(keys[2], (E, 2 * E)),
        q_halt=jax.random.normal(keys[3], (1, E), jnp.float32),  # torch.randn
        kv_halt_w=normal(keys[4], (E, 2 * E)),
        ffo_w1=normal(keys[5], (E, E)),
        ffo_b1=normal(keys[6], (1, E)),
        ffo_w2=normal(keys[7], (E, V)),
        ffo_b2=normal(keys[8], (1, V)),
        ffc_w1=normal(keys[9], (E, E)),
        ffc_b1=normal(keys[10], (1, E)),
        ffc_w2=normal(keys[11], (E, 1)),
        ffc_b2=normal(keys[12], (1, 1)),
    )
    return dict(intermediate=layers, output=output)


# --------------------------------- main --------------------------------------
if __name__ == "__main__":
    key = jax.random.PRNGKey(0)
    k_rec, k_int, k_par = jax.random.split(key, 3)
    params = init_params(k_par)
    kparams = prepare_kernel_params(params)

    recurrent = jax.random.normal(k_rec, (BATCH, RECURRENT_SEQ_LEN, N_EMBED), jnp.float32)
    internal = jax.random.normal(k_int, (BATCH, SHORT_CTX_LEN, N_EMBED), jnp.float32)

    rec_out, int_out, token_out, conf_out = rnn_ponder_forward(recurrent, internal, kparams)
    jax.block_until_ready((rec_out, int_out, token_out, conf_out))

    # silent correctness check against a pure-JAX reference (torch-equivalent math)
    r_rec, r_int, r_tok, r_conf = rnn_ponder_reference(recurrent, internal, params)
    assert jnp.allclose(rec_out, r_rec, atol=2e-4, rtol=2e-4)
    assert jnp.allclose(int_out, r_int, atol=2e-4, rtol=2e-4)
    assert jnp.allclose(token_out, r_tok, atol=2e-4, rtol=2e-4)
    assert jnp.allclose(conf_out, r_conf, atol=2e-4, rtol=2e-4)
    assert token_out.shape == (BATCH, VOCAB_SIZE) and conf_out.shape == (BATCH,)

    print("KERNEL_OK")
</pallas_src>

<mosaic_0001>
module attributes {stable_mosaic.version = 11 : i64} {
  func.func @rnn_ponder_kernel(%arg0: i32, %arg1: memref<2x8x32xf32, #tpu.memory_space<vmem>>, %arg2: memref<2x8x32xf32, #tpu.memory_space<vmem>>, %arg3: memref<2x1x32xf32, #tpu.memory_space<vmem>>, %arg4: memref<2x1x32xf32, #tpu.memory_space<vmem>>, %arg5: memref<2x32x384xf32, #tpu.memory_space<vmem>>, %arg6: memref<2x128x128xf32, #tpu.memory_space<vmem>>, %arg7: memref<2x1x128xf32, #tpu.memory_space<vmem>>, %arg8: memref<2x128x128xf32, #tpu.memory_space<vmem>>, %arg9: memref<2x1x128xf32, #tpu.memory_space<vmem>>, %arg10: memref<1x32xf32, #tpu.memory_space<vmem>>, %arg11: memref<1x32xf32, #tpu.memory_space<vmem>>, %arg12: memref<2x32xf32, #tpu.memory_space<vmem>>, %arg13: memref<32x128xf32, #tpu.memory_space<vmem>>, %arg14: memref<64x64xf32, #tpu.memory_space<vmem>>, %arg15: memref<1x64xf32, #tpu.memory_space<vmem>>, %arg16: memref<64x128xf32, #tpu.memory_space<vmem>>, %arg17: memref<1x128xf32, #tpu.memory_space<vmem>>, %arg18: memref<2x8x32xf32, #tpu.memory_space<vmem>>, %arg19: memref<2x8x32xf32, #tpu.memory_space<vmem>>, %arg20: memref<2x128xf32, #tpu.memory_space<vmem>>) attributes {dimension_semantics = [#tpu.dimension_semantics<arbitrary>], iteration_bounds = array<i64: 1>, scalar_prefetch = 0 : i64, scratch_operands = 0 : i64, tpu.core_type = #tpu.core_type<tc>, window_params = [{pipeline_mode = #tpu.pipeline_mode<synchronous>, transform_indices = @transform_0, window_bounds = array<i64: 2, 8, 32>}, {pipeline_mode = #tpu.pipeline_mode<synchronous>, transform_indices = @transform_1, window_bounds = array<i64: 2, 8, 32>}, {pipeline_mode = #tpu.pipeline_mode<synchronous>, transform_indices = @transform_2, window_bounds = array<i64: 2, 1, 32>}, {pipeline_mode = #tpu.pipeline_mode<synchronous>, transform_indices = @transform_3, window_bounds = array<i64: 2, 1, 32>}, {pipeline_mode = #tpu.pipeline_mode<synchronous>, transform_indices = @transform_4, window_bounds = array<i64: 2, 32, 384>}, {pipeline_mode = #tpu.pipeline_mode<synchronous>, transform_indices = @transform_5, window_bounds = array<i64: 2, 128, 128>}, {pipeline_mode = #tpu.pipeline_mode<synchronous>, transform_indices = @transform_6, window_bounds = array<i64: 2, 1, 128>}, {pipeline_mode = #tpu.pipeline_mode<synchronous>, transform_indices = @transform_7, window_bounds = array<i64: 2, 128, 128>}, {pipeline_mode = #tpu.pipeline_mode<synchronous>, transform_indices = @transform_8, window_bounds = array<i64: 2, 1, 128>}, {pipeline_mode = #tpu.pipeline_mode<synchronous>, transform_indices = @transform_9, window_bounds = array<i64: 1, 32>}, {pipeline_mode = #tpu.pipeline_mode<synchronous>, transform_indices = @transform_10, window_bounds = array<i64: 1, 32>}, {pipeline_mode = #tpu.pipeline_mode<synchronous>, transform_indices = @transform_11, window_bounds = array<i64: 2, 32>}, {pipeline_mode = #tpu.pipeline_mode<synchronous>, transform_indices = @transform_12, window_bounds = array<i64: 32, 128>}, {pipeline_mode = #tpu.pipeline_mode<synchronous>, transform_indices = @transform_13, window_bounds = array<i64: 64, 64>}, {pipeline_mode = #tpu.pipeline_mode<synchronous>, transform_indices = @transform_14, window_bounds = array<i64: 1, 64>}, {pipeline_mode = #tpu.pipeline_mode<synchronous>, transform_indices = @transform_15, window_bounds = array<i64: 64, 128>}, {pipeline_mode = #tpu.pipeline_mode<synchronous>, transform_indices = @transform_16, window_bounds = array<i64: 1, 128>}, {pipeline_mode = #tpu.pipeline_mode<synchronous>, transform_indices = @transform_17, window_bounds = array<i64: 2, 8, 32>}, {pipeline_mode = #tpu.pipeline_mode<synchronous>, transform_indices = @transform_18, window_bounds = array<i64: 2, 8, 32>}, {pipeline_mode = #tpu.pipeline_mode<synchronous>, transform_indices = @transform_19, window_bounds = array<i64: 2, 128>}]} {
    %c0 = arith.constant 0 : index
    %c0_0 = arith.constant 0 : index
    %c0_1 = arith.constant 0 : index
    %0 = vector.load %arg2[%c0, %c0_0, %c0_1] : memref<2x8x32xf32, #tpu.memory_space<vmem>>, vector<2x8x32xf32>
    %c0_2 = arith.constant 0 : index
    %c0_3 = arith.constant 0 : index
    %c0_4 = arith.constant 0 : index
    %1 = vector.load %arg1[%c0_2, %c0_3, %c0_4] : memref<2x8x32xf32, #tpu.memory_space<vmem>>, vector<2x8x32xf32>
    %2 = tpu.concatenate %0, %1 in 1 : vector<2x8x32xf32>, vector<2x8x32xf32> -> vector<2x16x32xf32>
    %c0_5 = arith.constant 0 : index
    %c0_6 = arith.constant 0 : index
    %c0_7 = arith.constant 0 : index
    %3 = vector.load %arg3[%c0_5, %c0_6, %c0_7] : memref<2x1x32xf32, #tpu.memory_space<vmem>>, vector<1x1x32xf32>
    %4 = vector.shape_cast %3 : vector<1x1x32xf32> to vector<1x32xf32>
    %c0_8 = arith.constant 0 : index
    %c0_9 = arith.constant 0 : index
    %c0_10 = arith.constant 0 : index
    %5 = vector.load %arg4[%c0_8, %c0_9, %c0_10] : memref<2x1x32xf32, #tpu.memory_space<vmem>>, vector<1x1x32xf32>
    %6 = vector.shape_cast %5 : vector<1x1x32xf32> to vector<1x32xf32>
    %cst = arith.constant dense<0.000000e+00> : vector<2x16xf32>
    %7 = vector.multi_reduction <add>, %2, %cst [2] : vector<2x16x32xf32> to vector<2x16xf32>
    %8 = vector.shape_cast %7 : vector<2x16xf32> to vector<2x16x1xf32>
    %cst_11 = arith.constant 3.200000e+01 : f32
    %9 = vector.broadcast %cst_11 : f32 to vector<2x16x1xf32>
    %10 = arith.divf %8, %9 : vector<2x16x1xf32>
    %11 = vector.broadcast %10 : vector<2x16x1xf32> to vector<2x16x32xf32>
    %12 = arith.subf %2, %11 : vector<2x16x32xf32>
    %13 = arith.mulf %12, %12 : vector<2x16x32xf32>
    %cst_12 = arith.constant dense<0.000000e+00> : vector<2x16xf32>
    %14 = vector.multi_reduction <add>, %13, %cst_12 [2] : vector<2x16x32xf32> to vector<2x16xf32>
    %15 = vector.shape_cast %14 : vector<2x16xf32> to vector<2x16x1xf32>
    %cst_13 = arith.constant 3.200000e+01 : f32
    %16 = vector.broadcast %cst_13 : f32 to vector<2x16x1xf32>
    %17 = arith.divf %15, %16 : vector<2x16x1xf32>
    %18 = vector.broadcast %10 : vector<2x16x1xf32> to vector<2x16x32xf32>
    %19 = arith.subf %2, %18 : vector<2x16x32xf32>
    %cst_14 = arith.constant 9.99999974E-6 : f32
    %20 = vector.broadcast %cst_14 : f32 to vector<2x16x1xf32>
    %21 = arith.addf %17, %20 : vector<2x16x1xf32>
    %22 = math.rsqrt %21 : vector<2x16x1xf32>
    %23 = vector.broadcast %22 : vector<2x16x1xf32> to vector<2x16x32xf32>
    %24 = arith.mulf %19, %23 : vector<2x16x32xf32>
    %25 = vector.shape_cast %4 : vector<1x32xf32> to vector<1x1x32xf32>
    %26 = vector.broadcast %25 : vector<1x1x32xf32> to vector<2x16x32xf32>
    %27 = arith.mulf %24, %26 : vector<2x16x32xf32>
    %28 = vector.shape_cast %6 : vector<1x32xf32> to vector<1x1x32xf32>
    %29 = vector.broadcast %28 : vector<1x1x32xf32> to vector<2x16x32xf32>
    %30 = arith.addf %27, %29 : vector<2x16x32xf32>
    %31 = vector.shape_cast %30 : vector<2x16x32xf32> to vector<32x32xf32>
    %c0_15 = arith.constant 0 : index
    %c0_16 = arith.constant 0 : index
    %c0_17 = arith.constant 0 : index
    %32 = vector.load %arg5[%c0_15, %c0_16, %c0_17] : memref<2x32x384xf32, #tpu.memory_space<vmem>>, vector<1x32x384xf32>
    %33 = vector.shape_cast %32 : vector<1x32x384xf32> to vector<32x384xf32>
    %cst_18 = arith.constant dense<0.000000e+00> : vector<32x384xf32>
    %34 = tpu.matmul %31, %33, %cst_18 {dimension_numbers = #tpu.dot_dimension_numbers<[1], [0], [0], [1], [0, 0, 1, 1], [], []>, precision = #tpu.contract_precision<fp32>} : vector<32x32xf32>, vector<32x384xf32>, vector<32x384xf32> -> vector<32x384xf32>
    %35 = vector.shape_cast %34 : vector<32x384xf32> to vector<2x16x384xf32>
    %c0_19 = arith.constant 0 : index
    %c0_20 = arith.constant 0 : index
    %c0_21 = arith.constant 0 : index
    %36 = vector.load %arg6[%c0_19, %c0_20, %c0_21] : memref<2x128x128xf32, #tpu.memory_space<vmem>>, vector<1x128x128xf32>
    %37 = vector.shape_cast %36 : vector<1x128x128xf32> to vector<128x128xf32>
    %cst_22 = arith.constant 0.000000e+00 : f32
    %38 = vector.broadcast %cst_22 : f32 to vector<16x128xf32>
    %39 = vector.extract_strided_slice %35 {offsets = [0, 8, 0], sizes = [2, 8, 32], strides = [1, 1, 1]} : vector<2x16x384xf32> to vector<2x8x32xf32>
    %40 = vector.extract_strided_slice %35 {offsets = [0, 0, 64], sizes = [2, 16, 32], strides = [1, 1, 1]} : vector<2x16x384xf32> to vector<2x16x32xf32>
    %41 = vector.extract_strided_slice %35 {offsets = [0, 0, 128], sizes = [2, 16, 32], strides = [1, 1, 1]} : vector<2x16x384xf32> to vector<2x16x32xf32>
    %cst_23 = arith.constant dense<0.000000e+00> : vector<2x8x16xf32>
    %42 = tpu.matmul %39, %40, %cst_23 {dimension_numbers = #tpu.dot_dimension_numbers<[2], [2], [1], [1], [0, 0, 0, 1, 1, 1], [0], [0]>, precision = #tpu.contract_precision<fp32>} : vector<2x8x32xf32>, vector<2x16x32xf32>, vector<2x8x16xf32> -> vector<2x8x16xf32>
    %cst_24 = arith.constant 0.176776692 : f32
    %43 = vector.broadcast %cst_24 : f32 to vector<2x8x16xf32>
    %44 = arith.mulf %42, %43 : vector<2x8x16xf32>
    %cst_25 = arith.constant dense<0xFF800000> : vector<2x8xf32>
    %45 = vector.multi_reduction <maximumf>, %44, %cst_25 [2] : vector<2x8x16xf32> to vector<2x8xf32>
    %46 = vector.shape_cast %45 : vector<2x8xf32> to vector<2x8x1xf32>
    %47 = vector.broadcast %46 : vector<2x8x1xf32> to vector<2x8x16xf32>
    %48 = arith.subf %44, %47 : vector<2x8x16xf32>
    %49 = math.exp %48 : vector<2x8x16xf32>
    %cst_26 = arith.constant dense<0.000000e+00> : vector<2x8xf32>
    %50 = vector.multi_reduction <add>, %49, %cst_26 [2] : vector<2x8x16xf32> to vector<2x8xf32>
    %51 = vector.shape_cast %50 : vector<2x8xf32> to vector<2x8x1xf32>
    %52 = vector.broadcast %51 : vector<2x8x1xf32> to vector<2x8x16xf32>
    %53 = arith.divf %49, %52 : vector<2x8x16xf32>
    %cst_27 = arith.constant dense<0.000000e+00> : vector<2x8x32xf32>
    %54 = tpu.matmul %53, %41, %cst_27 {dimension_numbers = #tpu.dot_dimension_numbers<[2], [1], [1], [2], [0, 0, 0, 1, 1, 2], [0], [0]>, precision = #tpu.contract_precision<fp32>} : vector<2x8x16xf32>, vector<2x16x32xf32>, vector<2x8x32xf32> -> vector<2x8x32xf32>
    %55 = vector.extract_strided_slice %35 {offsets = [0, 0, 192], sizes = [2, 8, 32], strides = [1, 1, 1]} : vector<2x16x384xf32> to vector<2x8x32xf32>
    %56 = vector.extract_strided_slice %35 {offsets = [0, 0, 256], sizes = [2, 16, 32], strides = [1, 1, 1]} : vector<2x16x384xf32> to vector<2x16x32xf32>
    %57 = vector.extract_strided_slice %35 {offsets = [0, 0, 320], sizes = [2, 16, 32], strides = [1, 1, 1]} : vector<2x16x384xf32> to vector<2x16x32xf32>
    %cst_28 = arith.constant dense<0.000000e+00> : vector<2x8x16xf32>
    %58 = tpu.matmul %55, %56, %cst_28 {dimension_numbers = #tpu.dot_dimension_numbers<[2], [2], [1], [1], [0, 0, 0, 1, 1, 1], [0], [0]>, precision = #tpu.contract_precision<fp32>} : vector<2x8x32xf32>, vector<2x16x32xf32>, vector<2x8x16xf32> -> vector<2x8x16xf32>
    %cst_29 = arith.constant 0.176776692 : f32
    %59 = vector.broadcast %cst_29 : f32 to vector<2x8x16xf32>
    %60 = arith.mulf %58, %59 : vector<2x8x16xf32>
    %cst_30 = arith.constant dense<0xFF800000> : vector<2x8xf32>
    %61 = vector.multi_reduction <maximumf>, %60, %cst_30 [2] : vector<2x8x16xf32> to vector<2x8xf32>
    %62 = vector.shape_cast %61 : vector<2x8xf32> to vector<2x8x1xf32>
    %63 = vector.broadcast %62 : vector<2x8x1xf32> to vector<2x8x16xf32>
    %64 = arith.subf %60, %63 : vector<2x8x16xf32>
    %65 = math.exp %64 : vector<2x8x16xf32>
    %cst_31 = arith.constant dense<0.000000e+00> : vector<2x8xf32>
    %66 = vector.multi_reduction <add>, %65, %cst_31 [2] : vector<2x8x16xf32> to vector<2x8xf32>
    %67 = vector.shape_cast %66 : vector<2x8xf32> to vector<2x8x1xf32>
    %68 = vector.broadcast %67 : vector<2x8x1xf32> to vector<2x8x16xf32>
    %69 = arith.divf %65, %68 : vector<2x8x16xf32>
    %cst_32 = arith.constant dense<0.000000e+00> : vector<2x8x32xf32>
    %70 = tpu.matmul %69, %57, %cst_32 {dimension_numbers = #tpu.dot_dimension_numbers<[2], [1], [1], [2], [0, 0, 0, 1, 1, 2], [0], [0]>, precision = #tpu.contract_precision<fp32>} : vector<2x8x16xf32>, vector<2x16x32xf32>, vector<2x8x32xf32> -> vector<2x8x32xf32>
    %71 = vector.shape_cast %54 : vector<2x8x32xf32> to vector<16x32xf32>
    %72 = vector.extract_strided_slice %37 {offsets = [0, 0], sizes = [32, 128], strides = [1, 1]} : vector<128x128xf32> to vector<32x128xf32>
    %cst_33 = arith.constant dense<0.000000e+00> : vector<16x128xf32>
    %73 = tpu.matmul %71, %72, %cst_33 {dimension_numbers = #tpu.dot_dimension_numbers<[1], [0], [0], [1], [0, 0, 1, 1], [], []>, precision = #tpu.contract_precision<fp32>} : vector<16x32xf32>, vector<32x128xf32>, vector<16x128xf32> -> vector<16x128xf32>
    %74 = arith.addf %38, %73 : vector<16x128xf32>
    %75 = vector.shape_cast %70 : vector<2x8x32xf32> to vector<16x32xf32>
    %76 = vector.extract_strided_slice %37 {offsets = [64, 0], sizes = [32, 128], strides = [1, 1]} : vector<128x128xf32> to vector<32x128xf32>
    %cst_34 = arith.constant dense<0.000000e+00> : vector<16x128xf32>
    %77 = tpu.matmul %75, %76, %cst_34 {dimension_numbers = #tpu.dot_dimension_numbers<[1], [0], [0], [1], [0, 0, 1, 1], [], []>, precision = #tpu.contract_precision<fp32>} : vector<16x32xf32>, vector<32x128xf32>, vector<16x128xf32> -> vector<16x128xf32>
    %78 = arith.addf %74, %77 : vector<16x128xf32>
    %79 = vector.extract_strided_slice %35 {offsets = [0, 8, 32], sizes = [2, 8, 32], strides = [1, 1, 1]} : vector<2x16x384xf32> to vector<2x8x32xf32>
    %80 = vector.extract_strided_slice %35 {offsets = [0, 0, 96], sizes = [2, 16, 32], strides = [1, 1, 1]} : vector<2x16x384xf32> to vector<2x16x32xf32>
    %81 = vector.extract_strided_slice %35 {offsets = [0, 0, 160], sizes = [2, 16, 32], strides = [1, 1, 1]} : vector<2x16x384xf32> to vector<2x16x32xf32>
    %cst_35 = arith.constant dense<0.000000e+00> : vector<2x8x16xf32>
    %82 = tpu.matmul %79, %80, %cst_35 {dimension_numbers = #tpu.dot_dimension_numbers<[2], [2], [1], [1], [0, 0, 0, 1, 1, 1], [0], [0]>, precision = #tpu.contract_precision<fp32>} : vector<2x8x32xf32>, vector<2x16x32xf32>, vector<2x8x16xf32> -> vector<2x8x16xf32>
    %cst_36 = arith.constant 0.176776692 : f32
    %83 = vector.broadcast %cst_36 : f32 to vector<2x8x16xf32>
    %84 = arith.mulf %82, %83 : vector<2x8x16xf32>
    %cst_37 = arith.constant dense<0xFF800000> : vector<2x8xf32>
    %85 = vector.multi_reduction <maximumf>, %84, %cst_37 [2] : vector<2x8x16xf32> to vector<2x8xf32>
    %86 = vector.shape_cast %85 : vector<2x8xf32> to vector<2x8x1xf32>
    %87 = vector.broadcast %86 : vector<2x8x1xf32> to vector<2x8x16xf32>
    %88 = arith.subf %84, %87 : vector<2x8x16xf32>
    %89 = math.exp %88 : vector<2x8x16xf32>
    %cst_38 = arith.constant dense<0.000000e+00> : vector<2x8xf32>
    %90 = vector.multi_reduction <add>, %89, %cst_38 [2] : vector<2x8x16xf32> to vector<2x8xf32>
    %91 = vector.shape_cast %90 : vector<2x8xf32> to vector<2x8x1xf32>
    %92 = vector.broadcast %91 : vector<2x8x1xf32> to vector<2x8x16xf32>
    %93 = arith.divf %89, %92 : vector<2x8x16xf32>
    %cst_39 = arith.constant dense<0.000000e+00> : vector<2x8x32xf32>
    %94 = tpu.matmul %93, %81, %cst_39 {dimension_numbers = #tpu.dot_dimension_numbers<[2], [1], [1], [2], [0, 0, 0, 1, 1, 2], [0], [0]>, precision = #tpu.contract_precision<fp32>} : vector<2x8x16xf32>, vector<2x16x32xf32>, vector<2x8x32xf32> -> vector<2x8x32xf32>
    %95 = vector.extract_strided_slice %35 {offsets = [0, 0, 224], sizes = [2, 8, 32], strides = [1, 1, 1]} : vector<2x16x384xf32> to vector<2x8x32xf32>
    %96 = vector.extract_strided_slice %35 {offsets = [0, 0, 288], sizes = [2, 16, 32], strides = [1, 1, 1]} : vector<2x16x384xf32> to vector<2x16x32xf32>
    %97 = vector.extract_strided_slice %35 {offsets = [0, 0, 352], sizes = [2, 16, 32], strides = [1, 1, 1]} : vector<2x16x384xf32> to vector<2x16x32xf32>
    %cst_40 = arith.constant dense<0.000000e+00> : vector<2x8x16xf32>
    %98 = tpu.matmul %95, %96, %cst_40 {dimension_numbers = #tpu.dot_dimension_numbers<[2], [2], [1], [1], [0, 0, 0, 1, 1, 1], [0], [0]>, precision = #tpu.contract_precision<fp32>} : vector<2x8x32xf32>, vector<2x16x32xf32>, vector<2x8x16xf32> -> vector<2x8x16xf32>
    %cst_41 = arith.constant 0.176776692 : f32
    %99 = vector.broadcast %cst_41 : f32 to vector<2x8x16xf32>
    %100 = arith.mulf %98, %99 : vector<2x8x16xf32>
    %cst_42 = arith.constant dense<0xFF800000> : vector<2x8xf32>
    %101 = vector.multi_reduction <maximumf>, %100, %cst_42 [2] : vector<2x8x16xf32> to vector<2x8xf32>
    %102 = vector.shape_cast %101 : vector<2x8xf32> to vector<2x8x1xf32>
    %103 = vector.broadcast %102 : vector<2x8x1xf32> to vector<2x8x16xf32>
    %104 = arith.subf %100, %103 : vector<2x8x16xf32>
    %105 = math.exp %104 : vector<2x8x16xf32>
    %cst_43 = arith.constant dense<0.000000e+00> : vector<2x8xf32>
    %106 = vector.multi_reduction <add>, %105, %cst_43 [2] : vector<2x8x16xf32> to vector<2x8xf32>
    %107 = vector.shape_cast %106 : vector<2x8xf32> to vector<2x8x1xf32>
    %108 = vector.broadcast %107 : vector<2x8x1xf32> to vector<2x8x16xf32>
    %109 = arith.divf %105, %108 : vector<2x8x16xf32>
    %cst_44 = arith.constant dense<0.000000e+00> : vector<2x8x32xf32>
    %110 = tpu.matmul %109, %97, %cst_44 {dimension_numbers = #tpu.dot_dimension_numbers<[2], [1], [1], [2], [0, 0, 0, 1, 1, 2], [0], [0]>, precision = #tpu.contract_precision<fp32>} : vector<2x8x16xf32>, vector<2x16x32xf32>, vector<2x8x32xf32> -> vector<2x8x32xf32>
    %111 = vector.shape_cast %94 : vector<2x8x32xf32> to vector<16x32xf32>
    %112 = vector.extract_strided_slice %37 {offsets = [32, 0], sizes = [32, 128], strides = [1, 1]} : vector<128x128xf32> to vector<32x128xf32>
    %cst_45 = arith.constant dense<0.000000e+00> : vector<16x128xf32>
    %113 = tpu.matmul %111, %112, %cst_45 {dimension_numbers = #tpu.dot_dimension_numbers<[1], [0], [0], [1], [0, 0, 1, 1], [], []>, precision = #tpu.contract_precision<fp32>} : vector<16x32xf32>, vector<32x128xf32>, vector<16x128xf32> -> vector<16x128xf32>
    %114 = arith.addf %78, %113 : vector<16x128xf32>
    %115 = vector.shape_cast %110 : vector<2x8x32xf32> to vector<16x32xf32>
    %116 = vector.extract_strided_slice %37 {offsets = [96, 0], sizes = [32, 128], strides = [1, 1]} : vector<128x128xf32> to vector<32x128xf32>
    %cst_46 = arith.constant dense<0.000000e+00> : vector<16x128xf32>
    %117 = tpu.matmul %115, %116, %cst_46 {dimension_numbers = #tpu.dot_dimension_numbers<[1], [0], [0], [1], [0, 0, 1, 1], [], []>, precision = #tpu.contract_precision<fp32>} : vector<16x32xf32>, vector<32x128xf32>, vector<16x128xf32> -> vector<16x128xf32>
    %118 = arith.addf %114, %117 : vector<16x128xf32>
    %c0_47 = arith.constant 0 : index
    %c0_48 = arith.constant 0 : index
    %c0_49 = arith.constant 0 : index
    %119 = vector.load %arg7[%c0_47, %c0_48, %c0_49] : memref<2x1x128xf32, #tpu.memory_space<vmem>>, vector<1x1x128xf32>
    %120 = vector.shape_cast %119 : vector<1x1x128xf32> to vector<1x128xf32>
    %121 = vector.broadcast %120 : vector<1x128xf32> to vector<16x128xf32>
    %122 = arith.addf %118, %121 : vector<16x128xf32>
    %123 = arith.mulf %122, %122 : vector<16x128xf32>
    %124 = arith.mulf %122, %123 : vector<16x128xf32>
    %cst_50 = arith.constant 4.471500e-02 : f32
    %125 = vector.broadcast %cst_50 : f32 to vector<16x128xf32>
    %126 = arith.mulf %125, %124 : vector<16x128xf32>
    %127 = arith.addf %122, %126 : vector<16x128xf32>
    %cst_51 = arith.constant 0.797884583 : f32
    %128 = vector.broadcast %cst_51 : f32 to vector<16x128xf32>
    %129 = arith.mulf %128, %127 : vector<16x128xf32>
    %130 = math.tanh %129 : vector<16x128xf32>
    %cst_52 = arith.constant 1.000000e+00 : f32
    %131 = vector.broadcast %cst_52 : f32 to vector<16x128xf32>
    %132 = arith.addf %131, %130 : vector<16x128xf32>
    %cst_53 = arith.constant 5.000000e-01 : f32
    %133 = vector.broadcast %cst_53 : f32 to vector<16x128xf32>
    %134 = arith.mulf %133, %132 : vector<16x128xf32>
    %135 = arith.mulf %122, %134 : vector<16x128xf32>
    %c0_54 = arith.constant 0 : index
    %c0_55 = arith.constant 0 : index
    %c0_56 = arith.constant 0 : index
    %136 = vector.load %arg8[%c0_54, %c0_55, %c0_56] : memref<2x128x128xf32, #tpu.memory_space<vmem>>, vector<1x128x128xf32>
    %137 = vector.shape_cast %136 : vector<1x128x128xf32> to vector<128x128xf32>
    %cst_57 = arith.constant dense<0.000000e+00> : vector<16x128xf32>
    %138 = tpu.matmul %135, %137, %cst_57 {dimension_numbers = #tpu.dot_dimension_numbers<[1], [0], [0], [1], [0, 0, 1, 1], [], []>, precision = #tpu.contract_precision<fp32>} : vector<16x128xf32>, vector<128x128xf32>, vector<16x128xf32> -> vector<16x128xf32>
    %c0_58 = arith.constant 0 : index
    %c0_59 = arith.constant 0 : index
    %c0_60 = arith.constant 0 : index
    %139 = vector.load %arg9[%c0_58, %c0_59, %c0_60] : memref<2x1x128xf32, #tpu.memory_space<vmem>>, vector<1x1x128xf32>
    %140 = vector.shape_cast %139 : vector<1x1x128xf32> to vector<1x128xf32>
    %141 = vector.broadcast %140 : vector<1x128xf32> to vector<16x128xf32>
    %142 = arith.addf %138, %141 : vector<16x128xf32>
    %143 = vector.extract_strided_slice %142 {offsets = [0, 0], sizes = [16, 32], strides = [1, 1]} : vector<16x128xf32> to vector<16x32xf32>
    %144 = vector.extract_strided_slice %142 {offsets = [0, 32], sizes = [16, 1], strides = [1, 1]} : vector<16x128xf32> to vector<16x1xf32>
    %145 = arith.negf %144 : vector<16x1xf32>
    %146 = math.exp %145 : vector<16x1xf32>
    %cst_61 = arith.constant 1.000000e+00 : f32
    %147 = vector.broadcast %cst_61 : f32 to vector<16x1xf32>
    %148 = arith.addf %147, %146 : vector<16x1xf32>
    %149 = arith.divf %147, %148 : vector<16x1xf32>
    %cst_62 = arith.constant 2.000000e+00 : f32
    %150 = vector.broadcast %cst_62 : f32 to vector<16x1xf32>
    %151 = arith.mulf %149, %150 : vector<16x1xf32>
    %152 = vector.broadcast %151 : vector<16x1xf32> to vector<16x32xf32>
    %153 = arith.mulf %143, %152 : vector<16x32xf32>
    %154 = vector.extract_strided_slice %142 {offsets = [0, 64], sizes = [16, 32], strides = [1, 1]} : vector<16x128xf32> to vector<16x32xf32>
    %155 = vector.extract_strided_slice %142 {offsets = [0, 96], sizes = [16, 1], strides = [1, 1]} : vector<16x128xf32> to vector<16x1xf32>
    %156 = arith.negf %155 : vector<16x1xf32>
    %157 = math.exp %156 : vector<16x1xf32>
    %cst_63 = arith.constant 1.000000e+00 : f32
    %158 = vector.broadcast %cst_63 : f32 to vector<16x1xf32>
    %159 = arith.addf %158, %157 : vector<16x1xf32>
    %160 = arith.divf %158, %159 : vector<16x1xf32>
    %cst_64 = arith.constant 2.000000e+00 : f32
    %161 = vector.broadcast %cst_64 : f32 to vector<16x1xf32>
    %162 = arith.mulf %160, %161 : vector<16x1xf32>
    %163 = vector.broadcast %162 : vector<16x1xf32> to vector<16x32xf32>
    %164 = arith.mulf %154, %163 : vector<16x32xf32>
    %165 = vector.shape_cast %164 : vector<16x32xf32> to vector<2x8x32xf32>
    %166 = vector.shape_cast %153 : vector<16x32xf32> to vector<2x8x32xf32>
    %167 = tpu.concatenate %165, %166 in 1 : vector<2x8x32xf32>, vector<2x8x32xf32> -> vector<2x16x32xf32>
    %168 = arith.addf %2, %167 : vector<2x16x32xf32>
    %c1 = arith.constant 1 : index
    %c0_65 = arith.constant 0 : index
    %c0_66 = arith.constant 0 : index
    %169 = vector.load %arg3[%c1, %c0_65, %c0_66] : memref<2x1x32xf32, #tpu.memory_space<vmem>>, vector<1x1x32xf32>
    %170 = vector.shape_cast %169 : vector<1x1x32xf32> to vector<1x32xf32>
    %c1_67 = arith.constant 1 : index
    %c0_68 = arith.constant 0 : index
    %c0_69 = arith.constant 0 : index
    %171 = vector.load %arg4[%c1_67, %c0_68, %c0_69] : memref<2x1x32xf32, #tpu.memory_space<vmem>>, vector<1x1x32xf32>
    %172 = vector.shape_cast %171 : vector<1x1x32xf32> to vector<1x32xf32>
    %cst_70 = arith.constant dense<0.000000e+00> : vector<2x16xf32>
    %173 = vector.multi_reduction <add>, %168, %cst_70 [2] : vector<2x16x32xf32> to vector<2x16xf32>
    %174 = vector.shape_cast %173 : vector<2x16xf32> to vector<2x16x1xf32>
    %cst_71 = arith.constant 3.200000e+01 : f32
    %175 = vector.broadcast %cst_71 : f32 to vector<2x16x1xf32>
    %176 = arith.divf %174, %175 : vector<2x16x1xf32>
    %177 = vector.broadcast %176 : vector<2x16x1xf32> to vector<2x16x32xf32>
    %178 = arith.subf %168, %177 : vector<2x16x32xf32>
    %179 = arith.mulf %178, %178 : vector<2x16x32xf32>
    %cst_72 = arith.constant dense<0.000000e+00> : vector<2x16xf32>
    %180 = vector.multi_reduction <add>, %179, %cst_72 [2] : vector<2x16x32xf32> to vector<2x16xf32>
    %181 = vector.shape_cast %180 : vector<2x16xf32> to vector<2x16x1xf32>
    %cst_73 = arith.constant 3.200000e+01 : f32
    %182 = vector.broadcast %cst_73 : f32 to vector<2x16x1xf32>
    %183 = arith.divf %181, %182 : vector<2x16x1xf32>
    %184 = vector.broadcast %176 : vector<2x16x1xf32> to vector<2x16x32xf32>
    %185 = arith.subf %168, %184 : vector<2x16x32xf32>
    %cst_74 = arith.constant 9.99999974E-6 : f32
    %186 = vector.broadcast %cst_74 : f32 to vector<2x16x1xf32>
    %187 = arith.addf %183, %186 : vector<2x16x1xf32>
    %188 = math.rsqrt %187 : vector<2x16x1xf32>
    %189 = vector.broadcast %188 : vector<2x16x1xf32> to vector<2x16x32xf32>
    %190 = arith.mulf %185, %189 : vector<2x16x32xf32>
    %191 = vector.shape_cast %170 : vector<1x32xf32> to vector<1x1x32xf32>
    %192 = vector.broadcast %191 : vector<1x1x32xf32> to vector<2x16x32xf32>
    %193 = arith.mulf %190, %192 : vector<2x16x32xf32>
    %194 = vector.shape_cast %172 : vector<1x32xf32> to vector<1x1x32xf32>
    %195 = vector.broadcast %194 : vector<1x1x32xf32> to vector<2x16x32xf32>
    %196 = arith.addf %193, %195 : vector<2x16x32xf32>
    %197 = vector.shape_cast %196 : vector<2x16x32xf32> to vector<32x32xf32>
    %c1_75 = arith.constant 1 : index
    %c0_76 = arith.constant 0 : index
    %c0_77 = arith.constant 0 : index
    %198 = vector.load %arg5[%c1_75, %c0_76, %c0_77] : memref<2x32x384xf32, #tpu.memory_space<vmem>>, vector<1x32x384xf32>
    %199 = vector.shape_cast %198 : vector<1x32x384xf32> to vector<32x384xf32>
    %cst_78 = arith.constant dense<0.000000e+00> : vector<32x384xf32>
    %200 = tpu.matmul %197, %199, %cst_78 {dimension_numbers = #tpu.dot_dimension_numbers<[1], [0], [0], [1], [0, 0, 1, 1], [], []>, precision = #tpu.contract_precision<fp32>} : vector<32x32xf32>, vector<32x384xf32>, vector<32x384xf32> -> vector<32x384xf32>
    %201 = vector.shape_cast %200 : vector<32x384xf32> to vector<2x16x384xf32>
    %c1_79 = arith.constant 1 : index
    %c0_80 = arith.constant 0 : index
    %c0_81 = arith.constant 0 : index
    %202 = vector.load %arg6[%c1_79, %c0_80, %c0_81] : memref<2x128x128xf32, #tpu.memory_space<vmem>>, vector<1x128x128xf32>
    %203 = vector.shape_cast %202 : vector<1x128x128xf32> to vector<128x128xf32>
    %cst_82 = arith.constant 0.000000e+00 : f32
    %204 = vector.broadcast %cst_82 : f32 to vector<16x128xf32>
    %205 = vector.extract_strided_slice %201 {offsets = [0, 8, 0], sizes = [2, 8, 32], strides = [1, 1, 1]} : vector<2x16x384xf32> to vector<2x8x32xf32>
    %206 = vector.extract_strided_slice %201 {offsets = [0, 0, 64], sizes = [2, 16, 32], strides = [1, 1, 1]} : vector<2x16x384xf32> to vector<2x16x32xf32>
    %207 = vector.extract_strided_slice %201 {offsets = [0, 0, 128], sizes = [2, 16, 32], strides = [1, 1, 1]} : vector<2x16x384xf32> to vector<2x16x32xf32>
    %cst_83 = arith.constant dense<0.000000e+00> : vector<2x8x16xf32>
    %208 = tpu.matmul %205, %206, %cst_83 {dimension_numbers = #tpu.dot_dimension_numbers<[2], [2], [1], [1], [0, 0, 0, 1, 1, 1], [0], [0]>, precision = #tpu.contract_precision<fp32>} : vector<2x8x32xf32>, vector<2x16x32xf32>, vector<2x8x16xf32> -> vector<2x8x16xf32>
    %cst_84 = arith.constant 0.176776692 : f32
    %209 = vector.broadcast %cst_84 : f32 to vector<2x8x16xf32>
    %210 = arith.mulf %208, %209 : vector<2x8x16xf32>
    %cst_85 = arith.constant dense<0xFF800000> : vector<2x8xf32>
    %211 = vector.multi_reduction <maximumf>, %210, %cst_85 [2] : vector<2x8x16xf32> to vector<2x8xf32>
    %212 = vector.shape_cast %211 : vector<2x8xf32> to vector<2x8x1xf32>
    %213 = vector.broadcast %212 : vector<2x8x1xf32> to vector<2x8x16xf32>
    %214 = arith.subf %210, %213 : vector<2x8x16xf32>
    %215 = math.exp %214 : vector<2x8x16xf32>
    %cst_86 = arith.constant dense<0.000000e+00> : vector<2x8xf32>
    %216 = vector.multi_reduction <add>, %215, %cst_86 [2] : vector<2x8x16xf32> to vector<2x8xf32>
    %217 = vector.shape_cast %216 : vector<2x8xf32> to vector<2x8x1xf32>
    %218 = vector.broadcast %217 : vector<2x8x1xf32> to vector<2x8x16xf32>
    %219 = arith.divf %215, %218 : vector<2x8x16xf32>
    %cst_87 = arith.constant dense<0.000000e+00> : vector<2x8x32xf32>
    %220 = tpu.matmul %219, %207, %cst_87 {dimension_numbers = #tpu.dot_dimension_numbers<[2], [1], [1], [2], [0, 0, 0, 1, 1, 2], [0], [0]>, precision = #tpu.contract_precision<fp32>} : vector<2x8x16xf32>, vector<2x16x32xf32>, vector<2x8x32xf32> -> vector<2x8x32xf32>
    %221 = vector.extract_strided_slice %201 {offsets = [0, 0, 192], sizes = [2, 8, 32], strides = [1, 1, 1]} : vector<2x16x384xf32> to vector<2x8x32xf32>
    %222 = vector.extract_strided_slice %201 {offsets = [0, 0, 256], sizes = [2, 16, 32], strides = [1, 1, 1]} : vector<2x16x384xf32> to vector<2x16x32xf32>
    %223 = vector.extract_strided_slice %201 {offsets = [0, 0, 320], sizes = [2, 16, 32], strides = [1, 1, 1]} : vector<2x16x384xf32> to vector<2x16x32xf32>
    %cst_88 = arith.constant dense<0.000000e+00> : vector<2x8x16xf32>
    %224 = tpu.matmul %221, %222, %cst_88 {dimension_numbers = #tpu.dot_dimension_numbers<[2], [2], [1], [1], [0, 0, 0, 1, 1, 1], [0], [0]>, precision = #tpu.contract_precision<fp32>} : vector<2x8x32xf32>, vector<2x16x32xf32>, vector<2x8x16xf32> -> vector<2x8x16xf32>
    %cst_89 = arith.constant 0.176776692 : f32
    %225 = vector.broadcast %cst_89 : f32 to vector<2x8x16xf32>
    %226 = arith.mulf %224, %225 : vector<2x8x16xf32>
    %cst_90 = arith.constant dense<0xFF800000> : vector<2x8xf32>
    %227 = vector.multi_reduction <maximumf>, %226, %cst_90 [2] : vector<2x8x16xf32> to vector<2x8xf32>
    %228 = vector.shape_cast %227 : vector<2x8xf32> to vector<2x8x1xf32>
    %229 = vector.broadcast %228 : vector<2x8x1xf32> to vector<2x8x16xf32>
    %230 = arith.subf %226, %229 : vector<2x8x16xf32>
    %231 = math.exp %230 : vector<2x8x16xf32>
    %cst_91 = arith.constant dense<0.000000e+00> : vector<2x8xf32>
    %232 = vector.multi_reduction <add>, %231, %cst_91 [2] : vector<2x8x16xf32> to vector<2x8xf32>
    %233 = vector.shape_cast %232 : vector<2x8xf32> to vector<2x8x1xf32>
    %234 = vector.broadcast %233 : vector<2x8x1xf32> to vector<2x8x16xf32>
    %235 = arith.divf %231, %234 : vector<2x8x16xf32>
    %cst_92 = arith.constant dense<0.000000e+00> : vector<2x8x32xf32>
    %236 = tpu.matmul %235, %223, %cst_92 {dimension_numbers = #tpu.dot_dimension_numbers<[2], [1], [1], [2], [0, 0, 0, 1, 1, 2], [0], [0]>, precision = #tpu.contract_precision<fp32>} : vector<2x8x16xf32>, vector<2x16x32xf32>, vector<2x8x32xf32> -> vector<2x8x32xf32>
    %237 = vector.shape_cast %220 : vector<2x8x32xf32> to vector<16x32xf32>
    %238 = vector.extract_strided_slice %203 {offsets = [0, 0], sizes = [32, 128], strides = [1, 1]} : vector<128x128xf32> to vector<32x128xf32>
    %cst_93 = arith.constant dense<0.000000e+00> : vector<16x128xf32>
    %239 = tpu.matmul %237, %238, %cst_93 {dimension_numbers = #tpu.dot_dimension_numbers<[1], [0], [0], [1], [0, 0, 1, 1], [], []>, precision = #tpu.contract_precision<fp32>} : vector<16x32xf32>, vector<32x128xf32>, vector<16x128xf32> -> vector<16x128xf32>
    %240 = arith.addf %204, %239 : vector<16x128xf32>
    %241 = vector.shape_cast %236 : vector<2x8x32xf32> to vector<16x32xf32>
    %242 = vector.extract_strided_slice %203 {offsets = [64, 0], sizes = [32, 128], strides = [1, 1]} : vector<128x128xf32> to vector<32x128xf32>
    %cst_94 = arith.constant dense<0.000000e+00> : vector<16x128xf32>
    %243 = tpu.matmul %241, %242, %cst_94 {dimension_numbers = #tpu.dot_dimension_numbers<[1], [0], [0], [1], [0, 0, 1, 1], [], []>, precision = #tpu.contract_precision<fp32>} : vector<16x32xf32>, vector<32x128xf32>, vector<16x128xf32> -> vector<16x128xf32>
    %244 = arith.addf %240, %243 : vector<16x128xf32>
    %245 = vector.extract_strided_slice %201 {offsets = [0, 8, 32], sizes = [2, 8, 32], strides = [1, 1, 1]} : vector<2x16x384xf32> to vector<2x8x32xf32>
    %246 = vector.extract_strided_slice %201 {offsets = [0, 0, 96], sizes = [2, 16, 32], strides = [1, 1, 1]} : vector<2x16x384xf32> to vector<2x16x32xf32>
    %247 = vector.extract_strided_slice %201 {offsets = [0, 0, 160], sizes = [2, 16, 32], strides = [1, 1, 1]} : vector<2x16x384xf32> to vector<2x16x32xf32>
    %cst_95 = arith.constant dense<0.000000e+00> : vector<2x8x16xf32>
    %248 = tpu.matmul %245, %246, %cst_95 {dimension_numbers = #tpu.dot_dimension_numbers<[2], [2], [1], [1], [0, 0, 0, 1, 1, 1], [0], [0]>, precision = #tpu.contract_precision<fp32>} : vector<2x8x32xf32>, vector<2x16x32xf32>, vector<2x8x16xf32> -> vector<2x8x16xf32>
    %cst_96 = arith.constant 0.176776692 : f32
    %249 = vector.broadcast %cst_96 : f32 to vector<2x8x16xf32>
    %250 = arith.mulf %248, %249 : vector<2x8x16xf32>
    %cst_97 = arith.constant dense<0xFF800000> : vector<2x8xf32>
    %251 = vector.multi_reduction <maximumf>, %250, %cst_97 [2] : vector<2x8x16xf32> to vector<2x8xf32>
    %252 = vector.shape_cast %251 : vector<2x8xf32> to vector<2x8x1xf32>
    %253 = vector.broadcast %252 : vector<2x8x1xf32> to vector<2x8x16xf32>
    %254 = arith.subf %250, %253 : vector<2x8x16xf32>
    %255 = math.exp %254 : vector<2x8x16xf32>
    %cst_98 = arith.constant dense<0.000000e+00> : vector<2x8xf32>
    %256 = vector.multi_reduction <add>, %255, %cst_98 [2] : vector<2x8x16xf32> to vector<2x8xf32>
    %257 = vector.shape_cast %256 : vector<2x8xf32> to vector<2x8x1xf32>
    %258 = vector.broadcast %257 : vector<2x8x1xf32> to vector<2x8x16xf32>
    %259 = arith.divf %255, %258 : vector<2x8x16xf32>
    %cst_99 = arith.constant dense<0.000000e+00> : vector<2x8x32xf32>
    %260 = tpu.matmul %259, %247, %cst_99 {dimension_numbers = #tpu.dot_dimension_numbers<[2], [1], [1], [2], [0, 0, 0, 1, 1, 2], [0], [0]>, precision = #tpu.contract_precision<fp32>} : vector<2x8x16xf32>, vector<2x16x32xf32>, vector<2x8x32xf32> -> vector<2x8x32xf32>
    %261 = vector.extract_strided_slice %201 {offsets = [0, 0, 224], sizes = [2, 8, 32], strides = [1, 1, 1]} : vector<2x16x384xf32> to vector<2x8x32xf32>
    %262 = vector.extract_strided_slice %201 {offsets = [0, 0, 288], sizes = [2, 16, 32], strides = [1, 1, 1]} : vector<2x16x384xf32> to vector<2x16x32xf32>
    %263 = vector.extract_strided_slice %201 {offsets = [0, 0, 352], sizes = [2, 16, 32], strides = [1, 1, 1]} : vector<2x16x384xf32> to vector<2x16x32xf32>
    %cst_100 = arith.constant dense<0.000000e+00> : vector<2x8x16xf32>
    %264 = tpu.matmul %261, %262, %cst_100 {dimension_numbers = #tpu.dot_dimension_numbers<[2], [2], [1], [1], [0, 0, 0, 1, 1, 1], [0], [0]>, precision = #tpu.contract_precision<fp32>} : vector<2x8x32xf32>, vector<2x16x32xf32>, vector<2x8x16xf32> -> vector<2x8x16xf32>
    %cst_101 = arith.constant 0.176776692 : f32
    %265 = vector.broadcast %cst_101 : f32 to vector<2x8x16xf32>
    %266 = arith.mulf %264, %265 : vector<2x8x16xf32>
    %cst_102 = arith.constant dense<0xFF800000> : vector<2x8xf32>
    %267 = vector.multi_reduction <maximumf>, %266, %cst_102 [2] : vector<2x8x16xf32> to vector<2x8xf32>
    %268 = vector.shape_cast %267 : vector<2x8xf32> to vector<2x8x1xf32>
    %269 = vector.broadcast %268 : vector<2x8x1xf32> to vector<2x8x16xf32>
    %270 = arith.subf %266, %269 : vector<2x8x16xf32>
    %271 = math.exp %270 : vector<2x8x16xf32>
    %cst_103 = arith.constant dense<0.000000e+00> : vector<2x8xf32>
    %272 = vector.multi_reduction <add>, %271, %cst_103 [2] : vector<2x8x16xf32> to vector<2x8xf32>
    %273 = vector.shape_cast %272 : vector<2x8xf32> to vector<2x8x1xf32>
    %274 = vector.broadcast %273 : vector<2x8x1xf32> to vector<2x8x16xf32>
    %275 = arith.divf %271, %274 : vector<2x8x16xf32>
    %cst_104 = arith.constant dense<0.000000e+00> : vector<2x8x32xf32>
    %276 = tpu.matmul %275, %263, %cst_104 {dimension_numbers = #tpu.dot_dimension_numbers<[2], [1], [1], [2], [0, 0, 0, 1, 1, 2], [0], [0]>, precision = #tpu.contract_precision<fp32>} : vector<2x8x16xf32>, vector<2x16x32xf32>, vector<2x8x32xf32> -> vector<2x8x32xf32>
    %277 = vector.shape_cast %260 : vector<2x8x32xf32> to vector<16x32xf32>
    %278 = vector.extract_strided_slice %203 {offsets = [32, 0], sizes = [32, 128], strides = [1, 1]} : vector<128x128xf32> to vector<32x128xf32>
    %cst_105 = arith.constant dense<0.000000e+00> : vector<16x128xf32>
    %279 = tpu.matmul %277, %278, %cst_105 {dimension_numbers = #tpu.dot_dimension_numbers<[1], [0], [0], [1], [0, 0, 1, 1], [], []>, precision = #tpu.contract_precision<fp32>} : vector<16x32xf32>, vector<32x128xf32>, vector<16x128xf32> -> vector<16x128xf32>
    %280 = arith.addf %244, %279 : vector<16x128xf32>
    %281 = vector.shape_cast %276 : vector<2x8x32xf32> to vector<16x32xf32>
    %282 = vector.extract_strided_slice %203 {offsets = [96, 0], sizes = [32, 128], strides = [1, 1]} : vector<128x128xf32> to vector<32x128xf32>
    %cst_106 = arith.constant dense<0.000000e+00> : vector<16x128xf32>
    %283 = tpu.matmul %281, %282, %cst_106 {dimension_numbers = #tpu.dot_dimension_numbers<[1], [0], [0], [1], [0, 0, 1, 1], [], []>, precision = #tpu.contract_precision<fp32>} : vector<16x32xf32>, vector<32x128xf32>, vector<16x128xf32> -> vector<16x128xf32>
    %284 = arith.addf %280, %283 : vector<16x128xf32>
    %c1_107 = arith.constant 1 : index
    %c0_108 = arith.constant 0 : index
    %c0_109 = arith.constant 0 : index
    %285 = vector.load %arg7[%c1_107, %c0_108, %c0_109] : memref<2x1x128xf32, #tpu.memory_space<vmem>>, vector<1x1x128xf32>
    %286 = vector.shape_cast %285 : vector<1x1x128xf32> to vector<1x128xf32>
    %287 = vector.broadcast %286 : vector<1x128xf32> to vector<16x128xf32>
    %288 = arith.addf %284, %287 : vector<16x128xf32>
    %289 = arith.mulf %288, %288 : vector<16x128xf32>
    %290 = arith.mulf %288, %289 : vector<16x128xf32>
    %cst_110 = arith.constant 4.471500e-02 : f32
    %291 = vector.broadcast %cst_110 : f32 to vector<16x128xf32>
    %292 = arith.mulf %291, %290 : vector<16x128xf32>
    %293 = arith.addf %288, %292 : vector<16x128xf32>
    %cst_111 = arith.constant 0.797884583 : f32
    %294 = vector.broadcast %cst_111 : f32 to vector<16x128xf32>
    %295 = arith.mulf %294, %293 : vector<16x128xf32>
    %296 = math.tanh %295 : vector<16x128xf32>
    %cst_112 = arith.constant 1.000000e+00 : f32
    %297 = vector.broadcast %cst_112 : f32 to vector<16x128xf32>
    %298 = arith.addf %297, %296 : vector<16x128xf32>
    %cst_113 = arith.constant 5.000000e-01 : f32
    %299 = vector.broadcast %cst_113 : f32 to vector<16x128xf32>
    %300 = arith.mulf %299, %298 : vector<16x128xf32>
    %301 = arith.mulf %288, %300 : vector<16x128xf32>
    %c1_114 = arith.constant 1 : index
    %c0_115 = arith.constant 0 : index
    %c0_116 = arith.constant 0 : index
    %302 = vector.load %arg8[%c1_114, %c0_115, %c0_116] : memref<2x128x128xf32, #tpu.memory_space<vmem>>, vector<1x128x128xf32>
    %303 = vector.shape_cast %302 : vector<1x128x128xf32> to vector<128x128xf32>
    %cst_117 = arith.constant dense<0.000000e+00> : vector<16x128xf32>
    %304 = tpu.matmul %301, %303, %cst_117 {dimension_numbers = #tpu.dot_dimension_numbers<[1], [0], [0], [1], [0, 0, 1, 1], [], []>, precision = #tpu.contract_precision<fp32>} : vector<16x128xf32>, vector<128x128xf32>, vector<16x128xf32> -> vector<16x128xf32>
    %c1_118 = arith.constant 1 : index
    %c0_119 = arith.constant 0 : index
    %c0_120 = arith.constant 0 : index
    %305 = vector.load %arg9[%c1_118, %c0_119, %c0_120] : memref<2x1x128xf32, #tpu.memory_space<vmem>>, vector<1x1x128xf32>
    %306 = vector.shape_cast %305 : vector<1x1x128xf32> to vector<1x128xf32>
    %307 = vector.broadcast %306 : vector<1x128xf32> to vector<16x128xf32>
    %308 = arith.addf %304, %307 : vector<16x128xf32>
    %309 = vector.extract_strided_slice %308 {offsets = [0, 0], sizes = [16, 32], strides = [1, 1]} : vector<16x128xf32> to vector<16x32xf32>
    %310 = vector.extract_strided_slice %308 {offsets = [0, 32], sizes = [16, 1], strides = [1, 1]} : vector<16x128xf32> to vector<16x1xf32>
    %311 = arith.negf %310 : vector<16x1xf32>
    %312 = math.exp %311 : vector<16x1xf32>
    %cst_121 = arith.constant 1.000000e+00 : f32
    %313 = vector.broadcast %cst_121 : f32 to vector<16x1xf32>
    %314 = arith.addf %313, %312 : vector<16x1xf32>
    %315 = arith.divf %313, %314 : vector<16x1xf32>
    %cst_122 = arith.constant 2.000000e+00 : f32
    %316 = vector.broadcast %cst_122 : f32 to vector<16x1xf32>
    %317 = arith.mulf %315, %316 : vector<16x1xf32>
    %318 = vector.broadcast %317 : vector<16x1xf32> to vector<16x32xf32>
    %319 = arith.mulf %309, %318 : vector<16x32xf32>
    %320 = vector.extract_strided_slice %308 {offsets = [0, 64], sizes = [16, 32], strides = [1, 1]} : vector<16x128xf32> to vector<16x32xf32>
    %321 = vector.extract_strided_slice %308 {offsets = [0, 96], sizes = [16, 1], strides = [1, 1]} : vector<16x128xf32> to vector<16x1xf32>
    %322 = arith.negf %321 : vector<16x1xf32>
    %323 = math.exp %322 : vector<16x1xf32>
    %cst_123 = arith.constant 1.000000e+00 : f32
    %324 = vector.broadcast %cst_123 : f32 to vector<16x1xf32>
    %325 = arith.addf %324, %323 : vector<16x1xf32>
    %326 = arith.divf %324, %325 : vector<16x1xf32>
    %cst_124 = arith.constant 2.000000e+00 : f32
    %327 = vector.broadcast %cst_124 : f32 to vector<16x1xf32>
    %328 = arith.mulf %326, %327 : vector<16x1xf32>
    %329 = vector.broadcast %328 : vector<16x1xf32> to vector<16x32xf32>
    %330 = arith.mulf %320, %329 : vector<16x32xf32>
    %331 = vector.shape_cast %330 : vector<16x32xf32> to vector<2x8x32xf32>
    %332 = vector.shape_cast %319 : vector<16x32xf32> to vector<2x8x32xf32>
    %333 = tpu.concatenate %331, %332 in 1 : vector<2x8x32xf32>, vector<2x8x32xf32> -> vector<2x16x32xf32>
    %334 = arith.addf %168, %333 : vector<2x16x32xf32>
    %335 = vector.extract_strided_slice %334 {offsets = [0, 0, 0], sizes = [2, 8, 32], strides = [1, 1, 1]} : vector<2x16x32xf32> to vector<2x8x32xf32>
    %c0_125 = arith.constant 0 : index
    %c0_126 = arith.constant 0 : index
    %336 = vector.load %arg10[%c0_125, %c0_126] : memref<1x32xf32, #tpu.memory_space<vmem>>, vector<1x32xf32>
    %c0_127 = arith.constant 0 : index
    %c0_128 = arith.constant 0 : index
    %337 = vector.load %arg11[%c0_127, %c0_128] : memref<1x32xf32, #tpu.memory_space<vmem>>, vector<1x32xf32>
    %cst_129 = arith.constant dense<0.000000e+00> : vector<2x8xf32>
    %338 = vector.multi_reduction <add>, %335, %cst_129 [2] : vector<2x8x32xf32> to vector<2x8xf32>
    %339 = vector.shape_cast %338 : vector<2x8xf32> to vector<2x8x1xf32>
    %cst_130 = arith.constant 3.200000e+01 : f32
    %340 = vector.broadcast %cst_130 : f32 to vector<2x8x1xf32>
    %341 = arith.divf %339, %340 : vector<2x8x1xf32>
    %342 = vector.broadcast %341 : vector<2x8x1xf32> to vector<2x8x32xf32>
    %343 = arith.subf %335, %342 : vector<2x8x32xf32>
    %344 = arith.mulf %343, %343 : vector<2x8x32xf32>
    %cst_131 = arith.constant dense<0.000000e+00> : vector<2x8xf32>
    %345 = vector.multi_reduction <add>, %344, %cst_131 [2] : vector<2x8x32xf32> to vector<2x8xf32>
    %346 = vector.shape_cast %345 : vector<2x8xf32> to vector<2x8x1xf32>
    %cst_132 = arith.constant 3.200000e+01 : f32
    %347 = vector.broadcast %cst_132 : f32 to vector<2x8x1xf32>
    %348 = arith.divf %346, %347 : vector<2x8x1xf32>
    %349 = vector.broadcast %341 : vector<2x8x1xf32> to vector<2x8x32xf32>
    %350 = arith.subf %335, %349 : vector<2x8x32xf32>
    %cst_133 = arith.constant 9.99999974E-6 : f32
    %351 = vector.broadcast %cst_133 : f32 to vector<2x8x1xf32>
    %352 = arith.addf %348, %351 : vector<2x8x1xf32>
    %353 = math.rsqrt %352 : vector<2x8x1xf32>
    %354 = vector.broadcast %353 : vector<2x8x1xf32> to vector<2x8x32xf32>
    %355 = arith.mulf %350, %354 : vector<2x8x32xf32>
    %356 = vector.shape_cast %336 : vector<1x32xf32> to vector<1x1x32xf32>
    %357 = vector.broadcast %356 : vector<1x1x32xf32> to vector<2x8x32xf32>
    %358 = arith.mulf %355, %357 : vector<2x8x32xf32>
    %359 = vector.shape_cast %337 : vector<1x32xf32> to vector<1x1x32xf32>
    %360 = vector.broadcast %359 : vector<1x1x32xf32> to vector<2x8x32xf32>
    %361 = arith.addf %358, %360 : vector<2x8x32xf32>
    %362 = vector.shape_cast %361 : vector<2x8x32xf32> to vector<16x32xf32>
    %c0_134 = arith.constant 0 : index
    %c0_135 = arith.constant 0 : index
    %363 = vector.load %arg13[%c0_134, %c0_135] : memref<32x128xf32, #tpu.memory_space<vmem>>, vector<32x128xf32>
    %cst_136 = arith.constant dense<0.000000e+00> : vector<16x128xf32>
    %364 = tpu.matmul %362, %363, %cst_136 {dimension_numbers = #tpu.dot_dimension_numbers<[1], [0], [0], [1], [0, 0, 1, 1], [], []>, precision = #tpu.contract_precision<fp32>} : vector<16x32xf32>, vector<32x128xf32>, vector<16x128xf32> -> vector<16x128xf32>
    %365 = vector.shape_cast %364 : vector<16x128xf32> to vector<2x8x128xf32>
    %c0_137 = arith.constant 0 : index
    %c0_138 = arith.constant 0 : index
    %366 = vector.load %arg12[%c0_137, %c0_138] : memref<2x32xf32, #tpu.memory_space<vmem>>, vector<2x32xf32>
    %367 = vector.extract_strided_slice %366 {offsets = [0, 0], sizes = [1, 32], strides = [1, 1]} : vector<2x32xf32> to vector<1x32xf32>
    %368 = vector.shape_cast %367 : vector<1x32xf32> to vector<1x1x32xf32>
    %369 = vector.shape_cast %368 : vector<1x1x32xf32> to vector<1x1x32xf32>
    %370 = vector.broadcast %369 : vector<1x1x32xf32> to vector<2x1x32xf32>
    %371 = vector.extract_strided_slice %365 {offsets = [0, 0, 0], sizes = [2, 8, 32], strides = [1, 1, 1]} : vector<2x8x128xf32> to vector<2x8x32xf32>
    %372 = vector.extract_strided_slice %365 {offsets = [0, 0, 32], sizes = [2, 8, 32], strides = [1, 1, 1]} : vector<2x8x128xf32> to vector<2x8x32xf32>
    %cst_139 = arith.constant dense<0.000000e+00> : vector<2x1x8xf32>
    %373 = tpu.matmul %370, %371, %cst_139 {dimension_numbers = #tpu.dot_dimension_numbers<[2], [2], [1], [1], [0, 0, 0, 1, 1, 1], [0], [0]>, precision = #tpu.contract_precision<fp32>} : vector<2x1x32xf32>, vector<2x8x32xf32>, vector<2x1x8xf32> -> vector<2x1x8xf32>
    %cst_140 = arith.constant 0.176776692 : f32
    %374 = vector.broadcast %cst_140 : f32 to vector<2x1x8xf32>
    %375 = arith.mulf %373, %374 : vector<2x1x8xf32>
    %cst_141 = arith.constant dense<0xFF800000> : vector<2x1xf32>
    %376 = vector.multi_reduction <maximumf>, %375, %cst_141 [2] : vector<2x1x8xf32> to vector<2x1xf32>
    %377 = vector.shape_cast %376 : vector<2x1xf32> to vector<2x1x1xf32>
    %378 = vector.broadcast %377 : vector<2x1x1xf32> to vector<2x1x8xf32>
    %379 = arith.subf %375, %378 : vector<2x1x8xf32>
    %380 = math.exp %379 : vector<2x1x8xf32>
    %cst_142 = arith.constant dense<0.000000e+00> : vector<2x1xf32>
    %381 = vector.multi_reduction <add>, %380, %cst_142 [2] : vector<2x1x8xf32> to vector<2x1xf32>
    %382 = vector.shape_cast %381 : vector<2x1xf32> to vector<2x1x1xf32>
    %383 = vector.broadcast %382 : vector<2x1x1xf32> to vector<2x1x8xf32>
    %384 = arith.divf %380, %383 : vector<2x1x8xf32>
    %cst_143 = arith.constant dense<0.000000e+00> : vector<2x1x32xf32>
    %385 = tpu.matmul %384, %372, %cst_143 {dimension_numbers = #tpu.dot_dimension_numbers<[2], [1], [1], [2], [0, 0, 0, 1, 1, 2], [0], [0]>, precision = #tpu.contract_precision<fp32>} : vector<2x1x8xf32>, vector<2x8x32xf32>, vector<2x1x32xf32> -> vector<2x1x32xf32>
    %386 = vector.shape_cast %385 : vector<2x1x32xf32> to vector<2x32xf32>
    %387 = vector.extract_strided_slice %366 {offsets = [1, 0], sizes = [1, 32], strides = [1, 1]} : vector<2x32xf32> to vector<1x32xf32>
    %388 = vector.shape_cast %387 : vector<1x32xf32> to vector<1x1x32xf32>
    %389 = vector.shape_cast %388 : vector<1x1x32xf32> to vector<1x1x32xf32>
    %390 = vector.broadcast %389 : vector<1x1x32xf32> to vector<2x1x32xf32>
    %391 = vector.extract_strided_slice %365 {offsets = [0, 0, 64], sizes = [2, 8, 32], strides = [1, 1, 1]} : vector<2x8x128xf32> to vector<2x8x32xf32>
    %392 = vector.extract_strided_slice %365 {offsets = [0, 0, 96], sizes = [2, 8, 32], strides = [1, 1, 1]} : vector<2x8x128xf32> to vector<2x8x32xf32>
    %cst_144 = arith.constant dense<0.000000e+00> : vector<2x1x8xf32>
    %393 = tpu.matmul %390, %391, %cst_144 {dimension_numbers = #tpu.dot_dimension_numbers<[2], [2], [1], [1], [0, 0, 0, 1, 1, 1], [0], [0]>, precision = #tpu.contract_precision<fp32>} : vector<2x1x32xf32>, vector<2x8x32xf32>, vector<2x1x8xf32> -> vector<2x1x8xf32>
    %cst_145 = arith.constant 0.176776692 : f32
    %394 = vector.broadcast %cst_145 : f32 to vector<2x1x8xf32>
    %395 = arith.mulf %393, %394 : vector<2x1x8xf32>
    %cst_146 = arith.constant dense<0xFF800000> : vector<2x1xf32>
    %396 = vector.multi_reduction <maximumf>, %395, %cst_146 [2] : vector<2x1x8xf32> to vector<2x1xf32>
    %397 = vector.shape_cast %396 : vector<2x1xf32> to vector<2x1x1xf32>
    %398 = vector.broadcast %397 : vector<2x1x1xf32> to vector<2x1x8xf32>
    %399 = arith.subf %395, %398 : vector<2x1x8xf32>
    %400 = math.exp %399 : vector<2x1x8xf32>
    %cst_147 = arith.constant dense<0.000000e+00> : vector<2x1xf32>
    %401 = vector.multi_reduction <add>, %400, %cst_147 [2] : vector<2x1x8xf32> to vector<2x1xf32>
    %402 = vector.shape_cast %401 : vector<2x1xf32> to vector<2x1x1xf32>
    %403 = vector.broadcast %402 : vector<2x1x1xf32> to vector<2x1x8xf32>
    %404 = arith.divf %400, %403 : vector<2x1x8xf32>
    %cst_148 = arith.constant dense<0.000000e+00> : vector<2x1x32xf32>
    %405 = tpu.matmul %404, %392, %cst_148 {dimension_numbers = #tpu.dot_dimension_numbers<[2], [1], [1], [2], [0, 0, 0, 1, 1, 2], [0], [0]>, precision = #tpu.contract_precision<fp32>} : vector<2x1x8xf32>, vector<2x8x32xf32>, vector<2x1x32xf32> -> vector<2x1x32xf32>
    %406 = vector.shape_cast %405 : vector<2x1x32xf32> to vector<2x32xf32>
    %c0_149 = arith.constant 0 : index
    %c0_150 = arith.constant 0 : index
    %407 = vector.load %arg14[%c0_149, %c0_150] : memref<64x64xf32, #tpu.memory_space<vmem>>, vector<64x64xf32>
    %408 = vector.extract_strided_slice %407 {offsets = [0, 0], sizes = [32, 64], strides = [1, 1]} : vector<64x64xf32> to vector<32x64xf32>
    %cst_151 = arith.constant dense<0.000000e+00> : vector<2x64xf32>
    %409 = tpu.matmul %386, %408, %cst_151 {dimension_numbers = #tpu.dot_dimension_numbers<[1], [0], [0], [1], [0, 0, 1, 1], [], []>, precision = #tpu.contract_precision<fp32>} : vector<2x32xf32>, vector<32x64xf32>, vector<2x64xf32> -> vector<2x64xf32>
    %410 = vector.extract_strided_slice %407 {offsets = [32, 0], sizes = [32, 64], strides = [1, 1]} : vector<64x64xf32> to vector<32x64xf32>
    %cst_152 = arith.constant dense<0.000000e+00> : vector<2x64xf32>
    %411 = tpu.matmul %406, %410, %cst_152 {dimension_numbers = #tpu.dot_dimension_numbers<[1], [0], [0], [1], [0, 0, 1, 1], [], []>, precision = #tpu.contract_precision<fp32>} : vector<2x32xf32>, vector<32x64xf32>, vector<2x64xf32> -> vector<2x64xf32>
    %412 = arith.addf %409, %411 : vector<2x64xf32>
    %c0_153 = arith.constant 0 : index
    %c0_154 = arith.constant 0 : index
    %413 = vector.load %arg15[%c0_153, %c0_154] : memref<1x64xf32, #tpu.memory_space<vmem>>, vector<1x64xf32>
    %414 = vector.broadcast %413 : vector<1x64xf32> to vector<2x64xf32>
    %415 = arith.addf %412, %414 : vector<2x64xf32>
    %416 = arith.mulf %415, %415 : vector<2x64xf32>
    %417 = arith.mulf %415, %416 : vector<2x64xf32>
    %cst_155 = arith.constant 4.471500e-02 : f32
    %418 = vector.broadcast %cst_155 : f32 to vector<2x64xf32>
    %419 = arith.mulf %418, %417 : vector<2x64xf32>
    %420 = arith.addf %415, %419 : vector<2x64xf32>
    %cst_156 = arith.constant 0.797884583 : f32
    %421 = vector.broadcast %cst_156 : f32 to vector<2x64xf32>
    %422 = arith.mulf %421, %420 : vector<2x64xf32>
    %423 = math.tanh %422 : vector<2x64xf32>
    %cst_157 = arith.constant 1.000000e+00 : f32
    %424 = vector.broadcast %cst_157 : f32 to vector<2x64xf32>
    %425 = arith.addf %424, %423 : vector<2x64xf32>
    %cst_158 = arith.constant 5.000000e-01 : f32
    %426 = vector.broadcast %cst_158 : f32 to vector<2x64xf32>
    %427 = arith.mulf %426, %425 : vector<2x64xf32>
    %428 = arith.mulf %415, %427 : vector<2x64xf32>
    %c0_159 = arith.constant 0 : index
    %c0_160 = arith.constant 0 : index
    %429 = vector.load %arg16[%c0_159, %c0_160] : memref<64x128xf32, #tpu.memory_space<vmem>>, vector<64x128xf32>
    %cst_161 = arith.constant dense<0.000000e+00> : vector<2x128xf32>
    %430 = tpu.matmul %428, %429, %cst_161 {dimension_numbers = #tpu.dot_dimension_numbers<[1], [0], [0], [1], [0, 0, 1, 1], [], []>, precision = #tpu.contract_precision<fp32>} : vector<2x64xf32>, vector<64x128xf32>, vector<2x128xf32> -> vector<2x128xf32>
    %c0_162 = arith.constant 0 : index
    %c0_163 = arith.constant 0 : index
    %431 = vector.load %arg17[%c0_162, %c0_163] : memref<1x128xf32, #tpu.memory_space<vmem>>, vector<1x128xf32>
    %432 = vector.broadcast %431 : vector<1x128xf32> to vector<2x128xf32>
    %433 = arith.addf %430, %432 : vector<2x128xf32>
    %c0_164 = arith.constant 0 : index
    %c0_165 = arith.constant 0 : index
    %434 = vector.load %arg20[%c0_164, %c0_165] : memref<2x128xf32, #tpu.memory_space<vmem>>, vector<2x128xf32>
    tpu.vector_store %arg20[%c0_164, %c0_165], %433 {strides = array<i32>} : memref<2x128xf32, #tpu.memory_space<vmem>>, vector<2x128xf32>,
    %435 = vector.extract_strided_slice %334 {offsets = [0, 0, 0], sizes = [2, 8, 32], strides = [1, 1, 1]} : vector<2x16x32xf32> to vector<2x8x32xf32>
    %c0_166 = arith.constant 0 : index
    %c0_167 = arith.constant 0 : index
    %c0_168 = arith.constant 0 : index
    %436 = vector.load %arg19[%c0_166, %c0_167, %c0_168] : memref<2x8x32xf32, #tpu.memory_space<vmem>>, vector<2x8x32xf32>
    tpu.vector_store %arg19[%c0_166, %c0_167, %c0_168], %435 {strides = array<i32>} : memref<2x8x32xf32, #tpu.memory_space<vmem>>, vector<2x8x32xf32>,
    %437 = vector.extract_strided_slice %334 {offsets = [0, 8, 0], sizes = [2, 8, 32], strides = [1, 1, 1]} : vector<2x16x32xf32> to vector<2x8x32xf32>
    %c0_169 = arith.constant 0 : index
    %c0_170 = arith.constant 0 : index
    %c0_171 = arith.constant 0 : index
    %438 = vector.load %arg18[%c0_169, %c0_170, %c0_171] : memref<2x8x32xf32, #tpu.memory_space<vmem>>, vector<2x8x32xf32>
    tpu.vector_store %arg18[%c0_169, %c0_170, %c0_171], %437 {strides = array<i32>} : memref<2x8x32xf32, #tpu.memory_space<vmem>>, vector<2x8x32xf32>,
    return
  }
  func.func @transform_0(%arg0: i32) -> (i32, i32, i32) {
    %c0_i32 = arith.constant 0 : i32
    %c0_i32_0 = arith.constant 0 : i32
    %c0_i32_1 = arith.constant 0 : i32
    %c0_i32_2 = arith.constant 0 : i32
    return %c0_i32, %c0_i32_0, %c0_i32_1 : i32, i32, i32
  }
  func.func @transform_1(%arg0: i32) -> (i32, i32, i32) {
    %c0_i32 = arith.constant 0 : i32
    %c0_i32_0 = arith.constant 0 : i32
    %c0_i32_1 = arith.constant 0 : i32
    %c0_i32_2 = arith.constant 0 : i32
    return %c0_i32, %c0_i32_0, %c0_i32_1 : i32, i32, i32
  }
  func.func @transform_2(%arg0: i32) -> (i32, i32, i32) {
    %c0_i32 = arith.constant 0 : i32
    %c0_i32_0 = arith.constant 0 : i32
    %c0_i32_1 = arith.constant 0 : i32
    %c0_i32_2 = arith.constant 0 : i32
    return %c0_i32, %c0_i32_0, %c0_i32_1 : i32, i32, i32
  }
  func.func @transform_3(%arg0: i32) -> (i32, i32, i32) {
    %c0_i32 = arith.constant 0 : i32
    %c0_i32_0 = arith.constant 0 : i32
    %c0_i32_1 = arith.constant 0 : i32
    %c0_i32_2 = arith.constant 0 : i32
    return %c0_i32, %c0_i32_0, %c0_i32_1 : i32, i32, i32
  }
  func.func @transform_4(%arg0: i32) -> (i32, i32, i32) {
    %c0_i32 = arith.constant 0 : i32
    %c0_i32_0 = arith.constant 0 : i32
    %c0_i32_1 = arith.constant 0 : i32
    %c0_i32_2 = arith.constant 0 : i32
    return %c0_i32, %c0_i32_0, %c0_i32_1 : i32, i32, i32
  }
  func.func @transform_5(%arg0: i32) -> (i32, i32, i32) {
    %c0_i32 = arith.constant 0 : i32
    %c0_i32_0 = arith.constant 0 : i32
    %c0_i32_1 = arith.constant 0 : i32
    %c0_i32_2 = arith.constant 0 : i32
    return %c0_i32, %c0_i32_0, %c0_i32_1 : i32, i32, i32
  }
  func.func @transform_6(%arg0: i32) -> (i32, i32, i32) {
    %c0_i32 = arith.constant 0 : i32
    %c0_i32_0 = arith.constant 0 : i32
    %c0_i32_1 = arith.constant 0 : i32
    %c0_i32_2 = arith.constant 0 : i32
    return %c0_i32, %c0_i32_0, %c0_i32_1 : i32, i32, i32
  }
  func.func @transform_7(%arg0: i32) -> (i32, i32, i32) {
    %c0_i32 = arith.constant 0 : i32
    %c0_i32_0 = arith.constant 0 : i32
    %c0_i32_1 = arith.constant 0 : i32
    %c0_i32_2 = arith.constant 0 : i32
    return %c0_i32, %c0_i32_0, %c0_i32_1 : i32, i32, i32
  }
  func.func @transform_8(%arg0: i32) -> (i32, i32, i32) {
    %c0_i32 = arith.constant 0 : i32
    %c0_i32_0 = arith.constant 0 : i32
    %c0_i32_1 = arith.constant 0 : i32
    %c0_i32_2 = arith.constant 0 : i32
    return %c0_i32, %c0_i32_0, %c0_i32_1 : i32, i32, i32
  }
  func.func @transform_9(%arg0: i32) -> (i32, i32) {
    %c0_i32 = arith.constant 0 : i32
    %c0_i32_0 = arith.constant 0 : i32
    %c0_i32_1 = arith.constant 0 : i32
    return %c0_i32, %c0_i32_0 : i32, i32
  }
  func.func @transform_10(%arg0: i32) -> (i32, i32) {
    %c0_i32 = arith.constant 0 : i32
    %c0_i32_0 = arith.constant 0 : i32
    %c0_i32_1 = arith.constant 0 : i32
    return %c0_i32, %c0_i32_0 : i32, i32
  }
  func.func @transform_11(%arg0: i32) -> (i32, i32) {
    %c0_i32 = arith.constant 0 : i32
    %c0_i32_0 = arith.constant 0 : i32
    %c0_i32_1 = arith.constant 0 : i32
    return %c0_i32, %c0_i32_0 : i32, i32
  }
  func.func @transform_12(%arg0: i32) -> (i32, i32) {
    %c0_i32 = arith.constant 0 : i32
    %c0_i32_0 = arith.constant 0 : i32
    %c0_i32_1 = arith.constant 0 : i32
    return %c0_i32, %c0_i32_0 : i32, i32
  }
  func.func @transform_13(%arg0: i32) -> (i32, i32) {
    %c0_i32 = arith.constant 0 : i32
    %c0_i32_0 = arith.constant 0 : i32
    %c0_i32_1 = arith.constant 0 : i32
    return %c0_i32, %c0_i32_0 : i32, i32
  }
  func.func @transform_14(%arg0: i32) -> (i32, i32) {
    %c0_i32 = arith.constant 0 : i32
    %c0_i32_0 = arith.constant 0 : i32
    %c0_i32_1 = arith.constant 0 : i32
    return %c0_i32, %c0_i32_0 : i32, i32
  }
  func.func @transform_15(%arg0: i32) -> (i32, i32) {
    %c0_i32 = arith.constant 0 : i32
    %c0_i32_0 = arith.constant 0 : i32
    %c0_i32_1 = arith.constant 0 : i32
    return %c0_i32, %c0_i32_0 : i32, i32
  }
  func.func @transform_16(%arg0: i32) -> (i32, i32) {
    %c0_i32 = arith.constant 0 : i32
    %c0_i32_0 = arith.constant 0 : i32
    %c0_i32_1 = arith.constant 0 : i32
    return %c0_i32, %c0_i32_0 : i32, i32
  }
  func.func @transform_17(%arg0: i32) -> (i32, i32, i32) {
    %c0_i32 = arith.constant 0 : i32
    %c0_i32_0 = arith.constant 0 : i32
    %c0_i32_1 = arith.constant 0 : i32
    %c0_i32_2 = arith.constant 0 : i32
    return %c0_i32, %c0_i32_0, %c0_i32_1 : i32, i32, i32
  }
  func.func @transform_18(%arg0: i32) -> (i32, i32, i32) {
    %c0_i32 = arith.constant 0 : i32
    %c0_i32_0 = arith.constant 0 : i32
    %c0_i32_1 = arith.constant 0 : i32
    %c0_i32_2 = arith.constant 0 : i32
    return %c0_i32, %c0_i32_0, %c0_i32_1 : i32, i32, i32
  }
  func.func @transform_19(%arg0: i32) -> (i32, i32) {
    %c0_i32 = arith.constant 0 : i32
    %c0_i32_0 = arith.constant 0 : i32
    %c0_i32_1 = arith.constant 0 : i32
    return %c0_i32, %c0_i32_0 : i32, i32
  }
}

</mosaic_0001>

<bundles_post_ra>
// kernel: tpu_custom_call.1
= control target key start
LH: loop header
LB: loop body
LE: loop exit
PB: predicated region body
PF: predicated region fallthrough
CT: control target
= control target key end

     0   :  { %s40954_s0 = inlined_call_operand.hbm [shape: f32[2,8,32], index: 0, kind: input, shape index: {}]   ;;  %s40955_s1 = inlined_call_operand.hbm [shape: f32[2,8,32], index: 1, kind: input, shape index: {}]   ;;  %s40956_s2 = inlined_call_operand.vmem [shape: f32[2,1,32], index: 2, kind: input, shape index: {}]   ;;  %s40957_s3 = inlined_call_operand.vmem [shape: f32[2,1,32], index: 3, kind: input, shape index: {}]   ;;  %s40958_s4 = inlined_call_operand.hbm [shape: f32[2,32,384], index: 4, kind: input, shape index: {}]   ;;  %s40959_s5 = inlined_call_operand.hbm [shape: f32[2,128,128], index: 5, kind: input, shape index: {}]   ;;  %s40960_s6 = inlined_call_operand.vmem [shape: f32[2,1,128], index: 6, kind: input, shape index: {}]   ;;  %s40961_s7 = inlined_call_operand.hbm [shape: f32[2,128,128], index: 7, kind: input, shape index: {}]   ;;  %s40962_s8 = inlined_call_operand.vmem [shape: f32[2,1,128], index: 8, kind: input, shape index: {}]   ;;  %s40963_s9 = inlined_call_operand.vmem [shape: f32[1,32], index: 9, kind: input, shape index: {}]   ;;  %s40964_s10 = inlined_call_operand.vmem [shape: f32[1,32], index: 10, kind: input, shape index: {}]   ;;  %s40965_s11 = inlined_call_operand.vmem [shape: f32[2,32], index: 11, kind: input, shape index: {}]   ;;  %s40966_s12 = inlined_call_operand.vmem [shape: f32[32,128], index: 12, kind: input, shape index: {}]   ;;  %s40967_s13 = inlined_call_operand.hbm [shape: f32[64,64], index: 13, kind: input, shape index: {}]   ;;  %s40968_s14 = inlined_call_operand.vmem [shape: f32[1,64], index: 14, kind: input, shape index: {}]   ;;  %s40969_s15 = inlined_call_operand.hbm [shape: f32[64,128], index: 15, kind: input, shape index: {}]   ;;  %s40970_s16 = inlined_call_operand.vmem [shape: f32[1,128], index: 16, kind: input, shape index: {}]   ;;  %s40971_s17 = inlined_call_operand.hbm [shape: f32[2,8,32], index: 17, kind: output, shape index: {0}]   ;;  %s40972_s18 = inlined_call_operand.hbm [shape: f32[2,8,32], index: 18, kind: output, shape index: {1}]   ;;  %s40973_s19 = inlined_call_operand.hbm [shape: f32[2,128], index: 19, kind: output, shape index: {2}]  }
   0x1   :  { %41016 = sst [smem:[#allocation28_spill]] %s40954_s0 }
   0x2   :  { %41017 = sst [smem:[#allocation29_spill]] %s40955_s1 }
   0x3   :  { %41018 = sst [smem:[#allocation30_spill]] %s40956_s2 }
   0x4   :  { %41019 = sst [smem:[#allocation31_spill]] %s40957_s3 }
   0x5   :  { %41020 = sst [smem:[#allocation32_spill]] %s40973_s19 }
   0x6   :  { %25 = vsyncpa [#allocation3], 0 }
   0x7   :  { %26 = vsyncpa [#allocation6], 0 }
   0x8   :  { %27 = vsyncpa [#allocation9], 0 }
   0x9   :  { %28 = vsyncpa [#allocation12], 0 }
   0xa   :  { %29 = vsyncpa [#allocation4], 0 }
   0xb   :  { %30 = vsyncpa [#allocation16], 0  ;;  %s37157_s0 = smov [#allocation5]   ;;  %s37158_s20 = smov [#allocation8]  }
   0xc   :  { %s48_s30 = sshll.u32 %s37157_s0, 4  ;;  %s76_s21 = sshll.u32 %s37158_s20, 4  ;;  %s49_s30 = int_to_ptr.vmem [resolvable:$true] %s48_s30  ;;  %s37279_s21 = int_to_ptr.vmem [resolvable:$true] %s76_s21 }
   0xd   :  { %s41021_s2 = sld [smem:[#allocation29_spill]] }
  0x13   :  { %s36925_s23 = scalar_lea.hbm %s41021_s2, 256 }
  0x14   :  { %p36926_p0 = scmp.ne.s32.totalorder %s41021_s2, %s36925_s23  ;;  %p36929_p1 = scmp.lt.u32.totalorder %s36925_s23, %s41021_s2 }
  0x16   :  { %p36931_p2 = pnand %p36929_p1, %p36926_p0 }
  0x18   :  { %36934 = shalt.err (!%p36931_p2)
}
  0x19   :  { %s36935_s27 = scalar_lea.vmem %s49_s30, 256  ;;  %p36940_p4 = scmp.lt.s32.totalorder %s49_s30, %s49_s30 }
  0x1a   :  { %p36936_p3 = scmp.ne.s32.totalorder %s49_s30, %s36935_s27  ;;  %p36941_p5 = scmp.lt.s32.totalorder %s36935_s27, %s36935_s27 }
  0x1c   :  { %p36942_p6 = por %p36941_p5, %p36940_p4 }
  0x1e   :  { %p36943_p7 = pnand %p36942_p6, %p36936_p3 }
  0x20   :  { %36946 = shalt.err (!%p36943_p7)
}
  0x21   :  { %s37159_s28 = smov 128   ;;  %s37160_s29 = smov 8  }
  0x22   :  { %54 = dma.hbm_to_vmem [thread:$0]  %s41021_s2, 256, %s49_s30, [#allocation6], %s37159_s28, %s37159_s28, %s37160_s29  }
  0x23   :  { %s36947_s23 = scalar_lea.hbm %s40959_s5, 4096 }
  0x24   :  { %p36948_p8 = scmp.ne.s32.totalorder %s40959_s5, %s36947_s23  ;;  %p36951_p9 = scmp.lt.u32.totalorder %s36947_s23, %s40959_s5 }
  0x26   :  { %p36953_p10 = pnand %p36951_p9, %p36948_p8 }
  0x28   :  { %36956 = shalt.err (!%p36953_p10)
}
  0x29   :  { %s36957_s27 = scalar_lea.vmem %s37279_s21, 4096  ;;  %p36962_p12 = scmp.lt.s32.totalorder %s37279_s21, %s37279_s21 }
  0x2a   :  { %p36958_p11 = scmp.ne.s32.totalorder %s37279_s21, %s36957_s27  ;;  %p36963_p13 = scmp.lt.s32.totalorder %s36957_s27, %s36957_s27 }
  0x2c   :  { %p36964_p0 = por %p36963_p13, %p36962_p12 }
  0x2e   :  { %p36965_p1 = pnand %p36964_p0, %p36958_p11 }
  0x30   :  { %36968 = shalt.err (!%p36965_p1)
}
  0x31   :  { %82 = dma.hbm_to_vmem [thread:$0]  %s40959_s5, 4096, %s37279_s21, [#allocation9], %s37159_s28, %s37159_s28, %s37160_s29  }
  0x32   :  { %s37161_s0 = smov [#allocation11]   ;;  %s37162_s1 = smov [#allocation2]  }
  0x33   :  { %s112_s20 = sshll.u32 %s37161_s0, 4  ;;  %s36_s22 = sshll.u32 %s37162_s1, 4  ;;  %s113_s20 = int_to_ptr.vmem [resolvable:$true] %s112_s20  ;;  %s37316_s22 = int_to_ptr.vmem [resolvable:$true] %s36_s22 }
  0x34   :  { %s36969_s25 = scalar_lea.hbm %s40967_s13, 1024 }
  0x35   :  { %p36970_p2 = scmp.ne.s32.totalorder %s40967_s13, %s36969_s25  ;;  %p36973_p3 = scmp.lt.u32.totalorder %s36969_s25, %s40967_s13 }
  0x37   :  { %p36975_p4 = pnand %p36973_p3, %p36970_p2 }
  0x39   :  { %36978 = shalt.err (!%p36975_p4)
}
  0x3a   :  { %s36979_s5 = scalar_lea.vmem %s113_s20, 1024  ;;  %p36984_p6 = scmp.lt.s32.totalorder %s113_s20, %s113_s20 }
  0x3b   :  { %p36980_p5 = scmp.ne.s32.totalorder %s113_s20, %s36979_s5  ;;  %p36985_p7 = scmp.lt.s32.totalorder %s36979_s5, %s36979_s5 }
  0x3d   :  { %p36986_p8 = por %p36985_p7, %p36984_p6 }
  0x3f   :  { %p36987_p9 = pnand %p36986_p8, %p36980_p5 }
  0x41   :  { %36990 = shalt.err (!%p36987_p9)
}
  0x42   :  { %118 = dma.hbm_to_vmem [thread:$0]  %s40967_s13, 1024, %s113_s20, [#allocation12], %s37159_s28, %s37159_s28, %s37160_s29  }
  0x43   :  { %s41022_s19 = sld [smem:[#allocation28_spill]] }
  0x49   :  { %s36991_s1 = scalar_lea.hbm %s41022_s19, 256 }
  0x4a   :  { %p36992_p10 = scmp.ne.s32.totalorder %s41022_s19, %s36991_s1  ;;  %p36995_p11 = scmp.lt.u32.totalorder %s36991_s1, %s41022_s19 }
  0x4c   :  { %p36997_p12 = pnand %p36995_p11, %p36992_p10 }
  0x4e   :  { %37000 = shalt.err (!%p36997_p12)
}
  0x4f   :  { %s37001_s26 = scalar_lea.vmem %s37316_s22, 256  ;;  %p37006_p0 = scmp.lt.s32.totalorder %s37316_s22, %s37316_s22 }
  0x50   :  { %p37002_p13 = scmp.ne.s32.totalorder %s37316_s22, %s37001_s26  ;;  %p37007_p1 = scmp.lt.s32.totalorder %s37001_s26, %s37001_s26 }
  0x52   :  { %p37008_p2 = por %p37007_p1, %p37006_p0 }
  0x54   :  { %p37009_p3 = pnand %p37008_p2, %p37002_p13 }
  0x56   :  { %37012 = shalt.err (!%p37009_p3)
}
  0x57   :  { %42 = dma.hbm_to_vmem [thread:$0]  %s41022_s19, 256, %s37316_s22, [#allocation3], %s37159_s28, %s37159_s28, %s37160_s29  }
  0x58   :  { %s37163_s27 = smov [#allocation7]   ;;  %s37013_s2 = scalar_lea.hbm %s40958_s4, 3072 }
  0x59   :  { %s64_s5 = sshll.u32 %s37163_s27, 4  ;;  %p37014_p4 = scmp.ne.s32.totalorder %s40958_s4, %s37013_s2  ;;  %s65_s5 = int_to_ptr.vmem [resolvable:$true] %s64_s5 }
  0x5a   :  { %p37017_p5 = scmp.lt.u32.totalorder %s37013_s2, %s40958_s4 }
  0x5c   :  { %p37019_p6 = pnand %p37017_p5, %p37014_p4 }
  0x5e   :  { %37022 = shalt.err (!%p37019_p6)
}
  0x5f   :  { %s37023_s25 = scalar_lea.vmem %s65_s5, 3072  ;;  %p37028_p8 = scmp.lt.s32.totalorder %s65_s5, %s65_s5 }
  0x60   :  { %p37024_p7 = scmp.ne.s32.totalorder %s65_s5, %s37023_s25  ;;  %p37029_p9 = scmp.lt.s32.totalorder %s37023_s25, %s37023_s25 }
  0x62   :  { %p37030_p10 = por %p37029_p9, %p37028_p8 }
  0x64   :  { %p37031_p11 = pnand %p37030_p10, %p37024_p7 }
  0x66   :  { %37034 = shalt.err (!%p37031_p11)
}
  0x67   :  { %s37164_s22 = smov 384   ;;  %s37165_s19 = smov 24  }
  0x68   :  { %70 = dma.hbm_to_vmem [thread:$0]  %s40958_s4, 3072, %s65_s5, [#allocation6], %s37164_s22, %s37164_s22, %s37165_s19  }
  0x69   :  { %s37166_s13 = smov [#allocation10]   ;;  %s37167_s27 = smov [#allocation13]  }
  0x6a   :  { %s90_s20 = sshll.u32 %s37166_s13, 4  ;;  %s126_s21 = sshll.u32 %s37167_s27, 4  ;;  %s91_s20 = int_to_ptr.vmem [resolvable:$true] %s90_s20  ;;  %s127_s21 = int_to_ptr.vmem [resolvable:$true] %s126_s21 }
  0x6b   :  { %s37035_s0 = scalar_lea.hbm %s40961_s7, 4096 }
  0x6c   :  { %p37036_p12 = scmp.ne.s32.totalorder %s40961_s7, %s37035_s0  ;;  %p37039_p13 = scmp.lt.u32.totalorder %s37035_s0, %s40961_s7 }
  0x6e   :  { %p37041_p0 = pnand %p37039_p13, %p37036_p12 }
  0x70   :  { %37044 = shalt.err (!%p37041_p0)
}
  0x71   :  { %s37045_s4 = scalar_lea.vmem %s91_s20, 4096  ;;  %p37050_p2 = scmp.lt.s32.totalorder %s91_s20, %s91_s20 }
  0x72   :  { %p37046_p1 = scmp.ne.s32.totalorder %s91_s20, %s37045_s4  ;;  %p37051_p3 = scmp.lt.s32.totalorder %s37045_s4, %s37045_s4 }
  0x74   :  { %p37052_p4 = por %p37051_p3, %p37050_p2 }
  0x76   :  { %p37053_p5 = pnand %p37052_p4, %p37046_p1 }
  0x78   :  { %37056 = shalt.err (!%p37053_p5)
}
  0x79   :  { %96 = dma.hbm_to_vmem [thread:$0]  %s40961_s7, 4096, %s91_s20, [#allocation9], %s37159_s28, %s37159_s28, %s37160_s29  }
  0x7a   :  { %s37057_s26 = scalar_lea.hbm %s40969_s15, 1024 }
  0x7b   :  { %p37058_p6 = scmp.ne.s32.totalorder %s40969_s15, %s37057_s26  ;;  %p37061_p7 = scmp.lt.u32.totalorder %s37057_s26, %s40969_s15 }
  0x7d   :  { %p37063_p8 = pnand %p37061_p7, %p37058_p6 }
  0x7f   :  { %37066 = shalt.err (!%p37063_p8)
}
  0x80   :  { %s37067_s0 = scalar_lea.vmem %s127_s21, 1024  ;;  %p37072_p10 = scmp.lt.s32.totalorder %s127_s21, %s127_s21 }
  0x81   :  { %p37068_p9 = scmp.ne.s32.totalorder %s127_s21, %s37067_s0  ;;  %p37073_p11 = scmp.lt.s32.totalorder %s37067_s0, %s37067_s0 }
  0x83   :  { %p37074_p12 = por %p37073_p11, %p37072_p10 }
  0x85   :  { %p37075_p13 = pnand %p37074_p12, %p37068_p9 }
  0x87   :  { %37078 = shalt.err (!%p37075_p13)
}
  0x88   :  { %132 = dma.hbm_to_vmem [thread:$0]  %s40969_s15, 1024, %s127_s21, [#allocation12], %s37159_s28, %s37159_s28, %s37160_s29  }
  0x89   :  { %37145 = dma.done.wait [#allocation3], 256  }
  0x8a   :  { %37146 = vsyncadd [#allocation3], 4294967040 }
  0x8b   :  { %37147 = dma.done.wait [#allocation6], 3328  }
  0x8c   :  { %37148 = vsyncadd [#allocation6], 4294963968 }
  0x8d   :  { %37149 = dma.done.wait [#allocation9], 8192  }
  0x8e   :  { %37150 = vsyncadd [#allocation9], 4294959104 }
  0x8f   :  { %37151 = dma.done.wait [#allocation12], 2048  }
  0x90   :  { %37152 = vsyncadd [#allocation12], 4294965248  ;;  %vm162_vm0 = vcmask 261120   ;;  %v156_v0 = vld [vmem:[#allocation5] sm:$0xff]  ;;  %v157_v1 = vld [vmem:[#allocation5 + $0x8] sm:$0xff]  ;;  %v40979_v54 = vmov 0.0  }
  0x91   :  { %v158_v2 = vld [vmem:[#allocation2] sm:$0xff]  ;;  %v163_v3 = vsel %vm162_vm0, %v156_v0, 0.0  ;;  %v169_v4 = vsel %vm162_vm0, %v157_v1, 0.0  ;;  %v159_v5 = vld [vmem:[#allocation2 + $0x8] sm:$0xff]  ;;  %v239_v33 = vld [vmem:[#allocation7 + $0x18] sm:$0xff]  ;;  %695 = vmatprep.mubr.f32.mxu0 %v40979_v54  ;;  %332 = vmatprep.mubr.f32.mxu1 %v40979_v54  ;;  %s41023_s1 = sld [smem:[#allocation30_spill]] }
  0x92   :  { %164 = vadd.xlane.f32.xlu0 %v163_v3  ;;  %170 = vadd.xlane.f32.xlu1 %v169_v4  ;;  %v166_v6 = vsel %vm162_vm0, %v158_v2, 0.0  ;;  %v172_v7 = vsel %vm162_vm0, %v159_v5, 0.0  ;;  %v237_v28 = vld [vmem:[#allocation7 + $0x8] sm:$0xff]  ;;  %v240_v29 = vld [vmem:[#allocation7 + $0x20] sm:$0xff]  ;;  %v266_v35 = vand.u32 4294901760, %v239_v33  ;;  %v243_v38 = vld [vmem:[#allocation7 + $0x38] sm:$0xff] }
  0x93   :  { %v260_v30 = vand.u32 4294901760, %v237_v28  ;;  %v264_v31 = vand.u32 4294901760, %v240_v29  ;;  %v236_v32 = vld [vmem:[#allocation7] sm:$0xff]  ;;  %v246_v39 = vld [vmem:[#allocation7 + $0x50] sm:$0xff]  ;;  %v268_v40 = vand.u32 4294901760, %v243_v38  ;;  %v245_v43 = vld [vmem:[#allocation7 + $0x48] sm:$0xff] }
  0x94   :  { %v262_v34 = vand.u32 4294901760, %v236_v32  ;;  %v272_v41 = vand.u32 4294901760, %v246_v39  ;;  %v242_v42 = vld [vmem:[#allocation7 + $0x30] sm:$0xff]  ;;  %v274_v45 = vand.u32 4294901760, %v245_v43  ;;  %v37433_v49 = vsub.f32 %v239_v33, %v266_v35  ;;  %s41024_s25 = sld [smem:[#allocation31_spill]]  ;;  %s37170_s4 = smov 64  }
  0x95   :  { %v37419_v36 = vpack.c.bf16 %v264_v31, %v260_v30  ;;  %v270_v44 = vand.u32 4294901760, %v242_v42  ;;  %v37436_v50 = vsub.f32 %v243_v38, %v268_v40  ;;  %v37448_v55 = vsub.f32 %v237_v28, %v260_v30  ;;  %s37172_s5 = smov 32   ;;  %s37173_s22 = smov 96  }
  0x96   :  { %167 = vadd.xlane.f32.xlu0 %v166_v6  ;;  %173 = vadd.xlane.f32.xlu1 %v172_v7  ;;  %v37421_v37 = vpack.c.bf16 %v266_v35, %v262_v34  ;;  %v37427_v46 = vpack.c.bf16 %v272_v41, %v268_v40  ;;  %v37431_v48 = vsub.f32 %v236_v32, %v262_v34  ;;  %v397_v60 = vand.u32 4294901760, %v37433_v49 }
  0x97   :  { %34408 = vmatprep.subr.bf16.mxu0 %v37419_v36  ;;  %34384 = vmatprep.subr.bf16.mxu1 %v37419_v36  ;;  %v37429_v47 = vpack.c.bf16 %v274_v45, %v270_v44  ;;  %v37438_v51 = vsub.f32 %v246_v39, %v272_v41  ;;  %v37440_v52 = vsub.f32 %v242_v42, %v270_v44  ;;  %v379_v57 = vand.u32 4294901760, %v37448_v55 }
  0x98   :  { %34410 = vmatpush1.bf16.msra.mxu0 %v37421_v37  ;;  %34386 = vmatpush1.bf16.msra.mxu1 %v37421_v37  ;;  %v37442_v53 = vsub.f32 %v245_v43, %v274_v45  ;;  %v37450_v56 = vsub.f32 %v240_v29, %v264_v31  ;;  %v385_v59 = vand.u32 4294901760, %v37431_v48  ;;  %v34401_v30 = vpack.c.bf16 %v37433_v49, %v37431_v48 }
  0x99   :  { %34412 = vmatprep.subr.bf16.mxu0 %v37427_v46  ;;  %34388 = vmatprep.subr.bf16.mxu1 %v37427_v46  ;;  %v380_v61 = vsub.f32 %v37448_v55, %v379_v57  ;;  %v415_v6 = vand.u32 4294901760, %v37438_v51  ;;  %v34403_v31 = vpack.c.bf16 %v37438_v51, %v37436_v50  ;;  %vm37171_vm1 = vmmov 0  }
  0x9a   :  { %v391_v58 = vand.u32 4294901760, %v37450_v56  ;;  %v34399_v29 = vpack.c.bf16 %v37450_v56, %v37448_v55  ;;  %v34405_v32 = vpack.c.bf16 %v37442_v53, %v37440_v52  ;;  %vm2524_vm2 = vcmask 130048  }
  0x9b   :  { %v381_v3 = vand.u32 4294901760, %v380_v61  ;;  %v29930_v61 = vld [vmem:[%s41024_s25] ss:$0 sm:$0xff]  ;;  %vm25552_vm3 = vcmask 57344   ;;  %vm25578_vm4 = vcmask 64512   ;;  %vm28322_vm5 = vcmask 1041409  }
  0x9c   :  { %34414 = vmatpush1.bf16.msra.mxu0 %v37429_v47  ;;  %34390 = vmatpush1.bf16.msra.mxu1 %v37429_v47  ;;  %v392_v62 = vsub.f32 %v37450_v56, %v391_v58  ;;  %v34415_v63 = vpack.c.bf16 %v391_v58, %v379_v57  ;;  %vm29334_vm6 = vcmask 523264  }
  0x9e   :  { %v393_v4 = vand.u32 4294901760, %v392_v62  ;;  %34416 = vmatprep.subr.bf16.mxu0 %v34415_v63 }
 0x11f   :  { %v165_v8 = vpop.xlane.xlu0 %164  ;;  %v171_v9 = vpop.xlane.xlu1 %170 }
 0x120   :  { %v176_v10 = vmul.f32 0.03125, %v165_v8  ;;  %v178_v11 = vmul.f32 0.03125, %v171_v9  ;;  %v409_v9 = vand.u32 4294901760, %v37440_v52 }
 0x122   :  { %v37399_v12 = vsub.f32 %v156_v0, %v176_v10  ;;  %v37401_v13 = vsub.f32 %v157_v1, %v178_v11  ;;  %v386_v0 = vsub.f32 %v37431_v48, %v385_v59  ;;  %v398_v1 = vsub.f32 %v37433_v49, %v397_v60  ;;  %v247_v48 = vld [vmem:[#allocation7 + $0x58] sm:$0xff] }
 0x123   :  { %v168_v14 = vpop.xlane.xlu0 %167  ;;  %v174_v15 = vpop.xlane.xlu1 %173  ;;  %v421_v10 = vand.u32 4294901760, %v37442_v53  ;;  %v34391_v11 = vpack.c.bf16 %v393_v4, %v381_v3 }
 0x124   :  { %v177_v16 = vmul.f32 0.03125, %v168_v14  ;;  %v179_v17 = vmul.f32 0.03125, %v174_v15  ;;  %v184_v18 = vmul.f32 %v37399_v12, %v37399_v12  ;;  %v186_v19 = vmul.f32 %v37401_v13, %v37401_v13 }
 0x125   :  { %v387_v7 = vand.u32 4294901760, %v386_v0  ;;  %v399_v8 = vand.u32 4294901760, %v398_v1  ;;  %34392 = vmatprep.subr.bf16.mxu1 %v34391_v11 }
 0x126   :  { %v37407_v20 = vsub.f32 %v158_v2, %v177_v16  ;;  %v37409_v21 = vsub.f32 %v159_v5, %v179_v17  ;;  %v188_v22 = vsel %vm162_vm0, %v184_v18, 0.0  ;;  %v194_v23 = vsel %vm162_vm0, %v186_v19, 0.0 }
 0x127   :  { %189 = vadd.xlane.f32.xlu0 %v188_v22  ;;  %v37461_v2 = vpack.c.bf16 %v397_v60, %v385_v59  ;;  %v403_v5 = vand.u32 4294901760, %v37436_v50  ;;  %v416_v16 = vsub.f32 %v37438_v51, %v415_v6  ;;  %v37471_v17 = vpack.c.bf16 %v399_v8, %v387_v7  ;;  %v29929_v59 = vld [vmem:[%s41023_s1] ss:$0 sm:$0xff] }
 0x128   :  { %v185_v24 = vmul.f32 %v37407_v20, %v37407_v20  ;;  %v187_v25 = vmul.f32 %v37409_v21, %v37409_v21  ;;  %v37473_v18 = vpack.c.bf16 %v421_v10, %v409_v9  ;;  %v410_v19 = vsub.f32 %v37440_v52, %v409_v9 }
 0x129   :  { %v37467_v14 = vpack.c.bf16 %v415_v6, %v403_v5  ;;  %v404_v15 = vsub.f32 %v37436_v50, %v403_v5  ;;  %v422_v22 = vsub.f32 %v37442_v53, %v421_v10 }
 0x12a   :  { %v191_v26 = vsel %vm162_vm0, %v185_v24, 0.0  ;;  %v197_v27 = vsel %vm162_vm0, %v187_v25, 0.0  ;;  %v417_v24 = vand.u32 4294901760, %v416_v16  ;;  %v411_v25 = vand.u32 4294901760, %v410_v19 }
 0x12b   :  { %195 = vadd.xlane.f32.xlu0 %v194_v23  ;;  %192 = vadd.xlane.f32.xlu1 %v191_v26  ;;  %v405_v23 = vand.u32 4294901760, %v404_v15  ;;  %v423_v26 = vand.u32 4294901760, %v422_v22 }
 0x12d   :  { %v37479_v28 = vpack.c.bf16 %v423_v26, %v411_v25 }
 0x12f   :  { %198 = vadd.xlane.f32.xlu1 %v197_v27  ;;  %v37477_v27 = vpack.c.bf16 %v417_v24, %v405_v23 }
 0x1b4   :  { %v190_v33 = vpop.xlane.xlu0 %189 }
 0x1b5   :  { %v200_v34 = vmul.f32 0.03125, %v190_v33 }
 0x1b7   :  { %v204_v35 = vadd.f32 1e-05, %v200_v34 }
 0x1b8   :  { %v193_v38 = vpop.xlane.xlu1 %192  ;;  %v196_v39 = vpop.xlane.xlu0 %195 }
 0x1b9   :  { %36795 = vrsqrt.f32 %v204_v35  ;;  %v201_v40 = vmul.f32 0.03125, %v193_v38  ;;  %v202_v41 = vmul.f32 0.03125, %v196_v39 }
 0x1bb   :  { %v205_v42 = vadd.f32 1e-05, %v201_v40  ;;  %v206_v43 = vadd.f32 1e-05, %v202_v41 }
 0x1bc   :  { %v199_v44 = vpop.xlane.xlu1 %198 }
 0x1bd   :  { %36797 = vrsqrt.f32 %v205_v42  ;;  %v203_v45 = vmul.f32 0.03125, %v199_v44 }
 0x1be   :  { %36799 = vrsqrt.f32 %v206_v43 }
 0x1bf   :  { %v207_v57 = vadd.f32 1e-05, %v203_v45 }
 0x1c1   :  { %36801 = vrsqrt.f32 %v207_v57 }
 0x1c3   :  { %v36796_v58 = vpop.eup %36795 }
 0x1c4   :  { %v212_v60 = vmul.f32 %v36796_v58, %v37399_v12 }
 0x1c6   :  { %v222_v62 = vmul.f32 %v29929_v59, %v212_v60 }
 0x1c7   :  { %v36798_v63 = vpop.eup %36797 }
 0x1c8   :  { %v36800_v0 = vpop.eup %36799  ;;  %v213_v1 = vmul.f32 %v36798_v63, %v37407_v20  ;;  %v232_v3 = vadd.f32 %v29930_v61, %v222_v62 }
 0x1c9   :  { %v214_v4 = vmul.f32 %v36800_v0, %v37401_v13 }
 0x1ca   :  { %v223_v5 = vmul.f32 %v29929_v59, %v213_v1  ;;  %v249_v6 = vsel %vm162_vm0, %v232_v3, 0 }
 0x1cb   :  { %v36802_v7 = vpop.eup %36801  ;;  %v224_v8 = vmul.f32 %v29929_v59, %v214_v4  ;;  %v37499_v9 = vand.u32 4294901760, %v249_v6 }
 0x1cc   :  { %v215_v12 = vmul.f32 %v36802_v7, %v37409_v21  ;;  %v233_v10 = vadd.f32 %v29930_v61, %v223_v5 }
 0x1cd   :  { %v37503_v11 = vsub.f32 %v249_v6, %v37499_v9  ;;  %v234_v15 = vadd.f32 %v29930_v61, %v224_v8  ;;  %v40981_v8 = vmov 0.0|0.0  }
 0x1ce   :  { %v225_v16 = vmul.f32 %v29929_v59, %v215_v12  ;;  %v252_v20 = vsel %vm162_vm0, %v233_v10, 0 }
 0x1cf   :  { %v37507_v19 = vand.u32 4294901760, %v37503_v11  ;;  %v37509_v13 = vand.u32 4294901760, %v252_v20  ;;  %v255_v22 = vsel %vm162_vm0, %v234_v15, 0 }
 0x1d0   :  { %v37512_v23 = vand.u32 4294901760, %v255_v22  ;;  %v235_v24 = vadd.f32 %v29930_v61, %v225_v16 }
 0x1d1   :  { %699 = vmatmul.mubr.f32.vlgmr.msra.gmra.mrb[0].mxu0 %v37507_v19  ;;  %v336_v21 = vsub.f32 %v37503_v11, %v37507_v19  ;;  %v37518_v25 = vsub.f32 %v252_v20, %v37509_v13 }
 0x1d2   :  { %704 = vmatprep.mubr.f32.mxu0 %v40979_v54  ;;  %v37522_v26 = vsub.f32 %v255_v22, %v37512_v23  ;;  %34418 = vmatpush1.bf16.msra.mxu0 %v37461_v2  ;;  %v258_v33 = vsel %vm162_vm0, %v235_v24, 0 }
 0x1d3   :  { %v37526_v34 = vand.u32 4294901760, %v336_v21  ;;  %v37529_v35 = vand.u32 4294901760, %v37518_v25  ;;  %v37531_v38 = vand.u32 4294901760, %v258_v33  ;;  %34420 = vmatprep.subr.bf16.mxu0 %v37467_v14 }
 0x1d4   :  { %v37535_v39 = vand.u32 4294901760, %v37522_v26 }
 0x1d5   :  { %338 = vmatmul.mubr.f32.vlgmr.msra.gmra.mrb[0].mxu1 %v37526_v34  ;;  %708 = vmatmul.mubr.f32.gmra.mrb[2].mxu0 %v37529_v35  ;;  %v347_v2 = vsub.f32 %v37518_v25, %v37529_v35  ;;  %v37542_v40 = vsub.f32 %v258_v33, %v37531_v38 }
 0x1d6   :  { %343 = vmatprep.mubr.f32.mxu1 %v40979_v54  ;;  %713 = vmatprep.mubr.f32.mxu0 %v40979_v54  ;;  %v358_v14 = vsub.f32 %v37522_v26, %v37535_v39 }
 0x1d7   :  { %v37546_v41 = vand.u32 4294901760, %v347_v2  ;;  %34394 = vmatpush1.bf16.msra.mxu1 %v37471_v17  ;;  %v37552_v42 = vand.u32 4294901760, %v37542_v40  ;;  %34422 = vmatpush1.bf16.msra.mxu0 %v37473_v18  ;;  %v238_v18 = vld [vmem:[#allocation7 + $0x10] sm:$0xff] }
 0x1d8   :  { %34396 = vmatprep.subr.bf16.mxu1 %v37477_v27  ;;  %34424 = vmatprep.subr.bf16.mxu0 %v37419_v36  ;;  %v37561_v17 = vand.u32 4294901760, %v358_v14  ;;  %v241_v27 = vld [vmem:[#allocation7 + $0x28] sm:$0xff]  ;;  %v951_v55 = vand.u32 4294901760, %v238_v18 }
 0x1d9   :  { %349 = vmatmul.mubr.f32.gmra.mrb[2].mxu1 %v37546_v41  ;;  %717 = vmatmul.mubr.f32.gmra.mrb[4].mxu0 %v37535_v39  ;;  %v369_v43 = vsub.f32 %v37542_v40, %v37552_v42  ;;  %v954_v56 = vand.u32 4294901760, %v241_v27 }
 0x1da   :  { %354 = vmatprep.mubr.f32.mxu1 %v40979_v54  ;;  %722 = vmatprep.mubr.f32.mxu0 %v40979_v54 }
 0x1db   :  { %34398 = vmatpush1.bf16.msra.mxu1 %v37479_v28  ;;  %v37573_v36 = vand.u32 4294901760, %v369_v43  ;;  %v37596_v28 = vsub.f32 %v241_v27, %v954_v56 }
 0x1dc   :  { %34400 = vmatprep.subr.bf16.mxu1 %v34399_v29  ;;  %v960_v29 = vand.u32 4294901760, %v247_v48 }
 0x1dd   :  { %360 = vmatmul.mubr.f32.gmra.mrb[4].mxu1 %v37561_v17  ;;  %726 = vmatmul.mubr.f32.gmra.mrb[6].mxu0 %v37552_v42  ;;  %v1069_v50 = vand.u32 4294901760, %v37596_v28 }
 0x1de   :  { %365 = vmatprep.mubr.f32.mxu1 %v40979_v54  ;;  %820 = vmatprep.mubr.f32.mxu0 %v40979_v54 }
 0x1df   :  { %v1070_v53 = vsub.f32 %v37596_v28, %v1069_v50 }
 0x1e1   :  { %371 = vmatmul.mubr.f32.gmra.mrb[6].mxu1 %v37573_v36  ;;  %822 = vmatmul.mubr.f32.vlgmr.msra.gmra.mrb[0].mxu0 %v37499_v9  ;;  %v1071_v45 = vand.u32 4294901760, %v1070_v53 }
 0x1e2   :  { %481 = vmatprep.mubr.f32.mxu1 %v40979_v54  ;;  %827 = vmatprep.mubr.f32.mxu0 %v40979_v54 }
 0x1e3   :  { %34426 = vmatpush1.bf16.msra.mxu0 %v37421_v37  ;;  %v37592_v37 = vpack.c.bf16 %v954_v56, %v951_v55 }
 0x1e4   :  { %34428 = vmatprep.subr.bf16.mxu0 %v37427_v46  ;;  %v37594_v46 = vsub.f32 %v238_v18, %v951_v55 }
 0x1e5   :  { %483 = vmatmul.mubr.f32.vlgmr.msra.gmra.mrb[0].mxu1 %v37499_v9  ;;  %829 = vmatmul.mubr.f32.gmra.mrb[2].mxu0 %v37509_v13 }
 0x1e6   :  { %488 = vmatprep.mubr.f32.mxu1 %v40979_v54  ;;  %834 = vmatprep.mubr.f32.mxu0 %v40979_v54  ;;  %v1062_v49 = vand.u32 4294901760, %v37594_v46  ;;  %v34447_v1 = vpack.c.bf16 %v37596_v28, %v37594_v46 }
 0x1e7   :  { %34402 = vmatpush1.bf16.msra.mxu1 %v34401_v30  ;;  %34430 = vmatpush1.bf16.msra.mxu0 %v37429_v47  ;;  %v244_v47 = vld [vmem:[#allocation7 + $0x40] sm:$0xff] }
 0x1e8   :  { %34404 = vmatprep.subr.bf16.mxu1 %v34403_v31  ;;  %v957_v51 = vand.u32 4294901760, %v244_v47  ;;  %v1063_v52 = vsub.f32 %v37594_v46, %v1062_v49  ;;  %v1082_v31 = vsub.f32 %v247_v48, %v960_v29  ;;  %v34463_v4 = vpack.c.bf16 %v1069_v50, %v1062_v49  ;;  %34497 = vmatprep.subr.bf16.mxu0 %v40981_v8 }
 0x1e9   :  { %490 = vmatmul.mubr.f32.gmra.mrb[2].mxu1 %v37509_v13  ;;  %836 = vmatmul.mubr.f32.gmra.mrb[4].mxu0 %v37512_v23 }
 0x1ea   :  { %495 = vmatprep.mubr.f32.mxu1 %v40979_v54  ;;  %841 = vmatprep.mubr.f32.mxu0 %v40979_v54  ;;  %v1075_v30 = vsub.f32 %v244_v47, %v957_v51  ;;  %v1064_v44 = vand.u32 4294901760, %v1063_v52  ;;  %v1083_v58 = vand.u32 4294901760, %v1082_v31 }
 0x1eb   :  { %34406 = vmatpush1.bf16.msra.mxu1 %v34405_v32  ;;  %v37622_v32 = vpack.c.bf16 %v960_v29, %v957_v51 }
 0x1ec   :  { %34432 = vmatprep.subr.bf16.mxu1 %v37592_v37  ;;  %v1076_v57 = vand.u32 4294901760, %v1075_v30  ;;  %v34439_v59 = vpack.c.bf16 %v1071_v45, %v1064_v44  ;;  %v1084_v61 = vsub.f32 %v1082_v31, %v1083_v58  ;;  %v34451_v3 = vpack.c.bf16 %v1082_v31, %v1075_v30 }
 0x1ed   :  { %497 = vmatmul.mubr.f32.gmra.mrb[4].mxu1 %v37512_v23  ;;  %843 = vmatmul.mubr.f32.gmra.mrb[6].mxu0 %v37531_v38 }
 0x1ee   :  { %502 = vmatprep.mubr.f32.mxu1 %v40979_v54  ;;  %921 = vmatprep.mubr.f32.mxu0 %v40979_v54  ;;  %v1077_v60 = vsub.f32 %v1075_v30, %v1076_v57  ;;  %v1085_v63 = vand.u32 4294901760, %v1084_v61  ;;  %v34467_v5 = vpack.c.bf16 %v1083_v58, %v1076_v57 }
 0x1f0   :  { %v1078_v62 = vand.u32 4294901760, %v1077_v60 }
 0x1f1   :  { %504 = vmatmul.mubr.f32.gmra.mrb[6].mxu1 %v37531_v38  ;;  %923 = vmatmul.mubr.f32.vlgmr.msra.gmra.mrb[0].mxu0 %v37499_v9 }
 0x1f2   :  { %590 = vmatprep.mubr.f32.mxu1 %v40979_v54  ;;  %928 = vmatprep.mubr.f32.mxu0 %v40979_v54  ;;  %v34443_v0 = vpack.c.bf16 %v1085_v63, %v1078_v62 }
 0x1f5   :  { %593 = vmatmul.mubr.f32.vlgmr.msra.gmra.mrb[0].mxu1 %v37503_v11  ;;  %930 = vmatmul.mubr.f32.gmra.mrb[2].mxu0 %v37509_v13 }
 0x1f6   :  { %598 = vmatprep.mubr.f32.mxu1 %v40979_v54  ;;  %935 = vmatprep.mubr.f32.mxu0 %v40979_v54 }
 0x1f7   :  { %34434 = vmatpush3.bf16.msra.mxu1 %v37592_v37 }
 0x1f8   :  { %34436 = vmatprep.subr.bf16.mxu1 %v37622_v32 }
 0x1f9   :  { %601 = vmatmul.mubr.f32.gmra.mrb[2].mxu1 %v37518_v25  ;;  %937 = vmatmul.mubr.f32.gmra.mrb[4].mxu0 %v37512_v23 }
 0x1fa   :  { %606 = vmatprep.mubr.f32.mxu1 %v40979_v54  ;;  %942 = vmatprep.mubr.f32.mxu0 %v40979_v54 }
 0x1fb   :  { %34438 = vmatpush3.bf16.msra.mxu1 %v37622_v32 }
 0x1fc   :  { %34440 = vmatprep.subr.bf16.mxu1 %v34439_v59 }
 0x1fd   :  { %609 = vmatmul.mubr.f32.gmra.mrb[4].mxu1 %v37522_v26  ;;  %944 = vmatmul.mubr.f32.gmra.mrb[6].mxu0 %v37531_v38 }
 0x1fe   :  { %614 = vmatprep.mubr.f32.mxu1 %v40979_v54  ;;  %31501 = vmatprep.mubr.msk.f32.mxu0 %vm37171_vm1, %v40979_v54 }
 0x201   :  { %617 = vmatmul.mubr.f32.gmra.mrb[6].mxu1 %v37542_v40 }
 0x202   :  { %31379 = vmatprep.mubr.f32.mxu1 %v37526_v34 }
 0x205   :  { %31380 = vmatmul.mubr.f32.vlgmr.msra.gmra.mrb[8].mxu1 %v37546_v41 }
 0x206   :  { %31382 = vmatprep.mubr.f32.mxu1 %v37561_v17  ;;  %34442 = vmatpush3.bf16.msra.mxu1 %v34439_v59 }
 0x207   :  { %34444 = vmatprep.subr.bf16.mxu1 %v34443_v0 }
 0x209   :  { %31383 = vmatmul.mubr.f32.gmra.mrb[10].mxu1 %v37573_v36 }
 0x20a   :  { %34446 = vmatpush3.bf16.msra.mxu1 %v34443_v0  ;;  %31393 = vmatprep.mubr.f32.mxu1 %v37499_v9 }
 0x20b   :  { %34448 = vmatprep.subr.bf16.mxu1 %v34447_v1 }
 0x20d   :  { %31394 = vmatmul.mubr.f32.vlgmr.msra.gmra.mrb[8].mxu1 %v37509_v13 }
 0x20e   :  { %31396 = vmatprep.mubr.f32.mxu1 %v37512_v23  ;;  %34450 = vmatpush3.bf16.msra.mxu1 %v34447_v1 }
 0x20f   :  { %34452 = vmatprep.subr.bf16.mxu1 %v34451_v3 }
 0x211   :  { %31397 = vmatmul.mubr.f32.gmra.mrb[10].mxu1 %v37531_v38 }
 0x212   :  { %34454 = vmatpush3.bf16.msra.mxu1 %v34451_v3  ;;  %31407 = vmatprep.mubr.f32.mxu1 %v37503_v11 }
 0x213   :  { %34456 = vmatprep.subr.bf16.mxu1 %v37592_v37 }
 0x215   :  { %31408 = vmatmul.mubr.f32.vlgmr.msra.gmra.mrb[8].mxu1 %v37518_v25 }
 0x216   :  { %31410 = vmatprep.mubr.f32.mxu1 %v37522_v26  ;;  %34458 = vmatpush3.bf16.msra.mxu1 %v37592_v37 }
 0x217   :  { %34460 = vmatprep.subr.bf16.mxu1 %v37622_v32 }
 0x219   :  { %31411 = vmatmul.mubr.f32.gmra.mrb[10].mxu1 %v37542_v40 }
 0x21a   :  { %34462 = vmatpush3.bf16.msra.mxu1 %v37622_v32  ;;  %31421 = vmatprep.mubr.f32.mxu1 %v37507_v19 }
 0x21b   :  { %34464 = vmatprep.subr.bf16.mxu1 %v34463_v4 }
 0x21d   :  { %31422 = vmatmul.mubr.f32.vlgmr.msra.gmra.mrb[8].mxu1 %v37529_v35 }
 0x21e   :  { %31424 = vmatprep.mubr.f32.mxu1 %v37535_v39  ;;  %34466 = vmatpush3.bf16.msra.mxu1 %v34463_v4 }
 0x21f   :  { %34468 = vmatprep.subr.bf16.mxu1 %v34467_v5 }
 0x221   :  { %31425 = vmatmul.mubr.f32.gmra.mrb[10].mxu1 %v37552_v42 }
 0x222   :  { %34470 = vmatpush3.bf16.msra.mxu1 %v34467_v5  ;;  %31435 = vmatprep.mubr.f32.mxu1 %v37499_v9 }
 0x223   :  { %34472 = vmatprep.subr.bf16.mxu1 %v37592_v37 }
 0x225   :  { %31436 = vmatmul.mubr.f32.vlgmr.msra.gmra.mrb[8].mxu1 %v37509_v13 }
 0x226   :  { %31438 = vmatprep.mubr.f32.mxu1 %v37512_v23  ;;  %34474 = vmatpush3.bf16.msra.mxu1 %v37592_v37 }
 0x227   :  { %34476 = vmatprep.subr.bf16.mxu1 %v37622_v32 }
 0x229   :  { %31439 = vmatmul.mubr.f32.gmra.mrb[10].mxu1 %v37531_v38 }
 0x22a   :  { %34478 = vmatpush3.bf16.msra.mxu1 %v37622_v32  ;;  %31449 = vmatprep.mubr.f32.mxu1 %v37499_v9 }
 0x22b   :  { %34479 = vmatprep.subr.bf16.mxu1 %v40981_v8 }
 0x22d   :  { %31450 = vmatmul.mubr.f32.vlgmr.msra.gmra.mrb[8].mxu1 %v37509_v13 }
 0x22e   :  { %31452 = vmatprep.mubr.f32.mxu1 %v37512_v23 }
 0x231   :  { %31453 = vmatmul.mubr.f32.gmra.mrb[10].mxu1 %v37531_v38 }
 0x232   :  { %31459 = vmatprep.mubr.msk.f32.mxu1 %vm37171_vm1, %v40979_v54 }
 0x2c4   :  { %v924_v6 = vpop.f32.mrb[0].mxu0 }
 0x2c5   :  { %v926_v7 = vpop.f32.mrb[1].mxu0 }
 0x2c8   :  { %v594_v12 = vpop.f32.mrb[0].mxu1  ;;  %v931_v10 = vpop.f32.mrb[2].mxu0 }
 0x2c9   :  { %v37679_v11 = vadd.f32 %v924_v6, %v594_v12  ;;  %v596_v15 = vpop.f32.mrb[1].mxu1  ;;  %v933_v16 = vpop.f32.mrb[3].mxu0 }
 0x2ca   :  { %v37681_v9 = vadd.f32 %v926_v7, %v596_v15 }
 0x2cb   :  { %1582 = vrot.lane.b32.xlu0 %v37679_v11, %s37170_s4 }
 0x2cc   :  { %v602_v20 = vpop.f32.mrb[2].mxu1  ;;  %v938_v19 = vpop.f32.mrb[4].mxu0  ;;  %v2551_v13 = vand.u32 4294901760, %v37681_v9 }
 0x2cd   :  { %v37686_v22 = vadd.f32 %v931_v10, %v602_v20  ;;  %v604_v23 = vpop.f32.mrb[3].mxu1  ;;  %v940_v24 = vpop.f32.mrb[5].mxu0 }
 0x2ce   :  { %v37688_v21 = vadd.f32 %v933_v16, %v604_v23  ;;  %v37693_v25 = vsub.f32 %v37681_v9, %v2551_v13 }
 0x2cf   :  { %1584 = vrot.lane.b32.xlu1 %v37686_v22, %s37170_s4 }
 0x2d0   :  { %v2554_v26 = vand.u32 4294901760, %v37688_v21  ;;  %v610_v33 = vpop.f32.mrb[4].mxu1  ;;  %v945_v34 = vpop.f32.mrb[6].mxu0  ;;  %v2630_v35 = vand.u32 4294901760, %v37693_v25 }
 0x2d1   :  { %v37703_v38 = vadd.f32 %v938_v19, %v610_v33  ;;  %v612_v39 = vpop.f32.mrb[5].mxu1  ;;  %v947_v2 = vpop.f32.mrb[7].mxu0 }
 0x2d2   :  { %v37708_v40 = vsub.f32 %v37688_v21, %v2554_v26  ;;  %v37710_v41 = vadd.f32 %v940_v24, %v612_v39  ;;  %v2631_v17 = vsub.f32 %v37693_v25, %v2630_v35 }
 0x2d3   :  { %2053 = vrot.lane.b32.xlu1 %v37703_v38, %s37170_s4 }
 0x2d4   :  { %v2637_v14 = vand.u32 4294901760, %v37708_v40  ;;  %v618_v42 = vpop.f32.mrb[6].mxu1  ;;  %v34522_v43 = vpack.c.bf16 %v37708_v40, %v37693_v25  ;;  %v2632_v37 = vand.u32 4294901760, %v2631_v17 }
 0x2d5   :  { %v37718_v36 = vadd.f32 %v945_v34, %v618_v42  ;;  %v620_v18 = vpop.f32.mrb[7].mxu1  ;;  %v1586_v34 = vsel %vm162_vm0, %v37686_v22, 0 }
 0x2d6   :  { %v2638_v27 = vsub.f32 %v37708_v40, %v2637_v14  ;;  %v37721_v55 = vadd.f32 %v947_v2, %v620_v18  ;;  %v37725_v56 = vpack.c.bf16 %v2637_v14, %v2630_v35  ;;  %v37779_v35 = vand.u32 4294901760, %v1586_v34 }
 0x2d7   :  { %2055 = vrot.lane.b32.xlu1 %v37718_v36, %s37170_s4  ;;  %v2057_v17 = vsel %vm162_vm0, %v37718_v36, 0  ;;  %v3013_v40 = vand.u32 4294901760, %v37710_v41 }
 0x2d8   :  { %v2639_v46 = vand.u32 4294901760, %v2638_v27  ;;  %v37783_v42 = vsub.f32 %v1586_v34, %v37779_v35 }
 0x2da   :  { %v37727_v28 = vpack.c.bf16 %v2639_v46, %v2632_v37 }
 0x300   :  { %v37729_v47 = vpop.f32.mrb[8].mxu1 }
 0x301   :  { %v3480_v48 = vsel %vm162_vm0, %v37729_v47, 0  ;;  %v37733_v49 = vpop.f32.mrb[9].mxu1 }
 0x302   :  { %v3486_v50 = vand.u32 4294901760, %v3480_v48  ;;  %v3477_v51 = vsel %vm162_vm0, %v37733_v49, 0 }
 0x303   :  { %v3483_v29 = vand.u32 4294901760, %v3477_v51 }
 0x304   :  { %v37737_v52 = vsub.f32 %v3480_v48, %v3486_v50  ;;  %v37739_v53 = vpop.f32.mrb[10].mxu1 }
 0x305   :  { %v37741_v30 = vsub.f32 %v3477_v51, %v3483_v29  ;;  %v3950_v31 = vsel %vm162_vm0, %v37739_v53, 0  ;;  %v37745_v32 = vpop.f32.mrb[11].mxu1  ;;  %v37747_v44 = vpack.c.bf16 %v3486_v50, %v3483_v29  ;;  %v1661_v50 = vand.u32 4294901760, %v37783_v42 }
 0x306   :  { %v3569_v45 = vand.u32 4294901760, %v37737_v52  ;;  %v3956_v57 = vand.u32 4294901760, %v3950_v31  ;;  %v3947_v58 = vsel %vm162_vm0, %v37745_v32, 0  ;;  %v37792_v51 = vand.u32 4294901760, %v2057_v17 }
 0x307   :  { %v3562_v59 = vand.u32 4294901760, %v37741_v30  ;;  %v3953_v60 = vand.u32 4294901760, %v3947_v58  ;;  %v34558_v61 = vpack.c.bf16 %v37737_v52, %v37741_v30 }
 0x308   :  { %v37755_v62 = vsub.f32 %v3950_v31, %v3956_v57  ;;  %v3570_v63 = vsub.f32 %v37737_v52, %v3569_v45 }
 0x309   :  { %v37758_v0 = vsub.f32 %v3947_v58, %v3953_v60  ;;  %v3563_v1 = vsub.f32 %v37741_v30, %v3562_v59  ;;  %v37761_v3 = vpack.c.bf16 %v3569_v45, %v3562_v59  ;;  %v37763_v4 = vpack.c.bf16 %v3956_v57, %v3953_v60 }
 0x30a   :  { %v4039_v5 = vand.u32 4294901760, %v37755_v62  ;;  %v3571_v6 = vand.u32 4294901760, %v3570_v63  ;;  %v2131_v63 = vsub.f32 %v2057_v17, %v37792_v51 }
 0x30b   :  { %v4032_v7 = vand.u32 4294901760, %v37758_v0  ;;  %v3564_v12 = vand.u32 4294901760, %v3563_v1  ;;  %v34576_v10 = vpack.c.bf16 %v37755_v62, %v37758_v0  ;;  %v1662_v1 = vsub.f32 %v37783_v42, %v1661_v50 }
 0x30c   :  { %v4040_v15 = vsub.f32 %v37755_v62, %v4039_v5  ;;  %v2132_v34 = vand.u32 4294901760, %v2131_v63 }
 0x30d   :  { %v37770_v16 = vpack.c.bf16 %v3571_v6, %v3564_v12  ;;  %v4033_v20 = vsub.f32 %v37758_v0, %v4032_v7  ;;  %v37773_v19 = vpack.c.bf16 %v4039_v5, %v4032_v7 }
 0x30e   :  { %v4041_v23 = vand.u32 4294901760, %v4040_v15 }
 0x30f   :  { %v4034_v24 = vand.u32 4294901760, %v4033_v20 }
 0x311   :  { %v37775_v33 = vpack.c.bf16 %v4041_v23, %v4034_v24 }
 0x33d   :  { %v1583_v39 = vpop.permute.xlu0 %1582 }
 0x33e   :  { %v1588_v2 = vsel %vm162_vm0, %v1583_v39, 0  ;;  %v1663_v39 = vand.u32 4294901760, %v1662_v1 }
 0x33f   :  { %v1593_v14 = vand.u32 4294901760, %v1588_v2 }
 0x341   :  { %v37787_v18 = vsub.f32 %v1588_v2, %v1593_v14  ;;  %v1585_v27 = vpop.permute.xlu1 %1584 }
 0x342   :  { %v1590_v37 = vsel %vm162_vm0, %v1585_v27, 0 }
 0x343   :  { %v1672_v46 = vand.u32 4294901760, %v37787_v18  ;;  %v1596_v48 = vand.u32 4294901760, %v1590_v37 }
 0x345   :  { %v37794_v29 = vpack.c.bf16 %v1596_v48, %v1593_v14  ;;  %v1678_v31 = vsub.f32 %v1590_v37, %v1596_v48  ;;  %v2054_v45 = vpop.permute.xlu1 %2053  ;;  %v1673_v58 = vsub.f32 %v37787_v18, %v1672_v46  ;;  %v2133_v48 = vsub.f32 %v2131_v63, %v2132_v34 }
 0x346   :  { %v2059_v57 = vsel %vm162_vm0, %v2054_v45, 0 }
 0x347   :  { %v1679_v59 = vand.u32 4294901760, %v1678_v31  ;;  %v2064_v60 = vand.u32 4294901760, %v2059_v57  ;;  %34481 = vmatpush3.bf16.xpose.msra.mxu1 %v37794_v29  ;;  %v1674_v15 = vand.u32 4294901760, %v1673_v58  ;;  %v2134_v1 = vand.u32 4294901760, %v2133_v48 }
 0x348   :  { %34482 = vmatprep.subr.bf16.mxu1 %v40981_v8 }
 0x349   :  { %v1680_v5 = vsub.f32 %v1678_v31, %v1679_v59  ;;  %v2142_v6 = vsub.f32 %v2059_v57, %v2064_v60  ;;  %v2056_v7 = vpop.permute.xlu1 %2055 }
 0x34a   :  { %v2061_v12 = vsel %vm162_vm0, %v2056_v7, 0 }
 0x34b   :  { %v1681_v20 = vand.u32 4294901760, %v1680_v5  ;;  %v2143_v23 = vand.u32 4294901760, %v2142_v6  ;;  %v2067_v24 = vand.u32 4294901760, %v2061_v12 }
 0x34d   :  { %v34498_v2 = vpack.c.bf16 %v2067_v24, %v2064_v60  ;;  %v2149_v14 = vsub.f32 %v2061_v12, %v2067_v24  ;;  %v34483_v27 = vpack.c.bf16 %v1681_v20, %v1674_v15  ;;  %v2144_v17 = vsub.f32 %v2142_v6, %v2143_v23 }
 0x34e   :  { %31460 = vmatmul.mubr.f32.vlgmr.msra.gmra.mrb[12].mxu1 %v1663_v39  ;;  %v34486_v60 = vpack.c.bf16 %v1678_v31, %v37787_v18  ;;  %v34492_v18 = vpack.c.bf16 %v1679_v59, %v1672_v46  ;;  %v37842_v46 = vpack.c.bf16 %v2554_v26, %v2551_v13 }
 0x34f   :  { %v2150_v37 = vand.u32 4294901760, %v2149_v14  ;;  %34484 = vmatpush3.bf16.xpose.msra.mxu1 %v34483_v27  ;;  %34499 = vmatpush3.bf16.xpose.msra.mxu0 %v34498_v2  ;;  %v2145_v57 = vand.u32 4294901760, %v2144_v17  ;;  %v34504_v7 = vpack.c.bf16 %v2149_v14, %v2142_v6 }
 0x350   :  { %31466 = vmatprep.mubr.msk.f32.mxu1 %vm37171_vm1, %v40979_v54  ;;  %34485 = vmatprep.subr.bf16.mxu1 %v40981_v8 }
 0x351   :  { %v2151_v45 = vsub.f32 %v2149_v14, %v2150_v37  ;;  %34500 = vmatprep.subr.bf16.mxu0 %v40981_v8 }
 0x353   :  { %v2152_v58 = vand.u32 4294901760, %v2151_v45 }
 0x355   :  { %v34501_v5 = vpack.c.bf16 %v2152_v58, %v2145_v57 }
 0x356   :  { %31467 = vmatmul.mubr.f32.vlgmr.msra.gmra.mrb[12].mxu1 %v37779_v35  ;;  %31502 = vmatmul.mubr.f32.vlgmr.msra.gmra.mrb[8].mxu0 %v2134_v1 }
 0x357   :  { %34487 = vmatpush3.bf16.xpose.msra.mxu1 %v34486_v60  ;;  %34502 = vmatpush3.bf16.xpose.msra.mxu0 %v34501_v5 }
 0x358   :  { %31473 = vmatprep.mubr.msk.f32.mxu1 %vm37171_vm1, %v40979_v54  ;;  %31508 = vmatprep.mubr.msk.f32.mxu0 %vm37171_vm1, %v40979_v54 }
 0x359   :  { %34488 = vmatprep.subr.bf16.mxu1 %v40981_v8  ;;  %34503 = vmatprep.subr.bf16.mxu0 %v40981_v8 }
 0x35e   :  { %31474 = vmatmul.mubr.f32.vlgmr.msra.gmra.mrb[12].mxu1 %v37783_v42  ;;  %31509 = vmatmul.mubr.f32.vlgmr.msra.gmra.mrb[8].mxu0 %v37792_v51  ;;  %v34510_v42 = vpack.c.bf16 %v2150_v37, %v2143_v23 }
 0x35f   :  { %34490 = vmatpush3.bf16.xpose.msra.mxu1 %v37794_v29  ;;  %34505 = vmatpush3.bf16.xpose.msra.mxu0 %v34504_v7 }
 0x360   :  { %31480 = vmatprep.mubr.msk.f32.mxu1 %vm37171_vm1, %v40979_v54  ;;  %31515 = vmatprep.mubr.msk.f32.mxu0 %vm37171_vm1, %v40979_v54 }
 0x361   :  { %34491 = vmatprep.subr.bf16.mxu1 %v40981_v8  ;;  %34506 = vmatprep.subr.bf16.mxu0 %v40981_v8 }
 0x366   :  { %31481 = vmatmul.mubr.f32.vlgmr.msra.gmra.mrb[12].mxu1 %v1661_v50  ;;  %31516 = vmatmul.mubr.f32.vlgmr.msra.gmra.mrb[8].mxu0 %v2131_v63 }
 0x367   :  { %34493 = vmatpush3.bf16.xpose.msra.mxu1 %v34492_v18  ;;  %34508 = vmatpush3.bf16.xpose.msra.mxu0 %v34498_v2  ;;  %v3016_v18 = vand.u32 4294901760, %v37721_v55 }
 0x368   :  { %31487 = vmatprep.mubr.msk.f32.mxu1 %vm37171_vm1, %v40979_v54  ;;  %31522 = vmatprep.mubr.msk.f32.mxu0 %vm37171_vm1, %v40979_v54 }
 0x369   :  { %34494 = vmatprep.subr.bf16.mxu1 %v40981_v8  ;;  %34509 = vmatprep.subr.bf16.mxu0 %v40981_v8 }
 0x36e   :  { %31488 = vmatmul.mubr.f32.vlgmr.msra.gmra.mrb[12].mxu1 %v37779_v35  ;;  %31523 = vmatmul.mubr.f32.vlgmr.msra.gmra.mrb[8].mxu0 %v2132_v34 }
 0x36f   :  { %34496 = vmatpush3.bf16.xpose.msra.mxu1 %v37794_v29  ;;  %34511 = vmatpush3.bf16.xpose.msra.mxu0 %v34510_v42  ;;  %v3098_v42 = vsub.f32 %v37721_v55, %v3016_v18 }
 0x370   :  { %31494 = vmatprep.mubr.msk.f32.mxu1 %vm37171_vm1, %v40979_v54  ;;  %31529 = vmatprep.mubr.msk.f32.mxu0 %vm37171_vm1, %v40979_v54 }
 0x371   :  { %34512 = vmatprep.subr.bf16.mxu0 %v40981_v8  ;;  %34515 = vmatprep.subr.bf16.mxu1 %v40981_v8 }
 0x376   :  { %31495 = vmatmul.mubr.f32.vlgmr.msra.gmra.mrb[12].mxu1 %v37779_v35  ;;  %31530 = vmatmul.mubr.f32.vlgmr.msra.gmra.mrb[8].mxu0 %v37792_v51 }
 0x377   :  { %34514 = vmatpush3.bf16.xpose.msra.mxu0 %v34498_v2  ;;  %34517 = vmatpush3.bf16.msra.mxu1 %v37842_v46 }
 0x378   :  { %31536 = vmatprep.mubr.msk.f32.mxu0 %vm37171_vm1, %v40979_v54  ;;  %34551 = vmatprep.subr.bf16.mxu0 %v40981_v8 }
 0x379   :  { %31543 = vmatprep.mubr.msk.f32.mxu1 %vm37171_vm1, %v40979_v54  ;;  %34518 = vmatprep.subr.bf16.mxu1 %v40981_v8 }
 0x37e   :  { %31537 = vmatmul.mubr.f32.vlgmr.msra.gmra.mrb[8].mxu0 %v37792_v51 }
 0x37f   :  { %34553 = vmatpush3.bf16.xpose.msra.mxu0 %v37747_v44  ;;  %31627 = vmatprep.mubr.msk.f32.mxu0 %vm37171_vm1, %v40979_v54 }
 0x380   :  { %34554 = vmatprep.subr.bf16.mxu0 %v40981_v8 }
 0x449   :  { %v2047_v13 = vpop.f32.mrb[12].mxu1 }
 0x44a   :  { %v2522_v26 = vmul.f32 0.17677669, %v2047_v13  ;;  %v31496_v35 = vpop.f32.mrb[13].mxu1  ;;  %v3091_v13 = vsub.f32 %v37710_v41, %v3013_v40 }
 0x44b   :  { %v3099_v35 = vand.u32 4294901760, %v3098_v42 }
 0x44c   :  { %v2525_v50 = vsel %vm2524_vm2, %v2522_v26, -inf }
 0x44d   :  { %2526 = vmax.xlane.f32.xlu0 %v2525_v50  ;;  %v3092_v50 = vand.u32 4294901760, %v3091_v13 }
 0x451   :  { %v2518_v29 = vpop.f32.mrb[8].mxu0 }
 0x452   :  { %v2523_v31 = vmul.f32 0.17677669, %v2518_v29  ;;  %v31538_v59 = vpop.f32.mrb[9].mxu0  ;;  %v3100_v29 = vsub.f32 %v3098_v42, %v3099_v35 }
 0x454   :  { %v2528_v63 = vsel %vm2524_vm2, %v2523_v31, -inf }
 0x455   :  { %2529 = vmax.xlane.f32.xlu1 %v2528_v63  ;;  %v34534_v63 = vpack.c.bf16 %v3016_v18, %v3013_v40 }
 0x466   :  { %3472 = vrot.lane.b32.xlu1 %v37681_v9, %s37170_s4 }
 0x4da   :  { %v2527_v51 = vpop.xlane.xlu0 %2526 }
 0x4db   :  { %v2531_v6 = vsub.f32 %v2522_v26, %v2527_v51  ;;  %v3101_v51 = vand.u32 4294901760, %v3100_v29 }
 0x4dd   :  { %v2533_v12 = vmul.f32 1.442695, %v2531_v6 }
 0x4df   :  { %36803 = vpow2.f32 %v2533_v12 }
 0x4e2   :  { %v2530_v15 = vpop.xlane.xlu1 %2529 }
 0x4e3   :  { %v2532_v20 = vsub.f32 %v2523_v31, %v2530_v15  ;;  %v3093_v31 = vsub.f32 %v3091_v13, %v3092_v50  ;;  %v34540_v15 = vpack.c.bf16 %v3098_v42, %v3091_v13 }
 0x4e5   :  { %v2535_v23 = vmul.f32 1.442695, %v2532_v20  ;;  %v3094_v6 = vand.u32 4294901760, %v3093_v31  ;;  %v34546_v20 = vpack.c.bf16 %v3099_v35, %v3092_v50 }
 0x4e6   :  { %v3473_v24 = vpop.permute.xlu1 %3472 }
 0x4e7   :  { %36805 = vpow2.f32 %v2535_v23  ;;  %v3474_v34 = vsel %vm162_vm0, %v3473_v24, 0  ;;  %v34537_v12 = vpack.c.bf16 %v3101_v51, %v3094_v6 }
 0x4e8   :  { %v3549_v39 = vand.u32 4294901760, %v3474_v34 }
 0x4e9   :  { %v36804_v2 = vpop.eup %36803 }
 0x4ea   :  { %v3550_v14 = vsub.f32 %v3474_v34, %v3549_v39  ;;  %v2537_v27 = vsel %vm2524_vm2, %v36804_v2, 0.0 }
 0x4eb   :  { %2538 = vadd.xlane.f32.xlu0 %v2537_v27 }
 0x4ec   :  { %v3551_v17 = vand.u32 4294901760, %v3550_v14 }
 0x4ee   :  { %v3552_v37 = vsub.f32 %v3550_v14, %v3551_v17 }
 0x4f0   :  { %v3553_v48 = vand.u32 4294901760, %v3552_v37 }
 0x4f1   :  { %v36806_v45 = vpop.eup %36805 }
 0x4f2   :  { %31628 = vmatmul.mubr.f32.vlgmr.msra.gmra.mrb[10].mxu0 %v3553_v48  ;;  %v2540_v57 = vsel %vm2524_vm2, %v36806_v45, 0.0 }
 0x4f3   :  { %34556 = vmatpush3.bf16.xpose.msra.mxu0 %v37770_v16  ;;  %2541 = vadd.xlane.f32.xlu0 %v2540_v57 }
 0x4f4   :  { %31634 = vmatprep.mubr.msk.f32.mxu0 %vm37171_vm1, %v40979_v54  ;;  %34557 = vmatprep.subr.bf16.mxu0 %v40981_v8 }
 0x4fa   :  { %31635 = vmatmul.mubr.f32.vlgmr.msra.gmra.mrb[10].mxu0 %v3549_v39 }
 0x4fb   :  { %34559 = vmatpush3.bf16.xpose.msra.mxu0 %v34558_v61  ;;  %31641 = vmatprep.mubr.msk.f32.mxu0 %vm37171_vm1, %v40979_v54 }
 0x4fc   :  { %34560 = vmatprep.subr.bf16.mxu0 %v40981_v8 }
 0x502   :  { %31642 = vmatmul.mubr.f32.vlgmr.msra.gmra.mrb[10].mxu0 %v3550_v14 }
 0x503   :  { %34562 = vmatpush3.bf16.xpose.msra.mxu0 %v37747_v44  ;;  %31648 = vmatprep.mubr.msk.f32.mxu0 %vm37171_vm1, %v40979_v54 }
 0x504   :  { %34563 = vmatprep.subr.bf16.mxu0 %v40981_v8 }
 0x509   :  { %3942 = vrot.lane.b32.xlu0 %v37710_v41, %s37170_s4 }
 0x50a   :  { %31649 = vmatmul.mubr.f32.vlgmr.msra.gmra.mrb[10].mxu0 %v3551_v17 }
 0x50b   :  { %34565 = vmatpush3.bf16.xpose.msra.mxu0 %v37761_v3  ;;  %31655 = vmatprep.mubr.msk.f32.mxu0 %vm37171_vm1, %v40979_v54 }
 0x50c   :  { %34566 = vmatprep.subr.bf16.mxu0 %v40981_v8 }
 0x512   :  { %31656 = vmatmul.mubr.f32.vlgmr.msra.gmra.mrb[10].mxu0 %v3549_v39 }
 0x513   :  { %34568 = vmatpush3.bf16.xpose.msra.mxu0 %v37747_v44  ;;  %31662 = vmatprep.mubr.msk.f32.mxu0 %vm37171_vm1, %v40979_v54 }
 0x514   :  { %34587 = vmatprep.subr.bf16.mxu0 %v40981_v8 }
 0x51a   :  { %31663 = vmatmul.mubr.f32.vlgmr.msra.gmra.mrb[10].mxu0 %v3549_v39 }
 0x51b   :  { %31711 = vmatprep.mubr.msk.f32.mxu0 %vm37171_vm1, %v40979_v54 }
 0x578   :  { %v2539_v52 = vpop.xlane.xlu0 %2538 }
 0x579   :  { %36807 = vrcp.f32 %v2539_v52 }
 0x580   :  { %v2542_v5 = vpop.xlane.xlu0 %2541 }
 0x581   :  { %36809 = vrcp.f32 %v2542_v5 }
 0x583   :  { %v36808_v30 = vpop.eup %36807 }
 0x584   :  { %v2544_v61 = vmul.f32 %v36808_v30, %v36804_v2  ;;  %v3943_v23 = vpop.permute.xlu0 %3942 }
 0x585   :  { %v3944_v24 = vsel %vm162_vm0, %v3943_v23, 0 }
 0x586   :  { %v2548_v3 = vsel %vm2524_vm2, %v2544_v61, 0  ;;  %v4019_v34 = vand.u32 4294901760, %v3944_v24 }
 0x587   :  { %v2617_v16 = vand.u32 4294901760, %v2548_v3 }
 0x588   :  { %v4020_v39 = vsub.f32 %v3944_v24, %v4019_v34 }
 0x589   :  { %v2618_v58 = vsub.f32 %v2548_v3, %v2617_v16 }
 0x58a   :  { %v4021_v2 = vand.u32 4294901760, %v4020_v39 }
 0x58b   :  { %v2619_v1 = vand.u32 4294901760, %v2618_v58  ;;  %v36810_v7 = vpop.eup %36809 }
 0x58c   :  { %v4022_v14 = vsub.f32 %v4020_v39, %v4021_v2 }
 0x58d   :  { %v2620_v60 = vsub.f32 %v2618_v58, %v2619_v1 }
 0x58e   :  { %v4023_v27 = vand.u32 4294901760, %v4022_v14 }
 0x58f   :  { %v2621_v44 = vand.u32 4294901760, %v2620_v60 }
 0x591   :  { %31544 = vmatmul.mubr.f32.vlgmr.msra.gmra.mrb[14].mxu1 %v2621_v44 }
 0x592   :  { %34520 = vmatpush3.bf16.msra.mxu1 %v37727_v28  ;;  %31550 = vmatprep.mubr.msk.f32.mxu1 %vm37171_vm1, %v40979_v54  ;;  %v2546_v28 = vmul.f32 %v36810_v7, %v36806_v45 }
 0x593   :  { %34521 = vmatprep.subr.bf16.mxu1 %v40981_v8 }
 0x594   :  { %v3010_v25 = vsel %vm2524_vm2, %v2546_v28, 0 }
 0x599   :  { %31551 = vmatmul.mubr.f32.vlgmr.msra.gmra.mrb[14].mxu1 %v2617_v16 }
 0x59a   :  { %34523 = vmatpush3.bf16.msra.mxu1 %v34522_v43  ;;  %31557 = vmatprep.mubr.msk.f32.mxu1 %vm37171_vm1, %v40979_v54  ;;  %v3079_v43 = vand.u32 4294901760, %v3010_v25 }
 0x59b   :  { %34524 = vmatprep.subr.bf16.mxu1 %v40981_v8 }
 0x59c   :  { %v3080_v26 = vsub.f32 %v3010_v25, %v3079_v43 }
 0x5a1   :  { %31558 = vmatmul.mubr.f32.vlgmr.msra.gmra.mrb[14].mxu1 %v2618_v58 }
 0x5a2   :  { %34526 = vmatpush3.bf16.msra.mxu1 %v37842_v46  ;;  %31564 = vmatprep.mubr.msk.f32.mxu1 %vm37171_vm1, %v40979_v54 }
 0x5a3   :  { %34527 = vmatprep.subr.bf16.mxu1 %v40981_v8 }
 0x5a9   :  { %31565 = vmatmul.mubr.f32.vlgmr.msra.gmra.mrb[14].mxu1 %v2619_v1 }
 0x5aa   :  { %34529 = vmatpush3.bf16.msra.mxu1 %v37725_v56  ;;  %31571 = vmatprep.mubr.msk.f32.mxu1 %vm37171_vm1, %v40979_v54  ;;  %v3081_v56 = vand.u32 4294901760, %v3080_v26 }
 0x5ab   :  { %34530 = vmatprep.subr.bf16.mxu1 %v40981_v8 }
 0x5ac   :  { %v3082_v59 = vsub.f32 %v3080_v26, %v3081_v56 }
 0x5b1   :  { %31572 = vmatmul.mubr.f32.vlgmr.msra.gmra.mrb[14].mxu1 %v2617_v16 }
 0x5b2   :  { %34532 = vmatpush3.bf16.msra.mxu1 %v37842_v46  ;;  %31578 = vmatprep.mubr.msk.f32.mxu1 %vm37171_vm1, %v40979_v54  ;;  %v3083_v46 = vand.u32 4294901760, %v3082_v59 }
 0x5b3   :  { %34533 = vmatprep.subr.bf16.mxu1 %v40981_v8 }
 0x5b9   :  { %31579 = vmatmul.mubr.f32.vlgmr.msra.gmra.mrb[14].mxu1 %v2617_v16 }
 0x5ba   :  { %34535 = vmatpush3.bf16.msra.mxu1 %v34534_v63  ;;  %31585 = vmatprep.mubr.msk.f32.mxu1 %vm37171_vm1, %v40979_v54 }
 0x5bb   :  { %34536 = vmatprep.subr.bf16.mxu1 %v40981_v8 }
 0x5bd   :  { %31586 = vmatmul.mubr.f32.vlgmr.msra.gmra.mrb[16].mxu1 %v3083_v46 }
 0x5be   :  { %34538 = vmatpush3.bf16.msra.mxu1 %v34537_v12  ;;  %31592 = vmatprep.mubr.msk.f32.mxu1 %vm37171_vm1, %v40979_v54 }
 0x5bf   :  { %34539 = vmatprep.subr.bf16.mxu1 %v40981_v8 }
 0x5c5   :  { %31593 = vmatmul.mubr.f32.vlgmr.msra.gmra.mrb[16].mxu1 %v3079_v43 }
 0x5c6   :  { %34541 = vmatpush3.bf16.msra.mxu1 %v34540_v15  ;;  %31599 = vmatprep.mubr.msk.f32.mxu1 %vm37171_vm1, %v40979_v54 }
 0x5c7   :  { %34542 = vmatprep.subr.bf16.mxu1 %v40981_v8 }
 0x5cd   :  { %31600 = vmatmul.mubr.f32.vlgmr.msra.gmra.mrb[16].mxu1 %v3080_v26 }
 0x5ce   :  { %34544 = vmatpush3.bf16.msra.mxu1 %v34534_v63  ;;  %31606 = vmatprep.mubr.msk.f32.mxu1 %vm37171_vm1, %v40979_v54 }
 0x5cf   :  { %34545 = vmatprep.subr.bf16.mxu1 %v40981_v8 }
 0x5d5   :  { %31607 = vmatmul.mubr.f32.vlgmr.msra.gmra.mrb[16].mxu1 %v3081_v56 }
 0x5d6   :  { %34547 = vmatpush3.bf16.msra.mxu1 %v34546_v20  ;;  %31613 = vmatprep.mubr.msk.f32.mxu1 %vm37171_vm1, %v40979_v54 }
 0x5d7   :  { %34548 = vmatprep.subr.bf16.mxu1 %v40981_v8 }
 0x5dd   :  { %31614 = vmatmul.mubr.f32.vlgmr.msra.gmra.mrb[16].mxu1 %v3079_v43 }
 0x5de   :  { %34550 = vmatpush3.bf16.msra.mxu1 %v34534_v63  ;;  %31620 = vmatprep.mubr.msk.f32.mxu1 %vm37171_vm1, %v40979_v54 }
 0x5df   :  { %34569 = vmatprep.subr.bf16.mxu1 %v40981_v8 }
 0x5e5   :  { %31621 = vmatmul.mubr.f32.vlgmr.msra.gmra.mrb[16].mxu1 %v3079_v43 }
 0x5e6   :  { %31669 = vmatprep.mubr.msk.f32.mxu1 %vm37171_vm1, %v40979_v54 }
 0x5e7   :  { %34571 = vmatpush3.bf16.xpose.msra.mxu1 %v37763_v4 }
 0x5e8   :  { %34572 = vmatprep.subr.bf16.mxu1 %v40981_v8 }
 0x5ed   :  { %v3937_v17 = vpop.f32.mrb[10].mxu0 }
 0x5ee   :  { %31670 = vmatmul.mubr.f32.vlgmr.msra.gmra.mrb[18].mxu1 %v4023_v27  ;;  %v31664_v37 = vpop.f32.mrb[11].mxu0  ;;  %v4411_v57 = vmul.f32 0.17677669, %v3937_v17 }
 0x5ef   :  { %34574 = vmatpush3.bf16.xpose.msra.mxu1 %v37775_v33  ;;  %31676 = vmatprep.mubr.msk.f32.mxu1 %vm37171_vm1, %v40979_v54 }
 0x5f0   :  { %34575 = vmatprep.subr.bf16.mxu1 %v40981_v8  ;;  %v4413_v52 = vsel %vm2524_vm2, %v4411_v57, -inf }
 0x5f6   :  { %31677 = vmatmul.mubr.f32.vlgmr.msra.gmra.mrb[18].mxu1 %v4019_v34 }
 0x5f7   :  { %34577 = vmatpush3.bf16.xpose.msra.mxu1 %v34576_v10  ;;  %31683 = vmatprep.mubr.msk.f32.mxu1 %vm37171_vm1, %v40979_v54 }
 0x5f8   :  { %34578 = vmatprep.subr.bf16.mxu1 %v40981_v8 }
 0x5fe   :  { %31684 = vmatmul.mubr.f32.vlgmr.msra.gmra.mrb[18].mxu1 %v4020_v39 }
 0x5ff   :  { %34580 = vmatpush3.bf16.xpose.msra.mxu1 %v37763_v4  ;;  %31690 = vmatprep.mubr.msk.f32.mxu1 %vm37171_vm1, %v40979_v54 }
 0x600   :  { %34581 = vmatprep.subr.bf16.mxu1 %v40981_v8 }
 0x606   :  { %31691 = vmatmul.mubr.f32.vlgmr.msra.gmra.mrb[18].mxu1 %v4021_v2 }
 0x607   :  { %34583 = vmatpush3.bf16.xpose.msra.mxu1 %v37773_v19  ;;  %31697 = vmatprep.mubr.msk.f32.mxu1 %vm37171_vm1, %v40979_v54 }
 0x608   :  { %34584 = vmatprep.subr.bf16.mxu1 %v40981_v8 }
 0x60e   :  { %31698 = vmatmul.mubr.f32.vlgmr.msra.gmra.mrb[18].mxu1 %v4019_v34 }
 0x60f   :  { %34586 = vmatpush3.bf16.xpose.msra.mxu1 %v37763_v4  ;;  %31704 = vmatprep.mubr.msk.f32.mxu1 %vm37171_vm1, %v40979_v54 }
 0x610   :  { %34605 = vmatprep.subr.bf16.mxu1 %v40981_v8 }
 0x616   :  { %31705 = vmatmul.mubr.f32.vlgmr.msra.gmra.mrb[18].mxu1 %v4019_v34 }
 0x617   :  { %31753 = vmatprep.mubr.msk.f32.mxu1 %vm37171_vm1, %v40979_v54 }
 0x68c   :  { %v37966_v62 = vpop.f32.mrb[14].mxu1 }
 0x68d   :  { %v31580_v0 = vpop.f32.mrb[15].mxu1 }
 0x6b8   :  { %v37968_v10 = vpop.f32.mrb[16].mxu1 }
 0x6b9   :  { %v31622_v19 = vpop.f32.mrb[17].mxu1 }
 0x6e9   :  { %v4407_v33 = vpop.f32.mrb[18].mxu1 }
 0x6ea   :  { %v4412_v48 = vmul.f32 0.17677669, %v4407_v33  ;;  %v31706_v45 = vpop.f32.mrb[19].mxu1 }
 0x6ec   :  { %v4416_v4 = vsel %vm2524_vm2, %v4412_v48, -inf }
 0x6ed   :  { %4417 = vmax.xlane.f32.xlu1 %v4416_v4 }
 0x6fe   :  { %4905 = vrot.lane.b32.xlu1 %v37739_v53, %s37170_s4 }
 0x702   :  { %6441 = vrot.lane.b32.xlu1 %v37679_v11, %s37172_s5 }
 0x706   :  { %6443 = vrot.lane.b32.xlu1 %v37686_v22, %s37172_s5 }
 0x72a   :  { %4414 = vmax.xlane.f32.xlu1 %v4413_v52 }
 0x73b   :  { %4435 = vrot.lane.b32.xlu1 %v37733_v49, %s37170_s4 }
 0x77a   :  { %v4418_v30 = vpop.xlane.xlu1 %4417 }
 0x77b   :  { %v4420_v61 = vsub.f32 %v4412_v48, %v4418_v30 }
 0x77d   :  { %v4423_v3 = vmul.f32 1.442695, %v4420_v61 }
 0x77e   :  { %v4906_v11 = vpop.permute.xlu1 %4905 }
 0x77f   :  { %36811 = vpow2.f32 %v4423_v3  ;;  %v4916_v25 = vand.u32 4294901760, %v4906_v11 }
 0x781   :  { %v4998_v42 = vsub.f32 %v4906_v11, %v4916_v25 }
 0x782   :  { %v6442_v1 = vpop.permute.xlu1 %6441 }
 0x783   :  { %v4999_v50 = vand.u32 4294901760, %v4998_v42  ;;  %v6447_v2 = vsel %vm162_vm0, %v6442_v1, 0 }
 0x784   :  { %v6452_v37 = vand.u32 4294901760, %v6447_v2 }
 0x785   :  { %v5000_v63 = vsub.f32 %v4998_v42, %v4999_v50 }
 0x786   :  { %v6444_v60 = vpop.permute.xlu1 %6443  ;;  %v38022_v33 = vsub.f32 %v6447_v2, %v6452_v37 }
 0x787   :  { %v5001_v12 = vand.u32 4294901760, %v5000_v63  ;;  %v6449_v39 = vsel %vm162_vm0, %v6444_v60, 0 }
 0x788   :  { %v6455_v14 = vand.u32 4294901760, %v6449_v39 }
 0x789   :  { %v36812_v16 = vpop.eup %36811 }
 0x78a   :  { %v4428_v58 = vsel %vm2524_vm2, %v36812_v16, 0.0  ;;  %v38018_v19 = vsub.f32 %v6449_v39, %v6455_v14  ;;  %v38030_v30 = vpack.c.bf16 %v6455_v14, %v6452_v37 }
 0x78b   :  { %4429 = vadd.xlane.f32.xlu0 %v4428_v58 }
 0x78c   :  { %v6538_v4 = vand.u32 4294901760, %v38018_v19 }
 0x78e   :  { %v6539_v61 = vsub.f32 %v38018_v19, %v6538_v4 }
 0x790   :  { %v6540_v11 = vand.u32 4294901760, %v6539_v61 }
 0x7a1   :  { %4903 = vrot.lane.b32.xlu0 %v37745_v32, %s37170_s4 }
 0x7a5   :  { %6439 = vrot.lane.b32.xlu0 %v37686_v22, %s37173_s22 }
 0x7a9   :  { %6912 = vrot.lane.b32.xlu0 %v37703_v38, %s37172_s5 }
 0x7ad   :  { %6914 = vrot.lane.b32.xlu0 %v37718_v36, %s37172_s5 }
 0x7b1   :  { %6910 = vrot.lane.b32.xlu0 %v37718_v36, %s37173_s22 }
 0x7b7   :  { %v4415_v44 = vpop.xlane.xlu1 %4414 }
 0x7b8   :  { %v4419_v5 = vsub.f32 %v4411_v57, %v4415_v44  ;;  %v6531_v57 = vand.u32 4294901760, %v38022_v33 }
 0x7ba   :  { %v4421_v7 = vmul.f32 1.442695, %v4419_v5 }
 0x7bb   :  { %v4436_v44 = vpop.permute.xlu1 %4435 }
 0x7bc   :  { %36813 = vpow2.f32 %v4421_v7 }
 0x7c6   :  { %v37991_v28 = vpop.eup %36813 }
 0x7c7   :  { %v4425_v22 = vsel %vm2524_vm2, %v37991_v28, 0.0 }
 0x7d0   :  { %4426 = vadd.xlane.f32.xlu0 %v4425_v22 }
 0x7e6   :  { %4437 = vrot.lane.b32.xlu0 %v37729_v47, %s37170_s4 }
 0x818   :  { %v4430_v38 = vpop.xlane.xlu0 %4429 }
 0x819   :  { %36815 = vrcp.f32 %v4430_v38  ;;  %v4445_v38 = vand.u32 4294901760, %v4436_v44 }
 0x81c   :  { %v4904_v18 = vpop.permute.xlu0 %4903 }
 0x81d   :  { %v4913_v40 = vand.u32 4294901760, %v4904_v18 }
 0x81f   :  { %v34606_v36 = vpack.c.bf16 %v4916_v25, %v4913_v40  ;;  %v4991_v43 = vsub.f32 %v4904_v18, %v4913_v40 }
 0x820   :  { %v6440_v24 = vpop.permute.xlu0 %6439 }
 0x821   :  { %34607 = vmatpush3.bf16.msra.mxu1 %v34606_v36  ;;  %v4992_v35 = vand.u32 4294901760, %v4991_v43  ;;  %v34612_v23 = vpack.c.bf16 %v4998_v42, %v4991_v43  ;;  %v6445_v27 = vsel %vm162_vm0, %v6440_v24, 0  ;;  %v34726_v42 = vpack.c.bf16 %v38018_v19, %v38022_v33 }
 0x822   :  { %34608 = vmatprep.subr.bf16.mxu1 %v40981_v8  ;;  %v38016_v0 = vand.u32 4294901760, %v6445_v27 }
 0x823   :  { %v36816_v13 = vpop.eup %36815  ;;  %v4993_v31 = vsub.f32 %v4991_v43, %v4992_v35  ;;  %v34618_v34 = vpack.c.bf16 %v4999_v50, %v4992_v35 }
 0x824   :  { %v4434_v26 = vmul.f32 %v36816_v13, %v36812_v16  ;;  %v38014_v17 = vpop.permute.xlu0 %6912  ;;  %v6519_v45 = vsub.f32 %v6445_v27, %v38016_v0  ;;  %v6532_v16 = vsub.f32 %v38022_v33, %v6531_v57 }
 0x825   :  { %v4994_v6 = vand.u32 4294901760, %v4993_v31 }
 0x826   :  { %v4910_v56 = vsel %vm2524_vm2, %v4434_v26, 0  ;;  %v6520_v52 = vand.u32 4294901760, %v6519_v45  ;;  %v6533_v60 = vand.u32 4294901760, %v6532_v16 }
 0x827   :  { %v4979_v29 = vand.u32 4294901760, %v4910_v56  ;;  %v34609_v20 = vpack.c.bf16 %v5001_v12, %v4994_v6 }
 0x828   :  { %v38024_v48 = vpop.permute.xlu0 %6914  ;;  %v6521_v58 = vsub.f32 %v6519_v45, %v6520_v52  ;;  %v34723_v22 = vpack.c.bf16 %v6540_v11, %v6533_v60  ;;  %v1573_v60 = vld [vmem:[#allocation8 + $0x48] sm:$0xff] }
 0x829   :  { %v4980_v59 = vsub.f32 %v4910_v56, %v4979_v29 }
 0x82a   :  { %v6522_v5 = vand.u32 4294901760, %v6521_v58 }
 0x82b   :  { %v4981_v51 = vand.u32 4294901760, %v4980_v59 }
 0x82c   :  { %v6911_v3 = vpop.permute.xlu0 %6910 }
 0x82d   :  { %v4982_v46 = vsub.f32 %v4980_v59, %v4981_v51 }
 0x82f   :  { %v4983_v15 = vand.u32 4294901760, %v4982_v46 }
 0x831   :  { %31754 = vmatmul.mubr.f32.vlgmr.msra.gmra.mrb[20].mxu1 %v4983_v15  ;;  %v34732_v15 = vpack.c.bf16 %v6538_v4, %v6531_v57 }
 0x832   :  { %34610 = vmatpush3.bf16.msra.mxu1 %v34609_v20  ;;  %31760 = vmatprep.mubr.msk.f32.mxu1 %vm37171_vm1, %v40979_v54  ;;  %v6920_v20 = vsel %vm162_vm0, %v38024_v48, 0 }
 0x833   :  { %34611 = vmatprep.subr.bf16.mxu1 %v40981_v8  ;;  %v6926_v24 = vand.u32 4294901760, %v6920_v20 }
 0x835   :  { %v7008_v27 = vsub.f32 %v6920_v20, %v6926_v24 }
 0x837   :  { %v7009_v19 = vand.u32 4294901760, %v7008_v27 }
 0x839   :  { %31761 = vmatmul.mubr.f32.vlgmr.msra.gmra.mrb[20].mxu1 %v4979_v29  ;;  %v7010_v4 = vsub.f32 %v7008_v27, %v7009_v19 }
 0x83a   :  { %34613 = vmatpush3.bf16.msra.mxu1 %v34612_v23  ;;  %31767 = vmatprep.mubr.msk.f32.mxu1 %vm37171_vm1, %v40979_v54  ;;  %v6918_v23 = vsel %vm162_vm0, %v38014_v17, 0 }
 0x83b   :  { %34614 = vmatprep.subr.bf16.mxu1 %v40981_v8  ;;  %v6923_v2 = vand.u32 4294901760, %v6918_v23 }
 0x83d   :  { %v7001_v17 = vsub.f32 %v6918_v23, %v6923_v2 }
 0x83f   :  { %v7002_v33 = vand.u32 4294901760, %v7001_v17  ;;  %v34744_v58 = vpack.c.bf16 %v7008_v27, %v7001_v17 }
 0x841   :  { %31768 = vmatmul.mubr.f32.vlgmr.msra.gmra.mrb[20].mxu1 %v4980_v59  ;;  %v7003_v57 = vsub.f32 %v7001_v17, %v7002_v33  ;;  %v34750_v11 = vpack.c.bf16 %v7009_v19, %v7002_v33 }
 0x842   :  { %34616 = vmatpush3.bf16.msra.mxu1 %v34606_v36  ;;  %31774 = vmatprep.mubr.msk.f32.mxu1 %vm37171_vm1, %v40979_v54 }
 0x843   :  { %34617 = vmatprep.subr.bf16.mxu1 %v40981_v8 }
 0x849   :  { %31775 = vmatmul.mubr.f32.vlgmr.msra.gmra.mrb[20].mxu1 %v4981_v51 }
 0x84a   :  { %34619 = vmatpush3.bf16.msra.mxu1 %v34618_v34  ;;  %31781 = vmatprep.mubr.msk.f32.mxu1 %vm37171_vm1, %v40979_v54  ;;  %v6916_v34 = vsel %vm162_vm0, %v6911_v3, 0  ;;  %v7004_v3 = vand.u32 4294901760, %v7003_v57 }
 0x84b   :  { %34620 = vmatprep.subr.bf16.mxu1 %v40981_v8  ;;  %v6989_v14 = vand.u32 4294901760, %v6916_v34 }
 0x84d   :  { %v6990_v37 = vsub.f32 %v6916_v34, %v6989_v14 }
 0x84f   :  { %v6991_v48 = vand.u32 4294901760, %v6990_v37 }
 0x851   :  { %31782 = vmatmul.mubr.f32.vlgmr.msra.gmra.mrb[20].mxu1 %v4979_v29 }
 0x852   :  { %34622 = vmatpush3.bf16.msra.mxu1 %v34606_v36  ;;  %31788 = vmatprep.mubr.msk.f32.mxu1 %vm37171_vm1, %v40979_v54  ;;  %v38046_v36 = vsub.f32 %v4436_v44, %v4445_v38 }
 0x853   :  { %34719 = vmatprep.subr.bf16.mxu1 %v40981_v8 }
 0x854   :  { %v4524_v35 = vand.u32 4294901760, %v38046_v36 }
 0x856   :  { %v4525_v31 = vsub.f32 %v38046_v36, %v4524_v35 }
 0x858   :  { %v4526_v6 = vand.u32 4294901760, %v4525_v31 }
 0x859   :  { %31789 = vmatmul.mubr.f32.vlgmr.msra.gmra.mrb[20].mxu1 %v4979_v29 }
 0x85a   :  { %31927 = vmatprep.mubr.msk.f32.mxu1 %vm37171_vm1, %v40979_v54 }
 0x85b   :  { %34721 = vmatpush3.bf16.xpose.msra.mxu1 %v38030_v30 }
 0x85c   :  { %34722 = vmatprep.subr.bf16.mxu1 %v40981_v8 }
 0x85d   :  { %v4427_v1 = vpop.xlane.xlu0 %4426 }
 0x85e   :  { %36817 = vrcp.f32 %v4427_v1  ;;  %v1572_v1 = vld [vmem:[#allocation8 + $0x40] sm:$0xff] }
 0x85f   :  { %v5378_v44 = vand.u32 4294901760, %v1572_v1 }
 0x861   :  { %v4438_v7 = vpop.permute.xlu0 %4437 }
 0x862   :  { %31928 = vmatmul.mubr.f32.vlgmr.msra.gmra.mrb[22].mxu1 %v6522_v5  ;;  %v4448_v18 = vand.u32 4294901760, %v4438_v7  ;;  %v5381_v5 = vand.u32 4294901760, %v1573_v60 }
 0x863   :  { %34724 = vmatpush3.bf16.xpose.msra.mxu1 %v34723_v22  ;;  %31934 = vmatprep.mubr.msk.f32.mxu1 %vm37171_vm1, %v40979_v54  ;;  %v5468_v22 = vsub.f32 %v1572_v1, %v5378_v44 }
 0x864   :  { %v38040_v25 = vpack.c.bf16 %v4448_v18, %v4445_v38  ;;  %34725 = vmatprep.subr.bf16.mxu1 %v40981_v8  ;;  %v38043_v40 = vsub.f32 %v4438_v7, %v4448_v18  ;;  %v38127_v7 = vpack.c.bf16 %v5381_v5, %v5378_v44  ;;  %v5475_v38 = vsub.f32 %v1573_v60, %v5381_v5  ;;  %v1574_v18 = vld [vmem:[#allocation8 + $0x50] sm:$0xff]  ;;  %v1564_v5 = vld [vmem:[#allocation8] sm:$0xff] }
 0x866   :  { %34589 = vmatpush3.bf16.msra.mxu0 %v38040_v25  ;;  %v4531_v26 = vand.u32 4294901760, %v38043_v40  ;;  %v34594_v39 = vpack.c.bf16 %v38043_v40, %v38046_v36  ;;  %v34639_v20 = vpack.c.bf16 %v5475_v38, %v5468_v22 }
 0x867   :  { %34590 = vmatprep.subr.bf16.mxu0 %v40981_v8 }
 0x868   :  { %v36818_v43 = vpop.eup %36817  ;;  %v34600_v61 = vpack.c.bf16 %v4531_v26, %v4524_v35 }
 0x869   :  { %v4432_v13 = vmul.f32 %v36818_v43, %v37991_v28  ;;  %v4532_v28 = vsub.f32 %v38043_v40, %v4531_v26  ;;  %v5384_v40 = vand.u32 4294901760, %v1574_v18  ;;  %v5469_v43 = vand.u32 4294901760, %v5468_v22 }
 0x86a   :  { %31935 = vmatmul.mubr.f32.vlgmr.msra.gmra.mrb[22].mxu1 %v38016_v0 }
 0x86b   :  { %34727 = vmatpush3.bf16.xpose.msra.mxu1 %v34726_v42  ;;  %31941 = vmatprep.mubr.msk.f32.mxu1 %vm37171_vm1, %v40979_v54  ;;  %v4442_v50 = vsel %vm2524_vm2, %v4432_v13, 0  ;;  %v4533_v63 = vand.u32 4294901760, %v4532_v28  ;;  %v5476_v42 = vand.u32 4294901760, %v5475_v38  ;;  %v5470_v26 = vsub.f32 %v5468_v22, %v5469_v43  ;;  %v1565_v22 = vld [vmem:[#allocation8 + $0x8] sm:$0xff] }
 0x86c   :  { %34728 = vmatprep.subr.bf16.mxu1 %v40981_v8  ;;  %v38059_v56 = vand.u32 4294901760, %v4442_v50 }
 0x86d   :  { %v34591_v12 = vpack.c.bf16 %v4533_v63, %v4526_v6  ;;  %v5477_v35 = vsub.f32 %v5475_v38, %v5476_v42  ;;  %v5471_v28 = vand.u32 4294901760, %v5470_v26  ;;  %v5906_v38 = vsel %vm162_vm0, %v37966_v62, 0 }
 0x86e   :  { %v4512_v29 = vsub.f32 %v4442_v50, %v38059_v56  ;;  %v5482_v50 = vsub.f32 %v1574_v18, %v5384_v40  ;;  %v5912_v18 = vand.u32 4294901760, %v1564_v5 }
 0x870   :  { %v4513_v59 = vand.u32 4294901760, %v4512_v29  ;;  %v5483_v31 = vand.u32 4294901760, %v5482_v50  ;;  %v38166_v62 = vsub.f32 %v1564_v5, %v5912_v18 }
 0x872   :  { %31942 = vmatmul.mubr.f32.vlgmr.msra.gmra.mrb[22].mxu1 %v6519_v45  ;;  %v4514_v51 = vsub.f32 %v4512_v29, %v4513_v59  ;;  %v34738_v45 = vpack.c.bf16 %v6926_v24, %v6923_v2  ;;  %v34655_v24 = vpack.c.bf16 %v5476_v42, %v5469_v43  ;;  %v38161_v43 = vand.u32 4294901760, %v5906_v38 }
 0x873   :  { %34730 = vmatpush3.bf16.xpose.msra.mxu1 %v38030_v30  ;;  %31948 = vmatprep.mubr.msk.f32.mxu1 %vm37171_vm1, %v40979_v54  ;;  %v5909_v42 = vsel %vm162_vm0, %v37968_v10, 0  ;;  %v6003_v10 = vand.u32 4294901760, %v38166_v62 }
 0x874   :  { %v4515_v46 = vand.u32 4294901760, %v4514_v51  ;;  %34731 = vmatprep.subr.bf16.mxu1 %v40981_v8  ;;  %v5484_v51 = vsub.f32 %v5482_v50, %v5483_v31 }
 0x876   :  { %31712 = vmatmul.mubr.f32.vlgmr.msra.gmra.mrb[12].mxu0 %v4515_v46  ;;  %v5485_v46 = vand.u32 4294901760, %v5484_v51 }
 0x877   :  { %34592 = vmatpush3.bf16.msra.mxu0 %v34591_v12  ;;  %31718 = vmatprep.mubr.msk.f32.mxu0 %vm37171_vm1, %v40979_v54 }
 0x878   :  { %34593 = vmatprep.subr.bf16.mxu0 %v40981_v8 }
 0x87a   :  { %31949 = vmatmul.mubr.f32.vlgmr.msra.gmra.mrb[22].mxu1 %v6520_v52  ;;  %v6992_v52 = vsub.f32 %v6990_v37, %v6991_v48 }
 0x87b   :  { %34733 = vmatpush3.bf16.xpose.msra.mxu1 %v34732_v15  ;;  %31955 = vmatprep.mubr.msk.f32.mxu1 %vm37171_vm1, %v40979_v54 }
 0x87c   :  { %34734 = vmatprep.subr.bf16.mxu1 %v40981_v8  ;;  %v6993_v16 = vand.u32 4294901760, %v6992_v52 }
 0x87e   :  { %31719 = vmatmul.mubr.f32.vlgmr.msra.gmra.mrb[12].mxu0 %v38059_v56 }
 0x87f   :  { %34595 = vmatpush3.bf16.msra.mxu0 %v34594_v39  ;;  %31725 = vmatprep.mubr.msk.f32.mxu0 %vm37171_vm1, %v40979_v54 }
 0x880   :  { %34596 = vmatprep.subr.bf16.mxu0 %v40981_v8 }
 0x882   :  { %31956 = vmatmul.mubr.f32.vlgmr.msra.gmra.mrb[22].mxu1 %v38016_v0 }
 0x883   :  { %34736 = vmatpush3.bf16.xpose.msra.mxu1 %v38030_v30  ;;  %31962 = vmatprep.mubr.msk.f32.mxu1 %vm37171_vm1, %v40979_v54  ;;  %v7011_v30 = vand.u32 4294901760, %v7010_v4 }
 0x884   :  { %34737 = vmatprep.subr.bf16.mxu1 %v40981_v8 }
 0x886   :  { %31726 = vmatmul.mubr.f32.vlgmr.msra.gmra.mrb[12].mxu0 %v4512_v29  ;;  %v5478_v29 = vand.u32 4294901760, %v5477_v35 }
 0x887   :  { %34598 = vmatpush3.bf16.msra.mxu0 %v38040_v25  ;;  %31732 = vmatprep.mubr.msk.f32.mxu0 %vm37171_vm1, %v40979_v54 }
 0x888   :  { %34599 = vmatprep.subr.bf16.mxu0 %v40981_v8  ;;  %v34631_v63 = vpack.c.bf16 %v5478_v29, %v5471_v28  ;;  %v38171_v28 = vand.u32 4294901760, %v5909_v42 }
 0x88a   :  { %31963 = vmatmul.mubr.f32.vlgmr.msra.gmra.mrb[22].mxu1 %v38016_v0  ;;  %v34741_v0 = vpack.c.bf16 %v7011_v30, %v7004_v3  ;;  %v5991_v51 = vsub.f32 %v5909_v42, %v38171_v28 }
 0x88b   :  { %34739 = vmatpush3.bf16.xpose.msra.mxu1 %v34738_v45  ;;  %31969 = vmatprep.mubr.msk.f32.mxu1 %vm37171_vm1, %v40979_v54 }
 0x88c   :  { %34740 = vmatprep.subr.bf16.mxu1 %v40981_v8 }
 0x88e   :  { %31733 = vmatmul.mubr.f32.vlgmr.msra.gmra.mrb[12].mxu0 %v4513_v59 }
 0x88f   :  { %34601 = vmatpush3.bf16.msra.mxu0 %v34600_v61  ;;  %31739 = vmatprep.mubr.msk.f32.mxu0 %vm37171_vm1, %v40979_v54 }
 0x890   :  { %34602 = vmatprep.subr.bf16.mxu0 %v40981_v8 }
 0x892   :  { %31970 = vmatmul.mubr.f32.vlgmr.msra.gmra.mrb[24].mxu1 %v6993_v16 }
 0x893   :  { %34742 = vmatpush3.bf16.xpose.msra.mxu1 %v34741_v0  ;;  %31976 = vmatprep.mubr.msk.f32.mxu1 %vm37171_vm1, %v40979_v54 }
 0x894   :  { %34743 = vmatprep.subr.bf16.mxu1 %v40981_v8 }
 0x896   :  { %31740 = vmatmul.mubr.f32.vlgmr.msra.gmra.mrb[12].mxu0 %v38059_v56 }
 0x897   :  { %34604 = vmatpush3.bf16.msra.mxu0 %v38040_v25  ;;  %31746 = vmatprep.mubr.msk.f32.mxu0 %vm37171_vm1, %v40979_v54  ;;  %v1575_v25 = vld [vmem:[#allocation8 + $0x58] sm:$0xff] }
 0x898   :  { %34624 = vmatprep.subr.bf16.mxu0 %v38127_v7  ;;  %v5387_v36 = vand.u32 4294901760, %v1575_v25 }
 0x89a   :  { %31977 = vmatmul.mubr.f32.vlgmr.msra.gmra.mrb[24].mxu1 %v6989_v14  ;;  %v38131_v13 = vpack.c.bf16 %v5387_v36, %v5384_v40  ;;  %v1566_v40 = vld [vmem:[#allocation8 + $0x10] sm:$0xff] }
 0x89b   :  { %34745 = vmatpush3.bf16.xpose.msra.mxu1 %v34744_v58  ;;  %31983 = vmatprep.mubr.msk.f32.mxu1 %vm37171_vm1, %v40979_v54  ;;  %v5918_v26 = vand.u32 4294901760, %v1566_v40 }
 0x89c   :  { %34746 = vmatprep.subr.bf16.mxu1 %v40981_v8 }
 0x89e   :  { %31747 = vmatmul.mubr.f32.vlgmr.msra.gmra.mrb[12].mxu0 %v38059_v56  ;;  %v5489_v56 = vsub.f32 %v1575_v25, %v5387_v36  ;;  %v5915_v25 = vand.u32 4294901760, %v1565_v22  ;;  %v1567_v36 = vld [vmem:[#allocation8 + $0x18] sm:$0xff] }
 0x89f   :  { %34626 = vmatpush3.bf16.msra.mxu0 %v38127_v7  ;;  %v5921_v35 = vand.u32 4294901760, %v1567_v36 }
 0x8a0   :  { %34628 = vmatprep.subr.bf16.mxu0 %v38131_v13  ;;  %v5490_v59 = vand.u32 4294901760, %v5489_v56  ;;  %v34643_v23 = vpack.c.bf16 %v5489_v56, %v5482_v50  ;;  %v38168_v50 = vsub.f32 %v1565_v22, %v5915_v25 }
 0x8a2   :  { %31984 = vmatmul.mubr.f32.vlgmr.msra.gmra.mrb[24].mxu1 %v6990_v37  ;;  %v5491_v6 = vsub.f32 %v5489_v56, %v5490_v59  ;;  %v38135_v34 = vpack.c.bf16 %v5490_v59, %v5483_v31  ;;  %v5981_v56 = vsub.f32 %v5906_v38, %v38161_v43  ;;  %v6010_v29 = vand.u32 4294901760, %v38168_v50 }
 0x8a3   :  { %34748 = vmatpush3.bf16.xpose.msra.mxu1 %v34738_v45  ;;  %31990 = vmatprep.mubr.msk.f32.mxu1 %vm37171_vm1, %v40979_v54  ;;  %v6016_v31 = vsub.f32 %v1566_v40, %v5918_v26  ;;  %v6023_v59 = vsub.f32 %v1567_v36, %v5921_v35 }
 0x8a4   :  { %34749 = vmatprep.subr.bf16.mxu1 %v40981_v8  ;;  %34630 = vmatpush3.bf16.msra.mxu0 %v38131_v13  ;;  %v5492_v12 = vand.u32 4294901760, %v5491_v6  ;;  %v34671_v6 = vpack.c.bf16 %v5915_v25, %v5912_v18 }
 0x8a5   :  { %34632 = vmatprep.subr.bf16.mxu0 %v34631_v63 }
 0x8a6   :  { %v34635_v15 = vpack.c.bf16 %v5492_v12, %v5485_v46  ;;  %v6004_v46 = vsub.f32 %v38166_v62, %v6003_v10  ;;  %v6011_v12 = vsub.f32 %v38168_v50, %v6010_v29 }
 0x8aa   :  { %31991 = vmatmul.mubr.f32.vlgmr.msra.gmra.mrb[24].mxu1 %v6991_v48 }
 0x8ab   :  { %34751 = vmatpush3.bf16.xpose.msra.mxu1 %v34750_v11  ;;  %31997 = vmatprep.mubr.msk.f32.mxu1 %vm37171_vm1, %v40979_v54 }
 0x8ac   :  { %34752 = vmatprep.subr.bf16.mxu1 %v40981_v8 }
 0x8b2   :  { %31998 = vmatmul.mubr.f32.vlgmr.msra.gmra.mrb[24].mxu1 %v6989_v14 }
 0x8b3   :  { %34754 = vmatpush3.bf16.xpose.msra.mxu1 %v34738_v45  ;;  %32004 = vmatprep.mubr.msk.f32.mxu1 %vm37171_vm1, %v40979_v54 }
 0x8b4   :  { %34773 = vmatprep.subr.bf16.mxu1 %v40981_v8 }
 0x8ba   :  { %32005 = vmatmul.mubr.f32.vlgmr.msra.gmra.mrb[24].mxu1 %v6989_v14 }
 0x8bb   :  { %32053 = vmatprep.mubr.msk.f32.mxu1 %vm37171_vm1, %v40979_v54 }
 0x92c   :  { %v5367_v39 = vpop.f32.mrb[20].mxu1 }
 0x92d   :  { %v31790_v2 = vpop.f32.mrb[21].mxu1  ;;  %v5375_v19 = vsel %vm162_vm0, %v5367_v39, 0  ;;  %v6005_v39 = vand.u32 4294901760, %v6004_v46 }
 0x92e   :  { %v38142_v33 = vand.u32 4294901760, %v5375_v19  ;;  %v6012_v2 = vand.u32 4294901760, %v6011_v12 }
 0x930   :  { %v5457_v48 = vsub.f32 %v5375_v19, %v38142_v33  ;;  %v34679_v19 = vpack.c.bf16 %v6012_v2, %v6005_v39 }
 0x932   :  { %v5458_v30 = vand.u32 4294901760, %v5457_v48 }
 0x934   :  { %v5459_v16 = vsub.f32 %v5457_v48, %v5458_v30 }
 0x936   :  { %v5460_v11 = vand.u32 4294901760, %v5459_v16 }
 0x95d   :  { %v6906_v14 = vpop.f32.mrb[22].mxu1 }
 0x95e   :  { %v38137_v27 = vmul.f32 0.17677669, %v6906_v14  ;;  %v31964_v17 = vpop.f32.mrb[23].mxu1 }
 0x960   :  { %v7383_v37 = vsel %vm2524_vm2, %v38137_v27, -inf }
 0x961   :  { %7384 = vmax.xlane.f32.xlu1 %v7383_v37 }
 0x971   :  { %v4899_v45 = vpop.f32.mrb[12].mxu0 }
 0x972   :  { %v5372_v4 = vsel %vm162_vm0, %v4899_v45, 0  ;;  %7408 = vrot.lane.b32.xlu1 %v37688_v21, %s37173_s22  ;;  %v31748_v57 = vpop.f32.mrb[13].mxu0 }
 0x973   :  { %v5446_v52 = vand.u32 4294901760, %v5372_v4  ;;  %v34691_v57 = vpack.c.bf16 %v6023_v59, %v6016_v31 }
 0x975   :  { %v5447_v61 = vsub.f32 %v5372_v4, %v5446_v52 }
 0x976   :  { %7875 = vrot.lane.b32.xlu1 %v37710_v41, %s37173_s22 }
 0x977   :  { %v5448_v3 = vand.u32 4294901760, %v5447_v61 }
 0x979   :  { %v5449_v0 = vsub.f32 %v5447_v61, %v5448_v3 }
 0x97b   :  { %v5450_v58 = vand.u32 4294901760, %v5449_v0 }
 0x97d   :  { %31799 = vmatprep.mubr.f32.mxu0 %v5450_v58 }
 0x97e   :  { %31800 = vmatmul.mubr.f32.vlgmr.msra.gmra.mrb[14].mxu0 %v5460_v11 }
 0x97f   :  { %34634 = vmatpush3.bf16.msra.mxu0 %v34631_v63  ;;  %31810 = vmatprep.mubr.f32.mxu0 %v5446_v52  ;;  %v5982_v63 = vand.u32 4294901760, %v5981_v56 }
 0x980   :  { %34636 = vmatprep.subr.bf16.mxu0 %v34635_v15 }
 0x983   :  { %34638 = vmatpush3.bf16.msra.mxu0 %v34635_v15  ;;  %v6017_v15 = vand.u32 4294901760, %v6016_v31 }
 0x984   :  { %34640 = vmatprep.subr.bf16.mxu0 %v34639_v20 }
 0x985   :  { %v6018_v14 = vsub.f32 %v6016_v31, %v6017_v15 }
 0x986   :  { %31811 = vmatmul.mubr.f32.vlgmr.msra.gmra.mrb[14].mxu0 %v38142_v33 }
 0x987   :  { %34642 = vmatpush3.bf16.msra.mxu0 %v34639_v20  ;;  %31821 = vmatprep.mubr.f32.mxu0 %v5447_v61  ;;  %v6024_v20 = vand.u32 4294901760, %v6023_v59 }
 0x988   :  { %34644 = vmatprep.subr.bf16.mxu0 %v34643_v23 }
 0x98b   :  { %34646 = vmatpush3.bf16.msra.mxu0 %v34643_v23  ;;  %v5983_v23 = vsub.f32 %v5981_v56, %v5982_v63 }
 0x98c   :  { %34648 = vmatprep.subr.bf16.mxu0 %v38127_v7 }
 0x98d   :  { %v7377_v21 = vpop.f32.mrb[24].mxu1  ;;  %v5984_v17 = vand.u32 4294901760, %v5983_v23 }
 0x98e   :  { %v38152_v1 = vmul.f32 0.17677669, %v7377_v21  ;;  %v32006_v60 = vpop.f32.mrb[25].mxu1  ;;  %31822 = vmatmul.mubr.f32.vlgmr.msra.gmra.mrb[14].mxu0 %v5457_v48  ;;  %v6019_v48 = vand.u32 4294901760, %v6018_v14 }
 0x98f   :  { %34650 = vmatpush3.bf16.msra.mxu0 %v38127_v7  ;;  %31832 = vmatprep.mubr.f32.mxu0 %v5448_v3 }
 0x990   :  { %v7386_v44 = vsel %vm2524_vm2, %v38152_v1, -inf  ;;  %34652 = vmatprep.subr.bf16.mxu0 %v38131_v13 }
 0x991   :  { %7387 = vmax.xlane.f32.xlu0 %v7386_v44 }
 0x993   :  { %34654 = vmatpush3.bf16.msra.mxu0 %v38131_v13 }
 0x994   :  { %34656 = vmatprep.subr.bf16.mxu0 %v34655_v24 }
 0x996   :  { %31833 = vmatmul.mubr.f32.vlgmr.msra.gmra.mrb[14].mxu0 %v5458_v30 }
 0x997   :  { %34658 = vmatpush3.bf16.msra.mxu0 %v34655_v24  ;;  %31843 = vmatprep.mubr.f32.mxu0 %v5446_v52  ;;  %v5992_v24 = vand.u32 4294901760, %v5991_v51 }
 0x998   :  { %34660 = vmatprep.subr.bf16.mxu0 %v38135_v34 }
 0x999   :  { %v5993_v37 = vsub.f32 %v5991_v51, %v5992_v24 }
 0x99b   :  { %34662 = vmatpush3.bf16.msra.mxu0 %v38135_v34  ;;  %v34675_v34 = vpack.c.bf16 %v5921_v35, %v5918_v26 }
 0x99c   :  { %34664 = vmatprep.subr.bf16.mxu0 %v38127_v7 }
 0x99e   :  { %31844 = vmatmul.mubr.f32.vlgmr.msra.gmra.mrb[14].mxu0 %v38142_v33 }
 0x99f   :  { %34666 = vmatpush3.bf16.msra.mxu0 %v38127_v7  ;;  %31854 = vmatprep.mubr.f32.mxu0 %v5446_v52  ;;  %v6025_v7 = vsub.f32 %v6023_v59, %v6024_v20  ;;  %v34707_v52 = vpack.c.bf16 %v6024_v20, %v6017_v15 }
 0x9a0   :  { %34668 = vmatprep.subr.bf16.mxu0 %v38131_v13 }
 0x9a1   :  { %v6026_v45 = vand.u32 4294901760, %v6025_v7 }
 0x9a3   :  { %34670 = vmatpush3.bf16.msra.mxu0 %v38131_v13  ;;  %v5994_v13 = vand.u32 4294901760, %v5993_v37  ;;  %v34683_v4 = vpack.c.bf16 %v6026_v45, %v6019_v48 }
 0x9a4   :  { %34672 = vmatprep.subr.bf16.mxu0 %v34671_v6 }
 0x9a6   :  { %31855 = vmatmul.mubr.f32.vlgmr.msra.gmra.mrb[14].mxu0 %v38142_v33  ;;  %v34687_v33 = vpack.c.bf16 %v38168_v50, %v38166_v62 }
 0x9a7   :  { %7406 = vrot.lane.b32.xlu0 %v37681_v9, %s37173_s22  ;;  %34674 = vmatpush3.bf16.msra.mxu0 %v34671_v6 }
 0x9a8   :  { %31865 = vmatprep.mubr.f32.mxu0 %v5984_v17  ;;  %34676 = vmatprep.subr.bf16.mxu0 %v34675_v34 }
 0x9ab   :  { %8345 = vrot.lane.b32.xlu0 %v37733_v49, %s37173_s22  ;;  %34678 = vmatpush3.bf16.msra.mxu0 %v34675_v34 }
 0x9ac   :  { %34680 = vmatprep.subr.bf16.mxu0 %v34679_v19 }
 0x9ae   :  { %31866 = vmatmul.mubr.f32.vlgmr.msra.gmra.mrb[14].mxu0 %v5994_v13 }
 0x9af   :  { %8343 = vrot.lane.b32.xlu0 %v37681_v9, %s37172_s5  ;;  %34682 = vmatpush3.bf16.msra.mxu0 %v34679_v19  ;;  %v34703_v9 = vpack.c.bf16 %v6010_v29, %v6003_v10 }
 0x9b0   :  { %31876 = vmatprep.mubr.f32.mxu0 %v38161_v43  ;;  %34684 = vmatprep.subr.bf16.mxu0 %v34683_v4 }
 0x9b3   :  { %8818 = vrot.lane.b32.xlu0 %v37739_v53, %s37173_s22  ;;  %34686 = vmatpush3.bf16.msra.mxu0 %v34683_v4 }
 0x9b4   :  { %34688 = vmatprep.subr.bf16.mxu0 %v34687_v33 }
 0x9b6   :  { %31877 = vmatmul.mubr.f32.vlgmr.msra.gmra.mrb[14].mxu0 %v38171_v28 }
 0x9b7   :  { %34690 = vmatpush3.bf16.msra.mxu0 %v34687_v33  ;;  %31887 = vmatprep.mubr.f32.mxu0 %v5981_v56 }
 0x9b8   :  { %34692 = vmatprep.subr.bf16.mxu0 %v34691_v57 }
 0x9bb   :  { %34694 = vmatpush3.bf16.msra.mxu0 %v34691_v57 }
 0x9bc   :  { %34696 = vmatprep.subr.bf16.mxu0 %v34671_v6 }
 0x9be   :  { %31888 = vmatmul.mubr.f32.vlgmr.msra.gmra.mrb[14].mxu0 %v5991_v51 }
 0x9bf   :  { %34698 = vmatpush3.bf16.msra.mxu0 %v34671_v6  ;;  %31898 = vmatprep.mubr.f32.mxu0 %v5982_v63 }
 0x9c0   :  { %34700 = vmatprep.subr.bf16.mxu0 %v34675_v34 }
 0x9c3   :  { %34702 = vmatpush3.bf16.msra.mxu0 %v34675_v34 }
 0x9c4   :  { %34704 = vmatprep.subr.bf16.mxu0 %v34703_v9 }
 0x9c6   :  { %31899 = vmatmul.mubr.f32.vlgmr.msra.gmra.mrb[14].mxu0 %v5992_v24 }
 0x9c7   :  { %34706 = vmatpush3.bf16.msra.mxu0 %v34703_v9  ;;  %31909 = vmatprep.mubr.f32.mxu0 %v38161_v43 }
 0x9c8   :  { %34708 = vmatprep.subr.bf16.mxu0 %v34707_v52 }
 0x9cb   :  { %34710 = vmatpush3.bf16.msra.mxu0 %v34707_v52 }
 0x9cc   :  { %34712 = vmatprep.subr.bf16.mxu0 %v34671_v6 }
 0x9ce   :  { %31910 = vmatmul.mubr.f32.vlgmr.msra.gmra.mrb[14].mxu0 %v38171_v28 }
 0x9cf   :  { %34714 = vmatpush3.bf16.msra.mxu0 %v34671_v6  ;;  %31920 = vmatprep.mubr.f32.mxu0 %v38161_v43 }
 0x9d0   :  { %34716 = vmatprep.subr.bf16.mxu0 %v34675_v34 }
 0x9d3   :  { %34718 = vmatpush3.bf16.msra.mxu0 %v34675_v34 }
 0x9d4   :  { %34755 = vmatprep.subr.bf16.mxu0 %v40981_v8 }
 0x9d6   :  { %31921 = vmatmul.mubr.f32.vlgmr.msra.gmra.mrb[14].mxu0 %v38171_v28 }
 0x9d7   :  { %32011 = vmatprep.mubr.msk.f32.mxu0 %vm37171_vm1, %v40979_v54 }
 0x9ee   :  { %v7385_v30 = vpop.xlane.xlu1 %7384 }
 0x9ef   :  { %v7389_v61 = vsub.f32 %v38137_v27, %v7385_v30 }
 0x9f1   :  { %v7391_v3 = vmul.f32 1.442695, %v7389_v61 }
 0x9f2   :  { %v7409_v58 = vpop.permute.xlu1 %7408 }
 0x9f3   :  { %36819 = vpow2.f32 %v7391_v3  ;;  %v7419_v11 = vand.u32 4294901760, %v7409_v58 }
 0x9f5   :  { %v7501_v60 = vsub.f32 %v7409_v58, %v7419_v11 }
 0x9f6   :  { %v7876_v28 = vpop.permute.xlu1 %7875 }
 0x9f7   :  { %v7502_v38 = vand.u32 4294901760, %v7501_v60  ;;  %v7885_v24 = vand.u32 4294901760, %v7876_v28 }
 0x9f9   :  { %v7503_v40 = vsub.f32 %v7501_v60, %v7502_v38  ;;  %v38244_v48 = vsub.f32 %v7876_v28, %v7885_v24 }
 0x9fb   :  { %v7504_v35 = vand.u32 4294901760, %v7503_v40  ;;  %v7964_v30 = vand.u32 4294901760, %v38244_v48 }
 0x9fd   :  { %v36820_v16 = vpop.eup %36819 }
 0x9fe   :  { %v7395_v0 = vsel %vm2524_vm2, %v36820_v16, 0.0 }
 0x9ff   :  { %7396 = vadd.xlane.f32.xlu1 %v7395_v0 }
 0xa1e   :  { %v7388_v21 = vpop.xlane.xlu0 %7387 }
 0xa1f   :  { %v7390_v44 = vsub.f32 %v38152_v1, %v7388_v21 }
 0xa21   :  { %v7393_v5 = vmul.f32 1.442695, %v7390_v44 }
 0xa22   :  { %v7407_v22 = vpop.permute.xlu0 %7406 }
 0xa23   :  { %36821 = vpow2.f32 %v7393_v5  ;;  %v7416_v18 = vand.u32 4294901760, %v7407_v22  ;;  %v7965_v5 = vsub.f32 %v38244_v48, %v7964_v30 }
 0xa25   :  { %v38207_v25 = vpack.c.bf16 %v7419_v11, %v7416_v18  ;;  %v7494_v27 = vsub.f32 %v7407_v22, %v7416_v18 }
 0xa27   :  { %v7495_v36 = vand.u32 4294901760, %v7494_v27  ;;  %34757 = vmatpush3.bf16.msra.mxu0 %v38207_v25  ;;  %v34762_v43 = vpack.c.bf16 %v7501_v60, %v7494_v27 }
 0xa28   :  { %34758 = vmatprep.subr.bf16.mxu0 %v40981_v8 }
 0xa29   :  { %v7496_v42 = vsub.f32 %v7494_v27, %v7495_v36  ;;  %v34768_v26 = vpack.c.bf16 %v7502_v38, %v7495_v36  ;;  %v7966_v36 = vand.u32 4294901760, %v7965_v5 }
 0xa2b   :  { %v7497_v62 = vand.u32 4294901760, %v7496_v42 }
 0xa2d   :  { %v36822_v1 = vpop.eup %36821  ;;  %v34759_v50 = vpack.c.bf16 %v7504_v35, %v7497_v62 }
 0xa2e   :  { %v7398_v56 = vsel %vm2524_vm2, %v36822_v1, 0.0 }
 0xa2f   :  { %7399 = vadd.xlane.f32.xlu1 %v7398_v56 }
 0xa40   :  { %7877 = vrot.lane.b32.xlu1 %v37721_v55, %s37173_s22 }
 0xa44   :  { %8347 = vrot.lane.b32.xlu1 %v37729_v47, %s37173_s22 }
 0xa48   :  { %8816 = vrot.lane.b32.xlu1 %v37745_v32, %s37173_s22 }
 0xa4c   :  { %8814 = vrot.lane.b32.xlu1 %v37710_v41, %s37172_s5  ;;  %v8346_v41 = vpop.permute.xlu0 %8345 }
 0xa4d   :  { %v8351_v20 = vsel %vm162_vm0, %v8346_v41, 0 }
 0xa4e   :  { %v8356_v2 = vand.u32 4294901760, %v8351_v20 }
 0xa50   :  { %v8344_v15 = vpop.permute.xlu0 %8343  ;;  %v38249_v4 = vsub.f32 %v8351_v20, %v8356_v2 }
 0xa51   :  { %v8349_v34 = vsel %vm162_vm0, %v8344_v15, 0 }
 0xa52   :  { %v38238_v7 = vand.u32 4294901760, %v8349_v34 }
 0xa54   :  { %v38254_v33 = vsub.f32 %v8349_v34, %v38238_v7 }
 0xa56   :  { %v8424_v58 = vand.u32 4294901760, %v38254_v33 }
 0xa58   :  { %v8425_v18 = vsub.f32 %v38254_v33, %v8424_v58 }
 0xa5a   :  { %v8426_v35 = vand.u32 4294901760, %v8425_v18 }
 0xa8c   :  { %v7397_v10 = vpop.xlane.xlu1 %7396 }
 0xa8d   :  { %36823 = vrcp.f32 %v7397_v10  ;;  %v8819_v10 = vpop.permute.xlu0 %8818 }
 0xa97   :  { %v36824_v29 = vpop.eup %36823 }
 0xa98   :  { %v7402_v31 = vmul.f32 %v36824_v29, %v36820_v16  ;;  %v8435_v16 = vand.u32 4294901760, %v38249_v4 }
 0xa9a   :  { %v7413_v59 = vsel %vm2524_vm2, %v7402_v31, 0  ;;  %v8436_v22 = vsub.f32 %v38249_v4, %v8435_v16 }
 0xa9b   :  { %v7482_v63 = vand.u32 4294901760, %v7413_v59 }
 0xa9d   :  { %v7483_v51 = vsub.f32 %v7413_v59, %v7482_v63 }
 0xa9f   :  { %v7484_v6 = vand.u32 4294901760, %v7483_v51 }
 0xaa1   :  { %v7485_v55 = vsub.f32 %v7483_v51, %v7484_v6 }
 0xaa3   :  { %v7486_v46 = vand.u32 4294901760, %v7485_v55 }
 0xaa5   :  { %32012 = vmatmul.mubr.f32.vlgmr.msra.gmra.mrb[16].mxu0 %v7486_v46 }
 0xaa6   :  { %34760 = vmatpush3.bf16.msra.mxu0 %v34759_v50  ;;  %32018 = vmatprep.mubr.msk.f32.mxu0 %vm37171_vm1, %v40979_v54 }
 0xaa7   :  { %34761 = vmatprep.subr.bf16.mxu0 %v40981_v8 }
 0xaad   :  { %32019 = vmatmul.mubr.f32.vlgmr.msra.gmra.mrb[16].mxu0 %v7482_v63 }
 0xaae   :  { %34763 = vmatpush3.bf16.msra.mxu0 %v34762_v43  ;;  %32025 = vmatprep.mubr.msk.f32.mxu0 %vm37171_vm1, %v40979_v54  ;;  %v8437_v43 = vand.u32 4294901760, %v8436_v22 }
 0xaaf   :  { %34764 = vmatprep.subr.bf16.mxu0 %v40981_v8 }
 0xab5   :  { %32026 = vmatmul.mubr.f32.vlgmr.msra.gmra.mrb[16].mxu0 %v7483_v51 }
 0xab6   :  { %34766 = vmatpush3.bf16.msra.mxu0 %v38207_v25  ;;  %32032 = vmatprep.mubr.msk.f32.mxu0 %vm37171_vm1, %v40979_v54 }
 0xab7   :  { %34767 = vmatprep.subr.bf16.mxu0 %v40981_v8 }
 0xabc   :  { %v7400_v12 = vpop.xlane.xlu1 %7399 }
 0xabd   :  { %36825 = vrcp.f32 %v7400_v12  ;;  %32033 = vmatmul.mubr.f32.vlgmr.msra.gmra.mrb[16].mxu0 %v7484_v6 }
 0xabe   :  { %34769 = vmatpush3.bf16.msra.mxu0 %v34768_v26  ;;  %32039 = vmatprep.mubr.msk.f32.mxu0 %vm37171_vm1, %v40979_v54 }
 0xabf   :  { %34770 = vmatprep.subr.bf16.mxu0 %v40981_v8 }
 0xac0   :  { %v7878_v23 = vpop.permute.xlu1 %7877 }
 0xac1   :  { %v7888_v39 = vand.u32 4294901760, %v7878_v23 }
 0xac3   :  { %v38236_v14 = vpack.c.bf16 %v7888_v39, %v7885_v24  ;;  %v38240_v17 = vsub.f32 %v7878_v23, %v7888_v39 }
 0xac4   :  { %v8348_v37 = vpop.permute.xlu1 %8347 }
 0xac5   :  { %v8353_v19 = vsel %vm162_vm0, %v8348_v37, 0  ;;  %32040 = vmatmul.mubr.f32.vlgmr.msra.gmra.mrb[16].mxu0 %v7482_v63  ;;  %34775 = vmatpush3.bf16.msra.mxu1 %v38236_v14  ;;  %v7971_v9 = vand.u32 4294901760, %v38240_v17 }
 0xac6   :  { %v8359_v45 = vand.u32 4294901760, %v8353_v19  ;;  %34772 = vmatpush3.bf16.msra.mxu0 %v38207_v25  ;;  %32046 = vmatprep.mubr.msk.f32.mxu0 %vm37171_vm1, %v40979_v54 }
 0xac7   :  { %v36826_v13 = vpop.eup %36825  ;;  %34791 = vmatprep.subr.bf16.mxu0 %v40981_v8  ;;  %34776 = vmatprep.subr.bf16.mxu1 %v40981_v8  ;;  %v7972_v11 = vsub.f32 %v38240_v17, %v7971_v9  ;;  %v34786_v28 = vpack.c.bf16 %v7971_v9, %v7964_v30 }
 0xac8   :  { %v7404_v57 = vmul.f32 %v36826_v13, %v36822_v1  ;;  %v8441_v52 = vsub.f32 %v8353_v19, %v8359_v45  ;;  %v38264_v21 = vpack.c.bf16 %v8359_v45, %v8356_v2  ;;  %v34780_v1 = vpack.c.bf16 %v38240_v17, %v38244_v48  ;;  %v8817_v56 = vpop.permute.xlu1 %8816 }
 0xac9   :  { %v7973_v25 = vand.u32 4294901760, %v7972_v11  ;;  %v8822_v31 = vsel %vm162_vm0, %v8817_v56, 0 }
 0xaca   :  { %v8442_v61 = vand.u32 4294901760, %v8441_v52  ;;  %v7882_v3 = vsel %vm2524_vm2, %v7404_v57, 0  ;;  %v34798_v50 = vpack.c.bf16 %v8441_v52, %v38249_v4  ;;  %v8827_v51 = vand.u32 4294901760, %v8822_v31 }
 0xacb   :  { %v38260_v0 = vand.u32 4294901760, %v7882_v3  ;;  %v34777_v26 = vpack.c.bf16 %v7973_v25, %v7966_v36 }
 0xacc   :  { %v8443_v60 = vsub.f32 %v8441_v52, %v8442_v61  ;;  %v34804_v29 = vpack.c.bf16 %v8442_v61, %v8435_v16  ;;  %v8815_v59 = vpop.permute.xlu1 %8814  ;;  %v8905_v41 = vsub.f32 %v8822_v31, %v8827_v51 }
 0xacd   :  { %32047 = vmatmul.mubr.f32.vlgmr.msra.gmra.mrb[16].mxu0 %v7482_v63  ;;  %v7952_v44 = vsub.f32 %v7882_v3, %v38260_v0  ;;  %v8824_v63 = vsel %vm162_vm0, %v8819_v10, 0  ;;  %v8820_v6 = vsel %vm162_vm0, %v8815_v59, 0 }
 0xace   :  { %32095 = vmatprep.mubr.msk.f32.mxu0 %vm37171_vm1, %v40979_v54  ;;  %v8444_v27 = vand.u32 4294901760, %v8443_v60  ;;  %v8830_v55 = vand.u32 4294901760, %v8824_v63  ;;  %v8893_v46 = vand.u32 4294901760, %v8820_v6  ;;  %v8906_v20 = vand.u32 4294901760, %v8905_v41 }
 0xacf   :  { %34793 = vmatpush3.bf16.xpose.msra.mxu0 %v38264_v21  ;;  %v7953_v38 = vand.u32 4294901760, %v7952_v44 }
 0xad0   :  { %34794 = vmatprep.subr.bf16.mxu0 %v40981_v8  ;;  %v34795_v62 = vpack.c.bf16 %v8444_v27, %v8437_v43  ;;  %v8912_v12 = vsub.f32 %v8824_v63, %v8830_v55  ;;  %v8894_v15 = vsub.f32 %v8820_v6, %v8893_v46  ;;  %v34810_v34 = vpack.c.bf16 %v8830_v55, %v8827_v51 }
 0xad1   :  { %v7954_v40 = vsub.f32 %v7952_v44, %v7953_v38  ;;  %v8907_v39 = vsub.f32 %v8905_v41, %v8906_v20 }
 0xad2   :  { %v8913_v23 = vand.u32 4294901760, %v8912_v12  ;;  %v8895_v24 = vand.u32 4294901760, %v8894_v15 }
 0xad3   :  { %v7955_v42 = vand.u32 4294901760, %v7954_v40  ;;  %v8908_v17 = vand.u32 4294901760, %v8907_v39 }
 0xad4   :  { %v8914_v2 = vsub.f32 %v8912_v12, %v8913_v23  ;;  %v34822_v45 = vpack.c.bf16 %v8913_v23, %v8906_v20 }
 0xad5   :  { %32054 = vmatmul.mubr.f32.vlgmr.msra.gmra.mrb[26].mxu1 %v7955_v42 }
 0xad6   :  { %34778 = vmatpush3.bf16.msra.mxu1 %v34777_v26  ;;  %32096 = vmatmul.mubr.f32.vlgmr.msra.gmra.mrb[18].mxu0 %v8426_v35  ;;  %v8915_v37 = vand.u32 4294901760, %v8914_v2 }
 0xad7   :  { %34796 = vmatpush3.bf16.xpose.msra.mxu0 %v34795_v62  ;;  %32060 = vmatprep.mubr.msk.f32.mxu1 %vm37171_vm1, %v40979_v54 }
 0xad8   :  { %34779 = vmatprep.subr.bf16.mxu1 %v40981_v8  ;;  %32102 = vmatprep.mubr.msk.f32.mxu0 %vm37171_vm1, %v40979_v54  ;;  %v34813_v48 = vpack.c.bf16 %v8915_v37, %v8908_v17 }
 0xad9   :  { %34797 = vmatprep.subr.bf16.mxu0 %v40981_v8 }
 0xadd   :  { %32061 = vmatmul.mubr.f32.vlgmr.msra.gmra.mrb[26].mxu1 %v38260_v0 }
 0xade   :  { %34781 = vmatpush3.bf16.msra.mxu1 %v34780_v1  ;;  %32103 = vmatmul.mubr.f32.vlgmr.msra.gmra.mrb[18].mxu0 %v38238_v7 }
 0xadf   :  { %34799 = vmatpush3.bf16.xpose.msra.mxu0 %v34798_v50  ;;  %32067 = vmatprep.mubr.msk.f32.mxu1 %vm37171_vm1, %v40979_v54 }
 0xae0   :  { %34782 = vmatprep.subr.bf16.mxu1 %v40981_v8  ;;  %32109 = vmatprep.mubr.msk.f32.mxu0 %vm37171_vm1, %v40979_v54 }
 0xae1   :  { %34800 = vmatprep.subr.bf16.mxu0 %v40981_v8 }
 0xae5   :  { %32068 = vmatmul.mubr.f32.vlgmr.msra.gmra.mrb[26].mxu1 %v7952_v44 }
 0xae6   :  { %34784 = vmatpush3.bf16.msra.mxu1 %v38236_v14  ;;  %32110 = vmatmul.mubr.f32.vlgmr.msra.gmra.mrb[18].mxu0 %v38254_v33 }
 0xae7   :  { %34802 = vmatpush3.bf16.xpose.msra.mxu0 %v38264_v21  ;;  %32074 = vmatprep.mubr.msk.f32.mxu1 %vm37171_vm1, %v40979_v54 }
 0xae8   :  { %34785 = vmatprep.subr.bf16.mxu1 %v40981_v8  ;;  %32116 = vmatprep.mubr.msk.f32.mxu0 %vm37171_vm1, %v40979_v54 }
 0xae9   :  { %34803 = vmatprep.subr.bf16.mxu0 %v40981_v8 }
 0xaed   :  { %32075 = vmatmul.mubr.f32.vlgmr.msra.gmra.mrb[26].mxu1 %v7953_v38 }
 0xaee   :  { %34787 = vmatpush3.bf16.msra.mxu1 %v34786_v28  ;;  %32117 = vmatmul.mubr.f32.vlgmr.msra.gmra.mrb[18].mxu0 %v8424_v58 }
 0xaef   :  { %34805 = vmatpush3.bf16.xpose.msra.mxu0 %v34804_v29  ;;  %32081 = vmatprep.mubr.msk.f32.mxu1 %vm37171_vm1, %v40979_v54 }
 0xaf0   :  { %34788 = vmatprep.subr.bf16.mxu1 %v40981_v8  ;;  %32123 = vmatprep.mubr.msk.f32.mxu0 %vm37171_vm1, %v40979_v54 }
 0xaf1   :  { %34806 = vmatprep.subr.bf16.mxu0 %v40981_v8 }
 0xaf5   :  { %32082 = vmatmul.mubr.f32.vlgmr.msra.gmra.mrb[26].mxu1 %v38260_v0 }
 0xaf6   :  { %34790 = vmatpush3.bf16.msra.mxu1 %v38236_v14  ;;  %32124 = vmatmul.mubr.f32.vlgmr.msra.gmra.mrb[18].mxu0 %v38238_v7  ;;  %v8896_v14 = vsub.f32 %v8894_v15, %v8895_v24 }
 0xaf7   :  { %34808 = vmatpush3.bf16.xpose.msra.mxu0 %v38264_v21  ;;  %32088 = vmatprep.mubr.msk.f32.mxu1 %vm37171_vm1, %v40979_v54 }
 0xaf8   :  { %32130 = vmatprep.mubr.msk.f32.mxu0 %vm37171_vm1, %v40979_v54  ;;  %34809 = vmatprep.subr.bf16.mxu1 %v40981_v8  ;;  %v8897_v19 = vand.u32 4294901760, %v8896_v14 }
 0xaf9   :  { %34827 = vmatprep.subr.bf16.mxu0 %v40981_v8 }
 0xafd   :  { %32089 = vmatmul.mubr.f32.vlgmr.msra.gmra.mrb[26].mxu1 %v38260_v0 }
 0xafe   :  { %32131 = vmatmul.mubr.f32.vlgmr.msra.gmra.mrb[18].mxu0 %v38238_v7  ;;  %32137 = vmatprep.mubr.msk.f32.mxu1 %vm37171_vm1, %v40979_v54  ;;  %v34816_v7 = vpack.c.bf16 %v8912_v12, %v8905_v41 }
 0xaff   :  { %34811 = vmatpush3.bf16.xpose.msra.mxu1 %v34810_v34  ;;  %32179 = vmatprep.mubr.msk.f32.mxu0 %vm37171_vm1, %v40979_v54 }
 0xb00   :  { %34812 = vmatprep.subr.bf16.mxu1 %v40981_v8 }
 0xb06   :  { %32138 = vmatmul.mubr.f32.vlgmr.msra.gmra.mrb[28].mxu1 %v8897_v19 }
 0xb07   :  { %34814 = vmatpush3.bf16.xpose.msra.mxu1 %v34813_v48  ;;  %32144 = vmatprep.mubr.msk.f32.mxu1 %vm37171_vm1, %v40979_v54 }
 0xb08   :  { %34815 = vmatprep.subr.bf16.mxu1 %v40981_v8 }
 0xb0e   :  { %32145 = vmatmul.mubr.f32.vlgmr.msra.gmra.mrb[28].mxu1 %v8893_v46 }
 0xb0f   :  { %34817 = vmatpush3.bf16.xpose.msra.mxu1 %v34816_v7  ;;  %32151 = vmatprep.mubr.msk.f32.mxu1 %vm37171_vm1, %v40979_v54 }
 0xb10   :  { %34818 = vmatprep.subr.bf16.mxu1 %v40981_v8 }
 0xb16   :  { %32152 = vmatmul.mubr.f32.vlgmr.msra.gmra.mrb[28].mxu1 %v8894_v15 }
 0xb17   :  { %34820 = vmatpush3.bf16.xpose.msra.mxu1 %v34810_v34  ;;  %32158 = vmatprep.mubr.msk.f32.mxu1 %vm37171_vm1, %v40979_v54 }
 0xb18   :  { %34821 = vmatprep.subr.bf16.mxu1 %v40981_v8 }
 0xb1e   :  { %32159 = vmatmul.mubr.f32.vlgmr.msra.gmra.mrb[28].mxu1 %v8895_v24 }
 0xb1f   :  { %34823 = vmatpush3.bf16.xpose.msra.mxu1 %v34822_v45  ;;  %32165 = vmatprep.mubr.msk.f32.mxu1 %vm37171_vm1, %v40979_v54 }
 0xb20   :  { %34824 = vmatprep.subr.bf16.mxu1 %v40981_v8 }
 0xb26   :  { %32166 = vmatmul.mubr.f32.vlgmr.msra.gmra.mrb[28].mxu1 %v8893_v46 }
 0xb27   :  { %34826 = vmatpush3.bf16.xpose.msra.mxu1 %v34810_v34  ;;  %32172 = vmatprep.mubr.msk.f32.mxu1 %vm37171_vm1, %v40979_v54 }
 0xb28   :  { %34845 = vmatprep.subr.bf16.mxu1 %v40981_v8 }
 0xb2e   :  { %32173 = vmatmul.mubr.f32.vlgmr.msra.gmra.mrb[28].mxu1 %v8893_v46 }
 0xb2f   :  { %32221 = vmatprep.mubr.msk.f32.mxu1 %vm37171_vm1, %v40979_v54 }
 0xba0   :  { %v38343_v13 = vpop.f32.mrb[16].mxu0 }
 0xba1   :  { %v32048_v4 = vpop.f32.mrb[17].mxu0 }
 0xbd0   :  { %v38345_v33 = vpop.f32.mrb[26].mxu1 }
 0xbd1   :  { %v8810_v57 = vpop.f32.mrb[18].mxu0  ;;  %v32090_v9 = vpop.f32.mrb[27].mxu1 }
 0xbd2   :  { %v9285_v52 = vmul.f32 0.17677669, %v8810_v57  ;;  %v32132_v30 = vpop.f32.mrb[19].mxu0 }
 0xbd4   :  { %v9287_v61 = vsel %vm2524_vm2, %v9285_v52, -inf }
 0xbd5   :  { %9288 = vmax.xlane.f32.xlu0 %v9287_v61 }
 0xc01   :  { %v9281_v3 = vpop.f32.mrb[28].mxu1 }
 0xc02   :  { %v9286_v16 = vmul.f32 0.17677669, %v9281_v3  ;;  %v32174_v0 = vpop.f32.mrb[29].mxu1 }
 0xc04   :  { %v9290_v58 = vsel %vm2524_vm2, %v9286_v16, -inf }
 0xc05   :  { %9291 = vmax.xlane.f32.xlu1 %v9290_v58  ;;  %v1568_v58 = vld [vmem:[#allocation8 + $0x20] sm:$0xff] }
 0xc16   :  { %9311 = vrot.lane.b32.xlu1 %v37729_v47, %s37172_s5 }
 0xc1a   :  { %9777 = vrot.lane.b32.xlu1 %v37745_v32, %s37172_s5 }
 0xc1e   :  { %9779 = vrot.lane.b32.xlu1 %v37739_v53, %s37172_s5 }
 0xc62   :  { %v9289_v11 = vpop.xlane.xlu0 %9288 }
 0xc63   :  { %v9293_v21 = vsub.f32 %v9285_v52, %v9289_v11  ;;  %v1569_v11 = vld [vmem:[#allocation8 + $0x28] sm:$0xff] }
 0xc65   :  { %v9295_v60 = vmul.f32 1.442695, %v9293_v21  ;;  %v10246_v21 = vsel %vm162_vm0, %v38343_v13, 0  ;;  %v10249_v13 = vsel %vm162_vm0, %v38345_v33, 0 }
 0xc67   :  { %36827 = vpow2.f32 %v9295_v60  ;;  %v10252_v60 = vand.u32 4294901760, %v1568_v58 }
 0xc71   :  { %v36828_v44 = vpop.eup %36827 }
 0xc72   :  { %v9299_v5 = vsel %vm2524_vm2, %v36828_v44, 0.0 }
 0xc73   :  { %9300 = vadd.xlane.f32.xlu0 %v9299_v5  ;;  %v38413_v5 = vand.u32 4294901760, %v10246_v21 }
 0xc92   :  { %v9292_v22 = vpop.xlane.xlu1 %9291 }
 0xc93   :  { %v9294_v38 = vsub.f32 %v9286_v16, %v9292_v22 }
 0xc95   :  { %v9297_v18 = vmul.f32 1.442695, %v9294_v38  ;;  %v1570_v38 = vld [vmem:[#allocation8 + $0x30] sm:$0xff] }
 0xc96   :  { %v9312_v25 = vpop.permute.xlu1 %9311 }
 0xc97   :  { %36829 = vpow2.f32 %v9297_v18  ;;  %v9322_v46 = vand.u32 4294901760, %v9312_v25  ;;  %v1571_v18 = vld [vmem:[#allocation8 + $0x38] sm:$0xff] }
 0xc99   :  { %v9404_v15 = vsub.f32 %v9312_v25, %v9322_v46  ;;  %v10258_v25 = vand.u32 4294901760, %v1570_v38 }
 0xc9a   :  { %v9778_v47 = vpop.permute.xlu1 %9777 }
 0xc9b   :  { %v9787_v27 = vand.u32 4294901760, %v9778_v47  ;;  %v9405_v24 = vand.u32 4294901760, %v9404_v15 }
 0xc9d   :  { %v38356_v40 = vsub.f32 %v9778_v47, %v9787_v27  ;;  %v9406_v14 = vsub.f32 %v9404_v15, %v9405_v24  ;;  %v10261_v47 = vand.u32 4294901760, %v1571_v18 }
 0xc9e   :  { %v9780_v32 = vpop.permute.xlu1 %9779 }
 0xc9f   :  { %v9866_v53 = vand.u32 4294901760, %v38356_v40  ;;  %v9790_v36 = vand.u32 4294901760, %v9780_v32  ;;  %v9407_v45 = vand.u32 4294901760, %v9406_v14  ;;  %v1577_v14 = vld [vmem:[#allocation8 + $0x68] sm:$0xff] }
 0xca1   :  { %v36830_v43 = vpop.eup %36829  ;;  %v38359_v42 = vpack.c.bf16 %v9790_v36, %v9787_v27  ;;  %v38361_v26 = vsub.f32 %v9780_v32, %v9790_v36  ;;  %v9867_v62 = vsub.f32 %v38356_v40, %v9866_v53  ;;  %v38421_v27 = vsub.f32 %v1568_v58, %v10252_v60 }
 0xca2   :  { %v9302_v35 = vsel %vm2524_vm2, %v36830_v43, 0.0  ;;  %v38426_v32 = vsub.f32 %v10246_v21, %v38413_v5 }
 0xca3   :  { %v9873_v1 = vand.u32 4294901760, %v38361_v26  ;;  %v34852_v50 = vpack.c.bf16 %v38361_v26, %v38356_v40  ;;  %9303 = vadd.xlane.f32.xlu0 %v9302_v35  ;;  %34847 = vmatpush3.bf16.msra.mxu1 %v38359_v42  ;;  %v9868_v10 = vand.u32 4294901760, %v9867_v62  ;;  %v10343_v36 = vand.u32 4294901760, %v38421_v27 }
 0xca4   :  { %34848 = vmatprep.subr.bf16.mxu1 %v40981_v8  ;;  %v10363_v35 = vsub.f32 %v1571_v18, %v10261_v47  ;;  %v10322_v62 = vand.u32 4294901760, %v38426_v32 }
 0xca5   :  { %v9874_v56 = vsub.f32 %v38361_v26, %v9873_v1  ;;  %v38371_v28 = vpack.c.bf16 %v9873_v1, %v9866_v53  ;;  %v38428_v53 = vand.u32 4294901760, %v10249_v13  ;;  %v38438_v26 = vsub.f32 %v1570_v38, %v10258_v25 }
 0xca7   :  { %v9875_v29 = vand.u32 4294901760, %v9874_v56  ;;  %v10331_v1 = vsub.f32 %v10249_v13, %v38428_v53 }
 0xca9   :  { %v34849_v31 = vpack.c.bf16 %v9875_v29, %v9868_v10  ;;  %v10357_v10 = vand.u32 4294901760, %v38438_v26  ;;  %v10364_v29 = vand.u32 4294901760, %v10363_v35 }
 0xcb9   :  { %9309 = vrot.lane.b32.xlu0 %v37733_v49, %s37172_s5 }
 0xd00   :  { %v9301_v59 = vpop.xlane.xlu0 %9300 }
 0xd01   :  { %36831 = vrcp.f32 %v9301_v59  ;;  %v10332_v59 = vand.u32 4294901760, %v10331_v1 }
 0xd0b   :  { %v36832_v63 = vpop.eup %36831 }
 0xd0c   :  { %v9306_v51 = vmul.f32 %v36832_v63, %v36828_v44  ;;  %v10255_v44 = vand.u32 4294901760, %v1569_v11  ;;  %v34867_v63 = vpack.c.bf16 %v10261_v47, %v10258_v25 }
 0xd0e   :  { %v9316_v6 = vsel %vm2524_vm2, %v9306_v51, 0  ;;  %v38423_v40 = vsub.f32 %v1569_v11, %v10255_v44  ;;  %v38431_v33 = vpack.c.bf16 %v10255_v44, %v10252_v60 }
 0xd0f   :  { %v38376_v55 = vand.u32 4294901760, %v9316_v6 }
 0xd11   :  { %v9386_v41 = vsub.f32 %v9316_v6, %v38376_v55 }
 0xd13   :  { %v9387_v20 = vand.u32 4294901760, %v9386_v41 }
 0xd15   :  { %v9388_v39 = vsub.f32 %v9386_v41, %v9387_v20 }
 0xd17   :  { %v9389_v37 = vand.u32 4294901760, %v9388_v39  ;;  %v34883_v39 = vpack.c.bf16 %v10363_v35, %v38438_v26 }
 0xd30   :  { %v9304_v12 = vpop.xlane.xlu0 %9303 }
 0xd31   :  { %36833 = vrcp.f32 %v9304_v12 }
 0xd34   :  { %v9310_v23 = vpop.permute.xlu0 %9309 }
 0xd35   :  { %v9319_v34 = vand.u32 4294901760, %v9310_v23 }
 0xd37   :  { %v38379_v49 = vpack.c.bf16 %v9322_v46, %v9319_v34  ;;  %v9397_v2 = vsub.f32 %v9310_v23, %v9319_v34  ;;  %v10358_v46 = vsub.f32 %v38438_v26, %v10357_v10 }
 0xd39   :  { %v9398_v17 = vand.u32 4294901760, %v9397_v2  ;;  %34829 = vmatpush3.bf16.msra.mxu0 %v38379_v49  ;;  %v34834_v61 = vpack.c.bf16 %v9404_v15, %v9397_v2  ;;  %v10333_v15 = vsub.f32 %v10331_v1, %v10332_v59 }
 0xd3a   :  { %34830 = vmatprep.subr.bf16.mxu0 %v40981_v8 }
 0xd3b   :  { %v36834_v19 = vpop.eup %36833  ;;  %v9399_v48 = vsub.f32 %v9397_v2, %v9398_v17  ;;  %v34840_v22 = vpack.c.bf16 %v9405_v24, %v9398_v17  ;;  %v10334_v24 = vand.u32 4294901760, %v10333_v15  ;;  %v1576_v2 = vld [vmem:[#allocation8 + $0x60] sm:$0xff] }
 0xd3c   :  { %v9308_v7 = vmul.f32 %v36834_v19, %v36830_v43  ;;  %32180 = vmatmul.mubr.f32.vlgmr.msra.gmra.mrb[20].mxu0 %v9389_v37  ;;  %v10350_v43 = vand.u32 4294901760, %v38423_v40  ;;  %v10788_v17 = vand.u32 4294901760, %v1576_v2  ;;  %v10791_v37 = vand.u32 4294901760, %v1577_v14 }
 0xd3d   :  { %v9400_v4 = vand.u32 4294901760, %v9399_v48  ;;  %32186 = vmatprep.mubr.msk.f32.mxu0 %vm37171_vm1, %v40979_v54 }
 0xd3e   :  { %v9784_v57 = vsel %vm2524_vm2, %v9308_v7, 0  ;;  %v10351_v56 = vsub.f32 %v38423_v40, %v10350_v43  ;;  %v38478_v19 = vpack.c.bf16 %v10791_v37, %v10788_v17  ;;  %v10878_v48 = vsub.f32 %v1576_v2, %v10788_v17  ;;  %v11351_v17 = vld [vmem:[#allocation10 + $0x38] sm:$0xff] }
 0xd3f   :  { %v34831_v9 = vpack.c.bf16 %v9407_v45, %v9400_v4  ;;  %v38386_v52 = vand.u32 4294901760, %v9784_v57  ;;  %v10885_v7 = vsub.f32 %v1577_v14, %v10791_v37  ;;  %v1578_v45 = vld [vmem:[#allocation8 + $0x70] sm:$0xff]  ;;  %v1579_v4 = vld [vmem:[#allocation8 + $0x78] sm:$0xff] }
 0xd40   :  { %v10352_v6 = vand.u32 4294901760, %v10351_v56  ;;  %v11350_v14 = vld [vmem:[#allocation10 + $0x30] sm:$0xff] }
 0xd41   :  { %34832 = vmatpush3.bf16.msra.mxu0 %v34831_v9  ;;  %v38389_v30 = vsub.f32 %v9784_v57, %v38386_v52  ;;  %v10794_v57 = vand.u32 4294901760, %v1578_v45  ;;  %v10797_v9 = vand.u32 4294901760, %v1579_v4  ;;  %v34927_v47 = vpack.c.bf16 %v10885_v7, %v10878_v48 }
 0xd42   :  { %34833 = vmatprep.subr.bf16.mxu0 %v40981_v8  ;;  %v11386_v37 = vand.u32 4294901760, %v11350_v14 }
 0xd43   :  { %v9855_v3 = vand.u32 4294901760, %v38389_v30  ;;  %v10899_v58 = vsub.f32 %v1579_v4, %v10797_v9 }
 0xd44   :  { %32187 = vmatmul.mubr.f32.vlgmr.msra.gmra.mrb[20].mxu0 %v38376_v55 }
 0xd45   :  { %34835 = vmatpush3.bf16.msra.mxu0 %v34834_v61  ;;  %v9856_v16 = vsub.f32 %v38389_v30, %v9855_v3  ;;  %32193 = vmatprep.mubr.msk.f32.mxu0 %vm37171_vm1, %v40979_v54  ;;  %v38482_v61 = vpack.c.bf16 %v10797_v9, %v10794_v57  ;;  %v10900_v44 = vand.u32 4294901760, %v10899_v58 }
 0xd46   :  { %34836 = vmatprep.subr.bf16.mxu0 %v40981_v8 }
 0xd47   :  { %v9857_v0 = vand.u32 4294901760, %v9856_v16  ;;  %v10901_v38 = vsub.f32 %v10899_v58, %v10900_v44 }
 0xd49   :  { %32222 = vmatmul.mubr.f32.vlgmr.msra.gmra.mrb[30].mxu1 %v9857_v0  ;;  %v10892_v0 = vsub.f32 %v1578_v45, %v10794_v57  ;;  %v10902_v13 = vand.u32 4294901760, %v10901_v38  ;;  %v38513_v45 = vld [vmem:[#allocation10 + $0x48] sm:$0xff] }
 0xd4a   :  { %34850 = vmatpush3.bf16.msra.mxu1 %v34849_v31  ;;  %32228 = vmatprep.mubr.msk.f32.mxu1 %vm37171_vm1, %v40979_v54  ;;  %v10323_v31 = vsub.f32 %v38426_v32, %v10322_v62  ;;  %v11395_v57 = vand.u32 4294901760, %v38513_v45 }
 0xd4b   :  { %34851 = vmatprep.subr.bf16.mxu1 %v40981_v8  ;;  %v10893_v60 = vand.u32 4294901760, %v10892_v0 }
 0xd4c   :  { %32194 = vmatmul.mubr.f32.vlgmr.msra.gmra.mrb[20].mxu0 %v9386_v41  ;;  %v10365_v41 = vsub.f32 %v10363_v35, %v10364_v29  ;;  %v10324_v12 = vand.u32 4294901760, %v10323_v31 }
 0xd4d   :  { %34838 = vmatpush3.bf16.msra.mxu0 %v38379_v49  ;;  %32200 = vmatprep.mubr.msk.f32.mxu0 %vm37171_vm1, %v40979_v54 }
 0xd4e   :  { %34839 = vmatprep.subr.bf16.mxu0 %v40981_v8  ;;  %v10366_v23 = vand.u32 4294901760, %v10365_v41 }
 0xd51   :  { %32229 = vmatmul.mubr.f32.vlgmr.msra.gmra.mrb[30].mxu1 %v38386_v52 }
 0xd52   :  { %34853 = vmatpush3.bf16.msra.mxu1 %v34852_v50  ;;  %32235 = vmatprep.mubr.msk.f32.mxu1 %vm37171_vm1, %v40979_v54  ;;  %v10344_v50 = vsub.f32 %v38421_v27, %v10343_v36 }
 0xd53   :  { %34854 = vmatprep.subr.bf16.mxu1 %v40981_v8 }
 0xd54   :  { %32201 = vmatmul.mubr.f32.vlgmr.msra.gmra.mrb[20].mxu0 %v9387_v20  ;;  %v10345_v51 = vand.u32 4294901760, %v10344_v50 }
 0xd55   :  { %34841 = vmatpush3.bf16.msra.mxu0 %v34840_v22  ;;  %32207 = vmatprep.mubr.msk.f32.mxu0 %vm37171_vm1, %v40979_v54  ;;  %v10894_v22 = vsub.f32 %v10892_v0, %v10893_v60 }
 0xd56   :  { %34842 = vmatprep.subr.bf16.mxu0 %v40981_v8  ;;  %v34871_v20 = vpack.c.bf16 %v10352_v6, %v10345_v51  ;;  %v11344_v6 = vld [vmem:[#allocation10] sm:$0xff] }
 0xd57   :  { %v10895_v18 = vand.u32 4294901760, %v10894_v22  ;;  %v11368_v41 = vand.u32 4294901760, %v11344_v6 }
 0xd59   :  { %32236 = vmatmul.mubr.f32.vlgmr.msra.gmra.mrb[30].mxu1 %v38389_v30  ;;  %v10886_v30 = vand.u32 4294901760, %v10885_v7  ;;  %v34923_v25 = vpack.c.bf16 %v10902_v13, %v10895_v18  ;;  %v38553_v22 = vsub.f32 %v11344_v6, %v11368_v41 }
 0xd5a   :  { %34856 = vmatpush3.bf16.msra.mxu1 %v38359_v42  ;;  %32242 = vmatprep.mubr.msk.f32.mxu1 %vm37171_vm1, %v40979_v54 }
 0xd5b   :  { %34857 = vmatprep.subr.bf16.mxu1 %v40981_v8  ;;  %v10887_v16 = vsub.f32 %v10885_v7, %v10886_v30  ;;  %v38511_v7 = vld [vmem:[#allocation10 + $0x40] sm:$0xff] }
 0xd5c   :  { %32208 = vmatmul.mubr.f32.vlgmr.msra.gmra.mrb[20].mxu0 %v38376_v55  ;;  %v11392_v4 = vand.u32 4294901760, %v38511_v7 }
 0xd5d   :  { %34844 = vmatpush3.bf16.msra.mxu0 %v38379_v49  ;;  %32214 = vmatprep.mubr.msk.f32.mxu0 %vm37171_vm1, %v40979_v54  ;;  %v34899_v49 = vpack.c.bf16 %v10364_v29, %v10357_v10  ;;  %v10888_v21 = vand.u32 4294901760, %v10887_v16 }
 0xd5e   :  { %34864 = vmatprep.subr.bf16.mxu0 %v38431_v33  ;;  %v38519_v9 = vpack.c.bf16 %v11395_v57, %v11392_v4 }
 0xd61   :  { %32243 = vmatmul.mubr.f32.vlgmr.msra.gmra.mrb[30].mxu1 %v9855_v3 }
 0xd62   :  { %34859 = vmatpush3.bf16.msra.mxu1 %v38371_v28  ;;  %32249 = vmatprep.mubr.msk.f32.mxu1 %vm37171_vm1, %v40979_v54  ;;  %v10359_v28 = vand.u32 4294901760, %v10358_v46  ;;  %v11345_v46 = vld [vmem:[#allocation10 + $0x8] sm:$0xff] }
 0xd63   :  { %34860 = vmatprep.subr.bf16.mxu1 %v40981_v8 }
 0xd64   :  { %32215 = vmatmul.mubr.f32.vlgmr.msra.gmra.mrb[20].mxu0 %v38376_v55  ;;  %v34875_v34 = vpack.c.bf16 %v10366_v23, %v10359_v28  ;;  %v34879_v55 = vpack.c.bf16 %v38423_v40, %v38421_v27  ;;  %v34931_v27 = vpack.c.bf16 %v10899_v58, %v10892_v0  ;;  %v11347_v28 = vld [vmem:[#allocation10 + $0x18] sm:$0xff]  ;;  %v38535_v0 = vld [vmem:[#allocation10 + $0x60] sm:$0xff]  ;;  %v38537_v58 = vld [vmem:[#allocation10 + $0x68] sm:$0xff] }
 0xd65   :  { %34866 = vmatpush3.bf16.msra.mxu0 %v38431_v33  ;;  %32267 = vmatprep.mubr.f32.mxu0 %v10324_v12  ;;  %v11371_v12 = vand.u32 4294901760, %v11345_v46 }
 0xd66   :  { %34868 = vmatprep.subr.bf16.mxu0 %v34867_v63 }
 0xd67   :  { %v38497_v15 = vpack.c.bf16 %v11371_v12, %v11368_v41  ;;  %v38555_v38 = vsub.f32 %v11345_v46, %v11371_v12  ;;  %v38603_v46 = vsub.f32 %v11350_v14, %v11386_v37 }
 0xd69   :  { %34870 = vmatpush3.bf16.msra.mxu0 %v34867_v63  ;;  %32250 = vmatmul.mubr.f32.vlgmr.msra.gmra.mrb[30].mxu1 %v38386_v52 }
 0xd6a   :  { %34862 = vmatpush3.bf16.msra.mxu1 %v38359_v42  ;;  %34872 = vmatprep.subr.bf16.mxu0 %v34871_v20  ;;  %v34895_v42 = vpack.c.bf16 %v10350_v43, %v10343_v36 }
 0xd6b   :  { %32256 = vmatprep.mubr.msk.f32.mxu1 %vm37171_vm1, %v40979_v54  ;;  %34960 = vmatprep.subr.bf16.mxu1 %v38497_v15 }
 0xd6c   :  { %32268 = vmatmul.mubr.f32.vlgmr.msra.gmra.mrb[14].mxu0 %v10334_v24  ;;  %v11377_v24 = vand.u32 4294901760, %v11347_v28 }
 0xd6d   :  { %34874 = vmatpush3.bf16.msra.mxu0 %v34871_v20  ;;  %32278 = vmatprep.mubr.f32.mxu0 %v38413_v5  ;;  %v11346_v20 = vld [vmem:[#allocation10 + $0x10] sm:$0xff] }
 0xd6e   :  { %34876 = vmatprep.subr.bf16.mxu0 %v34875_v34  ;;  %v11374_v23 = vand.u32 4294901760, %v11346_v20 }
 0xd71   :  { %34878 = vmatpush3.bf16.msra.mxu0 %v34875_v34  ;;  %32257 = vmatmul.mubr.f32.vlgmr.msra.gmra.mrb[30].mxu1 %v38386_v52  ;;  %v10879_v52 = vand.u32 4294901760, %v10878_v48  ;;  %v38501_v34 = vpack.c.bf16 %v11377_v24, %v11374_v23 }
 0xd72   :  { %34880 = vmatprep.subr.bf16.mxu0 %v34879_v55  ;;  %34962 = vmatpush3.bf16.msra.mxu1 %v38497_v15 }
 0xd73   :  { %v10880_v3 = vsub.f32 %v10878_v48, %v10879_v52  ;;  %v34943_v40 = vpack.c.bf16 %v10886_v30, %v10879_v52  ;;  %34964 = vmatprep.subr.bf16.mxu1 %v38501_v34  ;;  %v38521_v52 = vld [vmem:[#allocation10 + $0x50] sm:$0xff]  ;;  %v38523_v30 = vld [vmem:[#allocation10 + $0x58] sm:$0xff] }
 0xd74   :  { %32279 = vmatmul.mubr.f32.vlgmr.msra.gmra.mrb[14].mxu0 %v38428_v53 }
 0xd75   :  { %34882 = vmatpush3.bf16.msra.mxu0 %v34879_v55  ;;  %32289 = vmatprep.mubr.f32.mxu0 %v38426_v32  ;;  %v10881_v11 = vand.u32 4294901760, %v10880_v3  ;;  %v34947_v32 = vpack.c.bf16 %v10900_v44, %v10893_v60  ;;  %v11348_v55 = vld [vmem:[#allocation10 + $0x20] sm:$0xff]  ;;  %v11401_v3 = vand.u32 4294901760, %v38523_v30  ;;  %v38549_v44 = vld [vmem:[#allocation10 + $0x70] sm:$0xff] }
 0xd76   :  { %34884 = vmatprep.subr.bf16.mxu0 %v34883_v39  ;;  %34966 = vmatpush3.bf16.msra.mxu1 %v38501_v34  ;;  %v11410_v18 = vand.u32 4294901760, %v38549_v44 }
 0xd79   :  { %34886 = vmatpush3.bf16.msra.mxu0 %v34883_v39  ;;  %v11349_v39 = vld [vmem:[#allocation10 + $0x28] sm:$0xff] }
 0xd7a   :  { %34888 = vmatprep.subr.bf16.mxu0 %v38431_v33 }
 0xd7c   :  { %32290 = vmatmul.mubr.f32.vlgmr.msra.gmra.mrb[14].mxu0 %v10331_v1 }
 0xd7d   :  { %34890 = vmatpush3.bf16.msra.mxu0 %v38431_v33  ;;  %32300 = vmatprep.mubr.f32.mxu0 %v10322_v62 }
 0xd7e   :  { %34892 = vmatprep.subr.bf16.mxu0 %v34867_v63 }
 0xd81   :  { %34894 = vmatpush3.bf16.msra.mxu0 %v34867_v63 }
 0xd82   :  { %34896 = vmatprep.subr.bf16.mxu0 %v34895_v42 }
 0xd84   :  { %32301 = vmatmul.mubr.f32.vlgmr.msra.gmra.mrb[14].mxu0 %v10332_v59 }
 0xd85   :  { %34898 = vmatpush3.bf16.msra.mxu0 %v34895_v42  ;;  %32311 = vmatprep.mubr.f32.mxu0 %v38413_v5  ;;  %v11380_v42 = vand.u32 4294901760, %v11348_v55 }
 0xd86   :  { %34900 = vmatprep.subr.bf16.mxu0 %v34899_v49 }
 0xd89   :  { %34902 = vmatpush3.bf16.msra.mxu0 %v34899_v49  ;;  %v11383_v49 = vand.u32 4294901760, %v11349_v39 }
 0xd8a   :  { %34904 = vmatprep.subr.bf16.mxu0 %v38431_v33 }
 0xd8b   :  { %v38505_v2 = vpack.c.bf16 %v11383_v49, %v11380_v42 }
 0xd8c   :  { %32312 = vmatmul.mubr.f32.vlgmr.msra.gmra.mrb[14].mxu0 %v38428_v53 }
 0xd8d   :  { %34906 = vmatpush3.bf16.msra.mxu0 %v38431_v33  ;;  %32322 = vmatprep.mubr.f32.mxu0 %v38413_v5  ;;  %v34919_v5 = vpack.c.bf16 %v10888_v21, %v10881_v11  ;;  %v11404_v11 = vand.u32 4294901760, %v38535_v0  ;;  %v11407_v21 = vand.u32 4294901760, %v38537_v58 }
 0xd8e   :  { %34908 = vmatprep.subr.bf16.mxu0 %v34867_v63  ;;  %34968 = vmatprep.subr.bf16.mxu1 %v38505_v2 }
 0xd8f   :  { %34970 = vmatpush3.bf16.msra.mxu1 %v38505_v2  ;;  %v38547_v60 = vpack.c.bf16 %v11407_v21, %v11404_v11 }
 0xd91   :  { %34910 = vmatpush3.bf16.msra.mxu0 %v34867_v63 }
 0xd92   :  { %34912 = vmatprep.subr.bf16.mxu0 %v38478_v19 }
 0xd94   :  { %32323 = vmatmul.mubr.f32.vlgmr.msra.gmra.mrb[14].mxu0 %v38428_v53 }
 0xd95   :  { %34914 = vmatpush3.bf16.msra.mxu0 %v38478_v19 }
 0xd96   :  { %34916 = vmatprep.subr.bf16.mxu0 %v38482_v61 }
 0xd99   :  { %34918 = vmatpush3.bf16.msra.mxu0 %v38482_v61 }
 0xd9a   :  { %34920 = vmatprep.subr.bf16.mxu0 %v34919_v5 }
 0xe37   :  { %v9773_v53 = vpop.f32.mrb[20].mxu0 }
 0xe38   :  { %v10782_v33 = vsel %vm162_vm0, %v9773_v53, 0  ;;  %v32216_v36 = vpop.f32.mrb[21].mxu0  ;;  %v38575_v53 = vsub.f32 %v11346_v20, %v11374_v23 }
 0xe39   :  { %v10856_v43 = vand.u32 4294901760, %v10782_v33 }
 0xe3b   :  { %v10857_v26 = vsub.f32 %v10782_v33, %v10856_v43  ;;  %v38577_v33 = vsub.f32 %v11347_v28, %v11377_v24  ;;  %v40992_v28 = vand.u32 4294901760, %v38603_v46 }
 0xe3d   :  { %v10858_v35 = vand.u32 4294901760, %v10857_v26 }
 0xe3f   :  { %v10859_v62 = vsub.f32 %v10857_v26, %v10858_v35 }
 0xe41   :  { %v10860_v1 = vand.u32 4294901760, %v10859_v62 }
 0xe43   :  { %32333 = vmatprep.mubr.f32.mxu0 %v10860_v1 }
 0xe44   :  { %v10241_v50 = vpop.f32.mrb[30].mxu1 }
 0xe45   :  { %v10785_v56 = vsel %vm162_vm0, %v10241_v50, 0  ;;  %v32258_v10 = vpop.f32.mrb[31].mxu1 }
 0xe46   :  { %v10866_v29 = vand.u32 4294901760, %v10785_v56  ;;  %v38593_v10 = vsub.f32 %v11349_v39, %v11383_v49  ;;  %v38622_v49 = vsub.f32 %v38513_v45, %v11395_v57 }
 0xe48   :  { %v10867_v31 = vsub.f32 %v10785_v56, %v10866_v29  ;;  %v38591_v56 = vsub.f32 %v11348_v55, %v11380_v42  ;;  %v11514_v55 = vsub.f32 %v38603_v46, %v40992_v28  ;;  %v38619_v42 = vsub.f32 %v38511_v7, %v11392_v4 }
 0xe49   :  { %v38644_v4 = vsub.f32 %v38523_v30, %v11401_v3  ;;  %v38661_v30 = vsub.f32 %v38537_v58, %v11407_v21  ;;  %v38677_v58 = vsub.f32 %v38549_v44, %v11410_v18 }
 0xe4a   :  { %v10868_v59 = vand.u32 4294901760, %v10867_v31 }
 0xe4c   :  { %v10869_v63 = vsub.f32 %v10867_v31, %v10868_v59 }
 0xe4e   :  { %v10870_v51 = vand.u32 4294901760, %v10869_v63  ;;  %v40993_v63 = vand.u32 4294901760, %v38593_v10 }
 0xe50   :  { %32334 = vmatmul.mubr.f32.vlgmr.msra.gmra.mrb[14].mxu0 %v10870_v51  ;;  %v11507_v12 = vsub.f32 %v38593_v10, %v40993_v63 }
 0xe51   :  { %34922 = vmatpush3.bf16.msra.mxu0 %v34919_v5  ;;  %32344 = vmatprep.mubr.f32.mxu0 %v10856_v43  ;;  %v38551_v5 = vld [vmem:[#allocation10 + $0x78] sm:$0xff] }
 0xe52   :  { %34924 = vmatprep.subr.bf16.mxu0 %v34923_v25  ;;  %v11413_v13 = vand.u32 4294901760, %v38551_v5  ;;  %v11508_v24 = vand.u32 4294901760, %v11507_v12  ;;  %v40985_v12 = vand.u32 4294901760, %v38661_v30 }
 0xe54   :  { %v38682_v21 = vsub.f32 %v38551_v5, %v11413_v13 }
 0xe55   :  { %34926 = vmatpush3.bf16.msra.mxu0 %v34923_v25  ;;  %v11471_v25 = vand.u32 4294901760, %v38553_v22 }
 0xe56   :  { %34928 = vmatprep.subr.bf16.mxu0 %v34927_v47 }
 0xe58   :  { %32345 = vmatmul.mubr.f32.vlgmr.msra.gmra.mrb[14].mxu0 %v10866_v29 }
 0xe59   :  { %34930 = vmatpush3.bf16.msra.mxu0 %v34927_v47  ;;  %32355 = vmatprep.mubr.f32.mxu0 %v10857_v26  ;;  %v11478_v47 = vand.u32 4294901760, %v38555_v38  ;;  %v11485_v26 = vand.u32 4294901760, %v38575_v53 }
 0xe5a   :  { %34932 = vmatprep.subr.bf16.mxu0 %v34931_v27 }
 0xe5b   :  { %v11486_v1 = vsub.f32 %v38575_v53, %v11485_v26 }
 0xe5d   :  { %34934 = vmatpush3.bf16.msra.mxu0 %v34931_v27  ;;  %v38567_v27 = vpack.c.bf16 %v11413_v13, %v11410_v18 }
 0xe5e   :  { %34936 = vmatprep.subr.bf16.mxu0 %v38478_v19 }
 0xe60   :  { %32356 = vmatmul.mubr.f32.vlgmr.msra.gmra.mrb[14].mxu0 %v10867_v31 }
 0xe61   :  { %34938 = vmatpush3.bf16.msra.mxu0 %v38478_v19  ;;  %32366 = vmatprep.mubr.f32.mxu0 %v10858_v35  ;;  %v40995_v35 = vand.u32 4294901760, %v38577_v33 }
 0xe62   :  { %34940 = vmatprep.subr.bf16.mxu0 %v38482_v61 }
 0xe63   :  { %v11493_v50 = vsub.f32 %v38577_v33, %v40995_v35 }
 0xe65   :  { %34942 = vmatpush3.bf16.msra.mxu0 %v38482_v61  ;;  %v11494_v31 = vand.u32 4294901760, %v11493_v50  ;;  %v40987_v50 = vand.u32 4294901760, %v38644_v4 }
 0xe66   :  { %34944 = vmatprep.subr.bf16.mxu0 %v34943_v40 }
 0xe68   :  { %32367 = vmatmul.mubr.f32.vlgmr.msra.gmra.mrb[14].mxu0 %v10868_v59  ;;  %v40994_v59 = vand.u32 4294901760, %v38591_v56 }
 0xe69   :  { %34946 = vmatpush3.bf16.msra.mxu0 %v34943_v40  ;;  %32377 = vmatprep.mubr.f32.mxu0 %v10856_v43  ;;  %v11472_v40 = vsub.f32 %v38553_v22, %v11471_v25 }
 0xe6a   :  { %34948 = vmatprep.subr.bf16.mxu0 %v34947_v32  ;;  %v11500_v6 = vsub.f32 %v38591_v56, %v40994_v59 }
 0xe6b   :  { %v11473_v36 = vand.u32 4294901760, %v11472_v40  ;;  %v40989_v40 = vand.u32 4294901760, %v38622_v49 }
 0xe6c   :  { %v11501_v20 = vand.u32 4294901760, %v11500_v6 }
 0xe6d   :  { %34950 = vmatpush3.bf16.msra.mxu0 %v34947_v32  ;;  %v11479_v32 = vsub.f32 %v38555_v38, %v11478_v47  ;;  %v11535_v7 = vsub.f32 %v38622_v49, %v40989_v40 }
 0xe6e   :  { %34952 = vmatprep.subr.bf16.mxu0 %v38478_v19  ;;  %v38624_v14 = vpack.c.bf16 %v11508_v24, %v11501_v20 }
 0xe70   :  { %32378 = vmatmul.mubr.f32.vlgmr.msra.gmra.mrb[14].mxu0 %v10866_v29 }
 0xe71   :  { %34954 = vmatpush3.bf16.msra.mxu0 %v38478_v19  ;;  %32388 = vmatprep.mubr.f32.mxu0 %v10856_v43  ;;  %v11389_v19 = vand.u32 4294901760, %v11351_v17  ;;  %v11480_v43 = vand.u32 4294901760, %v11479_v32 }
 0xe72   :  { %34956 = vmatprep.subr.bf16.mxu0 %v38482_v61 }
 0xe73   :  { %v38509_v48 = vpack.c.bf16 %v11389_v19, %v11386_v37  ;;  %v38583_v62 = vpack.c.bf16 %v11480_v43, %v11473_v36  ;;  %v38605_v41 = vsub.f32 %v11351_v17, %v11389_v19  ;;  %v11515_v17 = vand.u32 4294901760, %v11514_v55 }
 0xe74   :  { %v40990_v19 = vand.u32 4294901760, %v38619_v42  ;;  %v11536_v43 = vand.u32 4294901760, %v11535_v7 }
 0xe75   :  { %34958 = vmatpush3.bf16.msra.mxu0 %v38482_v61  ;;  %34972 = vmatprep.subr.bf16.mxu1 %v38509_v48  ;;  %v11398_v61 = vand.u32 4294901760, %v38521_v52  ;;  %v40991_v23 = vand.u32 4294901760, %v38605_v41 }
 0xe76   :  { %34974 = vmatpush3.bf16.msra.mxu1 %v38509_v48  ;;  %v11528_v36 = vsub.f32 %v38619_v42, %v40990_v19 }
 0xe77   :  { %34976 = vmatprep.subr.bf16.mxu1 %v38519_v9  ;;  %v38533_v16 = vpack.c.bf16 %v11401_v3, %v11398_v61  ;;  %v11521_v39 = vsub.f32 %v38605_v41, %v40991_v23  ;;  %v38639_v45 = vsub.f32 %v38521_v52, %v11398_v61  ;;  %v38656_v52 = vsub.f32 %v38535_v0, %v11404_v11 }
 0xe78   :  { %32389 = vmatmul.mubr.f32.vlgmr.msra.gmra.mrb[14].mxu0 %v10866_v29  ;;  %v11487_v29 = vand.u32 4294901760, %v11486_v1  ;;  %v11529_v57 = vand.u32 4294901760, %v11528_v36  ;;  %v11549_v61 = vsub.f32 %v38644_v4, %v40987_v50  ;;  %v11563_v11 = vsub.f32 %v38661_v30, %v40985_v12 }
 0xe79   :  { %12284 = vmatprep.mubr.f32.mxu0 %v40979_v54  ;;  %v11522_v37 = vand.u32 4294901760, %v11521_v39  ;;  %v40988_v1 = vand.u32 4294901760, %v38639_v45  ;;  %v40986_v6 = vand.u32 4294901760, %v38656_v52 }
 0xe7a   :  { %34978 = vmatpush3.bf16.msra.mxu1 %v38519_v9  ;;  %v38598_v51 = vpack.c.bf16 %v11494_v31, %v11487_v29  ;;  %v38648_v29 = vpack.c.bf16 %v11536_v43, %v11529_v57  ;;  %v11550_v20 = vand.u32 4294901760, %v11549_v61  ;;  %v11564_v39 = vand.u32 4294901760, %v11563_v11 }
 0xe7b   :  { %34980 = vmatprep.subr.bf16.mxu1 %v38533_v16  ;;  %v38628_v32 = vpack.c.bf16 %v11522_v37, %v11515_v17  ;;  %v11542_v31 = vsub.f32 %v38639_v45, %v40988_v1  ;;  %v11556_v0 = vsub.f32 %v38656_v52, %v40986_v6  ;;  %v40984_v17 = vand.u32 4294901760, %v38677_v58 }
 0xe7c   :  { %v40983_v37 = vand.u32 4294901760, %v38682_v21  ;;  %v35023_v57 = vpack.c.bf16 %v38555_v38, %v38553_v22  ;;  %v38700_v43 = vpack.c.bf16 %v38577_v33, %v38575_v53  ;;  %v38708_v61 = vpack.c.bf16 %v38605_v41, %v38603_v46 }
 0xe7d   :  { %v11543_v3 = vand.u32 4294901760, %v11542_v31  ;;  %v11557_v55 = vand.u32 4294901760, %v11556_v0  ;;  %v11570_v44 = vsub.f32 %v38677_v58, %v40984_v17  ;;  %v38704_v31 = vpack.c.bf16 %v38593_v10, %v38591_v56 }
 0xe7e   :  { %34982 = vmatpush3.bf16.msra.mxu1 %v38533_v16  ;;  %v11577_v18 = vsub.f32 %v38682_v21, %v40983_v37  ;;  %v38720_v0 = vpack.c.bf16 %v38661_v30, %v38656_v52  ;;  %v38724_v11 = vpack.c.bf16 %v38682_v21, %v38677_v58  ;;  %v41026_v22 = vand.u32 4294901760, %v38591_v56 }
 0xe7f   :  { %34984 = vmatprep.subr.bf16.mxu1 %v38547_v60  ;;  %v38684_v24 = vpack.c.bf16 %v11550_v20, %v11543_v3  ;;  %v38688_v36 = vpack.c.bf16 %v11564_v39, %v11557_v55  ;;  %v11571_v5 = vand.u32 4294901760, %v11570_v44  ;;  %v38712_v3 = vpack.c.bf16 %v38622_v49, %v38619_v42  ;;  %v29931_v55 = vld [vmem:[%s40960_s6] ss:$0 sm:$0xff] }
 0xe80   :  { %v11578_v13 = vand.u32 4294901760, %v11577_v18  ;;  %v38716_v20 = vpack.c.bf16 %v38644_v4, %v38639_v45  ;;  %v41027_v38 = vand.u32 4294901760, %v38593_v10  ;;  %v41029_v53 = vand.u32 4294901760, %v38605_v41 }
 0xe81   :  { %v41032_v56 = vand.u32 4294901760, %v38639_v45  ;;  %v41033_v10 = vand.u32 4294901760, %v38644_v4  ;;  %v41035_v41 = vand.u32 4294901760, %v38661_v30 }
 0xe82   :  { %34986 = vmatpush3.bf16.msra.mxu1 %v38547_v60  ;;  %v35019_v7 = vpack.c.bf16 %v11578_v13, %v11571_v5 }
 0xe83   :  { %34988 = vmatprep.subr.bf16.mxu1 %v38567_v27 }
 0xe86   :  { %34990 = vmatpush3.bf16.msra.mxu1 %v38567_v27 }
 0xe87   :  { %34992 = vmatprep.subr.bf16.mxu1 %v38583_v62 }
 0xf4b   :  { %v32390_v39 = vpop.f32.mrb[14].mxu0 }
 0xf4c   :  { %v11325_v44 = vadd.f32 %v32390_v39, %v29931_v55  ;;  %v11305_v18 = vpop.f32.mrb[15].mxu0 }
 0xf4d   :  { %v11324_v5 = vadd.f32 %v29931_v55, %v11305_v18 }
 0xf4e   :  { %v11327_v13 = vmul.f32 %v11325_v44, %v11325_v44 }
 0xf4f   :  { %v11326_v54 = vmul.f32 %v11324_v5, %v11324_v5 }
 0xf50   :  { %v11329_v8 = vmul.f32 %v11327_v13, %v11325_v44 }
 0xf51   :  { %v11328_v37 = vmul.f32 %v11326_v54, %v11324_v5 }
 0xf52   :  { %v11331_v17 = vmul.f32 0.044715, %v11329_v8 }
 0xf53   :  { %v11330_v12 = vmul.f32 0.044715, %v11328_v37  ;;  %v37175_v37 = vmov 96  }
 0xf54   :  { %v11333_v6 = vadd.f32 %v11331_v17, %v11325_v44 }
 0xf55   :  { %v11332_v50 = vadd.f32 %v11330_v12, %v11324_v5 }
 0xf56   :  { %v11335_v1 = vmul.f32 0.7978846, %v11333_v6 }
 0xf57   :  { %v11334_v40 = vmul.f32 0.7978846, %v11332_v50 }
 0xf58   :  { %36835 = vtanh.f32 %v11335_v1 }
 0xf59   :  { %36837 = vtanh.f32 %v11334_v40 }
 0xf62   :  { %v36836_v19 = vpop.eup %36835 }
 0xf63   :  { %v36838_v23 = vpop.eup %36837  ;;  %v11339_v28 = vadd.f32 1.0, %v36836_v19 }
 0xf64   :  { %v11338_v63 = vadd.f32 1.0, %v36838_v23 }
 0xf65   :  { %v11341_v59 = vmul.f32 0.5, %v11339_v28 }
 0xf66   :  { %v11340_v39 = vmul.f32 0.5, %v11338_v63 }
 0xf67   :  { %v11343_v35 = vmul.f32 %v11341_v59, %v11325_v44 }
 0xf68   :  { %v11342_v55 = vmul.f32 %v11340_v39, %v11324_v5  ;;  %v36921_v5 = vld [vmem:[#allocation5] sm:$0xff] }
 0xf69   :  { %v38729_v18 = vand.u32 4294901760, %v11343_v35 }
 0xf6a   :  { %v38731_v13 = vand.u32 4294901760, %v11342_v55 }
 0xf6b   :  { %v38734_v54 = vsub.f32 %v11343_v35, %v38729_v18  ;;  %v35087_v35 = vpack.c.bf16 %v11478_v47, %v11471_v25  ;;  %v35095_v25 = vpack.c.bf16 %v41027_v38, %v41026_v22  ;;  %v41028_v47 = vand.u32 4294901760, %v38603_v46 }
 0xf6c   :  { %v11449_v8 = vsub.f32 %v11342_v55, %v38731_v13  ;;  %v41034_v46 = vand.u32 4294901760, %v38656_v52 }
 0xf6d   :  { %v11460_v1 = vand.u32 4294901760, %v38734_v54 }
 0xf6e   :  { %v11450_v40 = vand.u32 4294901760, %v11449_v8  ;;  %v35111_v50 = vpack.c.bf16 %v41035_v41, %v41034_v46  ;;  %v12188_v41 = vld [vmem:[#allocation7 + $0x60] sm:$0xff] }
 0xf6f   :  { %v11461_v23 = vsub.f32 %v38734_v54, %v11460_v1 }
 0xf70   :  { %v11451_v28 = vsub.f32 %v11449_v8, %v11450_v40 }
 0xf71   :  { %v11462_v59 = vand.u32 4294901760, %v11461_v23 }
 0xf72   :  { %v11452_v63 = vand.u32 4294901760, %v11451_v28 }
 0xf74   :  { %32423 = vmatprep.mubr.f32.mxu1 %v11452_v63 }
 0xf75   :  { %32424 = vmatmul.mubr.f32.vlgmr.msra.gmra.mrb[32].mxu1 %v11462_v59  ;;  %v36924_v59 = vld [vmem:[#allocation2 + $0x8] sm:$0xff] }
 0xf76   :  { %34994 = vmatpush3.bf16.msra.mxu1 %v38583_v62  ;;  %32458 = vmatprep.mubr.f32.mxu1 %v38731_v13  ;;  %v41025_v62 = vand.u32 4294901760, %v38577_v33  ;;  %v35099_v33 = vpack.c.bf16 %v41029_v53, %v41028_v47 }
 0xf77   :  { %34996 = vmatprep.subr.bf16.mxu1 %v38598_v51 }
 0xf7a   :  { %34998 = vmatpush3.bf16.msra.mxu1 %v38598_v51  ;;  %v35091_v51 = vpack.c.bf16 %v41025_v62, %v11485_v26  ;;  %v41030_v26 = vand.u32 4294901760, %v38619_v42  ;;  %v41036_v42 = vand.u32 4294901760, %v38677_v58 }
 0xf7b   :  { %35000 = vmatprep.subr.bf16.mxu1 %v38624_v14 }
 0xf7e   :  { %35002 = vmatpush3.bf16.msra.mxu1 %v38624_v14  ;;  %v41031_v14 = vand.u32 4294901760, %v38622_v49  ;;  %v41037_v49 = vand.u32 4294901760, %v38682_v21 }
 0xf7f   :  { %35004 = vmatprep.subr.bf16.mxu1 %v38628_v32 }
 0xf80   :  { %v35103_v19 = vpack.c.bf16 %v41031_v14, %v41030_v26 }
 0xf82   :  { %35006 = vmatpush3.bf16.msra.mxu1 %v38628_v32  ;;  %v35107_v32 = vpack.c.bf16 %v41033_v10, %v41032_v56  ;;  %v12189_v56 = vld [vmem:[#allocation7 + $0x68] sm:$0xff]  ;;  %v12192_v10 = vld [vmem:[#allocation7 + $0x80] sm:$0xff] }
 0xf83   :  { %35008 = vmatprep.subr.bf16.mxu1 %v38648_v29  ;;  %v12216_v46 = vand.u32 4294901760, %v12192_v10 }
 0xf86   :  { %35010 = vmatpush3.bf16.msra.mxu1 %v38648_v29  ;;  %v35115_v29 = vpack.c.bf16 %v41037_v49, %v41036_v42  ;;  %v12214_v42 = vand.u32 4294901760, %v12188_v41 }
 0xf87   :  { %35012 = vmatprep.subr.bf16.mxu1 %v38684_v24 }
 0xf8a   :  { %35014 = vmatpush3.bf16.msra.mxu1 %v38684_v24 }
 0xf8b   :  { %35016 = vmatprep.subr.bf16.mxu1 %v38688_v36 }
 0xf8e   :  { %35018 = vmatpush3.bf16.msra.mxu1 %v38688_v36 }
 0xf8f   :  { %35020 = vmatprep.subr.bf16.mxu1 %v35019_v7 }
 0xf92   :  { %35022 = vmatpush3.bf16.msra.mxu1 %v35019_v7 }
 0xf93   :  { %35024 = vmatprep.subr.bf16.mxu1 %v35023_v57 }
 0xf95   :  { %32459 = vmatmul.mubr.f32.vlgmr.msra.gmra.mrb[32].mxu1 %v38729_v18 }
 0xf96   :  { %35026 = vmatpush3.bf16.msra.mxu1 %v35023_v57  ;;  %32493 = vmatprep.mubr.f32.mxu1 %v11449_v8 }
 0xf97   :  { %35028 = vmatprep.subr.bf16.mxu1 %v38700_v43 }
 0xf9a   :  { %35030 = vmatpush3.bf16.msra.mxu1 %v38700_v43 }
 0xf9b   :  { %35032 = vmatprep.subr.bf16.mxu1 %v38704_v31 }
 0xf9e   :  { %35034 = vmatpush3.bf16.msra.mxu1 %v38704_v31 }
 0xf9f   :  { %35036 = vmatprep.subr.bf16.mxu1 %v38708_v61 }
 0xfa2   :  { %35038 = vmatpush3.bf16.msra.mxu1 %v38708_v61 }
 0xfa3   :  { %35040 = vmatprep.subr.bf16.mxu1 %v38712_v3 }
 0xfa6   :  { %35042 = vmatpush3.bf16.msra.mxu1 %v38712_v3 }
 0xfa7   :  { %35044 = vmatprep.subr.bf16.mxu1 %v38716_v20 }
 0xfaa   :  { %35046 = vmatpush3.bf16.msra.mxu1 %v38716_v20 }
 0xfab   :  { %35048 = vmatprep.subr.bf16.mxu1 %v38720_v0 }
 0xfae   :  { %35050 = vmatpush3.bf16.msra.mxu1 %v38720_v0 }
 0xfaf   :  { %35052 = vmatprep.subr.bf16.mxu1 %v38724_v11 }
 0xfb2   :  { %35054 = vmatpush3.bf16.msra.mxu1 %v38724_v11 }
 0xfb3   :  { %35056 = vmatprep.subr.bf16.mxu1 %v38497_v15 }
 0xfb5   :  { %32494 = vmatmul.mubr.f32.vlgmr.msra.gmra.mrb[32].mxu1 %v38734_v54 }
 0xfb6   :  { %35058 = vmatpush3.bf16.msra.mxu1 %v38497_v15  ;;  %32528 = vmatprep.mubr.f32.mxu1 %v11450_v40  ;;  %v36923_v40 = vld [vmem:[#allocation2] sm:$0xff] }
 0xfb7   :  { %35060 = vmatprep.subr.bf16.mxu1 %v38501_v34 }
 0xfba   :  { %35062 = vmatpush3.bf16.msra.mxu1 %v38501_v34 }
 0xfbb   :  { %35064 = vmatprep.subr.bf16.mxu1 %v38505_v2 }
 0xfbe   :  { %35066 = vmatpush3.bf16.msra.mxu1 %v38505_v2 }
 0xfbf   :  { %35068 = vmatprep.subr.bf16.mxu1 %v38509_v48 }
 0xfc2   :  { %35070 = vmatpush3.bf16.msra.mxu1 %v38509_v48 }
 0xfc3   :  { %35072 = vmatprep.subr.bf16.mxu1 %v38519_v9 }
 0xfc6   :  { %35074 = vmatpush3.bf16.msra.mxu1 %v38519_v9 }
 0xfc7   :  { %35076 = vmatprep.subr.bf16.mxu1 %v38533_v16 }
 0xfca   :  { %35078 = vmatpush3.bf16.msra.mxu1 %v38533_v16 }
 0xfcb   :  { %35080 = vmatprep.subr.bf16.mxu1 %v38547_v60 }
 0xfce   :  { %35082 = vmatpush3.bf16.msra.mxu1 %v38547_v60 }
 0xfcf   :  { %35084 = vmatprep.subr.bf16.mxu1 %v38567_v27 }
 0xfd2   :  { %35086 = vmatpush3.bf16.msra.mxu1 %v38567_v27 }
 0xfd3   :  { %35088 = vmatprep.subr.bf16.mxu1 %v35087_v35 }
 0xfd5   :  { %32529 = vmatmul.mubr.f32.vlgmr.msra.gmra.mrb[32].mxu1 %v11460_v1 }
 0xfd6   :  { %35090 = vmatpush3.bf16.msra.mxu1 %v35087_v35  ;;  %32563 = vmatprep.mubr.f32.mxu1 %v38731_v13 }
 0xfd7   :  { %35092 = vmatprep.subr.bf16.mxu1 %v35091_v51 }
 0xfda   :  { %35094 = vmatpush3.bf16.msra.mxu1 %v35091_v51 }
 0xfdb   :  { %35096 = vmatprep.subr.bf16.mxu1 %v35095_v25 }
 0xfde   :  { %35098 = vmatpush3.bf16.msra.mxu1 %v35095_v25 }
 0xfdf   :  { %35100 = vmatprep.subr.bf16.mxu1 %v35099_v33 }
 0xfe2   :  { %35102 = vmatpush3.bf16.msra.mxu1 %v35099_v33 }
 0xfe3   :  { %35104 = vmatprep.subr.bf16.mxu1 %v35103_v19 }
 0xfe6   :  { %35106 = vmatpush3.bf16.msra.mxu1 %v35103_v19 }
 0xfe7   :  { %35108 = vmatprep.subr.bf16.mxu1 %v35107_v32 }
 0xfea   :  { %35110 = vmatpush3.bf16.msra.mxu1 %v35107_v32  ;;  %v12212_v32 = vand.u32 4294901760, %v12189_v56 }
 0xfeb   :  { %35112 = vmatprep.subr.bf16.mxu1 %v35111_v50 }
 0xfee   :  { %35114 = vmatpush3.bf16.msra.mxu1 %v35111_v50  ;;  %v12191_v50 = vld [vmem:[#allocation7 + $0x78] sm:$0xff] }
 0xfef   :  { %35116 = vmatprep.subr.bf16.mxu1 %v35115_v29  ;;  %v12218_v49 = vand.u32 4294901760, %v12191_v50 }
 0xff2   :  { %35118 = vmatpush3.bf16.msra.mxu1 %v35115_v29  ;;  %v12195_v29 = vld [vmem:[#allocation7 + $0x98] sm:$0xff] }
 0xff3   :  { %35120 = vmatprep.subr.bf16.mxu1 %v38497_v15 }
 0xff5   :  { %32564 = vmatmul.mubr.f32.vlgmr.msra.gmra.mrb[32].mxu1 %v38729_v18 }
 0xff6   :  { %35122 = vmatpush3.bf16.msra.mxu1 %v38497_v15  ;;  %32598 = vmatprep.mubr.f32.mxu1 %v38731_v13  ;;  %v41038_v15 = vmov 0.0|0.0   ;;  %v36922_v13 = vld [vmem:[#allocation5 + $0x8] sm:$0xff] }
 0xff7   :  { %35124 = vmatprep.subr.bf16.mxu1 %v38501_v34 }
 0xffa   :  { %35126 = vmatpush3.bf16.msra.mxu1 %v38501_v34  ;;  %v41039_v34 = vmov 0.0  }
 0xffb   :  { %35128 = vmatprep.subr.bf16.mxu1 %v38505_v2 }
 0xffe   :  { %35130 = vmatpush3.bf16.msra.mxu1 %v38505_v2  ;;  %v40996_v2 = vmov 32  }
 0xfff   :  { %35132 = vmatprep.subr.bf16.mxu1 %v38509_v48  ;;  %36791 = vset.pattern.permute.xlu1 %v40996_v2 }
0x1000   :  { %36790 = vset.pattern.permute.xlu0 %v40996_v2 }
0x1002   :  { %35134 = vmatpush3.bf16.msra.mxu1 %v38509_v48  ;;  %v29932_v48 = vld [vmem:[%s40962_s8] ss:$0 sm:$0xff] }
0x1003   :  { %35136 = vmatprep.subr.bf16.mxu1 %v38519_v9 }
0x1006   :  { %35138 = vmatpush3.bf16.msra.mxu1 %v38519_v9 }
0x1007   :  { %35140 = vmatprep.subr.bf16.mxu1 %v38533_v16 }
0x100a   :  { %35142 = vmatpush3.bf16.msra.mxu1 %v38533_v16 }
0x100b   :  { %35144 = vmatprep.subr.bf16.mxu1 %v38547_v60 }
0x100e   :  { %35146 = vmatpush3.bf16.msra.mxu1 %v38547_v60 }
0x100f   :  { %35148 = vmatprep.subr.bf16.mxu1 %v38567_v27 }
0x1012   :  { %35150 = vmatpush3.bf16.msra.mxu1 %v38567_v27 }
0x1013   :  { %35247 = vmatprep.subr.bf16.mxu1 %v41038_v15 }
0x1015   :  { %32599 = vmatmul.mubr.f32.vlgmr.msra.gmra.mrb[32].mxu1 %v38729_v18 }
0x1016   :  { %32689 = vmatprep.mubr.msk.f32.mxu1 %vm37171_vm1, %v41039_v34 }
0x10e8   :  { %v32600_v9 = vpop.f32.mrb[32].mxu1 }
0x10e9   :  { %v36119_v16 = vadd.f32 %v32600_v9, %v29932_v48  ;;  %v12041_v60 = vpop.f32.mrb[33].mxu1  ;;  %v12194_v9 = vld [vmem:[#allocation7 + $0x90] sm:$0xff] }
0x10ea   :  { %v36120_v27 = vadd.f32 %v29932_v48, %v12041_v60  ;;  %v12198_v48 = vld [vmem:[#allocation7 + $0xb0] sm:$0xff]  ;;  %v38885_v60 = vsub.f32 %v12189_v56, %v12212_v32  ;;  %v38941_v56 = vld [vmem:[%s41024_s25 + $0x1] ss:$0 sm:$0xff] }
0x10eb   :  { %v29934_v45 = vmul.f32 -1.442695, %v36119_v16 }
0x10ec   :  { %v29933_v4 = vmul.f32 -1.442695, %v36120_v27 }
0x10ed   :  { %36839 = vpow2.f32 %v29934_v45  ;;  %v12220_v45 = vand.u32 4294901760, %v12195_v29 }
0x10ee   :  { %36841 = vpow2.f32 %v29933_v4  ;;  %v12197_v4 = vld [vmem:[#allocation7 + $0xa8] sm:$0xff] }
0x10f7   :  { %v36840_v52 = vpop.eup %36839 }
0x10f8   :  { %v36842_v30 = vpop.eup %36841  ;;  %v12058_v6 = vadd.f32 1.0, %v36840_v52  ;;  %v38889_v52 = vpack.c.bf16 %v12218_v49, %v12214_v42 }
0x10f9   :  { %v12057_v12 = vadd.f32 1.0, %v36842_v30  ;;  %v38891_v30 = vsub.f32 %v12188_v41, %v12214_v42 }
0x10fa   :  { %36843 = vrcp.f32 %v12058_v6  ;;  %v38893_v6 = vsub.f32 %v12191_v50, %v12218_v49 }
0x10fb   :  { %36845 = vrcp.f32 %v12057_v12  ;;  %v12224_v12 = vand.u32 4294901760, %v12198_v48 }
0x1104   :  { %v36844_v58 = vpop.eup %36843 }
0x1105   :  { %v36846_v21 = vpop.eup %36845  ;;  %v12064_v24 = vmul.f32 2.0, %v36844_v58  ;;  %v38896_v58 = vsub.f32 %v12195_v29, %v12220_v45 }
0x1106   :  { %v12063_v17 = vmul.f32 2.0, %v36846_v21  ;;  %v12222_v21 = vand.u32 4294901760, %v12194_v9 }
0x1107   :  { %12072 = vperm.xlu1 %36791, %v12064_v24  }
0x1108   :  { %12067 = vperm.xlu0 %36790, %v12063_v17  }
0x110b   :  { %36792 = vset.pattern.permute.xlu1 %v37175_v37 }
0x110c   :  { %12078 = vperm.xlu1 %36792, %v12063_v17   ;;  %36793 = vset.pattern.permute.xlu0 %v37175_v37  ;;  %v38899_v17 = vpack.c.bf16 %v12224_v12, %v12220_v45  ;;  %v38901_v37 = vsub.f32 %v12198_v48, %v12224_v12 }
0x110d   :  { %12082 = vperm.xlu0 %36793, %v12064_v24   ;;  %v12226_v24 = vand.u32 4294901760, %v12197_v4 }
0x1186   :  { %v12073_v36 = vpop.permute.xlu1 %12072 }
0x1187   :  { %v12068_v7 = vpop.permute.xlu0 %12067  ;;  %v12076_v31 = vmul.f32 %v36119_v16, %v12073_v36  ;;  %v38903_v36 = vpack.c.bf16 %v12226_v24, %v12222_v21 }
0x1188   :  { %v12075_v57 = vmul.f32 %v36120_v27, %v12068_v7  ;;  %v38905_v7 = vsub.f32 %v12194_v9, %v12222_v21 }
0x118a   :  { %12089 = vrot.lane.b32.xlu1 %v12075_v57, %s37170_s4  ;;  %v38907_v57 = vsub.f32 %v12197_v4, %v12226_v24  ;;  %v12361_v41 = vand.u32 4294901760, %v38905_v7 }
0x118b   :  { %v12079_v43 = vpop.permute.xlu1 %12078 }
0x118c   :  { %v12085_v61 = vmul.f32 %v36120_v27, %v12079_v43  ;;  %v12083_v3 = vpop.permute.xlu0 %12082  ;;  %v38887_v27 = vsub.f32 %v12192_v10, %v12216_v46  ;;  %v12373_v49 = vand.u32 4294901760, %v38907_v57  ;;  %v12362_v9 = vsub.f32 %v38905_v7, %v12361_v41 }
0x118d   :  { %v12086_v20 = vmul.f32 %v36119_v16, %v12083_v3  ;;  %v38883_v16 = vpack.c.bf16 %v12216_v46, %v12212_v32  ;;  %v12367_v46 = vand.u32 4294901760, %v38901_v37 }
0x118e   :  { %12095 = vrot.lane.b32.xlu0 %v12085_v61, %s37170_s4  ;;  %12091 = vrot.lane.b32.xlu1 %v12076_v31, %s37170_s4  ;;  %v12374_v12 = vsub.f32 %v38907_v57, %v12373_v49  ;;  %v12363_v24 = vand.u32 4294901760, %v12362_v9 }
0x118f   :  { %35152 = vmatprep.subr.bf16.mxu0 %v38883_v16  ;;  %v12368_v48 = vsub.f32 %v38901_v37, %v12367_v46 }
0x1190   :  { %35154 = vmatpush1.bf16.msra.mxu0 %v38889_v52 }
0x1191   :  { %35156 = vmatprep.subr.bf16.mxu0 %v38899_v17  ;;  %v12369_v21 = vand.u32 4294901760, %v12368_v48 }
0x1192   :  { %12099 = vrot.lane.b32.xlu0 %v12086_v20, %s37170_s4 }
0x1194   :  { %35158 = vmatpush1.bf16.msra.mxu0 %v38903_v36 }
0x11fc   :  { %v12090_v0 = vpop.permute.xlu1 %12089 }
0x11fd   :  { %12097 = vrot.lane.b32.xlu1 %v12090_v0, %s37170_s4 }
0x1200   :  { %v12092_v11 = vpop.permute.xlu1 %12091  ;;  %v12096_v44 = vpop.permute.xlu0 %12095 }
0x1201   :  { %v38854_v39 = vadd.f32 %v36921_v5, %v12096_v44  ;;  %12101 = vrot.lane.b32.xlu1 %v12092_v11, %s37170_s4 }
0x1203   :  { %41040 = vst [vmem:[#allocation24_spill] sm:$0xff] %v38854_v39  ;;  %v12115_v55 = vsel %vm162_vm0, %v38854_v39, 0.0 }
0x1204   :  { %12116 = vadd.xlane.f32.xlu0 %v12115_v55  ;;  %v12100_v18 = vpop.permute.xlu0 %12099 }
0x1205   :  { %v38859_v54 = vadd.f32 %v36922_v13, %v12100_v18 }
0x1207   :  { %41041 = vst [vmem:[#allocation25_spill] sm:$0xff] %v38859_v54  ;;  %v12121_v8 = vsel %vm162_vm0, %v38859_v54, 0.0 }
0x1208   :  { %12122 = vadd.xlane.f32.xlu0 %v12121_v8 }
0x126f   :  { %v12098_v1 = vpop.permute.xlu1 %12097 }
0x1270   :  { %v38863_v23 = vadd.f32 %v36923_v40, %v12098_v1  ;;  %v12331_v1 = vand.u32 4294901760, %v38885_v60  ;;  %v12343_v40 = vand.u32 4294901760, %v38887_v27 }
0x1272   :  { %41042 = vst [vmem:[#allocation26_spill] sm:$0xff] %v38863_v23  ;;  %v12118_v28 = vsel %vm162_vm0, %v38863_v23, 0.0 }
0x1273   :  { %12119 = vadd.xlane.f32.xlu1 %v12118_v28  ;;  %v12102_v63 = vpop.permute.xlu1 %12101  ;;  %v12337_v28 = vand.u32 4294901760, %v38891_v30 }
0x1274   :  { %v38867_v35 = vadd.f32 %v36924_v59, %v12102_v63  ;;  %v12349_v63 = vand.u32 4294901760, %v38893_v6  ;;  %v12332_v59 = vsub.f32 %v38885_v60, %v12331_v1 }
0x1276   :  { %41043 = vst [vmem:[#allocation27_spill] sm:$0xff] %v38867_v35  ;;  %v12124_v62 = vsel %vm162_vm0, %v38867_v35, 0.0 }
0x1277   :  { %12125 = vadd.xlane.f32.xlu0 %v12124_v62  ;;  %v12344_v62 = vsub.f32 %v38887_v27, %v12343_v40 }
0x1291   :  { %v12117_v51 = vpop.xlane.xlu0 %12116 }
0x1292   :  { %v12127_v22 = vmul.f32 0.03125, %v12117_v51 }
0x1294   :  { %v38872_v38 = vsub.f32 %v38854_v39, %v12127_v22  ;;  %v38932_v22 = vld [vmem:[%s41023_s1 + $0x1] ss:$0 sm:$0xff] }
0x1295   :  { %v12123_v25 = vpop.xlane.xlu0 %12122 }
0x1296   :  { %v12129_v47 = vmul.f32 0.03125, %v12123_v25  ;;  %v12135_v53 = vmul.f32 %v38872_v38, %v38872_v38  ;;  %v12338_v25 = vsub.f32 %v38891_v30, %v12337_v28 }
0x1298   :  { %v38877_v33 = vsub.f32 %v38859_v54, %v12129_v47  ;;  %v12139_v26 = vsel %vm162_vm0, %v12135_v53, 0.0  ;;  %v12350_v47 = vsub.f32 %v38893_v6, %v12349_v63  ;;  %v12339_v10 = vand.u32 4294901760, %v12338_v25 }
0x1299   :  { %12140 = vadd.xlane.f32.xlu0 %v12139_v26  ;;  %v12333_v26 = vand.u32 4294901760, %v12332_v59  ;;  %v35171_v59 = vpack.c.bf16 %v38901_v37, %v38896_v58 }
0x129a   :  { %v12137_v14 = vmul.f32 %v38877_v33, %v38877_v33  ;;  %v12351_v32 = vand.u32 4294901760, %v12350_v47 }
0x129c   :  { %v12145_v19 = vsel %vm162_vm0, %v12137_v14, 0.0  ;;  %v12345_v14 = vand.u32 4294901760, %v12344_v62  ;;  %v35161_v29 = vpack.c.bf16 %v12351_v32, %v12339_v10  ;;  %v35173_v62 = vpack.c.bf16 %v38907_v57, %v38905_v7 }
0x129d   :  { %12146 = vadd.xlane.f32.xlu0 %v12145_v19  ;;  %v12355_v19 = vand.u32 4294901760, %v38896_v58 }
0x129e   :  { %v35159_v42 = vpack.c.bf16 %v12345_v14, %v12333_v26 }
0x12a0   :  { %35160 = vmatprep.subr.bf16.mxu0 %v35159_v42 }
0x1300   :  { %v12120_v43 = vpop.xlane.xlu1 %12119 }
0x1301   :  { %v12128_v31 = vmul.f32 0.03125, %v12120_v43 }
0x1303   :  { %v38912_v61 = vsub.f32 %v38863_v23, %v12128_v31  ;;  %v12375_v31 = vand.u32 4294901760, %v12374_v12 }
0x1304   :  { %v12126_v3 = vpop.xlane.xlu0 %12125 }
0x1305   :  { %v12130_v20 = vmul.f32 0.03125, %v12126_v3  ;;  %v12136_v0 = vmul.f32 %v38912_v61, %v38912_v61 }
0x1307   :  { %v38917_v11 = vsub.f32 %v38867_v35, %v12130_v20  ;;  %v12142_v44 = vsel %vm162_vm0, %v12136_v0, 0.0  ;;  %v35165_v0 = vpack.c.bf16 %v12375_v31, %v12363_v24 }
0x1308   :  { %12143 = vadd.xlane.f32.xlu1 %v12142_v44 }
0x1309   :  { %v12138_v5 = vmul.f32 %v38917_v11, %v38917_v11 }
0x130b   :  { %v12148_v55 = vsel %vm162_vm0, %v12138_v5, 0.0 }
0x130c   :  { %12149 = vadd.xlane.f32.xlu1 %v12148_v55 }
0x1326   :  { %v12141_v18 = vpop.xlane.xlu0 %12140 }
0x1327   :  { %v12151_v13 = vmul.f32 0.03125, %v12141_v18 }
0x1329   :  { %v12155_v8 = vadd.f32 1e-05, %v12151_v13  ;;  %v35167_v13 = vpack.c.bf16 %v38887_v27, %v38885_v60  ;;  %v38977_v60 = vpack.c.bf16 %v12349_v63, %v12337_v28  ;;  %v38979_v27 = vpack.c.bf16 %v12367_v46, %v12355_v19 }
0x132b   :  { %36847 = vrsqrt.f32 %v12155_v8  ;;  %v35169_v8 = vpack.c.bf16 %v38893_v6, %v38891_v30  ;;  %v38981_v30 = vpack.c.bf16 %v12373_v49, %v12361_v41  ;;  %v12147_v6 = vpop.xlane.xlu0 %12146 }
0x132c   :  { %v12153_v25 = vmul.f32 0.03125, %v12147_v6 }
0x132e   :  { %v12157_v47 = vadd.f32 1e-05, %v12153_v25 }
0x1330   :  { %36849 = vrsqrt.f32 %v12157_v47 }
0x1335   :  { %v36848_v51 = vpop.eup %36847 }
0x1336   :  { %v12163_v53 = vmul.f32 %v36848_v51, %v38872_v38  ;;  %v12356_v38 = vsub.f32 %v38896_v58, %v12355_v19  ;;  %v38975_v51 = vpack.c.bf16 %v12343_v40, %v12331_v1 }
0x1338   :  { %v12173_v50 = vmul.f32 %v38932_v22, %v12163_v53  ;;  %v12357_v4 = vand.u32 4294901760, %v12356_v38 }
0x133a   :  { %v12183_v45 = vadd.f32 %v38941_v56, %v12173_v50  ;;  %v35163_v20 = vpack.c.bf16 %v12369_v21, %v12357_v4  ;;  %v36850_v26 = vpop.eup %36849 }
0x133b   :  { %v12165_v37 = vmul.f32 %v36850_v26, %v38877_v33 }
0x133c   :  { %v12201_v43 = vsel %vm162_vm0, %v12183_v45, 0 }
0x133d   :  { %v38953_v3 = vand.u32 4294901760, %v12201_v43  ;;  %v12175_v1 = vmul.f32 %v38932_v22, %v12165_v37 }
0x133f   :  { %v38956_v44 = vsub.f32 %v12201_v43, %v38953_v3  ;;  %v12185_v40 = vadd.f32 %v38941_v56, %v12175_v1 }
0x1341   :  { %v38959_v5 = vand.u32 4294901760, %v38956_v44  ;;  %v12207_v19 = vsel %vm162_vm0, %v12185_v40, 0 }
0x1342   :  { %v38989_v41 = vand.u32 4294901760, %v12207_v19 }
0x1343   :  { %v12288_v55 = vsub.f32 %v38956_v44, %v38959_v5 }
0x1345   :  { %v38963_v18 = vand.u32 4294901760, %v12288_v55  ;;  %v12193_v55 = vld [vmem:[#allocation7 + $0x88] sm:$0xff] }
0x1347   :  { %12290 = vmatmul.mubr.f32.vlgmr.msra.gmra.mrb[22].mxu0 %v38963_v18 }
0x1348   :  { %12295 = vmatprep.mubr.f32.mxu0 %v41039_v34  ;;  %35162 = vmatpush1.bf16.msra.mxu0 %v35161_v29  ;;  %v38998_v29 = vsub.f32 %v12207_v19, %v38989_v41 }
0x1349   :  { %35164 = vmatprep.subr.bf16.mxu0 %v35163_v20 }
0x134a   :  { %v39009_v45 = vand.u32 4294901760, %v38998_v29 }
0x134c   :  { %35166 = vmatpush1.bf16.msra.mxu0 %v35165_v0  ;;  %v12310_v21 = vsub.f32 %v38998_v29, %v39009_v45  ;;  %v12190_v0 = vld [vmem:[#allocation7 + $0x70] sm:$0xff] }
0x134d   :  { %35168 = vmatprep.subr.bf16.mxu0 %v35167_v13  ;;  %v12903_v13 = vand.u32 4294901760, %v12190_v0 }
0x134e   :  { %v39027_v43 = vand.u32 4294901760, %v12310_v21 }
0x1395   :  { %v12144_v53 = vpop.xlane.xlu1 %12143 }
0x1396   :  { %v12152_v14 = vmul.f32 0.03125, %v12144_v53 }
0x1398   :  { %v12156_v58 = vadd.f32 1e-05, %v12152_v14 }
0x1399   :  { %v12150_v10 = vpop.xlane.xlu1 %12149 }
0x139a   :  { %36851 = vrsqrt.f32 %v12156_v58  ;;  %v12154_v7 = vmul.f32 0.03125, %v12150_v10 }
0x139c   :  { %v12158_v57 = vadd.f32 1e-05, %v12154_v7 }
0x139e   :  { %36853 = vrsqrt.f32 %v12158_v57 }
0x13a4   :  { %v36852_v28 = vpop.eup %36851 }
0x13a5   :  { %v12164_v63 = vmul.f32 %v36852_v28, %v38912_v61 }
0x13a7   :  { %v12174_v32 = vmul.f32 %v38932_v22, %v12164_v63 }
0x13a8   :  { %v36854_v46 = vpop.eup %36853 }
0x13a9   :  { %v12166_v33 = vmul.f32 %v36854_v46, %v38917_v11  ;;  %v12184_v50 = vadd.f32 %v38941_v56, %v12174_v32 }
0x13ab   :  { %v12176_v42 = vmul.f32 %v38932_v22, %v12166_v33  ;;  %v12204_v38 = vsel %vm162_vm0, %v12184_v50, 0 }
0x13ac   :  { %v38995_v49 = vand.u32 4294901760, %v12204_v38 }
0x13ad   :  { %v12186_v61 = vadd.f32 %v38941_v56, %v12176_v42 }
0x13ae   :  { %v39002_v48 = vsub.f32 %v12204_v38, %v38995_v49 }
0x13af   :  { %v12210_v9 = vsel %vm162_vm0, %v12186_v61, 0 }
0x13b0   :  { %v39006_v11 = vand.u32 4294901760, %v39002_v48  ;;  %v39011_v22 = vand.u32 4294901760, %v12210_v9 }
0x13b2   :  { %v12299_v4 = vsub.f32 %v39002_v48, %v39006_v11  ;;  %v39016_v12 = vsub.f32 %v12210_v9, %v39011_v22 }
0x13b4   :  { %v39018_v56 = vand.u32 4294901760, %v12299_v4  ;;  %v39023_v24 = vand.u32 4294901760, %v39016_v12 }
0x13b6   :  { %12301 = vmatmul.mubr.f32.gmra.mrb[24].mxu0 %v39018_v56  ;;  %v12321_v31 = vsub.f32 %v39016_v12, %v39023_v24 }
0x13b7   :  { %12306 = vmatprep.mubr.f32.mxu0 %v41039_v34 }
0x13b8   :  { %v39033_v20 = vand.u32 4294901760, %v12321_v31 }
0x13ba   :  { %12312 = vmatmul.mubr.f32.gmra.mrb[26].mxu0 %v39027_v43 }
0x13bb   :  { %12317 = vmatprep.mubr.f32.mxu0 %v41039_v34 }
0x13be   :  { %12323 = vmatmul.mubr.f32.gmra.mrb[28].mxu0 %v39033_v20 }
0x13bf   :  { %12433 = vmatprep.mubr.f32.mxu0 %v41039_v34 }
0x13c2   :  { %12435 = vmatmul.mubr.f32.vlgmr.msra.gmra.mrb[22].mxu0 %v38953_v3 }
0x13c3   :  { %12440 = vmatprep.mubr.f32.mxu0 %v41039_v34  ;;  %35170 = vmatpush1.bf16.msra.mxu0 %v35169_v8  ;;  %v12906_v8 = vand.u32 4294901760, %v12193_v55 }
0x13c4   :  { %35172 = vmatprep.subr.bf16.mxu0 %v35171_v59  ;;  %v39076_v59 = vsub.f32 %v12190_v0, %v12903_v13 }
0x13c6   :  { %12442 = vmatmul.mubr.f32.gmra.mrb[24].mxu0 %v38995_v49 }
0x13c7   :  { %12447 = vmatprep.mubr.f32.mxu0 %v41039_v34  ;;  %35174 = vmatpush1.bf16.msra.mxu0 %v35173_v62  ;;  %v39078_v62 = vsub.f32 %v12193_v55, %v12906_v8 }
0x13c8   :  { %35176 = vmatprep.subr.bf16.mxu0 %v38883_v16 }
0x13c9   :  { %v35215_v63 = vpack.c.bf16 %v39078_v62, %v39076_v59 }
0x13ca   :  { %12449 = vmatmul.mubr.f32.gmra.mrb[26].mxu0 %v38989_v41 }
0x13cb   :  { %12454 = vmatprep.mubr.f32.mxu0 %v41039_v34 }
0x13ce   :  { %12456 = vmatmul.mubr.f32.gmra.mrb[28].mxu0 %v39011_v22 }
0x13cf   :  { %12542 = vmatprep.mubr.f32.mxu0 %v41039_v34 }
0x13d2   :  { %12545 = vmatmul.mubr.f32.vlgmr.msra.gmra.mrb[22].mxu0 %v38956_v44 }
0x13d3   :  { %12550 = vmatprep.mubr.f32.mxu0 %v41039_v34  ;;  %35178 = vmatpush1.bf16.msra.mxu0 %v38889_v52 }
0x13d4   :  { %35180 = vmatprep.subr.bf16.mxu0 %v38899_v17 }
0x13d6   :  { %12553 = vmatmul.mubr.f32.gmra.mrb[24].mxu0 %v39002_v48 }
0x13d7   :  { %12558 = vmatprep.mubr.f32.mxu0 %v41039_v34  ;;  %35182 = vmatpush1.bf16.msra.mxu0 %v38903_v36 }
0x13d8   :  { %35184 = vmatprep.subr.bf16.mxu0 %v38975_v51  ;;  %v12196_v51 = vld [vmem:[#allocation7 + $0xa0] sm:$0xff] }
0x13da   :  { %12561 = vmatmul.mubr.f32.gmra.mrb[26].mxu0 %v38998_v29 }
0x13db   :  { %12566 = vmatprep.mubr.f32.mxu0 %v41039_v34 }
0x13de   :  { %12569 = vmatmul.mubr.f32.gmra.mrb[28].mxu0 %v39016_v12 }
0x13df   :  { %12647 = vmatprep.mubr.f32.mxu0 %v41039_v34 }
0x13e2   :  { %12651 = vmatmul.mubr.f32.vlgmr.msra.gmra.mrb[22].mxu0 %v38959_v5 }
0x13e3   :  { %12656 = vmatprep.mubr.f32.mxu0 %v41039_v34  ;;  %35186 = vmatpush1.bf16.msra.mxu0 %v38977_v60  ;;  %v12199_v60 = vld [vmem:[#allocation7 + $0xb8] sm:$0xff] }
0x13e4   :  { %35188 = vmatprep.subr.bf16.mxu0 %v38979_v27  ;;  %v12909_v27 = vand.u32 4294901760, %v12196_v51 }
0x13e6   :  { %12660 = vmatmul.mubr.f32.gmra.mrb[24].mxu0 %v39006_v11  ;;  %v13027_v26 = vsub.f32 %v12196_v51, %v12909_v27 }
0x13e7   :  { %12665 = vmatprep.mubr.f32.mxu0 %v41039_v34  ;;  %35190 = vmatpush1.bf16.msra.mxu0 %v38981_v30  ;;  %v12912_v30 = vand.u32 4294901760, %v12199_v60 }
0x13e8   :  { %35192 = vmatprep.subr.bf16.mxu0 %v38883_v16  ;;  %v39074_v16 = vpack.c.bf16 %v12906_v8, %v12903_v13  ;;  %v13028_v37 = vand.u32 4294901760, %v13027_v26 }
0x13e9   :  { %v13034_v14 = vsub.f32 %v12199_v60, %v12912_v30 }
0x13ea   :  { %12669 = vmatmul.mubr.f32.gmra.mrb[26].mxu0 %v39009_v45  ;;  %v13029_v7 = vsub.f32 %v13027_v26, %v13028_v37 }
0x13eb   :  { %12674 = vmatprep.mubr.f32.mxu0 %v41039_v34  ;;  %v13035_v10 = vand.u32 4294901760, %v13034_v14  ;;  %v35219_v19 = vpack.c.bf16 %v13034_v14, %v13027_v26 }
0x13ec   :  { %v13030_v1 = vand.u32 4294901760, %v13029_v7 }
0x13ed   :  { %v13036_v57 = vsub.f32 %v13034_v14, %v13035_v10  ;;  %v35235_v32 = vpack.c.bf16 %v13035_v10, %v13028_v37 }
0x13ee   :  { %12678 = vmatmul.mubr.f32.gmra.mrb[28].mxu0 %v39023_v24 }
0x13ef   :  { %12772 = vmatprep.mubr.f32.mxu0 %v41039_v34  ;;  %v13037_v40 = vand.u32 4294901760, %v13036_v57 }
0x13f1   :  { %v35211_v28 = vpack.c.bf16 %v13037_v40, %v13030_v1 }
0x13f2   :  { %12774 = vmatmul.mubr.f32.vlgmr.msra.gmra.mrb[22].mxu0 %v38953_v3 }
0x13f3   :  { %12779 = vmatprep.mubr.f32.mxu0 %v41039_v34  ;;  %35194 = vmatpush1.bf16.msra.mxu0 %v38889_v52  ;;  %v13014_v52 = vand.u32 4294901760, %v39076_v59 }
0x13f4   :  { %35196 = vmatprep.subr.bf16.mxu0 %v38899_v17  ;;  %v13021_v17 = vand.u32 4294901760, %v39078_v62 }
0x13f5   :  { %v13015_v6 = vsub.f32 %v39076_v59, %v13014_v52 }
0x13f6   :  { %12781 = vmatmul.mubr.f32.gmra.mrb[24].mxu0 %v38995_v49  ;;  %v13022_v25 = vsub.f32 %v39078_v62, %v13021_v17 }
0x13f7   :  { %12786 = vmatprep.mubr.f32.mxu0 %v41039_v34  ;;  %35198 = vmatpush1.bf16.msra.mxu0 %v38903_v36  ;;  %v39092_v36 = vpack.c.bf16 %v12912_v30, %v12909_v27  ;;  %v13016_v47 = vand.u32 4294901760, %v13015_v6 }
0x13f8   :  { %35200 = vmatprep.subr.bf16.mxu0 %v39074_v16  ;;  %v13023_v53 = vand.u32 4294901760, %v13022_v25 }
0x13fa   :  { %12788 = vmatmul.mubr.f32.gmra.mrb[26].mxu0 %v38989_v41  ;;  %v35207_v58 = vpack.c.bf16 %v13023_v53, %v13016_v47 }
0x13fb   :  { %12793 = vmatprep.mubr.f32.mxu0 %v41039_v34 }
0x13fe   :  { %12795 = vmatmul.mubr.f32.gmra.mrb[28].mxu0 %v39011_v22 }
0x13ff   :  { %12873 = vmatprep.mubr.f32.mxu0 %v41039_v34 }
0x1402   :  { %12875 = vmatmul.mubr.f32.vlgmr.msra.gmra.mrb[22].mxu0 %v38953_v3 }
0x1403   :  { %12880 = vmatprep.mubr.f32.mxu0 %v41039_v34  ;;  %35202 = vmatpush3.bf16.msra.mxu0 %v39074_v16 }
0x1404   :  { %35204 = vmatprep.subr.bf16.mxu0 %v39092_v36 }
0x1406   :  { %12882 = vmatmul.mubr.f32.gmra.mrb[24].mxu0 %v38995_v49 }
0x1407   :  { %12887 = vmatprep.mubr.f32.mxu0 %v41039_v34  ;;  %35206 = vmatpush3.bf16.msra.mxu0 %v39092_v36 }
0x1408   :  { %35208 = vmatprep.subr.bf16.mxu0 %v35207_v58 }
0x140a   :  { %12889 = vmatmul.mubr.f32.gmra.mrb[26].mxu0 %v38989_v41 }
0x140b   :  { %12894 = vmatprep.mubr.f32.mxu0 %v41039_v34 }
0x140e   :  { %12896 = vmatmul.mubr.f32.gmra.mrb[28].mxu0 %v39011_v22 }
0x140f   :  { %32609 = vmatprep.mubr.f32.mxu0 %v38963_v18  ;;  %v35231_v18 = vpack.c.bf16 %v13021_v17, %v13014_v52 }
0x1412   :  { %32610 = vmatmul.mubr.f32.vlgmr.msra.gmra.mrb[30].mxu0 %v39018_v56 }
0x1413   :  { %32612 = vmatprep.mubr.f32.mxu0 %v39027_v43  ;;  %35210 = vmatpush3.bf16.msra.mxu0 %v35207_v58 }
0x1414   :  { %35212 = vmatprep.subr.bf16.mxu0 %v35211_v28 }
0x1416   :  { %32613 = vmatmul.mubr.f32.gmra.mrb[32].mxu0 %v39033_v20 }
0x1417   :  { %35214 = vmatpush3.bf16.msra.mxu0 %v35211_v28  ;;  %32623 = vmatprep.mubr.f32.mxu0 %v38953_v3 }
0x1418   :  { %35216 = vmatprep.subr.bf16.mxu0 %v35215_v63 }
0x141a   :  { %32624 = vmatmul.mubr.f32.vlgmr.msra.gmra.mrb[30].mxu0 %v38995_v49 }
0x141b   :  { %32626 = vmatprep.mubr.f32.mxu0 %v38989_v41  ;;  %35218 = vmatpush3.bf16.msra.mxu0 %v35215_v63 }
0x141c   :  { %35220 = vmatprep.subr.bf16.mxu0 %v35219_v19 }
0x141e   :  { %32627 = vmatmul.mubr.f32.gmra.mrb[32].mxu0 %v39011_v22 }
0x141f   :  { %35222 = vmatpush3.bf16.msra.mxu0 %v35219_v19  ;;  %32637 = vmatprep.mubr.f32.mxu0 %v38956_v44 }
0x1420   :  { %35224 = vmatprep.subr.bf16.mxu0 %v39074_v16 }
0x1422   :  { %32638 = vmatmul.mubr.f32.vlgmr.msra.gmra.mrb[30].mxu0 %v39002_v48 }
0x1423   :  { %32640 = vmatprep.mubr.f32.mxu0 %v38998_v29  ;;  %35226 = vmatpush3.bf16.msra.mxu0 %v39074_v16 }
0x1424   :  { %35228 = vmatprep.subr.bf16.mxu0 %v39092_v36 }
0x1426   :  { %32641 = vmatmul.mubr.f32.gmra.mrb[32].mxu0 %v39016_v12 }
0x1427   :  { %35230 = vmatpush3.bf16.msra.mxu0 %v39092_v36  ;;  %32651 = vmatprep.mubr.f32.mxu0 %v38959_v5 }
0x1428   :  { %35232 = vmatprep.subr.bf16.mxu0 %v35231_v18 }
0x142a   :  { %32652 = vmatmul.mubr.f32.vlgmr.msra.gmra.mrb[30].mxu0 %v39006_v11 }
0x142b   :  { %32654 = vmatprep.mubr.f32.mxu0 %v39009_v45  ;;  %35234 = vmatpush3.bf16.msra.mxu0 %v35231_v18 }
0x142c   :  { %35236 = vmatprep.subr.bf16.mxu0 %v35235_v32 }
0x142e   :  { %32655 = vmatmul.mubr.f32.gmra.mrb[32].mxu0 %v39023_v24 }
0x142f   :  { %35238 = vmatpush3.bf16.msra.mxu0 %v35235_v32  ;;  %32665 = vmatprep.mubr.f32.mxu0 %v38953_v3 }
0x1430   :  { %35240 = vmatprep.subr.bf16.mxu0 %v39074_v16 }
0x1432   :  { %32666 = vmatmul.mubr.f32.vlgmr.msra.gmra.mrb[30].mxu0 %v38995_v49 }
0x1433   :  { %32668 = vmatprep.mubr.f32.mxu0 %v38989_v41  ;;  %35242 = vmatpush3.bf16.msra.mxu0 %v39074_v16 }
0x1434   :  { %35244 = vmatprep.subr.bf16.mxu0 %v39092_v36 }
0x1436   :  { %32669 = vmatmul.mubr.f32.gmra.mrb[32].mxu0 %v39011_v22 }
0x1437   :  { %35246 = vmatpush3.bf16.msra.mxu0 %v39092_v36  ;;  %32679 = vmatprep.mubr.f32.mxu0 %v38953_v3 }
0x1438   :  { %35265 = vmatprep.subr.bf16.mxu0 %v41038_v15 }
0x143a   :  { %32680 = vmatmul.mubr.f32.vlgmr.msra.gmra.mrb[30].mxu0 %v38995_v49 }
0x143b   :  { %32682 = vmatprep.mubr.f32.mxu0 %v38989_v41 }
0x143e   :  { %32683 = vmatmul.mubr.f32.gmra.mrb[32].mxu0 %v39011_v22 }
0x143f   :  { %32731 = vmatprep.mubr.msk.f32.mxu0 %vm37171_vm1, %v41039_v34 }
0x14d5   :  { %v39141_v44 = vpop.f32.mrb[22].mxu0 }
0x14d6   :  { %13535 = vrot.lane.b32.xlu0 %v39141_v44, %s37170_s4  ;;  %v39145_v5 = vpop.f32.mrb[23].mxu0 }
0x14d7   :  { %v14503_v3 = vand.u32 4294901760, %v39145_v5 }
0x14d9   :  { %v39148_v46 = vpop.f32.mrb[24].mxu0  ;;  %v39151_v33 = vsub.f32 %v39145_v5, %v14503_v3 }
0x14da   :  { %13537 = vrot.lane.b32.xlu1 %v39148_v46, %s37170_s4  ;;  %v39155_v41 = vpop.f32.mrb[25].mxu0 }
0x14db   :  { %v14506_v50 = vand.u32 4294901760, %v39155_v41  ;;  %v14582_v42 = vand.u32 4294901760, %v39151_v33 }
0x14dd   :  { %v39159_v38 = vpack.c.bf16 %v14506_v50, %v14503_v3  ;;  %v39162_v49 = vsub.f32 %v39155_v41, %v14506_v50  ;;  %v39164_v29 = vpop.f32.mrb[26].mxu0  ;;  %v14583_v11 = vsub.f32 %v39151_v33, %v14582_v42 }
0x14de   :  { %14006 = vrot.lane.b32.xlu1 %v39164_v29, %s37170_s4  ;;  %v39168_v61 = vpop.f32.mrb[27].mxu0 }
0x14df   :  { %v14589_v48 = vand.u32 4294901760, %v39162_v49  ;;  %v14965_v9 = vand.u32 4294901760, %v39168_v61  ;;  %v14584_v31 = vand.u32 4294901760, %v14583_v11 }
0x14e1   :  { %v14590_v22 = vsub.f32 %v39162_v49, %v14589_v48  ;;  %v39176_v4 = vpop.f32.mrb[28].mxu0  ;;  %v39179_v12 = vsub.f32 %v39168_v61, %v14965_v9  ;;  %v39181_v56 = vpack.c.bf16 %v14589_v48, %v14582_v42 }
0x14e2   :  { %14008 = vrot.lane.b32.xlu1 %v39176_v4, %s37170_s4  ;;  %v39185_v21 = vpop.f32.mrb[29].mxu0 }
0x14e3   :  { %v14591_v24 = vand.u32 4294901760, %v14590_v22  ;;  %v14968_v43 = vand.u32 4294901760, %v39185_v21  ;;  %v15044_v20 = vand.u32 4294901760, %v39179_v12 }
0x14e5   :  { %v39189_v0 = vpack.c.bf16 %v14968_v43, %v14965_v9  ;;  %v39192_v55 = vsub.f32 %v39185_v21, %v14968_v43  ;;  %v39194_v13 = vpack.c.bf16 %v14591_v24, %v14584_v31  ;;  %v15045_v16 = vsub.f32 %v39179_v12, %v15044_v20 }
0x14e7   :  { %v15051_v8 = vand.u32 4294901760, %v39192_v55  ;;  %v15046_v52 = vand.u32 4294901760, %v15045_v16 }
0x14e9   :  { %v15052_v62 = vsub.f32 %v39192_v55, %v15051_v8  ;;  %v39201_v51 = vpack.c.bf16 %v15051_v8, %v15044_v20 }
0x14eb   :  { %v15053_v60 = vand.u32 4294901760, %v15052_v62 }
0x14ed   :  { %v39203_v17 = vpack.c.bf16 %v15053_v60, %v15046_v52  ;;  %v13539_v52 = vsel %vm162_vm0, %v39148_v46, 0 }
0x150d   :  { %v39205_v27 = vpop.f32.mrb[30].mxu0 }
0x150e   :  { %v15432_v30 = vsel %vm162_vm0, %v39205_v27, 0  ;;  %v39209_v6 = vpop.f32.mrb[31].mxu0 }
0x150f   :  { %v15438_v25 = vand.u32 4294901760, %v15432_v30  ;;  %v15429_v36 = vsel %vm162_vm0, %v39209_v6, 0 }
0x1510   :  { %v15435_v47 = vand.u32 4294901760, %v15429_v36 }
0x1511   :  { %v39213_v53 = vsub.f32 %v15432_v30, %v15438_v25  ;;  %v39215_v26 = vpop.f32.mrb[32].mxu0  ;;  %v39255_v30 = vand.u32 4294901760, %v13539_v52 }
0x1512   :  { %v39217_v14 = vsub.f32 %v15429_v36, %v15435_v47  ;;  %v15902_v58 = vsel %vm162_vm0, %v39215_v26, 0  ;;  %v39221_v37 = vpop.f32.mrb[33].mxu0  ;;  %v39223_v10 = vpack.c.bf16 %v15438_v25, %v15435_v47 }
0x1513   :  { %v15521_v7 = vand.u32 4294901760, %v39213_v53  ;;  %v15908_v57 = vand.u32 4294901760, %v15902_v58  ;;  %v15899_v1 = vsel %vm162_vm0, %v39221_v37, 0 }
0x1514   :  { %v15514_v40 = vand.u32 4294901760, %v39217_v14  ;;  %v15905_v28 = vand.u32 4294901760, %v15899_v1 }
0x1515   :  { %v39231_v19 = vsub.f32 %v15902_v58, %v15908_v57  ;;  %v15522_v18 = vsub.f32 %v39213_v53, %v15521_v7  ;;  %v39259_v58 = vsub.f32 %v13539_v52, %v39255_v30 }
0x1516   :  { %v39234_v32 = vsub.f32 %v15899_v1, %v15905_v28  ;;  %v15515_v3 = vsub.f32 %v39217_v14, %v15514_v40  ;;  %v39237_v50 = vpack.c.bf16 %v15521_v7, %v15514_v40  ;;  %v39239_v42 = vpack.c.bf16 %v15908_v57, %v15905_v28 }
0x1517   :  { %v15991_v48 = vand.u32 4294901760, %v39231_v19  ;;  %v15523_v9 = vand.u32 4294901760, %v15522_v18  ;;  %v14010_v7 = vsel %vm162_vm0, %v39176_v4, 0 }
0x1518   :  { %v15984_v11 = vand.u32 4294901760, %v39234_v32  ;;  %v15516_v22 = vand.u32 4294901760, %v15515_v3  ;;  %v39267_v3 = vand.u32 4294901760, %v14010_v7 }
0x1519   :  { %v15992_v43 = vsub.f32 %v39231_v19, %v15991_v48 }
0x151a   :  { %v39246_v31 = vpack.c.bf16 %v15523_v9, %v15516_v22  ;;  %v15985_v20 = vsub.f32 %v39234_v32, %v15984_v11  ;;  %v39249_v8 = vpack.c.bf16 %v15991_v48, %v15984_v11  ;;  %v13614_v48 = vand.u32 4294901760, %v39259_v58 }
0x151b   :  { %v15993_v16 = vand.u32 4294901760, %v15992_v43  ;;  %v14084_v52 = vsub.f32 %v14010_v7, %v39267_v3 }
0x151c   :  { %v15986_v62 = vand.u32 4294901760, %v15985_v20 }
0x151d   :  { %v14085_v59 = vand.u32 4294901760, %v14084_v52 }
0x151e   :  { %v39251_v60 = vpack.c.bf16 %v15993_v16, %v15986_v62 }
0x151f   :  { %v14086_v54 = vsub.f32 %v14084_v52, %v14085_v59 }
0x1548   :  { %v13536_v25 = vpop.permute.xlu0 %13535 }
0x1549   :  { %v13541_v36 = vsel %vm162_vm0, %v13536_v25, 0  ;;  %v13615_v25 = vsub.f32 %v39259_v58, %v13614_v48 }
0x154a   :  { %v13546_v47 = vand.u32 4294901760, %v13541_v36 }
0x154b   :  { %v13616_v45 = vand.u32 4294901760, %v13615_v25  ;;  %v14087_v25 = vand.u32 4294901760, %v14086_v54 }
0x154c   :  { %v39263_v57 = vsub.f32 %v13541_v36, %v13546_v47  ;;  %v13538_v1 = vpop.permute.xlu1 %13537 }
0x154d   :  { %v13543_v40 = vsel %vm162_vm0, %v13538_v1, 0 }
0x154e   :  { %v13625_v28 = vand.u32 4294901760, %v39263_v57  ;;  %v13549_v18 = vand.u32 4294901760, %v13543_v40 }
0x1550   :  { %v39270_v9 = vpack.c.bf16 %v13549_v18, %v13546_v47  ;;  %v13631_v11 = vsub.f32 %v13543_v40, %v13549_v18  ;;  %v14007_v22 = vpop.permute.xlu1 %14006  ;;  %v13626_v20 = vsub.f32 %v39263_v57, %v13625_v28 }
0x1551   :  { %v14012_v43 = vsel %vm162_vm0, %v14007_v22, 0 }
0x1552   :  { %v13632_v16 = vand.u32 4294901760, %v13631_v11  ;;  %v14017_v62 = vand.u32 4294901760, %v14012_v43  ;;  %35249 = vmatpush3.bf16.xpose.msra.mxu1 %v39270_v9  ;;  %v13627_v18 = vand.u32 4294901760, %v13626_v20 }
0x1553   :  { %35250 = vmatprep.subr.bf16.mxu1 %v41038_v15 }
0x1554   :  { %v13633_v36 = vsub.f32 %v13631_v11, %v13632_v16  ;;  %v14095_v1 = vsub.f32 %v14012_v43, %v14017_v62  ;;  %v14009_v47 = vpop.permute.xlu1 %14008  ;;  %v35260_v54 = vpack.c.bf16 %v13632_v16, %v13625_v28 }
0x1555   :  { %v14014_v40 = vsel %vm162_vm0, %v14009_v47, 0 }
0x1556   :  { %v13634_v2 = vand.u32 4294901760, %v13633_v36  ;;  %v14096_v22 = vand.u32 4294901760, %v14095_v1  ;;  %v14020_v24 = vand.u32 4294901760, %v14014_v40 }
0x1558   :  { %v35266_v63 = vpack.c.bf16 %v14020_v24, %v14017_v62  ;;  %v14102_v23 = vsub.f32 %v14014_v40, %v14020_v24  ;;  %v35251_v35 = vpack.c.bf16 %v13634_v2, %v13627_v18  ;;  %v14097_v7 = vsub.f32 %v14095_v1, %v14096_v22 }
0x1559   :  { %32690 = vmatmul.mubr.f32.vlgmr.msra.gmra.mrb[34].mxu1 %v13616_v45  ;;  %v35254_v24 = vpack.c.bf16 %v13631_v11, %v39263_v57 }
0x155a   :  { %v14103_v39 = vand.u32 4294901760, %v14102_v23  ;;  %35252 = vmatpush3.bf16.xpose.msra.mxu1 %v35251_v35  ;;  %35267 = vmatpush3.bf16.xpose.msra.mxu0 %v35266_v63  ;;  %v14098_v20 = vand.u32 4294901760, %v14097_v7  ;;  %v35272_v35 = vpack.c.bf16 %v14102_v23, %v14095_v1 }
0x155b   :  { %32696 = vmatprep.mubr.msk.f32.mxu1 %vm37171_vm1, %v41039_v34  ;;  %35253 = vmatprep.subr.bf16.mxu1 %v41038_v15 }
0x155c   :  { %v14104_v43 = vsub.f32 %v14102_v23, %v14103_v39  ;;  %35268 = vmatprep.subr.bf16.mxu0 %v41038_v15  ;;  %v35278_v23 = vpack.c.bf16 %v14103_v39, %v14096_v22 }
0x155e   :  { %v14105_v36 = vand.u32 4294901760, %v14104_v43 }
0x1560   :  { %v35269_v2 = vpack.c.bf16 %v14105_v36, %v14098_v20 }
0x1561   :  { %32697 = vmatmul.mubr.f32.vlgmr.msra.gmra.mrb[34].mxu1 %v39255_v30  ;;  %32732 = vmatmul.mubr.f32.vlgmr.msra.gmra.mrb[34].mxu0 %v14087_v25 }
0x1562   :  { %35255 = vmatpush3.bf16.xpose.msra.mxu1 %v35254_v24  ;;  %35270 = vmatpush3.bf16.xpose.msra.mxu0 %v35269_v2  ;;  %v41044_v24 = vpack.c.bf16 %v39213_v53, %v39217_v14 }
0x1563   :  { %32703 = vmatprep.mubr.msk.f32.mxu1 %vm37171_vm1, %v41039_v34  ;;  %32738 = vmatprep.mubr.msk.f32.mxu0 %vm37171_vm1, %v41039_v34 }
0x1564   :  { %35256 = vmatprep.subr.bf16.mxu1 %v41038_v15  ;;  %35271 = vmatprep.subr.bf16.mxu0 %v41038_v15 }
0x1569   :  { %32704 = vmatmul.mubr.f32.vlgmr.msra.gmra.mrb[34].mxu1 %v39259_v58  ;;  %32739 = vmatmul.mubr.f32.vlgmr.msra.gmra.mrb[34].mxu0 %v39267_v3 }
0x156a   :  { %35258 = vmatpush3.bf16.xpose.msra.mxu1 %v39270_v9  ;;  %35273 = vmatpush3.bf16.xpose.msra.mxu0 %v35272_v35 }
0x156b   :  { %32710 = vmatprep.mubr.msk.f32.mxu1 %vm37171_vm1, %v41039_v34  ;;  %32745 = vmatprep.mubr.msk.f32.mxu0 %vm37171_vm1, %v41039_v34 }
0x156c   :  { %35259 = vmatprep.subr.bf16.mxu1 %v41038_v15  ;;  %35274 = vmatprep.subr.bf16.mxu0 %v41038_v15 }
0x1571   :  { %32711 = vmatmul.mubr.f32.vlgmr.msra.gmra.mrb[34].mxu1 %v13614_v48  ;;  %32746 = vmatmul.mubr.f32.vlgmr.msra.gmra.mrb[34].mxu0 %v14084_v52 }
0x1572   :  { %35261 = vmatpush3.bf16.xpose.msra.mxu1 %v35260_v54  ;;  %35276 = vmatpush3.bf16.xpose.msra.mxu0 %v35266_v63 }
0x1573   :  { %32717 = vmatprep.mubr.msk.f32.mxu1 %vm37171_vm1, %v41039_v34  ;;  %32752 = vmatprep.mubr.msk.f32.mxu0 %vm37171_vm1, %v41039_v34 }
0x1574   :  { %35262 = vmatprep.subr.bf16.mxu1 %v41038_v15  ;;  %35277 = vmatprep.subr.bf16.mxu0 %v41038_v15 }
0x1579   :  { %32718 = vmatmul.mubr.f32.vlgmr.msra.gmra.mrb[34].mxu1 %v39255_v30  ;;  %32753 = vmatmul.mubr.f32.vlgmr.msra.gmra.mrb[34].mxu0 %v14085_v59 }
0x157a   :  { %35264 = vmatpush3.bf16.xpose.msra.mxu1 %v39270_v9  ;;  %35279 = vmatpush3.bf16.xpose.msra.mxu0 %v35278_v23 }
0x157b   :  { %32724 = vmatprep.mubr.msk.f32.mxu1 %vm37171_vm1, %v41039_v34  ;;  %32759 = vmatprep.mubr.msk.f32.mxu0 %vm37171_vm1, %v41039_v34 }
0x157c   :  { %35280 = vmatprep.subr.bf16.mxu0 %v41038_v15  ;;  %35283 = vmatprep.subr.bf16.mxu1 %v41038_v15 }
0x1581   :  { %32725 = vmatmul.mubr.f32.vlgmr.msra.gmra.mrb[34].mxu1 %v39255_v30  ;;  %32760 = vmatmul.mubr.f32.vlgmr.msra.gmra.mrb[34].mxu0 %v39267_v3 }
0x1582   :  { %35282 = vmatpush3.bf16.xpose.msra.mxu0 %v35266_v63  ;;  %35285 = vmatpush3.bf16.msra.mxu1 %v39159_v38 }
0x1583   :  { %32766 = vmatprep.mubr.msk.f32.mxu0 %vm37171_vm1, %v41039_v34  ;;  %35319 = vmatprep.subr.bf16.mxu0 %v41038_v15 }
0x1584   :  { %32773 = vmatprep.mubr.msk.f32.mxu1 %vm37171_vm1, %v41039_v34  ;;  %35286 = vmatprep.subr.bf16.mxu1 %v41038_v15 }
0x1589   :  { %32767 = vmatmul.mubr.f32.vlgmr.msra.gmra.mrb[34].mxu0 %v39267_v3 }
0x158a   :  { %35321 = vmatpush3.bf16.xpose.msra.mxu0 %v39223_v10  ;;  %32857 = vmatprep.mubr.msk.f32.mxu0 %vm37171_vm1, %v41039_v34 }
0x158b   :  { %35322 = vmatprep.subr.bf16.mxu0 %v41038_v15 }
0x1654   :  { %v14000_v39 = vpop.f32.mrb[34].mxu1 }
0x1655   :  { %v14475_v45 = vmul.f32 0.17677669, %v14000_v39  ;;  %v32726_v59 = vpop.f32.mrb[35].mxu1 }
0x1657   :  { %v14477_v63 = vsel %vm2524_vm2, %v14475_v45, -inf }
0x1658   :  { %14478 = vmax.xlane.f32.xlu0 %v14477_v63 }
0x165c   :  { %v14471_v30 = vpop.f32.mrb[34].mxu0 }
0x165d   :  { %v14476_v58 = vmul.f32 0.17677669, %v14471_v30  ;;  %v32768_v57 = vpop.f32.mrb[35].mxu0 }
0x165f   :  { %v14480_v28 = vsel %vm2524_vm2, %v14476_v58, -inf }
0x1660   :  { %14481 = vmax.xlane.f32.xlu1 %v14480_v28 }
0x1671   :  { %15424 = vrot.lane.b32.xlu1 %v39145_v5, %s37170_s4 }
0x16e5   :  { %v14479_v3 = vpop.xlane.xlu0 %14478 }
0x16e6   :  { %v14483_v48 = vsub.f32 %v14475_v45, %v14479_v3  ;;  %v41045_v45 = vpack.c.bf16 %v39162_v49, %v39151_v33 }
0x16e8   :  { %v14485_v9 = vmul.f32 1.442695, %v14483_v48 }
0x16ea   :  { %36855 = vpow2.f32 %v14485_v9  ;;  %v41047_v9 = vpack.c.bf16 %v39231_v19, %v39234_v32 }
0x16ed   :  { %v14482_v11 = vpop.xlane.xlu1 %14481 }
0x16ee   :  { %v14484_v16 = vsub.f32 %v14476_v58, %v14482_v11 }
0x16f0   :  { %v14487_v62 = vmul.f32 1.442695, %v14484_v16 }
0x16f1   :  { %v15425_v52 = vpop.permute.xlu1 %15424 }
0x16f2   :  { %36857 = vpow2.f32 %v14487_v62  ;;  %v15426_v1 = vsel %vm162_vm0, %v15425_v52, 0 }
0x16f3   :  { %v15501_v47 = vand.u32 4294901760, %v15426_v1 }
0x16f4   :  { %v36856_v40 = vpop.eup %36855 }
0x16f5   :  { %v15502_v18 = vsub.f32 %v15426_v1, %v15501_v47  ;;  %v14489_v22 = vsel %vm2524_vm2, %v36856_v40, 0.0 }
0x16f6   :  { %14490 = vadd.xlane.f32.xlu0 %v14489_v22 }
0x16f7   :  { %v15503_v7 = vand.u32 4294901760, %v15502_v18 }
0x16f9   :  { %v15504_v43 = vsub.f32 %v15502_v18, %v15503_v7 }
0x16fb   :  { %v15505_v20 = vand.u32 4294901760, %v15504_v43 }
0x16fc   :  { %v36858_v36 = vpop.eup %36857 }
0x16fd   :  { %32858 = vmatmul.mubr.f32.vlgmr.msra.gmra.mrb[36].mxu0 %v15505_v20  ;;  %v14492_v25 = vsel %vm2524_vm2, %v36858_v36, 0.0 }
0x16fe   :  { %35324 = vmatpush3.bf16.xpose.msra.mxu0 %v39246_v31  ;;  %14493 = vadd.xlane.f32.xlu0 %v14492_v25 }
0x16ff   :  { %32864 = vmatprep.mubr.msk.f32.mxu0 %vm37171_vm1, %v41039_v34  ;;  %35325 = vmatprep.subr.bf16.mxu0 %v41038_v15 }
0x1705   :  { %32865 = vmatmul.mubr.f32.vlgmr.msra.gmra.mrb[36].mxu0 %v15501_v47 }
0x1706   :  { %35327 = vmatpush3.bf16.xpose.msra.mxu0 %v41044_v24  ;;  %32871 = vmatprep.mubr.msk.f32.mxu0 %vm37171_vm1, %v41039_v34 }
0x1707   :  { %35328 = vmatprep.subr.bf16.mxu0 %v41038_v15 }
0x170d   :  { %32872 = vmatmul.mubr.f32.vlgmr.msra.gmra.mrb[36].mxu0 %v15502_v18 }
0x170e   :  { %35330 = vmatpush3.bf16.xpose.msra.mxu0 %v39223_v10  ;;  %32878 = vmatprep.mubr.msk.f32.mxu0 %vm37171_vm1, %v41039_v34 }
0x170f   :  { %35331 = vmatprep.subr.bf16.mxu0 %v41038_v15 }
0x1714   :  { %15894 = vrot.lane.b32.xlu0 %v39168_v61, %s37170_s4 }
0x1715   :  { %32879 = vmatmul.mubr.f32.vlgmr.msra.gmra.mrb[36].mxu0 %v15503_v7 }
0x1716   :  { %35333 = vmatpush3.bf16.xpose.msra.mxu0 %v39237_v50  ;;  %32885 = vmatprep.mubr.msk.f32.mxu0 %vm37171_vm1, %v41039_v34 }
0x1717   :  { %35334 = vmatprep.subr.bf16.mxu0 %v41038_v15 }
0x171d   :  { %32886 = vmatmul.mubr.f32.vlgmr.msra.gmra.mrb[36].mxu0 %v15501_v47 }
0x171e   :  { %35336 = vmatpush3.bf16.xpose.msra.mxu0 %v39223_v10  ;;  %32892 = vmatprep.mubr.msk.f32.mxu0 %vm37171_vm1, %v41039_v34 }
0x171f   :  { %35355 = vmatprep.subr.bf16.mxu0 %v41038_v15 }
0x1725   :  { %32893 = vmatmul.mubr.f32.vlgmr.msra.gmra.mrb[36].mxu0 %v15501_v47 }
0x1726   :  { %32941 = vmatprep.mubr.msk.f32.mxu0 %vm37171_vm1, %v41039_v34 }
0x1783   :  { %v14491_v53 = vpop.xlane.xlu0 %14490 }
0x1784   :  { %36859 = vrcp.f32 %v14491_v53 }
0x178b   :  { %v14494_v39 = vpop.xlane.xlu0 %14493 }
0x178c   :  { %36861 = vrcp.f32 %v14494_v39 }
0x178e   :  { %v36860_v14 = vpop.eup %36859 }
0x178f   :  { %v14496_v50 = vmul.f32 %v36860_v14, %v36856_v40 }
0x1791   :  { %v14500_v31 = vsel %vm2524_vm2, %v14496_v50, 0 }
0x1792   :  { %v14569_v2 = vand.u32 4294901760, %v14500_v31 }
0x1794   :  { %v14570_v35 = vsub.f32 %v14500_v31, %v14569_v2 }
0x1796   :  { %v14571_v54 = vand.u32 4294901760, %v14570_v35  ;;  %v36862_v59 = vpop.eup %36861 }
0x1798   :  { %v14572_v23 = vsub.f32 %v14570_v35, %v14571_v54 }
0x179a   :  { %v14573_v10 = vand.u32 4294901760, %v14572_v23 }
0x179c   :  { %32774 = vmatmul.mubr.f32.vlgmr.msra.gmra.mrb[36].mxu1 %v14573_v10 }
0x179d   :  { %35288 = vmatpush3.bf16.msra.mxu1 %v39194_v13  ;;  %32780 = vmatprep.mubr.msk.f32.mxu1 %vm37171_vm1, %v41039_v34  ;;  %v14498_v13 = vmul.f32 %v36862_v59, %v36858_v36 }
0x179e   :  { %35289 = vmatprep.subr.bf16.mxu1 %v41038_v15 }
0x179f   :  { %v14962_v63 = vsel %vm2524_vm2, %v14498_v13, 0 }
0x17a0   :  { %v15031_v33 = vand.u32 4294901760, %v14962_v63 }
0x17a2   :  { %v15032_v49 = vsub.f32 %v14962_v63, %v15031_v33 }
0x17a4   :  { %32781 = vmatmul.mubr.f32.vlgmr.msra.gmra.mrb[36].mxu1 %v14569_v2  ;;  %v15033_v30 = vand.u32 4294901760, %v15032_v49 }
0x17a5   :  { %35291 = vmatpush3.bf16.msra.mxu1 %v41045_v45  ;;  %32787 = vmatprep.mubr.msk.f32.mxu1 %vm37171_vm1, %v41039_v34 }
0x17a6   :  { %35292 = vmatprep.subr.bf16.mxu1 %v41038_v15  ;;  %v15034_v58 = vsub.f32 %v15032_v49, %v15033_v30 }
0x17ac   :  { %32788 = vmatmul.mubr.f32.vlgmr.msra.gmra.mrb[36].mxu1 %v14570_v35 }
0x17ad   :  { %35294 = vmatpush3.bf16.msra.mxu1 %v39159_v38  ;;  %32794 = vmatprep.mubr.msk.f32.mxu1 %vm37171_vm1, %v41039_v34 }
0x17ae   :  { %35295 = vmatprep.subr.bf16.mxu1 %v41038_v15 }
0x17b4   :  { %32795 = vmatmul.mubr.f32.vlgmr.msra.gmra.mrb[36].mxu1 %v14571_v54 }
0x17b5   :  { %35297 = vmatpush3.bf16.msra.mxu1 %v39181_v56  ;;  %32801 = vmatprep.mubr.msk.f32.mxu1 %vm37171_vm1, %v41039_v34  ;;  %v15035_v56 = vand.u32 4294901760, %v15034_v58 }
0x17b6   :  { %35298 = vmatprep.subr.bf16.mxu1 %v41038_v15 }
0x17bc   :  { %32802 = vmatmul.mubr.f32.vlgmr.msra.gmra.mrb[36].mxu1 %v14569_v2 }
0x17bd   :  { %35300 = vmatpush3.bf16.msra.mxu1 %v39159_v38  ;;  %32808 = vmatprep.mubr.msk.f32.mxu1 %vm37171_vm1, %v41039_v34  ;;  %v41046_v38 = vpack.c.bf16 %v39192_v55, %v39179_v12 }
0x17be   :  { %35301 = vmatprep.subr.bf16.mxu1 %v41038_v15 }
0x17c4   :  { %32809 = vmatmul.mubr.f32.vlgmr.msra.gmra.mrb[36].mxu1 %v14569_v2 }
0x17c5   :  { %35303 = vmatpush3.bf16.msra.mxu1 %v39189_v0  ;;  %32815 = vmatprep.mubr.msk.f32.mxu1 %vm37171_vm1, %v41039_v34 }
0x17c6   :  { %35304 = vmatprep.subr.bf16.mxu1 %v41038_v15 }
0x17c8   :  { %32816 = vmatmul.mubr.f32.vlgmr.msra.gmra.mrb[38].mxu1 %v15035_v56 }
0x17c9   :  { %35306 = vmatpush3.bf16.msra.mxu1 %v39203_v17  ;;  %32822 = vmatprep.mubr.msk.f32.mxu1 %vm37171_vm1, %v41039_v34  ;;  %v15895_v17 = vpop.permute.xlu0 %15894 }
0x17ca   :  { %35307 = vmatprep.subr.bf16.mxu1 %v41038_v15  ;;  %v15896_v12 = vsel %vm162_vm0, %v15895_v17, 0 }
0x17cb   :  { %v15971_v55 = vand.u32 4294901760, %v15896_v12 }
0x17cd   :  { %v15972_v57 = vsub.f32 %v15896_v12, %v15971_v55 }
0x17cf   :  { %v15973_v28 = vand.u32 4294901760, %v15972_v57 }
0x17d0   :  { %32823 = vmatmul.mubr.f32.vlgmr.msra.gmra.mrb[38].mxu1 %v15031_v33 }
0x17d1   :  { %35309 = vmatpush3.bf16.msra.mxu1 %v41046_v38  ;;  %32829 = vmatprep.mubr.msk.f32.mxu1 %vm37171_vm1, %v41039_v34 }
0x17d2   :  { %35310 = vmatprep.subr.bf16.mxu1 %v41038_v15 }
0x17d8   :  { %32830 = vmatmul.mubr.f32.vlgmr.msra.gmra.mrb[38].mxu1 %v15032_v49 }
0x17d9   :  { %35312 = vmatpush3.bf16.msra.mxu1 %v39189_v0  ;;  %32836 = vmatprep.mubr.msk.f32.mxu1 %vm37171_vm1, %v41039_v34 }
0x17da   :  { %35313 = vmatprep.subr.bf16.mxu1 %v41038_v15 }
0x17e0   :  { %32837 = vmatmul.mubr.f32.vlgmr.msra.gmra.mrb[38].mxu1 %v15033_v30 }
0x17e1   :  { %35315 = vmatpush3.bf16.msra.mxu1 %v39201_v51  ;;  %32843 = vmatprep.mubr.msk.f32.mxu1 %vm37171_vm1, %v41039_v34  ;;  %v15974_v51 = vsub.f32 %v15972_v57, %v15973_v28 }
0x17e2   :  { %35316 = vmatprep.subr.bf16.mxu1 %v41038_v15 }
0x17e3   :  { %v15975_v3 = vand.u32 4294901760, %v15974_v51 }
0x17e8   :  { %32844 = vmatmul.mubr.f32.vlgmr.msra.gmra.mrb[38].mxu1 %v15031_v33 }
0x17e9   :  { %35318 = vmatpush3.bf16.msra.mxu1 %v39189_v0  ;;  %32850 = vmatprep.mubr.msk.f32.mxu1 %vm37171_vm1, %v41039_v34 }
0x17ea   :  { %35337 = vmatprep.subr.bf16.mxu1 %v41038_v15 }
0x17f0   :  { %32851 = vmatmul.mubr.f32.vlgmr.msra.gmra.mrb[38].mxu1 %v15031_v33 }
0x17f1   :  { %32899 = vmatprep.mubr.msk.f32.mxu1 %vm37171_vm1, %v41039_v34 }
0x17f2   :  { %35339 = vmatpush3.bf16.xpose.msra.mxu1 %v39239_v42 }
0x17f3   :  { %35340 = vmatprep.subr.bf16.mxu1 %v41038_v15 }
0x17f8   :  { %v15889_v48 = vpop.f32.mrb[36].mxu0 }
0x17f9   :  { %32900 = vmatmul.mubr.f32.vlgmr.msra.gmra.mrb[40].mxu1 %v15975_v3  ;;  %v32894_v0 = vpop.f32.mrb[37].mxu0  ;;  %v16363_v52 = vmul.f32 0.17677669, %v15889_v48 }
0x17fa   :  { %35342 = vmatpush3.bf16.xpose.msra.mxu1 %v39251_v60  ;;  %32906 = vmatprep.mubr.msk.f32.mxu1 %vm37171_vm1, %v41039_v34 }
0x17fb   :  { %35343 = vmatprep.subr.bf16.mxu1 %v41038_v15  ;;  %v16365_v1 = vsel %vm2524_vm2, %v16363_v52, -inf }
0x1801   :  { %32907 = vmatmul.mubr.f32.vlgmr.msra.gmra.mrb[40].mxu1 %v15971_v55 }
0x1802   :  { %35345 = vmatpush3.bf16.xpose.msra.mxu1 %v41047_v9  ;;  %32913 = vmatprep.mubr.msk.f32.mxu1 %vm37171_vm1, %v41039_v34 }
0x1803   :  { %35346 = vmatprep.subr.bf16.mxu1 %v41038_v15 }
0x1809   :  { %32914 = vmatmul.mubr.f32.vlgmr.msra.gmra.mrb[40].mxu1 %v15972_v57 }
0x180a   :  { %35348 = vmatpush3.bf16.xpose.msra.mxu1 %v39239_v42  ;;  %32920 = vmatprep.mubr.msk.f32.mxu1 %vm37171_vm1, %v41039_v34 }
0x180b   :  { %35349 = vmatprep.subr.bf16.mxu1 %v41038_v15 }
0x1811   :  { %32921 = vmatmul.mubr.f32.vlgmr.msra.gmra.mrb[40].mxu1 %v15973_v28 }
0x1812   :  { %35351 = vmatpush3.bf16.xpose.msra.mxu1 %v39249_v8  ;;  %32927 = vmatprep.mubr.msk.f32.mxu1 %vm37171_vm1, %v41039_v34 }
0x1813   :  { %35352 = vmatprep.subr.bf16.mxu1 %v41038_v15 }
0x1819   :  { %32928 = vmatmul.mubr.f32.vlgmr.msra.gmra.mrb[40].mxu1 %v15971_v55 }
0x181a   :  { %35354 = vmatpush3.bf16.xpose.msra.mxu1 %v39239_v42  ;;  %32934 = vmatprep.mubr.msk.f32.mxu1 %vm37171_vm1, %v41039_v34 }
0x181b   :  { %35373 = vmatprep.subr.bf16.mxu1 %v41038_v15 }
0x1821   :  { %32935 = vmatmul.mubr.f32.vlgmr.msra.gmra.mrb[40].mxu1 %v15971_v55 }
0x1822   :  { %32983 = vmatprep.mubr.msk.f32.mxu1 %vm37171_vm1, %v41039_v34 }
0x1897   :  { %v39440_v19 = vpop.f32.mrb[36].mxu1 }
0x1898   :  { %v32810_v32 = vpop.f32.mrb[37].mxu1 }
0x18c3   :  { %v39442_v8 = vpop.f32.mrb[38].mxu1 }
0x18c4   :  { %v32852_v60 = vpop.f32.mrb[39].mxu1 }
0x18f4   :  { %v16359_v11 = vpop.f32.mrb[40].mxu1 }
0x18f5   :  { %v16364_v16 = vmul.f32 0.17677669, %v16359_v11  ;;  %v32936_v62 = vpop.f32.mrb[41].mxu1 }
0x18f7   :  { %v16368_v42 = vsel %vm2524_vm2, %v16364_v16, -inf }
0x18f8   :  { %16369 = vmax.xlane.f32.xlu1 %v16368_v42 }
0x1909   :  { %16857 = vrot.lane.b32.xlu1 %v39215_v26, %s37170_s4 }
0x190d   :  { %18393 = vrot.lane.b32.xlu1 %v39141_v44, %s37172_s5 }
0x1911   :  { %18395 = vrot.lane.b32.xlu1 %v39148_v46, %s37172_s5 }
0x1935   :  { %16366 = vmax.xlane.f32.xlu1 %v16365_v1 }
0x1946   :  { %16387 = vrot.lane.b32.xlu1 %v39209_v6, %s37170_s4 }
0x1985   :  { %v16370_v47 = vpop.xlane.xlu1 %16369 }
0x1986   :  { %v16372_v40 = vsub.f32 %v16364_v16, %v16370_v47 }
0x1988   :  { %v16375_v18 = vmul.f32 1.442695, %v16372_v40 }
0x1989   :  { %v16858_v22 = vpop.permute.xlu1 %16857 }
0x198a   :  { %36863 = vpow2.f32 %v16375_v18  ;;  %v16868_v56 = vand.u32 4294901760, %v16858_v22 }
0x198c   :  { %v16950_v12 = vsub.f32 %v16858_v22, %v16868_v56 }
0x198d   :  { %v18394_v7 = vpop.permute.xlu1 %18393 }
0x198e   :  { %v18399_v43 = vsel %vm162_vm0, %v18394_v7, 0  ;;  %v16951_v51 = vand.u32 4294901760, %v16950_v12 }
0x198f   :  { %v18404_v20 = vand.u32 4294901760, %v18399_v43 }
0x1990   :  { %v16952_v32 = vsub.f32 %v16950_v12, %v16951_v51 }
0x1991   :  { %v39455_v44 = vsub.f32 %v18399_v43, %v18404_v20  ;;  %v18396_v36 = vpop.permute.xlu1 %18395 }
0x1992   :  { %v18401_v25 = vsel %vm162_vm0, %v18396_v36, 0  ;;  %v16953_v62 = vand.u32 4294901760, %v16952_v32 }
0x1993   :  { %v18483_v24 = vand.u32 4294901760, %v39455_v44  ;;  %v18407_v53 = vand.u32 4294901760, %v18401_v25 }
0x1994   :  { %v36864_v14 = vpop.eup %36863 }
0x1995   :  { %v39459_v50 = vpack.c.bf16 %v18407_v53, %v18404_v20  ;;  %v39461_v31 = vsub.f32 %v18401_v25, %v18407_v53  ;;  %v16380_v2 = vsel %vm2524_vm2, %v36864_v14, 0.0  ;;  %v18484_v35 = vsub.f32 %v39455_v44, %v18483_v24 }
0x1996   :  { %16381 = vadd.xlane.f32.xlu0 %v16380_v2 }
0x1997   :  { %v18490_v54 = vand.u32 4294901760, %v39461_v31  ;;  %v35494_v23 = vpack.c.bf16 %v39461_v31, %v39455_v44  ;;  %v18485_v45 = vand.u32 4294901760, %v18484_v35 }
0x1999   :  { %v18491_v10 = vsub.f32 %v39461_v31, %v18490_v54  ;;  %v39469_v39 = vpack.c.bf16 %v18490_v54, %v18483_v24 }
0x199b   :  { %v18492_v59 = vand.u32 4294901760, %v18491_v10 }
0x199d   :  { %v39471_v13 = vpack.c.bf16 %v18492_v59, %v18485_v45 }
0x19ac   :  { %16855 = vrot.lane.b32.xlu0 %v39221_v37, %s37170_s4 }
0x19b0   :  { %18391 = vrot.lane.b32.xlu0 %v39148_v46, %s37173_s22 }
0x19b4   :  { %18864 = vrot.lane.b32.xlu0 %v39164_v29, %s37172_s5 }
0x19b8   :  { %18866 = vrot.lane.b32.xlu0 %v39176_v4, %s37172_s5 }
0x19bc   :  { %18862 = vrot.lane.b32.xlu0 %v39176_v4, %s37173_s22 }
0x19c2   :  { %v16367_v63 = vpop.xlane.xlu1 %16366 }
0x19c3   :  { %v16371_v33 = vsub.f32 %v16363_v52, %v16367_v63 }
0x19c5   :  { %v16373_v49 = vmul.f32 1.442695, %v16371_v33 }
0x19c7   :  { %36865 = vpow2.f32 %v16373_v49 }
0x19d1   :  { %v39483_v30 = vpop.eup %36865 }
0x19d2   :  { %v16377_v58 = vsel %vm2524_vm2, %v39483_v30, 0.0 }
0x19db   :  { %16378 = vadd.xlane.f32.xlu0 %v16377_v58 }
0x19f1   :  { %16389 = vrot.lane.b32.xlu0 %v39205_v27, %s37170_s4 }
0x1a23   :  { %v16382_v46 = vpop.xlane.xlu0 %16381 }
0x1a24   :  { %36867 = vrcp.f32 %v16382_v46 }
0x1a27   :  { %v16856_v29 = vpop.permute.xlu0 %16855 }
0x1a28   :  { %v16865_v38 = vand.u32 4294901760, %v16856_v29 }
0x1a2a   :  { %v35374_v17 = vpack.c.bf16 %v16868_v56, %v16865_v38  ;;  %v16943_v4 = vsub.f32 %v16856_v29, %v16865_v38 }
0x1a2b   :  { %v18392_v47 = vpop.permute.xlu0 %18391 }
0x1a2c   :  { %35375 = vmatpush3.bf16.msra.mxu1 %v35374_v17  ;;  %v16944_v28 = vand.u32 4294901760, %v16943_v4  ;;  %v35380_v1 = vpack.c.bf16 %v16950_v12, %v16943_v4  ;;  %v18397_v18 = vsel %vm162_vm0, %v18392_v47, 0 }
0x1a2d   :  { %35376 = vmatprep.subr.bf16.mxu1 %v41038_v15  ;;  %v39504_v7 = vand.u32 4294901760, %v18397_v18 }
0x1a2e   :  { %v36868_v55 = vpop.eup %36867  ;;  %v16945_v0 = vsub.f32 %v16943_v4, %v16944_v28  ;;  %v35386_v40 = vpack.c.bf16 %v16951_v51, %v16944_v28 }
0x1a2f   :  { %v16386_v57 = vmul.f32 %v36868_v55, %v36864_v14  ;;  %v18865_v22 = vpop.permute.xlu0 %18864  ;;  %v18471_v20 = vsub.f32 %v18397_v18, %v39504_v7  ;;  %v16388_v14 = vpop.permute.xlu1 %16387 }
0x1a30   :  { %v16946_v11 = vand.u32 4294901760, %v16945_v0  ;;  %v16397_v54 = vand.u32 4294901760, %v16388_v14 }
0x1a31   :  { %v16862_v3 = vsel %vm2524_vm2, %v16386_v57, 0  ;;  %v18472_v36 = vand.u32 4294901760, %v18471_v20  ;;  %v18870_v57 = vsel %vm162_vm0, %v18865_v22, 0 }
0x1a32   :  { %v16931_v48 = vand.u32 4294901760, %v16862_v3  ;;  %v35377_v52 = vpack.c.bf16 %v16953_v62, %v16946_v11  ;;  %v39523_v63 = vsub.f32 %v16388_v14, %v16397_v54 }
0x1a33   :  { %v18867_v43 = vpop.permute.xlu0 %18866  ;;  %v18473_v24 = vsub.f32 %v18471_v20, %v18472_v36 }
0x1a34   :  { %v16932_v9 = vsub.f32 %v16862_v3, %v16931_v48  ;;  %v16476_v58 = vand.u32 4294901760, %v39523_v63  ;;  %v18872_v55 = vsel %vm162_vm0, %v18867_v43, 0 }
0x1a35   :  { %v18474_v2 = vand.u32 4294901760, %v18473_v24  ;;  %v18878_v28 = vand.u32 4294901760, %v18872_v55 }
0x1a36   :  { %v16933_v60 = vand.u32 4294901760, %v16932_v9  ;;  %v16477_v38 = vsub.f32 %v39523_v63, %v16476_v58 }
0x1a37   :  { %v18863_v25 = vpop.permute.xlu0 %18862  ;;  %v18960_v0 = vsub.f32 %v18872_v55, %v18878_v28 }
0x1a38   :  { %v16934_v16 = vsub.f32 %v16932_v9, %v16933_v60  ;;  %v18868_v51 = vsel %vm162_vm0, %v18863_v25, 0 }
0x1a3a   :  { %v16935_v42 = vand.u32 4294901760, %v16934_v16 }
0x1a3c   :  { %32984 = vmatmul.mubr.f32.vlgmr.msra.gmra.mrb[42].mxu1 %v16935_v42 }
0x1a3d   :  { %35378 = vmatpush3.bf16.msra.mxu1 %v35377_v52  ;;  %32990 = vmatprep.mubr.msk.f32.mxu1 %vm37171_vm1, %v41039_v34 }
0x1a3e   :  { %35379 = vmatprep.subr.bf16.mxu1 %v41038_v15 }
0x1a44   :  { %32991 = vmatmul.mubr.f32.vlgmr.msra.gmra.mrb[42].mxu1 %v16931_v48 }
0x1a45   :  { %35381 = vmatpush3.bf16.msra.mxu1 %v35380_v1  ;;  %32997 = vmatprep.mubr.msk.f32.mxu1 %vm37171_vm1, %v41039_v34 }
0x1a46   :  { %35382 = vmatprep.subr.bf16.mxu1 %v41038_v15 }
0x1a4c   :  { %32998 = vmatmul.mubr.f32.vlgmr.msra.gmra.mrb[42].mxu1 %v16932_v9 }
0x1a4d   :  { %35384 = vmatpush3.bf16.msra.mxu1 %v35374_v17  ;;  %33004 = vmatprep.mubr.msk.f32.mxu1 %vm37171_vm1, %v41039_v34 }
0x1a4e   :  { %35385 = vmatprep.subr.bf16.mxu1 %v41038_v15 }
0x1a54   :  { %33005 = vmatmul.mubr.f32.vlgmr.msra.gmra.mrb[42].mxu1 %v16933_v60  ;;  %v18961_v60 = vand.u32 4294901760, %v18960_v0 }
0x1a55   :  { %35387 = vmatpush3.bf16.msra.mxu1 %v35386_v40  ;;  %33011 = vmatprep.mubr.msk.f32.mxu1 %vm37171_vm1, %v41039_v34 }
0x1a56   :  { %35388 = vmatprep.subr.bf16.mxu1 %v41038_v15  ;;  %v18962_v42 = vsub.f32 %v18960_v0, %v18961_v60 }
0x1a58   :  { %v18963_v1 = vand.u32 4294901760, %v18962_v42 }
0x1a5c   :  { %33012 = vmatmul.mubr.f32.vlgmr.msra.gmra.mrb[42].mxu1 %v16931_v48 }
0x1a5d   :  { %35390 = vmatpush3.bf16.msra.mxu1 %v35374_v17  ;;  %33018 = vmatprep.mubr.msk.f32.mxu1 %vm37171_vm1, %v41039_v34 }
0x1a5e   :  { %35487 = vmatprep.subr.bf16.mxu1 %v41038_v15 }
0x1a64   :  { %33019 = vmatmul.mubr.f32.vlgmr.msra.gmra.mrb[42].mxu1 %v16931_v48  ;;  %v18875_v48 = vand.u32 4294901760, %v18870_v57 }
0x1a65   :  { %33157 = vmatprep.mubr.msk.f32.mxu1 %vm37171_vm1, %v41039_v34 }
0x1a66   :  { %35489 = vmatpush3.bf16.xpose.msra.mxu1 %v39459_v50  ;;  %v18953_v9 = vsub.f32 %v18870_v57, %v18875_v48  ;;  %v35506_v62 = vpack.c.bf16 %v18878_v28, %v18875_v48 }
0x1a67   :  { %35490 = vmatprep.subr.bf16.mxu1 %v41038_v15 }
0x1a68   :  { %v16379_v53 = vpop.xlane.xlu0 %16378  ;;  %v18954_v11 = vand.u32 4294901760, %v18953_v9 }
0x1a69   :  { %36869 = vrcp.f32 %v16379_v53 }
0x1a6a   :  { %v35518_v43 = vpack.c.bf16 %v18961_v60, %v18954_v11 }
0x1a6c   :  { %v16390_v35 = vpop.permute.xlu0 %16389 }
0x1a6d   :  { %33158 = vmatmul.mubr.f32.vlgmr.msra.gmra.mrb[44].mxu1 %v18474_v2  ;;  %v16400_v10 = vand.u32 4294901760, %v16390_v35 }
0x1a6e   :  { %35492 = vmatpush3.bf16.xpose.msra.mxu1 %v39471_v13  ;;  %33164 = vmatprep.mubr.msk.f32.mxu1 %vm37171_vm1, %v41039_v34 }
0x1a6f   :  { %v39517_v45 = vpack.c.bf16 %v16400_v10, %v16397_v54  ;;  %35493 = vmatprep.subr.bf16.mxu1 %v41038_v15  ;;  %v39520_v59 = vsub.f32 %v16390_v35, %v16400_v10  ;;  %v13527_v35 = vld [vmem:[#allocation8 + $0xd0] sm:$0xff]  ;;  %v13528_v54 = vld [vmem:[#allocation8 + $0xd8] sm:$0xff] }
0x1a70   :  { %v17336_v10 = vand.u32 4294901760, %v13527_v35 }
0x1a71   :  { %35357 = vmatpush3.bf16.msra.mxu0 %v39517_v45  ;;  %v16483_v13 = vand.u32 4294901760, %v39520_v59  ;;  %v35362_v3 = vpack.c.bf16 %v39520_v59, %v39523_v63 }
0x1a72   :  { %35358 = vmatprep.subr.bf16.mxu0 %v41038_v15 }
0x1a73   :  { %v36870_v33 = vpop.eup %36869  ;;  %v35368_v47 = vpack.c.bf16 %v16483_v13, %v16476_v58  ;;  %v17434_v58 = vsub.f32 %v13527_v35, %v17336_v10 }
0x1a74   :  { %v16384_v49 = vmul.f32 %v36870_v33, %v39483_v30  ;;  %v16484_v30 = vsub.f32 %v39520_v59, %v16483_v13 }
0x1a75   :  { %33165 = vmatmul.mubr.f32.vlgmr.msra.gmra.mrb[44].mxu1 %v39504_v7 }
0x1a76   :  { %35495 = vmatpush3.bf16.xpose.msra.mxu1 %v35494_v23  ;;  %33171 = vmatprep.mubr.msk.f32.mxu1 %vm37171_vm1, %v41039_v34  ;;  %v16394_v46 = vsel %vm2524_vm2, %v16384_v49, 0  ;;  %v16485_v44 = vand.u32 4294901760, %v16484_v30  ;;  %v16478_v23 = vand.u32 4294901760, %v16477_v38 }
0x1a77   :  { %35496 = vmatprep.subr.bf16.mxu1 %v41038_v15  ;;  %v39537_v29 = vand.u32 4294901760, %v16394_v46 }
0x1a78   :  { %v35359_v12 = vpack.c.bf16 %v16485_v44, %v16478_v23 }
0x1a79   :  { %v16464_v56 = vsub.f32 %v16394_v46, %v39537_v29 }
0x1a7b   :  { %v16465_v17 = vand.u32 4294901760, %v16464_v56 }
0x1a7d   :  { %33172 = vmatmul.mubr.f32.vlgmr.msra.gmra.mrb[44].mxu1 %v18471_v20  ;;  %v16466_v31 = vsub.f32 %v16464_v56, %v16465_v17  ;;  %v13525_v20 = vld [vmem:[#allocation8 + $0xc0] sm:$0xff] }
0x1a7e   :  { %35498 = vmatpush3.bf16.xpose.msra.mxu1 %v39459_v50  ;;  %33178 = vmatprep.mubr.msk.f32.mxu1 %vm37171_vm1, %v41039_v34  ;;  %v17330_v25 = vand.u32 4294901760, %v13525_v20 }
0x1a7f   :  { %v16467_v4 = vand.u32 4294901760, %v16466_v31  ;;  %35499 = vmatprep.subr.bf16.mxu1 %v41038_v15 }
0x1a80   :  { %v17420_v14 = vsub.f32 %v13525_v20, %v17330_v25 }
0x1a81   :  { %32942 = vmatmul.mubr.f32.vlgmr.msra.gmra.mrb[38].mxu0 %v16467_v4 }
0x1a82   :  { %35360 = vmatpush3.bf16.msra.mxu0 %v35359_v12  ;;  %32948 = vmatprep.mubr.msk.f32.mxu0 %vm37171_vm1, %v41039_v34  ;;  %v17421_v59 = vand.u32 4294901760, %v17420_v14 }
0x1a83   :  { %35361 = vmatprep.subr.bf16.mxu0 %v41038_v15 }
0x1a84   :  { %v17422_v49 = vsub.f32 %v17420_v14, %v17421_v59 }
0x1a85   :  { %33179 = vmatmul.mubr.f32.vlgmr.msra.gmra.mrb[44].mxu1 %v18472_v36  ;;  %v13526_v36 = vld [vmem:[#allocation8 + $0xc8] sm:$0xff] }
0x1a86   :  { %35501 = vmatpush3.bf16.xpose.msra.mxu1 %v39469_v39  ;;  %33185 = vmatprep.mubr.msk.f32.mxu1 %vm37171_vm1, %v41039_v34  ;;  %v18941_v39 = vand.u32 4294901760, %v18868_v51  ;;  %v17333_v24 = vand.u32 4294901760, %v13526_v36 }
0x1a87   :  { %35502 = vmatprep.subr.bf16.mxu1 %v41038_v15 }
0x1a88   :  { %v18942_v32 = vsub.f32 %v18868_v51, %v18941_v39  ;;  %v39604_v53 = vpack.c.bf16 %v17333_v24, %v17330_v25  ;;  %v17427_v2 = vsub.f32 %v13526_v36, %v17333_v24  ;;  %v13517_v24 = vld [vmem:[#allocation8 + $0x80] sm:$0xff] }
0x1a89   :  { %32949 = vmatmul.mubr.f32.vlgmr.msra.gmra.mrb[38].mxu0 %v39537_v29  ;;  %v17864_v35 = vand.u32 4294901760, %v13517_v24 }
0x1a8a   :  { %35363 = vmatpush3.bf16.msra.mxu0 %v35362_v3  ;;  %32955 = vmatprep.mubr.msk.f32.mxu0 %vm37171_vm1, %v41039_v34  ;;  %v18943_v16 = vand.u32 4294901760, %v18942_v32  ;;  %v17428_v63 = vand.u32 4294901760, %v17427_v2  ;;  %v35407_v55 = vpack.c.bf16 %v17427_v2, %v17420_v14  ;;  %v13518_v14 = vld [vmem:[#allocation8 + $0x88] sm:$0xff] }
0x1a8b   :  { %35364 = vmatprep.subr.bf16.mxu0 %v41038_v15 }
0x1a8c   :  { %v18944_v52 = vsub.f32 %v18942_v32, %v18943_v16  ;;  %v17429_v13 = vsub.f32 %v17427_v2, %v17428_v63  ;;  %v35423_v28 = vpack.c.bf16 %v17428_v63, %v17421_v59  ;;  %v17858_v2 = vsel %vm162_vm0, %v39440_v19, 0 }
0x1a8d   :  { %33186 = vmatmul.mubr.f32.vlgmr.msra.gmra.mrb[44].mxu1 %v39504_v7  ;;  %v39638_v59 = vand.u32 4294901760, %v17858_v2  ;;  %v17861_v63 = vsel %vm162_vm0, %v39442_v8, 0  ;;  %v39643_v19 = vsub.f32 %v13517_v24, %v17864_v35 }
0x1a8e   :  { %35504 = vmatpush3.bf16.xpose.msra.mxu1 %v39459_v50  ;;  %33192 = vmatprep.mubr.msk.f32.mxu1 %vm37171_vm1, %v41039_v34  ;;  %v18955_v50 = vsub.f32 %v18953_v9, %v18954_v11  ;;  %v18945_v18 = vand.u32 4294901760, %v18944_v52  ;;  %v17430_v30 = vand.u32 4294901760, %v17429_v13 }
0x1a8f   :  { %35505 = vmatprep.subr.bf16.mxu1 %v41038_v15  ;;  %v17955_v8 = vand.u32 4294901760, %v39643_v19 }
0x1a90   :  { %v18956_v40 = vand.u32 4294901760, %v18955_v50 }
0x1a91   :  { %32956 = vmatmul.mubr.f32.vlgmr.msra.gmra.mrb[38].mxu0 %v16464_v56  ;;  %v17435_v56 = vand.u32 4294901760, %v17434_v58 }
0x1a92   :  { %35366 = vmatpush3.bf16.msra.mxu0 %v39517_v45  ;;  %32962 = vmatprep.mubr.msk.f32.mxu0 %vm37171_vm1, %v41039_v34  ;;  %v35509_v22 = vpack.c.bf16 %v18963_v1, %v18956_v40 }
0x1a93   :  { %35367 = vmatprep.subr.bf16.mxu0 %v41038_v15  ;;  %v17436_v44 = vsub.f32 %v17434_v58, %v17435_v56 }
0x1a95   :  { %33193 = vmatmul.mubr.f32.vlgmr.msra.gmra.mrb[44].mxu1 %v39504_v7  ;;  %v35512_v7 = vpack.c.bf16 %v18960_v0, %v18953_v9  ;;  %v17437_v23 = vand.u32 4294901760, %v17436_v44 }
0x1a96   :  { %35507 = vmatpush3.bf16.xpose.msra.mxu1 %v35506_v62  ;;  %33199 = vmatprep.mubr.msk.f32.mxu1 %vm37171_vm1, %v41039_v34 }
0x1a97   :  { %35508 = vmatprep.subr.bf16.mxu1 %v41038_v15 }
0x1a99   :  { %32963 = vmatmul.mubr.f32.vlgmr.msra.gmra.mrb[38].mxu0 %v16465_v17 }
0x1a9a   :  { %35369 = vmatpush3.bf16.msra.mxu0 %v35368_v47  ;;  %32969 = vmatprep.mubr.msk.f32.mxu0 %vm37171_vm1, %v41039_v34 }
0x1a9b   :  { %35370 = vmatprep.subr.bf16.mxu0 %v41038_v15 }
0x1a9d   :  { %33200 = vmatmul.mubr.f32.vlgmr.msra.gmra.mrb[46].mxu1 %v18945_v18 }
0x1a9e   :  { %35510 = vmatpush3.bf16.xpose.msra.mxu1 %v35509_v22  ;;  %33206 = vmatprep.mubr.msk.f32.mxu1 %vm37171_vm1, %v41039_v34 }
0x1a9f   :  { %35511 = vmatprep.subr.bf16.mxu1 %v41038_v15 }
0x1aa1   :  { %32970 = vmatmul.mubr.f32.vlgmr.msra.gmra.mrb[38].mxu0 %v39537_v29 }
0x1aa2   :  { %35372 = vmatpush3.bf16.msra.mxu0 %v39517_v45  ;;  %32976 = vmatprep.mubr.msk.f32.mxu0 %vm37171_vm1, %v41039_v34  ;;  %v17339_v45 = vand.u32 4294901760, %v13528_v54 }
0x1aa3   :  { %35392 = vmatprep.subr.bf16.mxu0 %v39604_v53 }
0x1aa4   :  { %v39608_v33 = vpack.c.bf16 %v17339_v45, %v17336_v10  ;;  %v17441_v46 = vsub.f32 %v13528_v54, %v17339_v45  ;;  %v17867_v54 = vand.u32 4294901760, %v13518_v14  ;;  %v13519_v10 = vld [vmem:[#allocation8 + $0x90] sm:$0xff]  ;;  %v13520_v45 = vld [vmem:[#allocation8 + $0x98] sm:$0xff] }
0x1aa5   :  { %33207 = vmatmul.mubr.f32.vlgmr.msra.gmra.mrb[46].mxu1 %v18941_v39  ;;  %v17873_v13 = vand.u32 4294901760, %v13520_v45 }
0x1aa6   :  { %35513 = vmatpush3.bf16.xpose.msra.mxu1 %v35512_v7  ;;  %33213 = vmatprep.mubr.msk.f32.mxu1 %vm37171_vm1, %v41039_v34  ;;  %v17442_v38 = vand.u32 4294901760, %v17441_v46  ;;  %v35411_v57 = vpack.c.bf16 %v17441_v46, %v17434_v58  ;;  %v39645_v58 = vsub.f32 %v13518_v14, %v17867_v54 }
0x1aa7   :  { %35514 = vmatprep.subr.bf16.mxu1 %v41038_v15 }
0x1aa8   :  { %v17443_v31 = vsub.f32 %v17441_v46, %v17442_v38  ;;  %v39612_v51 = vpack.c.bf16 %v17442_v38, %v17435_v56  ;;  %v17933_v46 = vsub.f32 %v17858_v2, %v39638_v59  ;;  %v17975_v38 = vsub.f32 %v13520_v45, %v17873_v13 }
0x1aa9   :  { %32977 = vmatmul.mubr.f32.vlgmr.msra.gmra.mrb[38].mxu0 %v39537_v29  ;;  %v17423_v29 = vand.u32 4294901760, %v17422_v49  ;;  %v17870_v49 = vand.u32 4294901760, %v13519_v10 }
0x1aaa   :  { %35394 = vmatpush3.bf16.msra.mxu0 %v39604_v53  ;;  %v17444_v4 = vand.u32 4294901760, %v17443_v31  ;;  %v35439_v31 = vpack.c.bf16 %v17867_v54, %v17864_v35 }
0x1aab   :  { %35396 = vmatprep.subr.bf16.mxu0 %v39608_v33  ;;  %v35399_v17 = vpack.c.bf16 %v17430_v30, %v17423_v29  ;;  %v39648_v29 = vand.u32 4294901760, %v17861_v63  ;;  %v17962_v30 = vand.u32 4294901760, %v39645_v58  ;;  %v17968_v56 = vsub.f32 %v13519_v10, %v17870_v49 }
0x1aac   :  { %v35403_v12 = vpack.c.bf16 %v17444_v4, %v17437_v23  ;;  %v17956_v23 = vsub.f32 %v39643_v19, %v17955_v8 }
0x1aad   :  { %33214 = vmatmul.mubr.f32.vlgmr.msra.gmra.mrb[46].mxu1 %v18942_v32  ;;  %v17943_v44 = vsub.f32 %v17861_v63, %v39648_v29  ;;  %v17963_v4 = vsub.f32 %v39645_v58, %v17962_v30 }
0x1aae   :  { %35516 = vmatpush3.bf16.xpose.msra.mxu1 %v35506_v62  ;;  %33220 = vmatprep.mubr.msk.f32.mxu1 %vm37171_vm1, %v41039_v34 }
0x1aaf   :  { %35517 = vmatprep.subr.bf16.mxu1 %v41038_v15  ;;  %35398 = vmatpush3.bf16.msra.mxu0 %v39608_v33 }
0x1ab0   :  { %35400 = vmatprep.subr.bf16.mxu0 %v35399_v17 }
0x1ab5   :  { %33221 = vmatmul.mubr.f32.vlgmr.msra.gmra.mrb[46].mxu1 %v18943_v16 }
0x1ab6   :  { %35519 = vmatpush3.bf16.xpose.msra.mxu1 %v35518_v43  ;;  %33227 = vmatprep.mubr.msk.f32.mxu1 %vm37171_vm1, %v41039_v34 }
0x1ab7   :  { %35520 = vmatprep.subr.bf16.mxu1 %v41038_v15 }
0x1abd   :  { %33228 = vmatmul.mubr.f32.vlgmr.msra.gmra.mrb[46].mxu1 %v18941_v39 }
0x1abe   :  { %35522 = vmatpush3.bf16.xpose.msra.mxu1 %v35506_v62  ;;  %33234 = vmatprep.mubr.msk.f32.mxu1 %vm37171_vm1, %v41039_v34 }
0x1abf   :  { %35541 = vmatprep.subr.bf16.mxu1 %v41038_v15 }
0x1ac5   :  { %33235 = vmatmul.mubr.f32.vlgmr.msra.gmra.mrb[46].mxu1 %v18941_v39 }
0x1ac6   :  { %33283 = vmatprep.mubr.msk.f32.mxu1 %vm37171_vm1, %v41039_v34 }
0x1b37   :  { %v17319_v3 = vpop.f32.mrb[42].mxu1 }
0x1b38   :  { %v33020_v48 = vpop.f32.mrb[43].mxu1  ;;  %v17327_v60 = vsel %vm162_vm0, %v17319_v3, 0  ;;  %v17957_v3 = vand.u32 4294901760, %v17956_v23 }
0x1b39   :  { %v39619_v11 = vand.u32 4294901760, %v17327_v60  ;;  %v17964_v48 = vand.u32 4294901760, %v17963_v4 }
0x1b3b   :  { %v17409_v16 = vsub.f32 %v17327_v60, %v39619_v11  ;;  %v35447_v60 = vpack.c.bf16 %v17964_v48, %v17957_v3 }
0x1b3d   :  { %v17410_v1 = vand.u32 4294901760, %v17409_v16 }
0x1b3f   :  { %v17411_v18 = vsub.f32 %v17409_v16, %v17410_v1 }
0x1b41   :  { %v17412_v43 = vand.u32 4294901760, %v17411_v18 }
0x1b68   :  { %v18858_v39 = vpop.f32.mrb[44].mxu1 }
0x1b69   :  { %v39614_v0 = vmul.f32 0.17677669, %v18858_v39  ;;  %v33194_v9 = vpop.f32.mrb[45].mxu1 }
0x1b6b   :  { %v19335_v32 = vsel %vm2524_vm2, %v39614_v0, -inf }
0x1b6c   :  { %19336 = vmax.xlane.f32.xlu1 %v19335_v32 }
0x1b7c   :  { %v16851_v62 = vpop.f32.mrb[38].mxu0 }
0x1b7d   :  { %19360 = vrot.lane.b32.xlu1 %v39155_v41, %s37173_s22  ;;  %v17324_v42 = vsel %vm162_vm0, %v16851_v62, 0  ;;  %v32978_v50 = vpop.f32.mrb[39].mxu0 }
0x1b7e   :  { %v17398_v52 = vand.u32 4294901760, %v17324_v42  ;;  %v35459_v50 = vpack.c.bf16 %v17975_v38, %v17968_v56 }
0x1b80   :  { %v17399_v47 = vsub.f32 %v17324_v42, %v17398_v52 }
0x1b81   :  { %19827 = vrot.lane.b32.xlu1 %v39168_v61, %s37173_s22 }
0x1b82   :  { %v17400_v40 = vand.u32 4294901760, %v17399_v47 }
0x1b84   :  { %v17401_v22 = vsub.f32 %v17399_v47, %v17400_v40 }
0x1b86   :  { %v17402_v7 = vand.u32 4294901760, %v17401_v22 }
0x1b88   :  { %33029 = vmatprep.mubr.f32.mxu0 %v17402_v7 }
0x1b89   :  { %33030 = vmatmul.mubr.f32.vlgmr.msra.gmra.mrb[40].mxu0 %v17412_v43 }
0x1b8a   :  { %35402 = vmatpush3.bf16.msra.mxu0 %v35399_v17  ;;  %33040 = vmatprep.mubr.f32.mxu0 %v17398_v52  ;;  %v17934_v17 = vand.u32 4294901760, %v17933_v46 }
0x1b8b   :  { %35404 = vmatprep.subr.bf16.mxu0 %v35403_v12 }
0x1b8e   :  { %35406 = vmatpush3.bf16.msra.mxu0 %v35403_v12  ;;  %v17969_v12 = vand.u32 4294901760, %v17968_v56 }
0x1b8f   :  { %35408 = vmatprep.subr.bf16.mxu0 %v35407_v55 }
0x1b90   :  { %v17970_v39 = vsub.f32 %v17968_v56, %v17969_v12 }
0x1b91   :  { %33041 = vmatmul.mubr.f32.vlgmr.msra.gmra.mrb[40].mxu0 %v39619_v11 }
0x1b92   :  { %35410 = vmatpush3.bf16.msra.mxu0 %v35407_v55  ;;  %33051 = vmatprep.mubr.f32.mxu0 %v17399_v47  ;;  %v17976_v55 = vand.u32 4294901760, %v17975_v38 }
0x1b93   :  { %35412 = vmatprep.subr.bf16.mxu0 %v35411_v57 }
0x1b96   :  { %35414 = vmatpush3.bf16.msra.mxu0 %v35411_v57  ;;  %v17935_v57 = vsub.f32 %v17933_v46, %v17934_v17 }
0x1b97   :  { %35416 = vmatprep.subr.bf16.mxu0 %v39604_v53 }
0x1b98   :  { %v19329_v41 = vpop.f32.mrb[46].mxu1  ;;  %v17936_v9 = vand.u32 4294901760, %v17935_v57 }
0x1b99   :  { %v39629_v20 = vmul.f32 0.17677669, %v19329_v41  ;;  %v33236_v36 = vpop.f32.mrb[47].mxu1  ;;  %33052 = vmatmul.mubr.f32.vlgmr.msra.gmra.mrb[40].mxu0 %v17409_v16  ;;  %v17971_v16 = vand.u32 4294901760, %v17970_v39 }
0x1b9a   :  { %35418 = vmatpush3.bf16.msra.mxu0 %v39604_v53  ;;  %33062 = vmatprep.mubr.f32.mxu0 %v17400_v40 }
0x1b9b   :  { %v19338_v25 = vsel %vm2524_vm2, %v39629_v20, -inf  ;;  %35420 = vmatprep.subr.bf16.mxu0 %v39608_v33 }
0x1b9c   :  { %19339 = vmax.xlane.f32.xlu0 %v19338_v25 }
0x1b9e   :  { %35422 = vmatpush3.bf16.msra.mxu0 %v39608_v33 }
0x1b9f   :  { %35424 = vmatprep.subr.bf16.mxu0 %v35423_v28 }
0x1ba1   :  { %33063 = vmatmul.mubr.f32.vlgmr.msra.gmra.mrb[40].mxu0 %v17410_v1 }
0x1ba2   :  { %35426 = vmatpush3.bf16.msra.mxu0 %v35423_v28  ;;  %33073 = vmatprep.mubr.f32.mxu0 %v17398_v52  ;;  %v17944_v28 = vand.u32 4294901760, %v17943_v44 }
0x1ba3   :  { %35428 = vmatprep.subr.bf16.mxu0 %v39612_v51 }
0x1ba4   :  { %v17945_v32 = vsub.f32 %v17943_v44, %v17944_v28 }
0x1ba6   :  { %35430 = vmatpush3.bf16.msra.mxu0 %v39612_v51  ;;  %v35443_v51 = vpack.c.bf16 %v17873_v13, %v17870_v49 }
0x1ba7   :  { %35432 = vmatprep.subr.bf16.mxu0 %v39604_v53 }
0x1ba9   :  { %33074 = vmatmul.mubr.f32.vlgmr.msra.gmra.mrb[40].mxu0 %v39619_v11 }
0x1baa   :  { %35434 = vmatpush3.bf16.msra.mxu0 %v39604_v53  ;;  %33084 = vmatprep.mubr.f32.mxu0 %v17398_v52  ;;  %v17977_v53 = vsub.f32 %v17975_v38, %v17976_v55  ;;  %v35475_v52 = vpack.c.bf16 %v17976_v55, %v17969_v12 }
0x1bab   :  { %35436 = vmatprep.subr.bf16.mxu0 %v39608_v33 }
0x1bac   :  { %v17978_v62 = vand.u32 4294901760, %v17977_v53 }
0x1bae   :  { %35438 = vmatpush3.bf16.msra.mxu0 %v39608_v33  ;;  %v17946_v33 = vand.u32 4294901760, %v17945_v32  ;;  %v35451_v42 = vpack.c.bf16 %v17978_v62, %v17971_v16 }
0x1baf   :  { %35440 = vmatprep.subr.bf16.mxu0 %v35439_v31 }
0x1bb1   :  { %33085 = vmatmul.mubr.f32.vlgmr.msra.gmra.mrb[40].mxu0 %v39619_v11  ;;  %v35455_v11 = vpack.c.bf16 %v39645_v58, %v39643_v19 }
0x1bb2   :  { %19358 = vrot.lane.b32.xlu0 %v39145_v5, %s37173_s22  ;;  %35442 = vmatpush3.bf16.msra.mxu0 %v35439_v31 }
0x1bb3   :  { %33095 = vmatprep.mubr.f32.mxu0 %v17936_v9  ;;  %35444 = vmatprep.subr.bf16.mxu0 %v35443_v51 }
0x1bb6   :  { %20297 = vrot.lane.b32.xlu0 %v39209_v6, %s37173_s22  ;;  %35446 = vmatpush3.bf16.msra.mxu0 %v35443_v51 }
0x1bb7   :  { %35448 = vmatprep.subr.bf16.mxu0 %v35447_v60 }
0x1bb9   :  { %33096 = vmatmul.mubr.f32.vlgmr.msra.gmra.mrb[40].mxu0 %v17946_v33 }
0x1bba   :  { %20295 = vrot.lane.b32.xlu0 %v39145_v5, %s37172_s5  ;;  %35450 = vmatpush3.bf16.msra.mxu0 %v35447_v60  ;;  %v35471_v5 = vpack.c.bf16 %v17962_v30, %v17955_v8 }
0x1bbb   :  { %33106 = vmatprep.mubr.f32.mxu0 %v39638_v59  ;;  %35452 = vmatprep.subr.bf16.mxu0 %v35451_v42 }
0x1bbe   :  { %20770 = vrot.lane.b32.xlu0 %v39215_v26, %s37173_s22  ;;  %35454 = vmatpush3.bf16.msra.mxu0 %v35451_v42 }
0x1bbf   :  { %35456 = vmatprep.subr.bf16.mxu0 %v35455_v11 }
0x1bc1   :  { %33107 = vmatmul.mubr.f32.vlgmr.msra.gmra.mrb[40].mxu0 %v39648_v29 }
0x1bc2   :  { %35458 = vmatpush3.bf16.msra.mxu0 %v35455_v11  ;;  %33117 = vmatprep.mubr.f32.mxu0 %v17933_v46 }
0x1bc3   :  { %35460 = vmatprep.subr.bf16.mxu0 %v35459_v50 }
0x1bc6   :  { %35462 = vmatpush3.bf16.msra.mxu0 %v35459_v50 }
0x1bc7   :  { %35464 = vmatprep.subr.bf16.mxu0 %v35439_v31 }
0x1bc9   :  { %33118 = vmatmul.mubr.f32.vlgmr.msra.gmra.mrb[40].mxu0 %v17943_v44 }
0x1bca   :  { %35466 = vmatpush3.bf16.msra.mxu0 %v35439_v31  ;;  %33128 = vmatprep.mubr.f32.mxu0 %v17934_v17 }
0x1bcb   :  { %35468 = vmatprep.subr.bf16.mxu0 %v35443_v51 }
0x1bce   :  { %35470 = vmatpush3.bf16.msra.mxu0 %v35443_v51 }
0x1bcf   :  { %35472 = vmatprep.subr.bf16.mxu0 %v35471_v5 }
0x1bd1   :  { %33129 = vmatmul.mubr.f32.vlgmr.msra.gmra.mrb[40].mxu0 %v17944_v28 }
0x1bd2   :  { %35474 = vmatpush3.bf16.msra.mxu0 %v35471_v5  ;;  %33139 = vmatprep.mubr.f32.mxu0 %v39638_v59 }
0x1bd3   :  { %35476 = vmatprep.subr.bf16.mxu0 %v35475_v52 }
0x1bd6   :  { %35478 = vmatpush3.bf16.msra.mxu0 %v35475_v52 }
0x1bd7   :  { %35480 = vmatprep.subr.bf16.mxu0 %v35439_v31 }
0x1bd9   :  { %33140 = vmatmul.mubr.f32.vlgmr.msra.gmra.mrb[40].mxu0 %v39648_v29 }
0x1bda   :  { %35482 = vmatpush3.bf16.msra.mxu0 %v35439_v31  ;;  %33150 = vmatprep.mubr.f32.mxu0 %v39638_v59 }
0x1bdb   :  { %35484 = vmatprep.subr.bf16.mxu0 %v35443_v51 }
0x1bde   :  { %35486 = vmatpush3.bf16.msra.mxu0 %v35443_v51 }
0x1bdf   :  { %35523 = vmatprep.subr.bf16.mxu0 %v41038_v15 }
0x1be1   :  { %33151 = vmatmul.mubr.f32.vlgmr.msra.gmra.mrb[40].mxu0 %v39648_v29 }
0x1be2   :  { %33241 = vmatprep.mubr.msk.f32.mxu0 %vm37171_vm1, %v41039_v34 }
0x1bf9   :  { %v19337_v1 = vpop.xlane.xlu1 %19336 }
0x1bfa   :  { %v19341_v47 = vsub.f32 %v39614_v0, %v19337_v1 }
0x1bfc   :  { %v19343_v40 = vmul.f32 1.442695, %v19341_v47 }
0x1bfd   :  { %v19361_v18 = vpop.permute.xlu1 %19360 }
0x1bfe   :  { %36871 = vpow2.f32 %v19343_v40  ;;  %v19371_v22 = vand.u32 4294901760, %v19361_v18 }
0x1c00   :  { %v19453_v7 = vsub.f32 %v19361_v18, %v19371_v22 }
0x1c01   :  { %v19828_v29 = vpop.permute.xlu1 %19827 }
0x1c02   :  { %v19454_v2 = vand.u32 4294901760, %v19453_v7  ;;  %v19837_v28 = vand.u32 4294901760, %v19828_v29 }
0x1c04   :  { %v19455_v10 = vsub.f32 %v19453_v7, %v19454_v2  ;;  %v39721_v16 = vsub.f32 %v19828_v29, %v19837_v28 }
0x1c06   :  { %v19456_v13 = vand.u32 4294901760, %v19455_v10  ;;  %v19916_v1 = vand.u32 4294901760, %v39721_v16 }
0x1c08   :  { %v36872_v43 = vpop.eup %36871 }
0x1c09   :  { %v19347_v41 = vsel %vm2524_vm2, %v36872_v43, 0.0 }
0x1c0a   :  { %19348 = vadd.xlane.f32.xlu1 %v19347_v41 }
0x1c29   :  { %v19340_v36 = vpop.xlane.xlu0 %19339 }
0x1c2a   :  { %v19342_v25 = vsub.f32 %v39629_v20, %v19340_v36 }
0x1c2c   :  { %v19345_v24 = vmul.f32 1.442695, %v19342_v25 }
0x1c2d   :  { %v19359_v14 = vpop.permute.xlu0 %19358 }
0x1c2e   :  { %36873 = vpow2.f32 %v19345_v24  ;;  %v19368_v35 = vand.u32 4294901760, %v19359_v14  ;;  %v19917_v24 = vsub.f32 %v39721_v16, %v19916_v1 }
0x1c30   :  { %v39684_v54 = vpack.c.bf16 %v19371_v22, %v19368_v35  ;;  %v19446_v0 = vsub.f32 %v19359_v14, %v19368_v35 }
0x1c32   :  { %v19447_v45 = vand.u32 4294901760, %v19446_v0  ;;  %v35530_v59 = vpack.c.bf16 %v19453_v7, %v19446_v0  ;;  %35525 = vmatpush3.bf16.msra.mxu0 %v39684_v54 }
0x1c33   :  { %35526 = vmatprep.subr.bf16.mxu0 %v41038_v15 }
0x1c34   :  { %v19448_v63 = vsub.f32 %v19446_v0, %v19447_v45  ;;  %v35536_v49 = vpack.c.bf16 %v19454_v2, %v19447_v45  ;;  %v19918_v45 = vand.u32 4294901760, %v19917_v24 }
0x1c36   :  { %v19449_v19 = vand.u32 4294901760, %v19448_v63 }
0x1c38   :  { %v36874_v20 = vpop.eup %36873  ;;  %v35527_v58 = vpack.c.bf16 %v19456_v13, %v19449_v19 }
0x1c39   :  { %v19350_v46 = vsel %vm2524_vm2, %v36874_v20, 0.0 }
0x1c3a   :  { %19351 = vadd.xlane.f32.xlu1 %v19350_v46 }
0x1c4b   :  { %19829 = vrot.lane.b32.xlu1 %v39185_v21, %s37173_s22 }
0x1c4f   :  { %20299 = vrot.lane.b32.xlu1 %v39205_v27, %s37173_s22 }
0x1c53   :  { %20768 = vrot.lane.b32.xlu1 %v39221_v37, %s37173_s22 }
0x1c57   :  { %20766 = vrot.lane.b32.xlu1 %v39168_v61, %s37172_s5  ;;  %v20298_v61 = vpop.permute.xlu0 %20297 }
0x1c58   :  { %v20303_v55 = vsel %vm162_vm0, %v20298_v61, 0 }
0x1c59   :  { %v20308_v48 = vand.u32 4294901760, %v20303_v55 }
0x1c5b   :  { %v20296_v12 = vpop.permute.xlu0 %20295  ;;  %v39726_v42 = vsub.f32 %v20303_v55, %v20308_v48 }
0x1c5c   :  { %v20301_v51 = vsel %vm162_vm0, %v20296_v12, 0 }
0x1c5d   :  { %v39715_v53 = vand.u32 4294901760, %v20301_v51  ;;  %v20387_v18 = vand.u32 4294901760, %v39726_v42 }
0x1c5f   :  { %v39731_v11 = vsub.f32 %v20301_v51, %v39715_v53  ;;  %v20388_v14 = vsub.f32 %v39726_v42, %v20387_v18 }
0x1c61   :  { %v20376_v7 = vand.u32 4294901760, %v39731_v11 }
0x1c63   :  { %v20377_v35 = vsub.f32 %v39731_v11, %v20376_v7 }
0x1c97   :  { %v19349_v8 = vpop.xlane.xlu1 %19348 }
0x1c98   :  { %36875 = vrcp.f32 %v19349_v8  ;;  %v20771_v8 = vpop.permute.xlu0 %20770 }
0x1ca2   :  { %v36876_v30 = vpop.eup %36875 }
0x1ca3   :  { %v19354_v56 = vmul.f32 %v36876_v30, %v36872_v43 }
0x1ca5   :  { %v19365_v38 = vsel %vm2524_vm2, %v19354_v56, 0 }
0x1ca6   :  { %v19434_v17 = vand.u32 4294901760, %v19365_v38 }
0x1ca8   :  { %v19435_v44 = vsub.f32 %v19365_v38, %v19434_v17 }
0x1caa   :  { %v19436_v31 = vand.u32 4294901760, %v19435_v44 }
0x1cac   :  { %v19437_v21 = vsub.f32 %v19435_v44, %v19436_v31 }
0x1cae   :  { %v19438_v23 = vand.u32 4294901760, %v19437_v21 }
0x1cb0   :  { %33242 = vmatmul.mubr.f32.vlgmr.msra.gmra.mrb[42].mxu0 %v19438_v23 }
0x1cb1   :  { %35528 = vmatpush3.bf16.msra.mxu0 %v35527_v58  ;;  %33248 = vmatprep.mubr.msk.f32.mxu0 %vm37171_vm1, %v41039_v34 }
0x1cb2   :  { %35529 = vmatprep.subr.bf16.mxu0 %v41038_v15 }
0x1cb8   :  { %33249 = vmatmul.mubr.f32.vlgmr.msra.gmra.mrb[42].mxu0 %v19434_v17 }
0x1cb9   :  { %35531 = vmatpush3.bf16.msra.mxu0 %v35530_v59  ;;  %33255 = vmatprep.mubr.msk.f32.mxu0 %vm37171_vm1, %v41039_v34  ;;  %v20389_v59 = vand.u32 4294901760, %v20388_v14 }
0x1cba   :  { %35532 = vmatprep.subr.bf16.mxu0 %v41038_v15 }
0x1cc0   :  { %33256 = vmatmul.mubr.f32.vlgmr.msra.gmra.mrb[42].mxu0 %v19435_v44 }
0x1cc1   :  { %35534 = vmatpush3.bf16.msra.mxu0 %v39684_v54  ;;  %33262 = vmatprep.mubr.msk.f32.mxu0 %vm37171_vm1, %v41039_v34 }
0x1cc2   :  { %35535 = vmatprep.subr.bf16.mxu0 %v41038_v15 }
0x1cc7   :  { %v19352_v4 = vpop.xlane.xlu1 %19351 }
0x1cc8   :  { %36877 = vrcp.f32 %v19352_v4  ;;  %33263 = vmatmul.mubr.f32.vlgmr.msra.gmra.mrb[42].mxu0 %v19436_v31 }
0x1cc9   :  { %35537 = vmatpush3.bf16.msra.mxu0 %v35536_v49  ;;  %33269 = vmatprep.mubr.msk.f32.mxu0 %vm37171_vm1, %v41039_v34  ;;  %v20378_v49 = vand.u32 4294901760, %v20377_v35 }
0x1cca   :  { %35538 = vmatprep.subr.bf16.mxu0 %v41038_v15 }
0x1ccb   :  { %v19830_v57 = vpop.permute.xlu1 %19829 }
0x1ccc   :  { %v19840_v3 = vand.u32 4294901760, %v19830_v57 }
0x1cce   :  { %v39713_v39 = vpack.c.bf16 %v19840_v3, %v19837_v28  ;;  %v39717_v9 = vsub.f32 %v19830_v57, %v19840_v3 }
0x1ccf   :  { %v20300_v32 = vpop.permute.xlu1 %20299 }
0x1cd0   :  { %v20305_v60 = vsel %vm162_vm0, %v20300_v32, 0  ;;  %33270 = vmatmul.mubr.f32.vlgmr.msra.gmra.mrb[42].mxu0 %v19434_v17  ;;  %35543 = vmatpush3.bf16.msra.mxu1 %v39713_v39  ;;  %v19923_v5 = vand.u32 4294901760, %v39717_v9 }
0x1cd1   :  { %v20311_v62 = vand.u32 4294901760, %v20305_v60  ;;  %35540 = vmatpush3.bf16.msra.mxu0 %v39684_v54  ;;  %33276 = vmatprep.mubr.msk.f32.mxu0 %vm37171_vm1, %v41039_v34 }
0x1cd2   :  { %v36878_v33 = vpop.eup %36877  ;;  %35559 = vmatprep.subr.bf16.mxu0 %v41038_v15  ;;  %35544 = vmatprep.subr.bf16.mxu1 %v41038_v15  ;;  %v19924_v43 = vsub.f32 %v39717_v9, %v19923_v5  ;;  %v35554_v29 = vpack.c.bf16 %v19923_v5, %v19916_v1 }
0x1cd3   :  { %v19356_v50 = vmul.f32 %v36878_v33, %v36874_v20  ;;  %v20393_v52 = vsub.f32 %v20305_v60, %v20311_v62  ;;  %v39741_v41 = vpack.c.bf16 %v20311_v62, %v20308_v48  ;;  %v35548_v20 = vpack.c.bf16 %v39717_v9, %v39721_v16  ;;  %v20769_v46 = vpop.permute.xlu1 %20768 }
0x1cd4   :  { %v19925_v54 = vand.u32 4294901760, %v19924_v43  ;;  %v20774_v56 = vsel %vm162_vm0, %v20769_v46, 0 }
0x1cd5   :  { %v20394_v47 = vand.u32 4294901760, %v20393_v52  ;;  %v19834_v40 = vsel %vm2524_vm2, %v19356_v50, 0  ;;  %v35566_v58 = vpack.c.bf16 %v20393_v52, %v39726_v42  ;;  %v20779_v44 = vand.u32 4294901760, %v20774_v56 }
0x1cd6   :  { %v39737_v22 = vand.u32 4294901760, %v19834_v40  ;;  %v35545_v13 = vpack.c.bf16 %v19925_v54, %v19918_v45 }
0x1cd7   :  { %v20395_v36 = vsub.f32 %v20393_v52, %v20394_v47  ;;  %v35572_v30 = vpack.c.bf16 %v20394_v47, %v20387_v18  ;;  %v20767_v38 = vpop.permute.xlu1 %20766  ;;  %v20857_v61 = vsub.f32 %v20774_v56, %v20779_v44 }
0x1cd8   :  { %33277 = vmatmul.mubr.f32.vlgmr.msra.gmra.mrb[42].mxu0 %v19434_v17  ;;  %v19904_v25 = vsub.f32 %v19834_v40, %v39737_v22  ;;  %v20776_v17 = vsel %vm162_vm0, %v20771_v8, 0  ;;  %v20772_v31 = vsel %vm162_vm0, %v20767_v38, 0 }
0x1cd9   :  { %33325 = vmatprep.mubr.msk.f32.mxu0 %vm37171_vm1, %v41039_v34  ;;  %v20396_v0 = vand.u32 4294901760, %v20395_v36  ;;  %v20782_v21 = vand.u32 4294901760, %v20776_v17  ;;  %v20845_v23 = vand.u32 4294901760, %v20772_v31  ;;  %v20858_v55 = vand.u32 4294901760, %v20857_v61 }
0x1cda   :  { %35561 = vmatpush3.bf16.xpose.msra.mxu0 %v39741_v41  ;;  %v19905_v2 = vand.u32 4294901760, %v19904_v25 }
0x1cdb   :  { %35562 = vmatprep.subr.bf16.mxu0 %v41038_v15  ;;  %v35563_v19 = vpack.c.bf16 %v20396_v0, %v20389_v59  ;;  %v20864_v4 = vsub.f32 %v20776_v17, %v20782_v21  ;;  %v20846_v12 = vsub.f32 %v20772_v31, %v20845_v23  ;;  %v35578_v51 = vpack.c.bf16 %v20782_v21, %v20779_v44 }
0x1cdc   :  { %v19906_v10 = vsub.f32 %v19904_v25, %v19905_v2  ;;  %v20859_v3 = vsub.f32 %v20857_v61, %v20858_v55 }
0x1cdd   :  { %v20865_v57 = vand.u32 4294901760, %v20864_v4  ;;  %v20847_v28 = vand.u32 4294901760, %v20846_v12 }
0x1cde   :  { %v19907_v63 = vand.u32 4294901760, %v19906_v10  ;;  %v20860_v9 = vand.u32 4294901760, %v20859_v3 }
0x1cdf   :  { %v20866_v48 = vsub.f32 %v20864_v4, %v20865_v57  ;;  %v35590_v62 = vpack.c.bf16 %v20865_v57, %v20858_v55 }
0x1ce0   :  { %33284 = vmatmul.mubr.f32.vlgmr.msra.gmra.mrb[48].mxu1 %v19907_v63 }
0x1ce1   :  { %35546 = vmatpush3.bf16.msra.mxu1 %v35545_v13  ;;  %33326 = vmatmul.mubr.f32.vlgmr.msra.gmra.mrb[44].mxu0 %v20378_v49  ;;  %v20867_v32 = vand.u32 4294901760, %v20866_v48 }
0x1ce2   :  { %35564 = vmatpush3.bf16.xpose.msra.mxu0 %v35563_v19  ;;  %33290 = vmatprep.mubr.msk.f32.mxu1 %vm37171_vm1, %v41039_v34 }
0x1ce3   :  { %35547 = vmatprep.subr.bf16.mxu1 %v41038_v15  ;;  %33332 = vmatprep.mubr.msk.f32.mxu0 %vm37171_vm1, %v41039_v34  ;;  %v35581_v16 = vpack.c.bf16 %v20867_v32, %v20860_v9 }
0x1ce4   :  { %35565 = vmatprep.subr.bf16.mxu0 %v41038_v15 }
0x1ce8   :  { %33291 = vmatmul.mubr.f32.vlgmr.msra.gmra.mrb[48].mxu1 %v39737_v22 }
0x1ce9   :  { %35549 = vmatpush3.bf16.msra.mxu1 %v35548_v20  ;;  %33333 = vmatmul.mubr.f32.vlgmr.msra.gmra.mrb[44].mxu0 %v39715_v53 }
0x1cea   :  { %35567 = vmatpush3.bf16.xpose.msra.mxu0 %v35566_v58  ;;  %33297 = vmatprep.mubr.msk.f32.mxu1 %vm37171_vm1, %v41039_v34 }
0x1ceb   :  { %35550 = vmatprep.subr.bf16.mxu1 %v41038_v15  ;;  %33339 = vmatprep.mubr.msk.f32.mxu0 %vm37171_vm1, %v41039_v34 }
0x1cec   :  { %35568 = vmatprep.subr.bf16.mxu0 %v41038_v15 }
0x1cf0   :  { %33298 = vmatmul.mubr.f32.vlgmr.msra.gmra.mrb[48].mxu1 %v19904_v25 }
0x1cf1   :  { %35552 = vmatpush3.bf16.msra.mxu1 %v39713_v39  ;;  %33340 = vmatmul.mubr.f32.vlgmr.msra.gmra.mrb[44].mxu0 %v39731_v11 }
0x1cf2   :  { %35570 = vmatpush3.bf16.xpose.msra.mxu0 %v39741_v41  ;;  %33304 = vmatprep.mubr.msk.f32.mxu1 %vm37171_vm1, %v41039_v34 }
0x1cf3   :  { %35553 = vmatprep.subr.bf16.mxu1 %v41038_v15  ;;  %33346 = vmatprep.mubr.msk.f32.mxu0 %vm37171_vm1, %v41039_v34 }
0x1cf4   :  { %35571 = vmatprep.subr.bf16.mxu0 %v41038_v15 }
0x1cf8   :  { %33305 = vmatmul.mubr.f32.vlgmr.msra.gmra.mrb[48].mxu1 %v19905_v2 }
0x1cf9   :  { %35555 = vmatpush3.bf16.msra.mxu1 %v35554_v29  ;;  %33347 = vmatmul.mubr.f32.vlgmr.msra.gmra.mrb[44].mxu0 %v20376_v7 }
0x1cfa   :  { %35573 = vmatpush3.bf16.xpose.msra.mxu0 %v35572_v30  ;;  %33311 = vmatprep.mubr.msk.f32.mxu1 %vm37171_vm1, %v41039_v34 }
0x1cfb   :  { %35556 = vmatprep.subr.bf16.mxu1 %v41038_v15  ;;  %33353 = vmatprep.mubr.msk.f32.mxu0 %vm37171_vm1, %v41039_v34 }
0x1cfc   :  { %35574 = vmatprep.subr.bf16.mxu0 %v41038_v15 }
0x1d00   :  { %33312 = vmatmul.mubr.f32.vlgmr.msra.gmra.mrb[48].mxu1 %v39737_v22 }
0x1d01   :  { %35558 = vmatpush3.bf16.msra.mxu1 %v39713_v39  ;;  %33354 = vmatmul.mubr.f32.vlgmr.msra.gmra.mrb[44].mxu0 %v39715_v53  ;;  %v20848_v39 = vsub.f32 %v20846_v12, %v20847_v28 }
0x1d02   :  { %35576 = vmatpush3.bf16.xpose.msra.mxu0 %v39741_v41  ;;  %33318 = vmatprep.mubr.msk.f32.mxu1 %vm37171_vm1, %v41039_v34 }
0x1d03   :  { %33360 = vmatprep.mubr.msk.f32.mxu0 %vm37171_vm1, %v41039_v34  ;;  %35577 = vmatprep.subr.bf16.mxu1 %v41038_v15  ;;  %v20849_v60 = vand.u32 4294901760, %v20848_v39 }
0x1d04   :  { %35595 = vmatprep.subr.bf16.mxu0 %v41038_v15 }
0x1d08   :  { %33319 = vmatmul.mubr.f32.vlgmr.msra.gmra.mrb[48].mxu1 %v39737_v22 }
0x1d09   :  { %33361 = vmatmul.mubr.f32.vlgmr.msra.gmra.mrb[44].mxu0 %v39715_v53  ;;  %33367 = vmatprep.mubr.msk.f32.mxu1 %vm37171_vm1, %v41039_v34  ;;  %v35584_v53 = vpack.c.bf16 %v20864_v4, %v20857_v61 }
0x1d0a   :  { %35579 = vmatpush3.bf16.xpose.msra.mxu1 %v35578_v51  ;;  %33409 = vmatprep.mubr.msk.f32.mxu0 %vm37171_vm1, %v41039_v34 }
0x1d0b   :  { %35580 = vmatprep.subr.bf16.mxu1 %v41038_v15 }
0x1d11   :  { %33368 = vmatmul.mubr.f32.vlgmr.msra.gmra.mrb[50].mxu1 %v20849_v60 }
0x1d12   :  { %35582 = vmatpush3.bf16.xpose.msra.mxu1 %v35581_v16  ;;  %33374 = vmatprep.mubr.msk.f32.mxu1 %vm37171_vm1, %v41039_v34 }
0x1d13   :  { %35583 = vmatprep.subr.bf16.mxu1 %v41038_v15 }
0x1d19   :  { %33375 = vmatmul.mubr.f32.vlgmr.msra.gmra.mrb[50].mxu1 %v20845_v23 }
0x1d1a   :  { %35585 = vmatpush3.bf16.xpose.msra.mxu1 %v35584_v53  ;;  %33381 = vmatprep.mubr.msk.f32.mxu1 %vm37171_vm1, %v41039_v34 }
0x1d1b   :  { %35586 = vmatprep.subr.bf16.mxu1 %v41038_v15 }
0x1d21   :  { %33382 = vmatmul.mubr.f32.vlgmr.msra.gmra.mrb[50].mxu1 %v20846_v12 }
0x1d22   :  { %35588 = vmatpush3.bf16.xpose.msra.mxu1 %v35578_v51  ;;  %33388 = vmatprep.mubr.msk.f32.mxu1 %vm37171_vm1, %v41039_v34 }
0x1d23   :  { %35589 = vmatprep.subr.bf16.mxu1 %v41038_v15 }
0x1d29   :  { %33389 = vmatmul.mubr.f32.vlgmr.msra.gmra.mrb[50].mxu1 %v20847_v28 }
0x1d2a   :  { %35591 = vmatpush3.bf16.xpose.msra.mxu1 %v35590_v62  ;;  %33395 = vmatprep.mubr.msk.f32.mxu1 %vm37171_vm1, %v41039_v34 }
0x1d2b   :  { %35592 = vmatprep.subr.bf16.mxu1 %v41038_v15 }
0x1d31   :  { %33396 = vmatmul.mubr.f32.vlgmr.msra.gmra.mrb[50].mxu1 %v20845_v23 }
0x1d32   :  { %35594 = vmatpush3.bf16.xpose.msra.mxu1 %v35578_v51  ;;  %33402 = vmatprep.mubr.msk.f32.mxu1 %vm37171_vm1, %v41039_v34 }
0x1d33   :  { %35613 = vmatprep.subr.bf16.mxu1 %v41038_v15 }
0x1d39   :  { %33403 = vmatmul.mubr.f32.vlgmr.msra.gmra.mrb[50].mxu1 %v20845_v23 }
0x1d3a   :  { %33451 = vmatprep.mubr.msk.f32.mxu1 %vm37171_vm1, %v41039_v34 }
0x1dab   :  { %v39820_v33 = vpop.f32.mrb[42].mxu0 }
0x1dac   :  { %v33278_v42 = vpop.f32.mrb[43].mxu0 }
0x1ddb   :  { %v39822_v11 = vpop.f32.mrb[48].mxu1 }
0x1ddc   :  { %v20762_v50 = vpop.f32.mrb[44].mxu0  ;;  %v33320_v5 = vpop.f32.mrb[49].mxu1 }
0x1ddd   :  { %v21237_v52 = vmul.f32 0.17677669, %v20762_v50  ;;  %v33362_v1 = vpop.f32.mrb[45].mxu0 }
0x1ddf   :  { %v21239_v47 = vsel %vm2524_vm2, %v21237_v52, -inf }
0x1de0   :  { %21240 = vmax.xlane.f32.xlu0 %v21239_v47 }
0x1e0c   :  { %v21233_v40 = vpop.f32.mrb[50].mxu1 }
0x1e0d   :  { %v21238_v18 = vmul.f32 0.17677669, %v21233_v40  ;;  %v33404_v22 = vpop.f32.mrb[51].mxu1 }
0x1e0f   :  { %v21242_v7 = vsel %vm2524_vm2, %v21238_v18, -inf }
0x1e10   :  { %21243 = vmax.xlane.f32.xlu1 %v21242_v7  ;;  %v13521_v7 = vld [vmem:[#allocation8 + $0xa0] sm:$0xff] }
0x1e21   :  { %21263 = vrot.lane.b32.xlu1 %v39205_v27, %s37172_s5 }
0x1e25   :  { %21729 = vrot.lane.b32.xlu1 %v39221_v37, %s37172_s5 }
0x1e29   :  { %21731 = vrot.lane.b32.xlu1 %v39215_v26, %s37172_s5 }
0x1e6d   :  { %v21241_v43 = vpop.xlane.xlu0 %21240 }
0x1e6e   :  { %v21245_v41 = vsub.f32 %v21237_v52, %v21241_v43  ;;  %v13522_v43 = vld [vmem:[#allocation8 + $0xa8] sm:$0xff] }
0x1e70   :  { %v21247_v36 = vmul.f32 1.442695, %v21245_v41  ;;  %v22198_v41 = vsel %vm162_vm0, %v39820_v33, 0  ;;  %v22201_v33 = vsel %vm162_vm0, %v39822_v11, 0 }
0x1e72   :  { %36879 = vpow2.f32 %v21247_v36  ;;  %v22204_v36 = vand.u32 4294901760, %v13521_v7 }
0x1e7c   :  { %v36880_v25 = vpop.eup %36879 }
0x1e7d   :  { %v21251_v24 = vsel %vm2524_vm2, %v36880_v25, 0.0 }
0x1e7e   :  { %21252 = vadd.xlane.f32.xlu0 %v21251_v24  ;;  %v39890_v24 = vand.u32 4294901760, %v22198_v41 }
0x1e9d   :  { %v21244_v14 = vpop.xlane.xlu1 %21243 }
0x1e9e   :  { %v21246_v2 = vsub.f32 %v21238_v18, %v21244_v14 }
0x1ea0   :  { %v21249_v35 = vmul.f32 1.442695, %v21246_v2  ;;  %v13523_v2 = vld [vmem:[#allocation8 + $0xb0] sm:$0xff] }
0x1ea1   :  { %v21264_v54 = vpop.permute.xlu1 %21263 }
0x1ea2   :  { %36881 = vpow2.f32 %v21249_v35  ;;  %v21274_v23 = vand.u32 4294901760, %v21264_v54  ;;  %v13524_v35 = vld [vmem:[#allocation8 + $0xb8] sm:$0xff] }
0x1ea4   :  { %v21356_v12 = vsub.f32 %v21264_v54, %v21274_v23  ;;  %v22210_v54 = vand.u32 4294901760, %v13523_v2 }
0x1ea5   :  { %v21730_v27 = vpop.permute.xlu1 %21729 }
0x1ea6   :  { %v21739_v0 = vand.u32 4294901760, %v21730_v27  ;;  %v21357_v28 = vand.u32 4294901760, %v21356_v12 }
0x1ea8   :  { %v39833_v10 = vsub.f32 %v21730_v27, %v21739_v0  ;;  %v21358_v39 = vsub.f32 %v21356_v12, %v21357_v28  ;;  %v22213_v27 = vand.u32 4294901760, %v13524_v35 }
0x1ea9   :  { %v21732_v37 = vpop.permute.xlu1 %21731 }
0x1eaa   :  { %v21818_v26 = vand.u32 4294901760, %v39833_v10  ;;  %v21742_v45 = vand.u32 4294901760, %v21732_v37  ;;  %v21359_v62 = vand.u32 4294901760, %v21358_v39  ;;  %v13530_v39 = vld [vmem:[#allocation8 + $0xe8] sm:$0xff] }
0x1eac   :  { %v36882_v59 = vpop.eup %36881  ;;  %v39836_v63 = vpack.c.bf16 %v21742_v45, %v21739_v0  ;;  %v39838_v49 = vsub.f32 %v21732_v37, %v21742_v45  ;;  %v21819_v19 = vsub.f32 %v39833_v10, %v21818_v26  ;;  %v39898_v0 = vsub.f32 %v13521_v7, %v22204_v36 }
0x1ead   :  { %v21254_v13 = vsel %vm2524_vm2, %v36882_v59, 0.0  ;;  %v39903_v37 = vsub.f32 %v22198_v41, %v39890_v24 }
0x1eae   :  { %v21825_v20 = vand.u32 4294901760, %v39838_v49  ;;  %v35620_v58 = vpack.c.bf16 %v39838_v49, %v39833_v10  ;;  %35615 = vmatpush3.bf16.msra.mxu1 %v39836_v63  ;;  %21255 = vadd.xlane.f32.xlu0 %v21254_v13  ;;  %v21820_v8 = vand.u32 4294901760, %v21819_v19  ;;  %v22295_v45 = vand.u32 4294901760, %v39898_v0 }
0x1eaf   :  { %35616 = vmatprep.subr.bf16.mxu1 %v41038_v15  ;;  %v22315_v13 = vsub.f32 %v13524_v35, %v22213_v27  ;;  %v22274_v19 = vand.u32 4294901760, %v39903_v37 }
0x1eb0   :  { %v21826_v46 = vsub.f32 %v39838_v49, %v21825_v20  ;;  %v39848_v29 = vpack.c.bf16 %v21825_v20, %v21818_v26  ;;  %v39905_v26 = vand.u32 4294901760, %v22201_v33  ;;  %v39915_v49 = vsub.f32 %v13523_v2, %v22210_v54 }
0x1eb2   :  { %v21827_v30 = vand.u32 4294901760, %v21826_v46  ;;  %v22283_v20 = vsub.f32 %v22201_v33, %v39905_v26 }
0x1eb4   :  { %v35617_v56 = vpack.c.bf16 %v21827_v30, %v21820_v8  ;;  %v22309_v8 = vand.u32 4294901760, %v39915_v49  ;;  %v22316_v30 = vand.u32 4294901760, %v22315_v13 }
0x1ec4   :  { %21261 = vrot.lane.b32.xlu0 %v39209_v6, %s37172_s5 }
0x1f0b   :  { %v21253_v38 = vpop.xlane.xlu0 %21252 }
0x1f0c   :  { %36883 = vrcp.f32 %v21253_v38  ;;  %v22284_v38 = vand.u32 4294901760, %v22283_v20 }
0x1f16   :  { %v36884_v17 = vpop.eup %36883 }
0x1f17   :  { %v21258_v44 = vmul.f32 %v36884_v17, %v36880_v25  ;;  %v22207_v25 = vand.u32 4294901760, %v13522_v43  ;;  %v35635_v17 = vpack.c.bf16 %v22213_v27, %v22210_v54 }
0x1f19   :  { %v21268_v31 = vsel %vm2524_vm2, %v21258_v44, 0  ;;  %v39900_v10 = vsub.f32 %v13522_v43, %v22207_v25  ;;  %v39908_v11 = vpack.c.bf16 %v22207_v25, %v22204_v36 }
0x1f1a   :  { %v39853_v21 = vand.u32 4294901760, %v21268_v31 }
0x1f1c   :  { %v21338_v61 = vsub.f32 %v21268_v31, %v39853_v21 }
0x1f1e   :  { %v21339_v55 = vand.u32 4294901760, %v21338_v61 }
0x1f20   :  { %v21340_v3 = vsub.f32 %v21338_v61, %v21339_v55 }
0x1f22   :  { %v21341_v32 = vand.u32 4294901760, %v21340_v3  ;;  %v35651_v3 = vpack.c.bf16 %v22315_v13, %v39915_v49 }
0x1f3b   :  { %v21256_v4 = vpop.xlane.xlu0 %21255 }
0x1f3c   :  { %36885 = vrcp.f32 %v21256_v4 }
0x1f3f   :  { %v21262_v57 = vpop.permute.xlu0 %21261 }
0x1f40   :  { %v21271_v51 = vand.u32 4294901760, %v21262_v57 }
0x1f42   :  { %v39856_v6 = vpack.c.bf16 %v21274_v23, %v21271_v51  ;;  %v21349_v48 = vsub.f32 %v21262_v57, %v21271_v51  ;;  %v22310_v23 = vsub.f32 %v39915_v49, %v22309_v8 }
0x1f44   :  { %v21350_v9 = vand.u32 4294901760, %v21349_v48  ;;  %35597 = vmatpush3.bf16.msra.mxu0 %v39856_v6  ;;  %v35602_v47 = vpack.c.bf16 %v21356_v12, %v21349_v48  ;;  %v22285_v12 = vsub.f32 %v22283_v20, %v22284_v38 }
0x1f45   :  { %35598 = vmatprep.subr.bf16.mxu0 %v41038_v15 }
0x1f46   :  { %v36886_v60 = vpop.eup %36885  ;;  %v21351_v16 = vsub.f32 %v21349_v48, %v21350_v9  ;;  %v35608_v14 = vpack.c.bf16 %v21357_v28, %v21350_v9  ;;  %v22286_v28 = vand.u32 4294901760, %v22285_v12  ;;  %v13529_v48 = vld [vmem:[#allocation8 + $0xe0] sm:$0xff] }
0x1f47   :  { %v21260_v53 = vmul.f32 %v36886_v60, %v36882_v59  ;;  %33410 = vmatmul.mubr.f32.vlgmr.msra.gmra.mrb[46].mxu0 %v21341_v32  ;;  %v22302_v59 = vand.u32 4294901760, %v39900_v10  ;;  %v22740_v9 = vand.u32 4294901760, %v13529_v48  ;;  %v22743_v32 = vand.u32 4294901760, %v13530_v39 }
0x1f48   :  { %v21352_v42 = vand.u32 4294901760, %v21351_v16  ;;  %33416 = vmatprep.mubr.msk.f32.mxu0 %vm37171_vm1, %v41039_v34 }
0x1f49   :  { %v21736_v50 = vsel %vm2524_vm2, %v21260_v53, 0  ;;  %v22303_v46 = vsub.f32 %v39900_v10, %v22302_v59  ;;  %v39955_v60 = vpack.c.bf16 %v22743_v32, %v22740_v9  ;;  %v22830_v16 = vsub.f32 %v13529_v48, %v22740_v9  ;;  %v23305_v9 = vld [vmem:[#allocation10 + $0xb8] sm:$0xff] }
0x1f4a   :  { %v35599_v5 = vpack.c.bf16 %v21359_v62, %v21352_v42  ;;  %v39863_v52 = vand.u32 4294901760, %v21736_v50  ;;  %v22837_v53 = vsub.f32 %v13530_v39, %v22743_v32  ;;  %v13531_v62 = vld [vmem:[#allocation8 + $0xf0] sm:$0xff]  ;;  %v13532_v42 = vld [vmem:[#allocation8 + $0xf8] sm:$0xff] }
0x1f4b   :  { %v22304_v31 = vand.u32 4294901760, %v22303_v46  ;;  %v23304_v39 = vld [vmem:[#allocation10 + $0xb0] sm:$0xff] }
0x1f4c   :  { %35600 = vmatpush3.bf16.msra.mxu0 %v35599_v5  ;;  %v39866_v1 = vsub.f32 %v21736_v50, %v39863_v52  ;;  %v22746_v50 = vand.u32 4294901760, %v13531_v62  ;;  %v22749_v5 = vand.u32 4294901760, %v13532_v42  ;;  %v35695_v27 = vpack.c.bf16 %v22837_v53, %v22830_v16 }
0x1f4d   :  { %35601 = vmatprep.subr.bf16.mxu0 %v41038_v15  ;;  %v23341_v32 = vand.u32 4294901760, %v23304_v39 }
0x1f4e   :  { %v21807_v40 = vand.u32 4294901760, %v39866_v1  ;;  %v22851_v7 = vsub.f32 %v13532_v42, %v22749_v5 }
0x1f4f   :  { %33417 = vmatmul.mubr.f32.vlgmr.msra.gmra.mrb[46].mxu0 %v39853_v21 }
0x1f50   :  { %35603 = vmatpush3.bf16.msra.mxu0 %v35602_v47  ;;  %v21808_v18 = vsub.f32 %v39866_v1, %v21807_v40  ;;  %33423 = vmatprep.mubr.msk.f32.mxu0 %vm37171_vm1, %v41039_v34  ;;  %v39959_v47 = vpack.c.bf16 %v22749_v5, %v22746_v50  ;;  %v22852_v25 = vand.u32 4294901760, %v22851_v7 }
0x1f51   :  { %35604 = vmatprep.subr.bf16.mxu0 %v41038_v15 }
0x1f52   :  { %v21809_v22 = vand.u32 4294901760, %v21808_v18  ;;  %v22853_v2 = vsub.f32 %v22851_v7, %v22852_v25 }
0x1f54   :  { %33452 = vmatmul.mubr.f32.vlgmr.msra.gmra.mrb[52].mxu1 %v21809_v22  ;;  %v22844_v22 = vsub.f32 %v13531_v62, %v22746_v50  ;;  %v22854_v33 = vand.u32 4294901760, %v22853_v2  ;;  %v39989_v62 = vld [vmem:[#allocation10 + $0xc8] sm:$0xff] }
0x1f55   :  { %35618 = vmatpush3.bf16.msra.mxu1 %v35617_v56  ;;  %33458 = vmatprep.mubr.msk.f32.mxu1 %vm37171_vm1, %v41039_v34  ;;  %v22275_v56 = vsub.f32 %v39903_v37, %v22274_v19  ;;  %v23350_v50 = vand.u32 4294901760, %v39989_v62 }
0x1f56   :  { %35619 = vmatprep.subr.bf16.mxu1 %v41038_v15  ;;  %v22845_v36 = vand.u32 4294901760, %v22844_v22 }
0x1f57   :  { %33424 = vmatmul.mubr.f32.vlgmr.msra.gmra.mrb[46].mxu0 %v21338_v61  ;;  %v22317_v61 = vsub.f32 %v22315_v13, %v22316_v30  ;;  %v22276_v4 = vand.u32 4294901760, %v22275_v56 }
0x1f58   :  { %35606 = vmatpush3.bf16.msra.mxu0 %v39856_v6  ;;  %33430 = vmatprep.mubr.msk.f32.mxu0 %vm37171_vm1, %v41039_v34 }
0x1f59   :  { %35607 = vmatprep.subr.bf16.mxu0 %v41038_v15  ;;  %v22318_v57 = vand.u32 4294901760, %v22317_v61 }
0x1f5c   :  { %33459 = vmatmul.mubr.f32.vlgmr.msra.gmra.mrb[52].mxu1 %v39863_v52 }
0x1f5d   :  { %35621 = vmatpush3.bf16.msra.mxu1 %v35620_v58  ;;  %33465 = vmatprep.mubr.msk.f32.mxu1 %vm37171_vm1, %v41039_v34  ;;  %v22296_v58 = vsub.f32 %v39898_v0, %v22295_v45 }
0x1f5e   :  { %35622 = vmatprep.subr.bf16.mxu1 %v41038_v15 }
0x1f5f   :  { %33431 = vmatmul.mubr.f32.vlgmr.msra.gmra.mrb[46].mxu0 %v21339_v55  ;;  %v22297_v44 = vand.u32 4294901760, %v22296_v58 }
0x1f60   :  { %35609 = vmatpush3.bf16.msra.mxu0 %v35608_v14  ;;  %33437 = vmatprep.mubr.msk.f32.mxu0 %vm37171_vm1, %v41039_v34  ;;  %v22846_v14 = vsub.f32 %v22844_v22, %v22845_v36 }
0x1f61   :  { %35610 = vmatprep.subr.bf16.mxu0 %v41038_v15  ;;  %v35639_v55 = vpack.c.bf16 %v22304_v31, %v22297_v44  ;;  %v23298_v31 = vld [vmem:[#allocation10 + $0x80] sm:$0xff] }
0x1f62   :  { %v22847_v35 = vand.u32 4294901760, %v22846_v14  ;;  %v23323_v61 = vand.u32 4294901760, %v23298_v31 }
0x1f64   :  { %33466 = vmatmul.mubr.f32.vlgmr.msra.gmra.mrb[52].mxu1 %v39866_v1  ;;  %v22838_v1 = vand.u32 4294901760, %v22837_v53  ;;  %v35691_v54 = vpack.c.bf16 %v22854_v33, %v22847_v35  ;;  %v40029_v14 = vsub.f32 %v23298_v31, %v23323_v61 }
0x1f65   :  { %35624 = vmatpush3.bf16.msra.mxu1 %v39836_v63  ;;  %33472 = vmatprep.mubr.msk.f32.mxu1 %vm37171_vm1, %v41039_v34 }
0x1f66   :  { %35625 = vmatprep.subr.bf16.mxu1 %v41038_v15  ;;  %v22839_v18 = vsub.f32 %v22837_v53, %v22838_v1  ;;  %v39987_v53 = vld [vmem:[#allocation10 + $0xc0] sm:$0xff] }
0x1f67   :  { %33438 = vmatmul.mubr.f32.vlgmr.msra.gmra.mrb[46].mxu0 %v39853_v21  ;;  %v23347_v42 = vand.u32 4294901760, %v39987_v53 }
0x1f68   :  { %35612 = vmatpush3.bf16.msra.mxu0 %v39856_v6  ;;  %33444 = vmatprep.mubr.msk.f32.mxu0 %vm37171_vm1, %v41039_v34  ;;  %v35667_v6 = vpack.c.bf16 %v22316_v30, %v22309_v8  ;;  %v22840_v41 = vand.u32 4294901760, %v22839_v18 }
0x1f69   :  { %35632 = vmatprep.subr.bf16.mxu0 %v39908_v11  ;;  %v39995_v5 = vpack.c.bf16 %v23350_v50, %v23347_v42 }
0x1f6c   :  { %33473 = vmatmul.mubr.f32.vlgmr.msra.gmra.mrb[52].mxu1 %v21807_v40 }
0x1f6d   :  { %35627 = vmatpush3.bf16.msra.mxu1 %v39848_v29  ;;  %33479 = vmatprep.mubr.msk.f32.mxu1 %vm37171_vm1, %v41039_v34  ;;  %v22311_v29 = vand.u32 4294901760, %v22310_v23  ;;  %v23299_v23 = vld [vmem:[#allocation10 + $0x88] sm:$0xff] }
0x1f6e   :  { %35628 = vmatprep.subr.bf16.mxu1 %v41038_v15 }
0x1f6f   :  { %33445 = vmatmul.mubr.f32.vlgmr.msra.gmra.mrb[46].mxu0 %v39853_v21  ;;  %v35643_v51 = vpack.c.bf16 %v22318_v57, %v22311_v29  ;;  %v35647_v21 = vpack.c.bf16 %v39900_v10, %v39898_v0  ;;  %v35699_v0 = vpack.c.bf16 %v22851_v7, %v22844_v22  ;;  %v23301_v29 = vld [vmem:[#allocation10 + $0x98] sm:$0xff]  ;;  %v40011_v22 = vld [vmem:[#allocation10 + $0xe0] sm:$0xff]  ;;  %v40013_v7 = vld [vmem:[#allocation10 + $0xe8] sm:$0xff] }
0x1f70   :  { %35634 = vmatpush3.bf16.msra.mxu0 %v39908_v11  ;;  %33497 = vmatprep.mubr.f32.mxu0 %v22276_v4  ;;  %v23326_v4 = vand.u32 4294901760, %v23299_v23 }
0x1f71   :  { %35636 = vmatprep.subr.bf16.mxu0 %v35635_v17 }
0x1f72   :  { %v39973_v12 = vpack.c.bf16 %v23326_v4, %v23323_v61  ;;  %v40031_v2 = vsub.f32 %v23299_v23, %v23326_v4  ;;  %v40079_v23 = vsub.f32 %v23304_v39, %v23341_v32 }
0x1f74   :  { %35638 = vmatpush3.bf16.msra.mxu0 %v35635_v17  ;;  %33480 = vmatmul.mubr.f32.vlgmr.msra.gmra.mrb[52].mxu1 %v39863_v52 }
0x1f75   :  { %35630 = vmatpush3.bf16.msra.mxu1 %v39836_v63  ;;  %35640 = vmatprep.subr.bf16.mxu0 %v35639_v55  ;;  %v35663_v63 = vpack.c.bf16 %v22302_v59, %v22295_v45 }
0x1f76   :  { %33486 = vmatprep.mubr.msk.f32.mxu1 %vm37171_vm1, %v41039_v34  ;;  %35728 = vmatprep.subr.bf16.mxu1 %v39973_v12 }
0x1f77   :  { %33498 = vmatmul.mubr.f32.vlgmr.msra.gmra.mrb[40].mxu0 %v22286_v28  ;;  %v23332_v28 = vand.u32 4294901760, %v23301_v29 }
0x1f78   :  { %35642 = vmatpush3.bf16.msra.mxu0 %v35639_v55  ;;  %33508 = vmatprep.mubr.f32.mxu0 %v39890_v24  ;;  %v23300_v55 = vld [vmem:[#allocation10 + $0x90] sm:$0xff] }
0x1f79   :  { %35644 = vmatprep.subr.bf16.mxu0 %v35643_v51  ;;  %v23329_v57 = vand.u32 4294901760, %v23300_v55 }
0x1f7c   :  { %35646 = vmatpush3.bf16.msra.mxu0 %v35643_v51  ;;  %33487 = vmatmul.mubr.f32.vlgmr.msra.gmra.mrb[52].mxu1 %v39863_v52  ;;  %v22831_v52 = vand.u32 4294901760, %v22830_v16  ;;  %v39977_v51 = vpack.c.bf16 %v23332_v28, %v23329_v57 }
0x1f7d   :  { %35648 = vmatprep.subr.bf16.mxu0 %v35647_v21  ;;  %35730 = vmatpush3.bf16.msra.mxu1 %v39973_v12 }
0x1f7e   :  { %v22832_v40 = vsub.f32 %v22830_v16, %v22831_v52  ;;  %v35711_v10 = vpack.c.bf16 %v22838_v1, %v22831_v52  ;;  %35732 = vmatprep.subr.bf16.mxu1 %v39977_v51  ;;  %v39997_v52 = vld [vmem:[#allocation10 + $0xd0] sm:$0xff]  ;;  %v39999_v1 = vld [vmem:[#allocation10 + $0xd8] sm:$0xff] }
0x1f7f   :  { %33509 = vmatmul.mubr.f32.vlgmr.msra.gmra.mrb[40].mxu0 %v39905_v26 }
0x1f80   :  { %35650 = vmatpush3.bf16.msra.mxu0 %v35647_v21  ;;  %33519 = vmatprep.mubr.f32.mxu0 %v39903_v37  ;;  %v22833_v43 = vand.u32 4294901760, %v22832_v40  ;;  %v35715_v37 = vpack.c.bf16 %v22852_v25, %v22845_v36  ;;  %v23302_v21 = vld [vmem:[#allocation10 + $0xa0] sm:$0xff]  ;;  %v23356_v40 = vand.u32 4294901760, %v39999_v1  ;;  %v40025_v25 = vld [vmem:[#allocation10 + $0xf0] sm:$0xff] }
0x1f81   :  { %35652 = vmatprep.subr.bf16.mxu0 %v35651_v3  ;;  %35734 = vmatpush3.bf16.msra.mxu1 %v39977_v51  ;;  %v23365_v35 = vand.u32 4294901760, %v40025_v25 }
0x1f84   :  { %35654 = vmatpush3.bf16.msra.mxu0 %v35651_v3  ;;  %v23303_v3 = vld [vmem:[#allocation10 + $0xa8] sm:$0xff] }
0x1f85   :  { %35656 = vmatprep.subr.bf16.mxu0 %v39908_v11 }
0x1f87   :  { %33520 = vmatmul.mubr.f32.vlgmr.msra.gmra.mrb[40].mxu0 %v22283_v20 }
0x1f88   :  { %35658 = vmatpush3.bf16.msra.mxu0 %v39908_v11  ;;  %33530 = vmatprep.mubr.f32.mxu0 %v22274_v19 }
0x1f89   :  { %35660 = vmatprep.subr.bf16.mxu0 %v35635_v17 }
0x1f8c   :  { %35662 = vmatpush3.bf16.msra.mxu0 %v35635_v17 }
0x1f8d   :  { %35664 = vmatprep.subr.bf16.mxu0 %v35663_v63 }
0x1f8f   :  { %33531 = vmatmul.mubr.f32.vlgmr.msra.gmra.mrb[40].mxu0 %v22284_v38 }
0x1f90   :  { %35666 = vmatpush3.bf16.msra.mxu0 %v35663_v63  ;;  %33541 = vmatprep.mubr.f32.mxu0 %v39890_v24  ;;  %v23335_v63 = vand.u32 4294901760, %v23302_v21 }
0x1f91   :  { %35668 = vmatprep.subr.bf16.mxu0 %v35667_v6 }
0x1f94   :  { %35670 = vmatpush3.bf16.msra.mxu0 %v35667_v6  ;;  %v23338_v6 = vand.u32 4294901760, %v23303_v3 }
0x1f95   :  { %35672 = vmatprep.subr.bf16.mxu0 %v39908_v11 }
0x1f96   :  { %v39981_v48 = vpack.c.bf16 %v23338_v6, %v23335_v63 }
0x1f97   :  { %33542 = vmatmul.mubr.f32.vlgmr.msra.gmra.mrb[40].mxu0 %v39905_v26 }
0x1f98   :  { %35674 = vmatpush3.bf16.msra.mxu0 %v39908_v11  ;;  %33552 = vmatprep.mubr.f32.mxu0 %v39890_v24  ;;  %v35687_v24 = vpack.c.bf16 %v22840_v41, %v22833_v43  ;;  %v23359_v43 = vand.u32 4294901760, %v40011_v22  ;;  %v23362_v41 = vand.u32 4294901760, %v40013_v7 }
0x1f99   :  { %35676 = vmatprep.subr.bf16.mxu0 %v35635_v17  ;;  %35736 = vmatprep.subr.bf16.mxu1 %v39981_v48 }
0x1f9a   :  { %35738 = vmatpush3.bf16.msra.mxu1 %v39981_v48  ;;  %v40023_v36 = vpack.c.bf16 %v23362_v41, %v23359_v43 }
0x1f9c   :  { %35678 = vmatpush3.bf16.msra.mxu0 %v35635_v17 }
0x1f9d   :  { %35680 = vmatprep.subr.bf16.mxu0 %v39955_v60 }
0x1f9f   :  { %33553 = vmatmul.mubr.f32.vlgmr.msra.gmra.mrb[40].mxu0 %v39905_v26 }
0x1fa0   :  { %35682 = vmatpush3.bf16.msra.mxu0 %v39955_v60 }
0x1fa1   :  { %35684 = vmatprep.subr.bf16.mxu0 %v39959_v47 }
0x1fa4   :  { %35686 = vmatpush3.bf16.msra.mxu0 %v39959_v47 }
0x1fa5   :  { %35688 = vmatprep.subr.bf16.mxu0 %v35687_v24 }
0x2042   :  { %v21725_v26 = vpop.f32.mrb[46].mxu0 }
0x2043   :  { %v22734_v11 = vsel %vm162_vm0, %v21725_v26, 0  ;;  %v33446_v45 = vpop.f32.mrb[47].mxu0  ;;  %v40051_v26 = vsub.f32 %v23300_v55, %v23329_v57 }
0x2044   :  { %v22808_v59 = vand.u32 4294901760, %v22734_v11 }
0x2046   :  { %v22809_v49 = vsub.f32 %v22734_v11, %v22808_v59  ;;  %v40053_v11 = vsub.f32 %v23301_v29, %v23332_v28  ;;  %v41010_v29 = vand.u32 4294901760, %v40079_v23 }
0x2048   :  { %v22810_v13 = vand.u32 4294901760, %v22809_v49 }
0x204a   :  { %v22811_v19 = vsub.f32 %v22809_v49, %v22810_v13 }
0x204c   :  { %v22812_v20 = vand.u32 4294901760, %v22811_v19 }
0x204e   :  { %33563 = vmatprep.mubr.f32.mxu0 %v22812_v20 }
0x204f   :  { %v22193_v58 = vpop.f32.mrb[52].mxu1 }
0x2050   :  { %v22737_v46 = vsel %vm162_vm0, %v22193_v58, 0  ;;  %v33488_v8 = vpop.f32.mrb[53].mxu1 }
0x2051   :  { %v22818_v30 = vand.u32 4294901760, %v22737_v46  ;;  %v40069_v8 = vsub.f32 %v23303_v3, %v23338_v6  ;;  %v40098_v6 = vsub.f32 %v39989_v62, %v23350_v50 }
0x2053   :  { %v22819_v56 = vsub.f32 %v22737_v46, %v22818_v30  ;;  %v40067_v46 = vsub.f32 %v23302_v21, %v23335_v63  ;;  %v23469_v21 = vsub.f32 %v40079_v23, %v41010_v29  ;;  %v40095_v63 = vsub.f32 %v39987_v53, %v23347_v42 }
0x2054   :  { %v40120_v42 = vsub.f32 %v39999_v1, %v23356_v40  ;;  %v40137_v1 = vsub.f32 %v40013_v7, %v23362_v41  ;;  %v40153_v7 = vsub.f32 %v40025_v25, %v23365_v35 }
0x2055   :  { %v22820_v38 = vand.u32 4294901760, %v22819_v56 }
0x2057   :  { %v22821_v17 = vsub.f32 %v22819_v56, %v22820_v38 }
0x2059   :  { %v22822_v44 = vand.u32 4294901760, %v22821_v17  ;;  %v41011_v17 = vand.u32 4294901760, %v40069_v8 }
0x205b   :  { %33564 = vmatmul.mubr.f32.vlgmr.msra.gmra.mrb[40].mxu0 %v22822_v44  ;;  %v23462_v4 = vsub.f32 %v40069_v8, %v41011_v17 }
0x205c   :  { %35690 = vmatpush3.bf16.msra.mxu0 %v35687_v24  ;;  %33574 = vmatprep.mubr.f32.mxu0 %v22808_v59  ;;  %v40027_v24 = vld [vmem:[#allocation10 + $0xf8] sm:$0xff] }
0x205d   :  { %35692 = vmatprep.subr.bf16.mxu0 %v35691_v54  ;;  %v23368_v33 = vand.u32 4294901760, %v40027_v24  ;;  %v23463_v28 = vand.u32 4294901760, %v23462_v4  ;;  %v41003_v4 = vand.u32 4294901760, %v40137_v1 }
0x205f   :  { %v40158_v41 = vsub.f32 %v40027_v24, %v23368_v33 }
0x2060   :  { %35694 = vmatpush3.bf16.msra.mxu0 %v35691_v54  ;;  %v23426_v54 = vand.u32 4294901760, %v40029_v14 }
0x2061   :  { %35696 = vmatprep.subr.bf16.mxu0 %v35695_v27 }
0x2063   :  { %33575 = vmatmul.mubr.f32.vlgmr.msra.gmra.mrb[40].mxu0 %v22818_v30 }
0x2064   :  { %35698 = vmatpush3.bf16.msra.mxu0 %v35695_v27  ;;  %33585 = vmatprep.mubr.f32.mxu0 %v22809_v49  ;;  %v41015_v27 = vand.u32 4294901760, %v40031_v2  ;;  %v41014_v49 = vand.u32 4294901760, %v40051_v26 }
0x2065   :  { %35700 = vmatprep.subr.bf16.mxu0 %v35699_v0 }
0x2066   :  { %v23441_v20 = vsub.f32 %v40051_v26, %v41014_v49 }
0x2068   :  { %35702 = vmatpush3.bf16.msra.mxu0 %v35699_v0  ;;  %v40043_v0 = vpack.c.bf16 %v23368_v33, %v23365_v35 }
0x2069   :  { %35704 = vmatprep.subr.bf16.mxu0 %v39955_v60 }
0x206b   :  { %33586 = vmatmul.mubr.f32.vlgmr.msra.gmra.mrb[40].mxu0 %v22819_v56 }
0x206c   :  { %35706 = vmatpush3.bf16.msra.mxu0 %v39955_v60  ;;  %33596 = vmatprep.mubr.f32.mxu0 %v22810_v13  ;;  %v41013_v13 = vand.u32 4294901760, %v40053_v11 }
0x206d   :  { %35708 = vmatprep.subr.bf16.mxu0 %v39959_v47 }
0x206e   :  { %v23448_v58 = vsub.f32 %v40053_v11, %v41013_v13 }
0x2070   :  { %35710 = vmatpush3.bf16.msra.mxu0 %v39959_v47  ;;  %v23449_v56 = vand.u32 4294901760, %v23448_v58  ;;  %v41005_v58 = vand.u32 4294901760, %v40120_v42 }
0x2071   :  { %35712 = vmatprep.subr.bf16.mxu0 %v35711_v10 }
0x2073   :  { %33597 = vmatmul.mubr.f32.vlgmr.msra.gmra.mrb[40].mxu0 %v22820_v38  ;;  %v41012_v38 = vand.u32 4294901760, %v40067_v46 }
0x2074   :  { %35714 = vmatpush3.bf16.msra.mxu0 %v35711_v10  ;;  %33607 = vmatprep.mubr.f32.mxu0 %v22808_v59  ;;  %v23427_v10 = vsub.f32 %v40029_v14, %v23426_v54 }
0x2075   :  { %35716 = vmatprep.subr.bf16.mxu0 %v35715_v37  ;;  %v23455_v31 = vsub.f32 %v40067_v46, %v41012_v38 }
0x2076   :  { %v23428_v45 = vand.u32 4294901760, %v23427_v10  ;;  %v41007_v10 = vand.u32 4294901760, %v40098_v6 }
0x2077   :  { %v23456_v55 = vand.u32 4294901760, %v23455_v31 }
0x2078   :  { %35718 = vmatpush3.bf16.msra.mxu0 %v35715_v37  ;;  %v23434_v37 = vsub.f32 %v40031_v2, %v41015_v27  ;;  %v23490_v53 = vsub.f32 %v40098_v6, %v41007_v10 }
0x2079   :  { %35720 = vmatprep.subr.bf16.mxu0 %v39955_v60  ;;  %v40100_v39 = vpack.c.bf16 %v23463_v28, %v23456_v55 }
0x207b   :  { %33608 = vmatmul.mubr.f32.vlgmr.msra.gmra.mrb[40].mxu0 %v22818_v30 }
0x207c   :  { %35722 = vmatpush3.bf16.msra.mxu0 %v39955_v60  ;;  %33618 = vmatprep.mubr.f32.mxu0 %v22808_v59  ;;  %v23344_v60 = vand.u32 4294901760, %v23305_v9  ;;  %v23435_v59 = vand.u32 4294901760, %v23434_v37 }
0x207d   :  { %35724 = vmatprep.subr.bf16.mxu0 %v39959_v47 }
0x207e   :  { %v39985_v16 = vpack.c.bf16 %v23344_v60, %v23341_v32  ;;  %v40059_v19 = vpack.c.bf16 %v23435_v59, %v23428_v45  ;;  %v40081_v61 = vsub.f32 %v23305_v9, %v23344_v60  ;;  %v23470_v9 = vand.u32 4294901760, %v23469_v21 }
0x207f   :  { %v41008_v60 = vand.u32 4294901760, %v40095_v63  ;;  %v23491_v59 = vand.u32 4294901760, %v23490_v53 }
0x2080   :  { %35726 = vmatpush3.bf16.msra.mxu0 %v39959_v47  ;;  %35740 = vmatprep.subr.bf16.mxu1 %v39985_v16  ;;  %v23353_v47 = vand.u32 4294901760, %v39997_v52  ;;  %v41009_v57 = vand.u32 4294901760, %v40081_v61 }
0x2081   :  { %35742 = vmatpush3.bf16.msra.mxu1 %v39985_v16  ;;  %v23483_v45 = vsub.f32 %v40095_v63, %v41008_v60 }
0x2082   :  { %35744 = vmatprep.subr.bf16.mxu1 %v39995_v5  ;;  %v40009_v18 = vpack.c.bf16 %v23356_v40, %v23353_v47  ;;  %v23476_v3 = vsub.f32 %v40081_v61, %v41009_v57  ;;  %v40115_v62 = vsub.f32 %v39997_v52, %v23353_v47  ;;  %v40132_v52 = vsub.f32 %v40011_v22, %v23359_v43 }
0x2083   :  { %33619 = vmatmul.mubr.f32.vlgmr.msra.gmra.mrb[40].mxu0 %v22818_v30  ;;  %v23442_v30 = vand.u32 4294901760, %v23441_v20  ;;  %v23484_v50 = vand.u32 4294901760, %v23483_v45  ;;  %v23504_v47 = vsub.f32 %v40120_v42, %v41005_v58  ;;  %v23518_v43 = vsub.f32 %v40137_v1, %v41003_v4 }
0x2084   :  { %v23477_v32 = vand.u32 4294901760, %v23476_v3  ;;  %v41006_v20 = vand.u32 4294901760, %v40115_v62  ;;  %v41004_v31 = vand.u32 4294901760, %v40132_v52 }
0x2085   :  { %35746 = vmatpush3.bf16.msra.mxu1 %v39995_v5  ;;  %v40074_v44 = vpack.c.bf16 %v23449_v56, %v23442_v30  ;;  %v40124_v30 = vpack.c.bf16 %v23491_v59, %v23484_v50  ;;  %v23505_v55 = vand.u32 4294901760, %v23504_v47  ;;  %v23519_v3 = vand.u32 4294901760, %v23518_v43 }
0x2086   :  { %35748 = vmatprep.subr.bf16.mxu1 %v40009_v18  ;;  %v40104_v37 = vpack.c.bf16 %v23477_v32, %v23470_v9  ;;  %v23497_v56 = vsub.f32 %v40115_v62, %v41006_v20  ;;  %v23511_v22 = vsub.f32 %v40132_v52, %v41004_v31  ;;  %v41002_v9 = vand.u32 4294901760, %v40153_v7 }
0x2087   :  { %v41001_v32 = vand.u32 4294901760, %v40158_v41  ;;  %v35791_v50 = vpack.c.bf16 %v40031_v2, %v40029_v14  ;;  %v40176_v59 = vpack.c.bf16 %v40053_v11, %v40051_v26  ;;  %v40184_v47 = vpack.c.bf16 %v40081_v61, %v40079_v23 }
0x2088   :  { %v23498_v40 = vand.u32 4294901760, %v23497_v56  ;;  %v23512_v21 = vand.u32 4294901760, %v23511_v22  ;;  %v23525_v25 = vsub.f32 %v40153_v7, %v41002_v9  ;;  %v40180_v56 = vpack.c.bf16 %v40069_v8, %v40067_v46 }
0x2089   :  { %35750 = vmatpush3.bf16.msra.mxu1 %v40009_v18  ;;  %v23532_v35 = vsub.f32 %v40158_v41, %v41001_v32  ;;  %v40196_v22 = vpack.c.bf16 %v40137_v1, %v40132_v52  ;;  %v40200_v43 = vpack.c.bf16 %v40158_v41, %v40153_v7  ;;  %v41051_v14 = vand.u32 4294901760, %v40067_v46 }
0x208a   :  { %35752 = vmatprep.subr.bf16.mxu1 %v40023_v36  ;;  %v40160_v28 = vpack.c.bf16 %v23505_v55, %v23498_v40  ;;  %v40164_v45 = vpack.c.bf16 %v23519_v3, %v23512_v21  ;;  %v23526_v24 = vand.u32 4294901760, %v23525_v25  ;;  %v40188_v40 = vpack.c.bf16 %v40098_v6, %v40095_v63  ;;  %v29940_v21 = vld [vmem:[%s40960_s6 + $0x1] ss:$0 sm:$0xff] }
0x208b   :  { %v23533_v33 = vand.u32 4294901760, %v23532_v35  ;;  %v40192_v55 = vpack.c.bf16 %v40120_v42, %v40115_v62  ;;  %v41057_v46 = vand.u32 4294901760, %v40115_v62 }
0x208d   :  { %35754 = vmatpush3.bf16.msra.mxu1 %v40023_v36  ;;  %v35787_v53 = vpack.c.bf16 %v23533_v33, %v23526_v24 }
0x208e   :  { %35756 = vmatprep.subr.bf16.mxu1 %v40043_v0 }
0x2091   :  { %35758 = vmatpush3.bf16.msra.mxu1 %v40043_v0 }
0x2092   :  { %35760 = vmatprep.subr.bf16.mxu1 %v40059_v19 }
0x2156   :  { %v33620_v3 = vpop.f32.mrb[40].mxu0 }
0x2157   :  { %v23278_v25 = vadd.f32 %v33620_v3, %v29940_v21  ;;  %v23257_v35 = vpop.f32.mrb[41].mxu0 }
0x2158   :  { %v23277_v24 = vadd.f32 %v29940_v21, %v23257_v35 }
0x2159   :  { %v23280_v33 = vmul.f32 %v23278_v25, %v23278_v25 }
0x215a   :  { %v23279_v32 = vmul.f32 %v23277_v24, %v23277_v24 }
0x215b   :  { %v23282_v9 = vmul.f32 %v23280_v33, %v23278_v25 }
0x215c   :  { %v23281_v4 = vmul.f32 %v23279_v32, %v23277_v24 }
0x215d   :  { %v23284_v31 = vmul.f32 0.044715, %v23282_v9 }
0x215e   :  { %v23283_v58 = vmul.f32 0.044715, %v23281_v4 }
0x215f   :  { %v23286_v20 = vadd.f32 %v23284_v31, %v23278_v25 }
0x2160   :  { %v23285_v10 = vadd.f32 %v23283_v58, %v23277_v24  ;;  %v41056_v58 = vand.u32 4294901760, %v40098_v6  ;;  %v41062_v6 = vand.u32 4294901760, %v40158_v41 }
0x2161   :  { %v23288_v60 = vmul.f32 0.7978846, %v23286_v20 }
0x2162   :  { %v23287_v57 = vmul.f32 0.7978846, %v23285_v10  ;;  %v41053_v10 = vand.u32 4294901760, %v40079_v23  ;;  %v41059_v23 = vand.u32 4294901760, %v40132_v52 }
0x2163   :  { %36887 = vtanh.f32 %v23288_v60 }
0x2164   :  { %36889 = vtanh.f32 %v23287_v57 }
0x216d   :  { %v36888_v29 = vpop.eup %36887 }
0x216e   :  { %v36890_v17 = vpop.eup %36889  ;;  %v23292_v38 = vadd.f32 1.0, %v36888_v29  ;;  %v41050_v29 = vand.u32 4294901760, %v40053_v11 }
0x216f   :  { %v23291_v13 = vadd.f32 1.0, %v36890_v17 }
0x2170   :  { %v23294_v49 = vmul.f32 0.5, %v23292_v38 }
0x2171   :  { %v23293_v3 = vmul.f32 0.5, %v23291_v13 }
0x2172   :  { %v23296_v27 = vmul.f32 %v23294_v49, %v23278_v25 }
0x2173   :  { %v23295_v21 = vmul.f32 %v23293_v3, %v23277_v24 }
0x2174   :  { %v40205_v35 = vand.u32 4294901760, %v23296_v27 }
0x2175   :  { %v40207_v33 = vand.u32 4294901760, %v23295_v21 }
0x2176   :  { %v40210_v4 = vsub.f32 %v23296_v27, %v40205_v35  ;;  %v41048_v27 = vand.u32 4294901760, %v40031_v2  ;;  %v41052_v2 = vand.u32 4294901760, %v40069_v8  ;;  %v41058_v8 = vand.u32 4294901760, %v40120_v42 }
0x2177   :  { %v23404_v20 = vsub.f32 %v23295_v21, %v40207_v33 }
0x2178   :  { %v23415_v60 = vand.u32 4294901760, %v40210_v4  ;;  %v35875_v31 = vpack.c.bf16 %v41058_v8, %v41057_v46 }
0x2179   :  { %v23405_v57 = vand.u32 4294901760, %v23404_v20 }
0x217a   :  { %v23416_v17 = vsub.f32 %v40210_v4, %v23415_v60 }
0x217b   :  { %v23406_v38 = vsub.f32 %v23404_v20, %v23405_v57 }
0x217c   :  { %v23417_v49 = vand.u32 4294901760, %v23416_v17 }
0x217d   :  { %v23407_v13 = vand.u32 4294901760, %v23406_v38 }
0x217f   :  { %33653 = vmatprep.mubr.f32.mxu1 %v23407_v13 }
0x2180   :  { %33654 = vmatmul.mubr.f32.vlgmr.msra.gmra.mrb[54].mxu1 %v23417_v49  ;;  %v24110_v49 = vld [vmem:[%s40966_s12] sm:$0xff] }
0x2181   :  { %35762 = vmatpush3.bf16.msra.mxu1 %v40059_v19  ;;  %33688 = vmatprep.mubr.f32.mxu1 %v40207_v33  ;;  %v35855_v19 = vpack.c.bf16 %v41048_v27, %v23426_v54  ;;  %v35863_v54 = vpack.c.bf16 %v41052_v2, %v41051_v14  ;;  %v24111_v27 = vld [vmem:[%s40966_s12 + $0x8] sm:$0xff] }
0x2182   :  { %35764 = vmatprep.subr.bf16.mxu1 %v40074_v44 }
0x2185   :  { %35766 = vmatpush3.bf16.msra.mxu1 %v40074_v44  ;;  %v41049_v44 = vand.u32 4294901760, %v40051_v26  ;;  %v41054_v26 = vand.u32 4294901760, %v40081_v61  ;;  %v41060_v61 = vand.u32 4294901760, %v40137_v1 }
0x2186   :  { %35768 = vmatprep.subr.bf16.mxu1 %v40100_v39 }
0x2187   :  { %v35867_v11 = vpack.c.bf16 %v41054_v26, %v41053_v10 }
0x2189   :  { %35770 = vmatpush3.bf16.msra.mxu1 %v40100_v39  ;;  %v35859_v39 = vpack.c.bf16 %v41050_v29, %v41049_v44  ;;  %v24121_v44 = vand.u32 4294901760, %v24110_v49  ;;  %v24124_v29 = vand.u32 4294901760, %v24111_v27 }
0x218a   :  { %35772 = vmatprep.subr.bf16.mxu1 %v40104_v37 }
0x218b   :  { %v24211_v26 = vsub.f32 %v24110_v49, %v24121_v44 }
0x218d   :  { %35774 = vmatpush3.bf16.msra.mxu1 %v40104_v37  ;;  %v41055_v37 = vand.u32 4294901760, %v40095_v63  ;;  %v41061_v63 = vand.u32 4294901760, %v40153_v7 }
0x218e   :  { %35776 = vmatprep.subr.bf16.mxu1 %v40124_v30 }
0x218f   :  { %v35883_v9 = vpack.c.bf16 %v41062_v6, %v41061_v63 }
0x2191   :  { %35778 = vmatpush3.bf16.msra.mxu1 %v40124_v30  ;;  %v35871_v30 = vpack.c.bf16 %v41056_v58, %v41055_v37  ;;  %v24212_v37 = vand.u32 4294901760, %v24211_v26 }
0x2192   :  { %35780 = vmatprep.subr.bf16.mxu1 %v40160_v28 }
0x2195   :  { %35782 = vmatpush3.bf16.msra.mxu1 %v40160_v28  ;;  %v35879_v28 = vpack.c.bf16 %v41060_v61, %v41059_v23 }
0x2196   :  { %35784 = vmatprep.subr.bf16.mxu1 %v40164_v45 }
0x2199   :  { %35786 = vmatpush3.bf16.msra.mxu1 %v40164_v45  ;;  %v41063_v45 = vmov 32  }
0x219a   :  { %35788 = vmatprep.subr.bf16.mxu1 %v35787_v53 }
0x219d   :  { %35790 = vmatpush3.bf16.msra.mxu1 %v35787_v53 }
0x219e   :  { %35792 = vmatprep.subr.bf16.mxu1 %v35791_v50 }
0x21a0   :  { %33689 = vmatmul.mubr.f32.vlgmr.msra.gmra.mrb[54].mxu1 %v40205_v35 }
0x21a1   :  { %35794 = vmatpush3.bf16.msra.mxu1 %v35791_v50  ;;  %33723 = vmatprep.mubr.f32.mxu1 %v23404_v20 }
0x21a2   :  { %35796 = vmatprep.subr.bf16.mxu1 %v40176_v59 }
0x21a5   :  { %35798 = vmatpush3.bf16.msra.mxu1 %v40176_v59 }
0x21a6   :  { %35800 = vmatprep.subr.bf16.mxu1 %v40180_v56 }
0x21a9   :  { %35802 = vmatpush3.bf16.msra.mxu1 %v40180_v56 }
0x21aa   :  { %35804 = vmatprep.subr.bf16.mxu1 %v40184_v47 }
0x21ad   :  { %35806 = vmatpush3.bf16.msra.mxu1 %v40184_v47 }
0x21ae   :  { %35808 = vmatprep.subr.bf16.mxu1 %v40188_v40 }
0x21b1   :  { %35810 = vmatpush3.bf16.msra.mxu1 %v40188_v40  ;;  %v41064_v40 = vld [vmem:[#allocation25_spill] sm:$0xff] }
0x21b2   :  { %35812 = vmatprep.subr.bf16.mxu1 %v40192_v55 }
0x21b5   :  { %35814 = vmatpush3.bf16.msra.mxu1 %v40192_v55 }
0x21b6   :  { %35816 = vmatprep.subr.bf16.mxu1 %v40196_v22 }
0x21b9   :  { %35818 = vmatpush3.bf16.msra.mxu1 %v40196_v22 }
0x21ba   :  { %35820 = vmatprep.subr.bf16.mxu1 %v40200_v43 }
0x21bd   :  { %35822 = vmatpush3.bf16.msra.mxu1 %v40200_v43  ;;  %v41065_v43 = vld [vmem:[#allocation24_spill] sm:$0xff] }
0x21be   :  { %35824 = vmatprep.subr.bf16.mxu1 %v39973_v12 }
0x21c0   :  { %33724 = vmatmul.mubr.f32.vlgmr.msra.gmra.mrb[54].mxu1 %v40210_v4 }
0x21c1   :  { %35826 = vmatpush3.bf16.msra.mxu1 %v39973_v12  ;;  %33758 = vmatprep.mubr.f32.mxu1 %v23405_v57 }
0x21c2   :  { %35828 = vmatprep.subr.bf16.mxu1 %v39977_v51 }
0x21c5   :  { %35830 = vmatpush3.bf16.msra.mxu1 %v39977_v51 }
0x21c6   :  { %35832 = vmatprep.subr.bf16.mxu1 %v39981_v48 }
0x21c9   :  { %35834 = vmatpush3.bf16.msra.mxu1 %v39981_v48 }
0x21ca   :  { %35836 = vmatprep.subr.bf16.mxu1 %v39985_v16 }
0x21cd   :  { %35838 = vmatpush3.bf16.msra.mxu1 %v39985_v16 }
0x21ce   :  { %35840 = vmatprep.subr.bf16.mxu1 %v39995_v5 }
0x21d1   :  { %35842 = vmatpush3.bf16.msra.mxu1 %v39995_v5 }
0x21d2   :  { %35844 = vmatprep.subr.bf16.mxu1 %v40009_v18 }
0x21d5   :  { %35846 = vmatpush3.bf16.msra.mxu1 %v40009_v18 }
0x21d6   :  { %35848 = vmatprep.subr.bf16.mxu1 %v40023_v36 }
0x21d9   :  { %35850 = vmatpush3.bf16.msra.mxu1 %v40023_v36 }
0x21da   :  { %35852 = vmatprep.subr.bf16.mxu1 %v40043_v0 }
0x21dd   :  { %35854 = vmatpush3.bf16.msra.mxu1 %v40043_v0 }
0x21de   :  { %35856 = vmatprep.subr.bf16.mxu1 %v35855_v19 }
0x21e0   :  { %33759 = vmatmul.mubr.f32.vlgmr.msra.gmra.mrb[54].mxu1 %v23415_v60 }
0x21e1   :  { %35858 = vmatpush3.bf16.msra.mxu1 %v35855_v19  ;;  %33793 = vmatprep.mubr.f32.mxu1 %v40207_v33  ;;  %v24112_v19 = vld [vmem:[%s40966_s12 + $0x10] sm:$0xff] }
0x21e2   :  { %35860 = vmatprep.subr.bf16.mxu1 %v35859_v39  ;;  %v24127_v14 = vand.u32 4294901760, %v24112_v19 }
0x21e4   :  { %v24225_v8 = vsub.f32 %v24112_v19, %v24127_v14 }
0x21e5   :  { %35862 = vmatpush3.bf16.msra.mxu1 %v35859_v39  ;;  %v24113_v39 = vld [vmem:[%s40966_s12 + $0x18] sm:$0xff] }
0x21e6   :  { %35864 = vmatprep.subr.bf16.mxu1 %v35863_v54  ;;  %v24130_v2 = vand.u32 4294901760, %v24113_v39 }
0x21e8   :  { %v40362_v10 = vpack.c.bf16 %v24130_v2, %v24127_v14 }
0x21e9   :  { %35866 = vmatpush3.bf16.msra.mxu1 %v35863_v54  ;;  %v40360_v54 = vpack.c.bf16 %v24124_v29, %v24121_v44 }
0x21ea   :  { %35868 = vmatprep.subr.bf16.mxu1 %v35867_v11 }
0x21eb   :  { %35920 = vmatprep.subr.bf16.mxu0 %v40360_v54 }
0x21ec   :  { %35922 = vmatpush3.bf16.msra.mxu0 %v40360_v54 }
0x21ed   :  { %35870 = vmatpush3.bf16.msra.mxu1 %v35867_v11  ;;  %v24218_v11 = vsub.f32 %v24111_v27, %v24124_v29  ;;  %35924 = vmatprep.subr.bf16.mxu0 %v40362_v10 }
0x21ee   :  { %35872 = vmatprep.subr.bf16.mxu1 %v35871_v30 }
0x21ef   :  { %v24219_v58 = vand.u32 4294901760, %v24218_v11 }
0x21f0   :  { %35926 = vmatpush3.bf16.msra.mxu0 %v40362_v10 }
0x21f1   :  { %35874 = vmatpush3.bf16.msra.mxu1 %v35871_v30  ;;  %v24213_v30 = vsub.f32 %v24211_v26, %v24212_v37  ;;  %v24220_v46 = vsub.f32 %v24218_v11, %v24219_v58 }
0x21f2   :  { %35876 = vmatprep.subr.bf16.mxu1 %v35875_v31 }
0x21f3   :  { %v24214_v23 = vand.u32 4294901760, %v24213_v30  ;;  %v24221_v61 = vand.u32 4294901760, %v24220_v46 }
0x21f5   :  { %35878 = vmatpush3.bf16.msra.mxu1 %v35875_v31  ;;  %v24232_v31 = vsub.f32 %v24113_v39, %v24130_v2  ;;  %v35927_v6 = vpack.c.bf16 %v24221_v61, %v24214_v23 }
0x21f6   :  { %35880 = vmatprep.subr.bf16.mxu1 %v35879_v28 }
0x21f7   :  { %v24233_v63 = vand.u32 4294901760, %v24232_v31  ;;  %35928 = vmatprep.subr.bf16.mxu0 %v35927_v6 }
0x21f9   :  { %35882 = vmatpush3.bf16.msra.mxu1 %v35879_v28  ;;  %v24226_v28 = vand.u32 4294901760, %v24225_v8 }
0x21fa   :  { %35884 = vmatprep.subr.bf16.mxu1 %v35883_v9 }
0x21fd   :  { %35886 = vmatpush3.bf16.msra.mxu1 %v35883_v9  ;;  %v24227_v9 = vsub.f32 %v24225_v8, %v24226_v28 }
0x21fe   :  { %35888 = vmatprep.subr.bf16.mxu1 %v39973_v12 }
0x2200   :  { %33794 = vmatmul.mubr.f32.vlgmr.msra.gmra.mrb[54].mxu1 %v40205_v35 }
0x2201   :  { %35890 = vmatpush3.bf16.msra.mxu1 %v39973_v12  ;;  %33828 = vmatprep.mubr.f32.mxu1 %v40207_v33  ;;  %v29942_v12 = vld [vmem:[%s40962_s8 + $0x1] ss:$0 sm:$0xff] }
0x2202   :  { %35892 = vmatprep.subr.bf16.mxu1 %v39977_v51 }
0x2205   :  { %35894 = vmatpush3.bf16.msra.mxu1 %v39977_v51 }
0x2206   :  { %35896 = vmatprep.subr.bf16.mxu1 %v39981_v48 }
0x2209   :  { %35898 = vmatpush3.bf16.msra.mxu1 %v39981_v48 }
0x220a   :  { %35900 = vmatprep.subr.bf16.mxu1 %v39985_v16 }
0x220d   :  { %35902 = vmatpush3.bf16.msra.mxu1 %v39985_v16 }
0x220e   :  { %35904 = vmatprep.subr.bf16.mxu1 %v39995_v5 }
0x2211   :  { %35906 = vmatpush3.bf16.msra.mxu1 %v39995_v5 }
0x2212   :  { %35908 = vmatprep.subr.bf16.mxu1 %v40009_v18 }
0x2215   :  { %35910 = vmatpush3.bf16.msra.mxu1 %v40009_v18 }
0x2216   :  { %35912 = vmatprep.subr.bf16.mxu1 %v40023_v36 }
0x2219   :  { %35914 = vmatpush3.bf16.msra.mxu1 %v40023_v36 }
0x221a   :  { %35916 = vmatprep.subr.bf16.mxu1 %v40043_v0 }
0x221d   :  { %35918 = vmatpush3.bf16.msra.mxu1 %v40043_v0 }
0x221e   :  { %33987 = vmatprep.subr.mxu1 %v41039_v34 }
0x2220   :  { %33829 = vmatmul.mubr.f32.vlgmr.msra.gmra.mrb[54].mxu1 %v40205_v35 }
0x2221   :  { %33989 = vmatprep.mubr.msk.f32.mxu1 %vm37171_vm1, %v41039_v34 }
0x22f3   :  { %v33830_v51 = vpop.f32.mrb[54].mxu1 }
0x22f4   :  { %v40323_v48 = vadd.f32 %v33830_v51, %v29942_v12  ;;  %v23996_v16 = vpop.f32.mrb[55].mxu1  ;;  %v24228_v51 = vand.u32 4294901760, %v24227_v9 }
0x22f5   :  { %v40325_v5 = vadd.f32 %v29942_v12, %v23996_v16  ;;  %v24234_v12 = vsub.f32 %v24232_v31, %v24233_v63 }
0x22f6   :  { %v29944_v18 = vmul.f32 -1.442695, %v40323_v48 }
0x22f7   :  { %v29943_v36 = vmul.f32 -1.442695, %v40325_v5  ;;  %v24235_v16 = vand.u32 4294901760, %v24234_v12 }
0x22f8   :  { %36891 = vpow2.f32 %v29944_v18 }
0x22f9   :  { %36893 = vpow2.f32 %v29943_v36  ;;  %v35931_v18 = vpack.c.bf16 %v24235_v16, %v24228_v51  ;;  %v35935_v36 = vpack.c.bf16 %v24218_v11, %v24211_v26 }
0x2302   :  { %v36892_v0 = vpop.eup %36891 }
0x2303   :  { %v36894_v62 = vpop.eup %36893  ;;  %v24013_v42 = vadd.f32 1.0, %v36892_v0  ;;  %v35939_v0 = vpack.c.bf16 %v24232_v31, %v24225_v8 }
0x2304   :  { %v24012_v52 = vadd.f32 1.0, %v36894_v62  ;;  %v35951_v62 = vpack.c.bf16 %v24219_v58, %v24212_v37 }
0x2305   :  { %36895 = vrcp.f32 %v24013_v42  ;;  %v35955_v42 = vpack.c.bf16 %v24233_v63, %v24226_v28 }
0x2306   :  { %36897 = vrcp.f32 %v24012_v52 }
0x230f   :  { %v36896_v1 = vpop.eup %36895 }
0x2310   :  { %v36898_v7 = vpop.eup %36897  ;;  %v40329_v41 = vmul.f32 2.0, %v36896_v1 }
0x2311   :  { %v40331_v32 = vmul.f32 2.0, %v36898_v7 }
0x2312   :  { %24037 = vperm.xlu1 %36792, %v40329_v41  }
0x2313   :  { %24033 = vperm.xlu0 %36793, %v40331_v32  }
0x2316   :  { %36794 = vset.pattern.permute.xlu1 %v41063_v45 }
0x2391   :  { %v24038_v53 = vpop.permute.xlu1 %24037 }
0x2392   :  { %v24041_v50 = vmul.f32 %v40323_v48, %v24038_v53  ;;  %v24034_v59 = vpop.permute.xlu0 %24033 }
0x2393   :  { %v24040_v56 = vmul.f32 %v40325_v5, %v24034_v59 }
0x2394   :  { %24054 = vrot.lane.b32.xlu1 %v24041_v50, %s37170_s4 }
0x2395   :  { %24050 = vrot.lane.b32.xlu0 %v24040_v56, %s37170_s4  ;;  %v29945_v56 = vld [vmem:[%s40963_s9] ss:$0 sm:$0xff] }
0x2406   :  { %v24055_v47 = vpop.permute.xlu1 %24054 }
0x2407   :  { %v24064_v55 = vadd.f32 %v24055_v47, %v41064_v40  ;;  %v24051_v22 = vpop.permute.xlu0 %24050  ;;  %v29946_v40 = vld [vmem:[%s40964_s10] ss:$0 sm:$0xff] }
0x2408   :  { %v24062_v25 = vadd.f32 %v24051_v22, %v41065_v43 }
0x2409   :  { %29877 = vst.msk [vmem:[#allocation15 + $0x8] sm:$0xff] %vm162_vm0, %v24064_v55  ;;  %v24071_v24 = vsel %vm162_vm0, %v24064_v55, 0.0 }
0x240a   :  { %29876 = vst.msk [vmem:[#allocation15] sm:$0xff] %vm162_vm0, %v24062_v25  ;;  %24072 = vadd.xlane.f32.xlu1 %v24071_v24  ;;  %v24068_v3 = vsel %vm162_vm0, %v24062_v25, 0.0 }
0x240b   :  { %24069 = vadd.xlane.f32.xlu0 %v24068_v3 }
0x2497   :  { %v24073_v21 = vpop.xlane.xlu1 %24072 }
0x2498   :  { %v24075_v35 = vmul.f32 0.03125, %v24073_v21  ;;  %v24070_v33 = vpop.xlane.xlu0 %24069 }
0x2499   :  { %v24074_v4 = vmul.f32 0.03125, %v24070_v33 }
0x249a   :  { %v24077_v20 = vsub.f32 %v24064_v55, %v24075_v35 }
0x249b   :  { %v24076_v60 = vsub.f32 %v24062_v25, %v24074_v4 }
0x249c   :  { %v24079_v38 = vmul.f32 %v24077_v20, %v24077_v20 }
0x249d   :  { %v24078_v57 = vmul.f32 %v24076_v60, %v24076_v60 }
0x249e   :  { %v24083_v13 = vsel %vm162_vm0, %v24079_v38, 0.0 }
0x249f   :  { %v24080_v17 = vsel %vm162_vm0, %v24078_v57, 0.0 }
0x24a0   :  { %24081 = vadd.xlane.f32.xlu0 %v24080_v17 }
0x24a4   :  { %24084 = vadd.xlane.f32.xlu0 %v24083_v13 }
0x252d   :  { %v24082_v52 = vpop.xlane.xlu0 %24081 }
0x252e   :  { %v24086_v1 = vmul.f32 0.03125, %v24082_v52 }
0x2530   :  { %v24088_v7 = vadd.f32 1e-05, %v24086_v1 }
0x2531   :  { %v24085_v45 = vpop.xlane.xlu0 %24084 }
0x2532   :  { %36899 = vrsqrt.f32 %v24088_v7  ;;  %v24087_v53 = vmul.f32 0.03125, %v24085_v45 }
0x2534   :  { %v24089_v50 = vadd.f32 1e-05, %v24087_v53 }
0x2536   :  { %36901 = vrsqrt.f32 %v24089_v50 }
0x253c   :  { %v36900_v59 = vpop.eup %36899 }
0x253d   :  { %v24092_v47 = vmul.f32 %v36900_v59, %v24076_v60 }
0x253f   :  { %v24100_v55 = vmul.f32 %v29945_v56, %v24092_v47 }
0x2540   :  { %v36902_v22 = vpop.eup %36901 }
0x2541   :  { %v24093_v43 = vmul.f32 %v36902_v22, %v24077_v20  ;;  %v24108_v25 = vadd.f32 %v29946_v40, %v24100_v55  ;;  %v40390_v20 = vld [vmem:[%s40965_s11] sm:$0x3] }
0x2542   :  { %v24650_v44 = vsel %vm162_vm0, %v40390_v20, 0 }
0x2543   :  { %v24101_v24 = vmul.f32 %v29945_v56, %v24093_v43  ;;  %v24115_v3 = vsel %vm162_vm0, %v24108_v25, 0  ;;  %v40394_v29 = vand.u32 4294901760, %v24650_v44 }
0x2544   :  { %v24189_v21 = vand.u32 4294901760, %v24115_v3 }
0x2545   :  { %v24109_v35 = vadd.f32 %v29946_v40, %v24101_v24  ;;  %v24722_v39 = vsub.f32 %v24650_v44, %v40394_v29 }
0x2546   :  { %v24190_v33 = vsub.f32 %v24115_v3, %v24189_v21 }
0x2547   :  { %v24118_v4 = vsel %vm162_vm0, %v24109_v35, 0  ;;  %v24723_v14 = vand.u32 4294901760, %v24722_v39 }
0x2548   :  { %v24191_v57 = vand.u32 4294901760, %v24190_v33  ;;  %v24199_v17 = vand.u32 4294901760, %v24118_v4 }
0x254a   :  { %v24192_v38 = vsub.f32 %v24190_v33, %v24191_v57  ;;  %v24200_v60 = vsub.f32 %v24118_v4, %v24199_v17 }
0x254c   :  { %v24193_v13 = vand.u32 4294901760, %v24192_v38  ;;  %v24201_v49 = vand.u32 4294901760, %v24200_v60 }
0x254e   :  { %33839 = vmatprep.mubr.f32.mxu0 %v24193_v13  ;;  %v24202_v27 = vsub.f32 %v24200_v60, %v24201_v49 }
0x2550   :  { %v24203_v19 = vand.u32 4294901760, %v24202_v27 }
0x2552   :  { %33840 = vmatmul.mubr.f32.vlgmr.msra.gmra.mrb[48].mxu0 %v24203_v19 }
0x2553   :  { %35930 = vmatpush3.bf16.msra.mxu0 %v35927_v6  ;;  %33850 = vmatprep.mubr.f32.mxu0 %v24189_v21 }
0x2554   :  { %35932 = vmatprep.subr.bf16.mxu0 %v35931_v18 }
0x2557   :  { %35934 = vmatpush3.bf16.msra.mxu0 %v35931_v18 }
0x2558   :  { %35936 = vmatprep.subr.bf16.mxu0 %v35935_v36 }
0x255a   :  { %33851 = vmatmul.mubr.f32.vlgmr.msra.gmra.mrb[48].mxu0 %v24199_v17 }
0x255b   :  { %35938 = vmatpush3.bf16.msra.mxu0 %v35935_v36  ;;  %33861 = vmatprep.mubr.f32.mxu0 %v24190_v33 }
0x255c   :  { %35940 = vmatprep.subr.bf16.mxu0 %v35939_v0 }
0x255f   :  { %35942 = vmatpush3.bf16.msra.mxu0 %v35939_v0 }
0x2560   :  { %35944 = vmatprep.subr.bf16.mxu0 %v40360_v54 }
0x2562   :  { %33862 = vmatmul.mubr.f32.vlgmr.msra.gmra.mrb[48].mxu0 %v24200_v60 }
0x2563   :  { %35946 = vmatpush3.bf16.msra.mxu0 %v40360_v54  ;;  %33872 = vmatprep.mubr.f32.mxu0 %v24191_v57 }
0x2564   :  { %35948 = vmatprep.subr.bf16.mxu0 %v40362_v10 }
0x2567   :  { %35950 = vmatpush3.bf16.msra.mxu0 %v40362_v10 }
0x2568   :  { %35952 = vmatprep.subr.bf16.mxu0 %v35951_v62 }
0x256a   :  { %33873 = vmatmul.mubr.f32.vlgmr.msra.gmra.mrb[48].mxu0 %v24201_v49  ;;  %v26480_v49 = vrot.slane %v40390_v20, 1 }
0x256b   :  { %35954 = vmatpush3.bf16.msra.mxu0 %v35951_v62  ;;  %33883 = vmatprep.mubr.f32.mxu0 %v24189_v21 }
0x256c   :  { %35956 = vmatprep.subr.bf16.mxu0 %v35955_v42  ;;  %v26483_v44 = vsel %vm162_vm0, %v26480_v49, 0 }
0x256f   :  { %35958 = vmatpush3.bf16.msra.mxu0 %v35955_v42 }
0x2570   :  { %35960 = vmatprep.subr.bf16.mxu0 %v40360_v54 }
0x2572   :  { %33884 = vmatmul.mubr.f32.vlgmr.msra.gmra.mrb[48].mxu0 %v24199_v17 }
0x2573   :  { %35962 = vmatpush3.bf16.msra.mxu0 %v40360_v54  ;;  %33894 = vmatprep.mubr.f32.mxu0 %v24189_v21  ;;  %v24724_v54 = vsub.f32 %v24722_v39, %v24723_v14 }
0x2574   :  { %35964 = vmatprep.subr.bf16.mxu0 %v40362_v10 }
0x2575   :  { %v24725_v37 = vand.u32 4294901760, %v24724_v54  ;;  %v40477_v54 = vand.u32 4294901760, %v26483_v44 }
0x2577   :  { %35966 = vmatpush3.bf16.msra.mxu0 %v40362_v10 }
0x2578   :  { %33897 = vmatprep.subr.mxu0 %v41039_v34 }
0x257a   :  { %33895 = vmatmul.mubr.f32.vlgmr.msra.gmra.mrb[48].mxu0 %v24199_v17 }
0x257b   :  { %33899 = vmatprep.mubr.msk.f32.mxu0 %vm37171_vm1, %v41039_v34 }
0x264d   :  { %v40397_v2 = vpop.f32.mrb[48].mxu0 }
0x264e   :  { %v40399_v10 = vpop.f32.mrb[49].mxu0  ;;  %v25102_v31 = vsel %vm162_vm0, %v40397_v2, 0 }
0x264f   :  { %v24653_v26 = vsel %vm162_vm0, %v40399_v10, 0  ;;  %v25105_v23 = vand.u32 4294901760, %v25102_v31 }
0x2650   :  { %v24656_v11 = vand.u32 4294901760, %v24653_v26 }
0x2651   :  { %v25182_v61 = vsub.f32 %v25102_v31, %v25105_v23 }
0x2652   :  { %v24733_v58 = vsub.f32 %v24653_v26, %v24656_v11  ;;  %33898 = vmatpush3.xpose.msra.mxu0 %v24656_v11  ;;  %v40487_v26 = vsub.f32 %v26483_v44, %v40477_v54 }
0x2653   :  { %33902 = vmatprep.subr.mxu0 %v41039_v34  ;;  %v25183_v28 = vand.u32 4294901760, %v25182_v61 }
0x2654   :  { %v24734_v30 = vand.u32 4294901760, %v24733_v58 }
0x2655   :  { %33900 = vmatmul.mubr.f32.vlgmr.msra.gmra.mrb[50].mxu0 %v24725_v37  ;;  %v25184_v63 = vsub.f32 %v25182_v61, %v25183_v28 }
0x2656   :  { %v24735_v46 = vsub.f32 %v24733_v58, %v24734_v30  ;;  %33904 = vmatprep.mubr.msk.f32.mxu0 %vm37171_vm1, %v41039_v34 }
0x2657   :  { %v25185_v6 = vand.u32 4294901760, %v25184_v63 }
0x2658   :  { %v24736_v8 = vand.u32 4294901760, %v24735_v46  ;;  %v40492_v46 = vand.u32 4294901760, %v40487_v26 }
0x265a   :  { %33903 = vmatpush3.xpose.msra.mxu0 %v24736_v8  ;;  %v26556_v63 = vsub.f32 %v40487_v26, %v40492_v46 }
0x265b   :  { %33907 = vmatprep.subr.mxu0 %v41039_v34 }
0x265d   :  { %33905 = vmatmul.mubr.f32.vlgmr.msra.gmra.mrb[50].mxu0 %v40394_v29 }
0x265e   :  { %33908 = vmatpush3.xpose.msra.mxu0 %v24733_v58  ;;  %33909 = vmatprep.mubr.msk.f32.mxu0 %vm37171_vm1, %v41039_v34 }
0x265f   :  { %33912 = vmatprep.subr.mxu0 %v41039_v34 }
0x2665   :  { %33910 = vmatmul.mubr.f32.vlgmr.msra.gmra.mrb[50].mxu0 %v24722_v39 }
0x2666   :  { %33913 = vmatpush3.xpose.msra.mxu0 %v24656_v11  ;;  %33914 = vmatprep.mubr.msk.f32.mxu0 %vm37171_vm1, %v41039_v34 }
0x2667   :  { %33917 = vmatprep.subr.mxu0 %v41039_v34 }
0x266d   :  { %33915 = vmatmul.mubr.f32.vlgmr.msra.gmra.mrb[50].mxu0 %v24723_v14 }
0x266e   :  { %33918 = vmatpush3.xpose.msra.mxu0 %v24734_v30  ;;  %33919 = vmatprep.mubr.msk.f32.mxu0 %vm37171_vm1, %v41039_v34 }
0x266f   :  { %33922 = vmatprep.subr.mxu0 %v41039_v34 }
0x2675   :  { %33920 = vmatmul.mubr.f32.vlgmr.msra.gmra.mrb[50].mxu0 %v40394_v29 }
0x2676   :  { %33923 = vmatpush3.xpose.msra.mxu0 %v24656_v11  ;;  %33924 = vmatprep.mubr.msk.f32.mxu0 %vm37171_vm1, %v41039_v34 }
0x2677   :  { %33927 = vmatprep.subr.mxu0 %v41039_v34 }
0x267d   :  { %33925 = vmatmul.mubr.f32.vlgmr.msra.gmra.mrb[50].mxu0 %v40394_v29 }
0x267e   :  { %33928 = vmatpush3.xpose.msra.mxu0 %v25105_v23  ;;  %33929 = vmatprep.mubr.msk.f32.mxu0 %vm37171_vm1, %v41039_v34 }
0x267f   :  { %33932 = vmatprep.subr.mxu0 %v41039_v34 }
0x2681   :  { %33930 = vmatmul.mubr.f32.vlgmr.msra.gmra.mrb[52].mxu0 %v24725_v37 }
0x2682   :  { %33933 = vmatpush3.xpose.msra.mxu0 %v25185_v6  ;;  %33934 = vmatprep.mubr.msk.f32.mxu0 %vm37171_vm1, %v41039_v34 }
0x2683   :  { %33937 = vmatprep.subr.mxu0 %v41039_v34 }
0x2689   :  { %33935 = vmatmul.mubr.f32.vlgmr.msra.gmra.mrb[52].mxu0 %v40394_v29 }
0x268a   :  { %33938 = vmatpush3.xpose.msra.mxu0 %v25182_v61  ;;  %33939 = vmatprep.mubr.msk.f32.mxu0 %vm37171_vm1, %v41039_v34 }
0x268b   :  { %33942 = vmatprep.subr.mxu0 %v41039_v34 }
0x2691   :  { %33940 = vmatmul.mubr.f32.vlgmr.msra.gmra.mrb[52].mxu0 %v24722_v39 }
0x2692   :  { %33943 = vmatpush3.xpose.msra.mxu0 %v25105_v23  ;;  %33944 = vmatprep.mubr.msk.f32.mxu0 %vm37171_vm1, %v41039_v34 }
0x2693   :  { %33947 = vmatprep.subr.mxu0 %v41039_v34 }
0x2699   :  { %33945 = vmatmul.mubr.f32.vlgmr.msra.gmra.mrb[52].mxu0 %v24723_v14 }
0x269a   :  { %33948 = vmatpush3.xpose.msra.mxu0 %v25183_v28  ;;  %33949 = vmatprep.mubr.msk.f32.mxu0 %vm37171_vm1, %v41039_v34 }
0x269b   :  { %33952 = vmatprep.subr.mxu0 %v41039_v34 }
0x26a1   :  { %33950 = vmatmul.mubr.f32.vlgmr.msra.gmra.mrb[52].mxu0 %v40394_v29 }
0x26a2   :  { %33953 = vmatpush3.xpose.msra.mxu0 %v25105_v23  ;;  %33954 = vmatprep.mubr.msk.f32.mxu0 %vm37171_vm1, %v41039_v34 }
0x26a3   :  { %33957 = vmatprep.subr.mxu0 %v41039_v34 }
0x26a9   :  { %33955 = vmatmul.mubr.f32.vlgmr.msra.gmra.mrb[52].mxu0 %v40394_v29 }
0x26aa   :  { %33959 = vmatprep.mubr.msk.f32.mxu0 %vm37171_vm1, %v41039_v34 }
0x2750   :  { %v25097_v9 = vpop.f32.mrb[50].mxu0 }
0x2751   :  { %v25550_v12 = vmul.f32 0.17677669, %v25097_v9  ;;  %v33926_v51 = vpop.f32.mrb[51].mxu0 }
0x2753   :  { %v25553_v16 = vsel %vm25552_vm3, %v25550_v12, -inf }
0x2754   :  { %25554 = vmax.xlane.f32.xlu1 %v25553_v16  ;;  %v26557_v16 = vand.u32 4294901760, %v26556_v63 }
0x277c   :  { %v25546_v18 = vpop.f32.mrb[52].mxu0 }
0x277d   :  { %v25551_v36 = vmul.f32 0.17677669, %v25546_v18  ;;  %v33956_v0 = vpop.f32.mrb[53].mxu0 }
0x277f   :  { %v25556_v62 = vsel %vm25552_vm3, %v25551_v36, -inf }
0x2780   :  { %25557 = vmax.xlane.f32.xlu0 %v25556_v62 }
0x27e1   :  { %v25555_v42 = vpop.xlane.xlu1 %25554 }
0x27e2   :  { %v25559_v52 = vsub.f32 %v25550_v12, %v25555_v42 }
0x27e4   :  { %v25561_v1 = vmul.f32 1.442695, %v25559_v52 }
0x27e6   :  { %36903 = vpow2.f32 %v25561_v1 }
0x27f0   :  { %v36904_v7 = vpop.eup %36903 }
0x27f1   :  { %v25565_v45 = vsel %vm25552_vm3, %v36904_v7, 0.0 }
0x27f2   :  { %25566 = vadd.xlane.f32.xlu1 %v25565_v45 }
0x2803   :  { %25575 = vrot.lane.b32.xlu1 %v40399_v10, %s37173_s22 }
0x2807   :  { %26933 = vrot.lane.b32.xlu1 %v40397_v2, %s37170_s4 }
0x280b   :  { %26481 = vrot.lane.b32.xlu1 %v40399_v10, %s37170_s4 }
0x280d   :  { %v25558_v53 = vpop.xlane.xlu0 %25557 }
0x280e   :  { %v25560_v50 = vsub.f32 %v25551_v36, %v25558_v53 }
0x2810   :  { %v25563_v59 = vmul.f32 1.442695, %v25560_v50 }
0x2812   :  { %36905 = vpow2.f32 %v25563_v59 }
0x281c   :  { %v36906_v56 = vpop.eup %36905 }
0x281d   :  { %v25568_v47 = vsel %vm25552_vm3, %v36906_v56, 0.0 }
0x281e   :  { %25569 = vadd.xlane.f32.xlu0 %v25568_v47 }
0x2834   :  { %26028 = vrot.lane.b32.xlu0 %v40397_v2, %s37173_s22  ;;  %s37177_s22 = smov [#allocation14]  }
0x2835   :  { %s29885_s30 = sshll.u32 %s37177_s22, 4  ;;  %s29886_s30 = int_to_ptr.vmem [resolvable:$true] %s29885_s30 }
0x287f   :  { %v25567_v40 = vpop.xlane.xlu1 %25566 }
0x2880   :  { %36907 = vrcp.f32 %v25567_v40 }
0x2883   :  { %v25576_v55 = vpop.permute.xlu1 %25575 }
0x2884   :  { %v25583_v22 = vand.u32 4294901760, %v25576_v55 }
0x2886   :  { %33958 = vmatpush3.msra.mxu0 %v25583_v22  ;;  %v25660_v24 = vsub.f32 %v25576_v55, %v25583_v22 }
0x2887   :  { %33962 = vmatprep.subr.mxu0 %v41039_v34  ;;  %v40467_v13 = vpop.permute.xlu1 %26933 }
0x2888   :  { %v25661_v35 = vand.u32 4294901760, %v25660_v24  ;;  %v26935_v62 = vsel %vm162_vm0, %v40467_v13, 0 }
0x2889   :  { %v26938_v42 = vand.u32 4294901760, %v26935_v62 }
0x288a   :  { %v36908_v43 = vpop.eup %36907  ;;  %v25662_v57 = vsub.f32 %v25660_v24, %v25661_v35 }
0x288b   :  { %v25572_v25 = vmul.f32 %v36908_v43, %v36904_v7  ;;  %v26482_v19 = vpop.permute.xlu1 %26481  ;;  %v27015_v52 = vsub.f32 %v26935_v62, %v26938_v42 }
0x288c   :  { %v25663_v60 = vand.u32 4294901760, %v25662_v57  ;;  %v26485_v39 = vsel %vm162_vm0, %v26482_v19, 0 }
0x288d   :  { %v25580_v3 = vsel %vm25578_vm4, %v25572_v25, 0  ;;  %v40483_v20 = vand.u32 4294901760, %v26485_v39  ;;  %v27016_v1 = vand.u32 4294901760, %v27015_v52 }
0x288e   :  { %v25648_v21 = vand.u32 4294901760, %v25580_v3 }
0x288f   :  { %v26565_v37 = vsub.f32 %v26485_v39, %v40483_v20  ;;  %v27017_v7 = vsub.f32 %v27015_v52, %v27016_v1 }
0x2890   :  { %v25649_v33 = vsub.f32 %v25580_v3, %v25648_v21 }
0x2891   :  { %v26566_v23 = vand.u32 4294901760, %v26565_v37  ;;  %v27018_v45 = vand.u32 4294901760, %v27017_v7 }
0x2892   :  { %v25650_v4 = vand.u32 4294901760, %v25649_v33 }
0x2893   :  { %v26567_v9 = vsub.f32 %v26565_v37, %v26566_v23 }
0x2894   :  { %v25651_v17 = vsub.f32 %v25649_v33, %v25650_v4 }
0x2895   :  { %v26568_v36 = vand.u32 4294901760, %v26567_v9 }
0x2896   :  { %v25652_v38 = vand.u32 4294901760, %v25651_v17 }
0x2898   :  { %33960 = vmatmul.mubr.f32.vlgmr.msra.gmra.mrb[54].mxu0 %v25652_v38 }
0x2899   :  { %33963 = vmatpush3.msra.mxu0 %v25663_v60  ;;  %33964 = vmatprep.mubr.msk.f32.mxu0 %vm37171_vm1, %v41039_v34 }
0x289a   :  { %33967 = vmatprep.subr.mxu0 %v41039_v34 }
0x28a0   :  { %33965 = vmatmul.mubr.f32.vlgmr.msra.gmra.mrb[54].mxu0 %v25648_v21 }
0x28a1   :  { %33968 = vmatpush3.msra.mxu0 %v25660_v24  ;;  %33969 = vmatprep.mubr.msk.f32.mxu0 %vm37171_vm1, %v41039_v34 }
0x28a2   :  { %33972 = vmatprep.subr.mxu0 %v41039_v34 }
0x28a8   :  { %33970 = vmatmul.mubr.f32.vlgmr.msra.gmra.mrb[54].mxu0 %v25649_v33 }
0x28a9   :  { %33973 = vmatpush3.msra.mxu0 %v25583_v22  ;;  %33974 = vmatprep.mubr.msk.f32.mxu0 %vm37171_vm1, %v41039_v34 }
0x28aa   :  { %33977 = vmatprep.subr.mxu0 %v41039_v34 }
0x28ab   :  { %v25570_v27 = vpop.xlane.xlu0 %25569 }
0x28ac   :  { %36909 = vrcp.f32 %v25570_v27 }
0x28af   :  { %v26029_v29 = vpop.permute.xlu0 %26028 }
0x28b0   :  { %v40475_v14 = vand.u32 4294901760, %v26029_v29  ;;  %33975 = vmatmul.mubr.f32.vlgmr.msra.gmra.mrb[54].mxu0 %v25650_v4 }
0x28b1   :  { %33978 = vmatpush3.msra.mxu0 %v25661_v35  ;;  %33979 = vmatprep.mubr.msk.f32.mxu0 %vm37171_vm1, %v41039_v34 }
0x28b2   :  { %33988 = vmatpush3.msra.mxu1 %v40475_v14  ;;  %33982 = vmatprep.subr.mxu0 %v41039_v34  ;;  %v26112_v30 = vsub.f32 %v26029_v29, %v40475_v14 }
0x28b3   :  { %33992 = vmatprep.subr.mxu1 %v41039_v34 }
0x28b4   :  { %v26113_v61 = vand.u32 4294901760, %v26112_v30 }
0x28b6   :  { %v36910_v11 = vpop.eup %36909  ;;  %v26114_v12 = vsub.f32 %v26112_v30, %v26113_v61 }
0x28b7   :  { %v25574_v58 = vmul.f32 %v36910_v11, %v36906_v56 }
0x28b8   :  { %33980 = vmatmul.mubr.f32.vlgmr.msra.gmra.mrb[54].mxu0 %v25648_v21  ;;  %v26115_v0 = vand.u32 4294901760, %v26114_v12 }
0x28b9   :  { %33983 = vmatpush3.msra.mxu0 %v25583_v22  ;;  %33984 = vmatprep.mubr.msk.f32.mxu0 %vm37171_vm1, %v41039_v34  ;;  %v26032_v8 = vsel %vm25578_vm4, %v25574_v58, 0 }
0x28ba   :  { %34017 = vmatprep.subr.mxu0 %v41039_v34  ;;  %v26100_v31 = vand.u32 4294901760, %v26032_v8 }
0x28bc   :  { %v26101_v28 = vsub.f32 %v26032_v8, %v26100_v31 }
0x28be   :  { %v26102_v6 = vand.u32 4294901760, %v26101_v28 }
0x28c0   :  { %33985 = vmatmul.mubr.f32.vlgmr.msra.gmra.mrb[54].mxu0 %v25648_v21  ;;  %v26103_v51 = vsub.f32 %v26101_v28, %v26102_v6 }
0x28c1   :  { %34018 = vmatpush3.xpose.msra.mxu0 %v40483_v20  ;;  %34019 = vmatprep.mubr.msk.f32.mxu0 %vm37171_vm1, %v41039_v34 }
0x28c2   :  { %34022 = vmatprep.subr.mxu0 %v41039_v34  ;;  %v26104_v18 = vand.u32 4294901760, %v26103_v51 }
0x28c4   :  { %33990 = vmatmul.mubr.f32.vlgmr.msra.gmra.mrb[56].mxu1 %v26104_v18  ;;  %34020 = vmatmul.mubr.f32.vlgmr.msra.gmra.mrb[56].mxu0 %v26557_v16 }
0x28c5   :  { %33993 = vmatpush3.msra.mxu1 %v26115_v0  ;;  %34023 = vmatpush3.xpose.msra.mxu0 %v26568_v36 }
0x28c6   :  { %33994 = vmatprep.mubr.msk.f32.mxu1 %vm37171_vm1, %v41039_v34  ;;  %33997 = vmatprep.subr.mxu1 %v41039_v34 }
0x28c7   :  { %34024 = vmatprep.mubr.msk.f32.mxu0 %vm37171_vm1, %v41039_v34  ;;  %34027 = vmatprep.subr.mxu0 %v41039_v34 }
0x28cc   :  { %33995 = vmatmul.mubr.f32.vlgmr.msra.gmra.mrb[56].mxu1 %v26100_v31  ;;  %34025 = vmatmul.mubr.f32.vlgmr.msra.gmra.mrb[56].mxu0 %v40477_v54 }
0x28cd   :  { %33998 = vmatpush3.msra.mxu1 %v26112_v30  ;;  %34028 = vmatpush3.xpose.msra.mxu0 %v26565_v37 }
0x28ce   :  { %33999 = vmatprep.mubr.msk.f32.mxu1 %vm37171_vm1, %v41039_v34  ;;  %34002 = vmatprep.subr.mxu1 %v41039_v34 }
0x28cf   :  { %34029 = vmatprep.mubr.msk.f32.mxu0 %vm37171_vm1, %v41039_v34  ;;  %34032 = vmatprep.subr.mxu0 %v41039_v34 }
0x28d4   :  { %34000 = vmatmul.mubr.f32.vlgmr.msra.gmra.mrb[56].mxu1 %v26101_v28  ;;  %34030 = vmatmul.mubr.f32.vlgmr.msra.gmra.mrb[56].mxu0 %v40487_v26 }
0x28d5   :  { %34003 = vmatpush3.msra.mxu1 %v40475_v14  ;;  %34033 = vmatpush3.xpose.msra.mxu0 %v40483_v20 }
0x28d6   :  { %34004 = vmatprep.mubr.msk.f32.mxu1 %vm37171_vm1, %v41039_v34  ;;  %34007 = vmatprep.subr.mxu1 %v41039_v34 }
0x28d7   :  { %34034 = vmatprep.mubr.msk.f32.mxu0 %vm37171_vm1, %v41039_v34  ;;  %34037 = vmatprep.subr.mxu0 %v41039_v34 }
0x28dc   :  { %34005 = vmatmul.mubr.f32.vlgmr.msra.gmra.mrb[56].mxu1 %v26102_v6  ;;  %34035 = vmatmul.mubr.f32.vlgmr.msra.gmra.mrb[56].mxu0 %v40492_v46 }
0x28dd   :  { %34008 = vmatpush3.msra.mxu1 %v26113_v61  ;;  %34038 = vmatpush3.xpose.msra.mxu0 %v26566_v23 }
0x28de   :  { %34009 = vmatprep.mubr.msk.f32.mxu1 %vm37171_vm1, %v41039_v34  ;;  %34012 = vmatprep.subr.mxu1 %v41039_v34 }
0x28df   :  { %34039 = vmatprep.mubr.msk.f32.mxu0 %vm37171_vm1, %v41039_v34  ;;  %34042 = vmatprep.subr.mxu0 %v41039_v34 }
0x28e4   :  { %34010 = vmatmul.mubr.f32.vlgmr.msra.gmra.mrb[56].mxu1 %v26100_v31  ;;  %34040 = vmatmul.mubr.f32.vlgmr.msra.gmra.mrb[56].mxu0 %v40477_v54 }
0x28e5   :  { %34013 = vmatpush3.msra.mxu1 %v40475_v14  ;;  %34043 = vmatpush3.xpose.msra.mxu0 %v40483_v20 }
0x28e6   :  { %34014 = vmatprep.mubr.msk.f32.mxu1 %vm37171_vm1, %v41039_v34  ;;  %34044 = vmatprep.mubr.msk.f32.mxu0 %vm37171_vm1, %v41039_v34 }
0x28e7   :  { %34047 = vmatprep.subr.mxu1 %v41039_v34  ;;  %34077 = vmatprep.subr.mxu0 %v41039_v34 }
0x28ec   :  { %34015 = vmatmul.mubr.f32.vlgmr.msra.gmra.mrb[56].mxu1 %v26100_v31  ;;  %34045 = vmatmul.mubr.f32.vlgmr.msra.gmra.mrb[56].mxu0 %v40477_v54 }
0x28ed   :  { %34048 = vmatpush3.xpose.msra.mxu1 %v26938_v42  ;;  %34049 = vmatprep.mubr.msk.f32.mxu1 %vm37171_vm1, %v41039_v34 }
0x28ee   :  { %34052 = vmatprep.subr.mxu1 %v41039_v34  ;;  %34079 = vmatprep.mubr.msk.f32.mxu0 %vm37171_vm1, %v41039_v34 }
0x28f0   :  { %34050 = vmatmul.mubr.f32.vlgmr.msra.gmra.mrb[58].mxu1 %v26557_v16 }
0x28f1   :  { %34053 = vmatpush3.xpose.msra.mxu1 %v27018_v45  ;;  %34054 = vmatprep.mubr.msk.f32.mxu1 %vm37171_vm1, %v41039_v34  ;;  %v41066_v45 = vld [vmem:[#allocation27_spill] sm:$0xff] }
0x28f2   :  { %34057 = vmatprep.subr.mxu1 %v41039_v34 }
0x28f8   :  { %34055 = vmatmul.mubr.f32.vlgmr.msra.gmra.mrb[58].mxu1 %v40477_v54 }
0x28f9   :  { %34058 = vmatpush3.xpose.msra.mxu1 %v27015_v52  ;;  %34059 = vmatprep.mubr.msk.f32.mxu1 %vm37171_vm1, %v41039_v34 }
0x28fa   :  { %34062 = vmatprep.subr.mxu1 %v41039_v34 }
0x2900   :  { %34060 = vmatmul.mubr.f32.vlgmr.msra.gmra.mrb[58].mxu1 %v40487_v26 }
0x2901   :  { %34063 = vmatpush3.xpose.msra.mxu1 %v26938_v42  ;;  %34064 = vmatprep.mubr.msk.f32.mxu1 %vm37171_vm1, %v41039_v34 }
0x2902   :  { %34067 = vmatprep.subr.mxu1 %v41039_v34 }
0x2908   :  { %34065 = vmatmul.mubr.f32.vlgmr.msra.gmra.mrb[58].mxu1 %v40492_v46 }
0x2909   :  { %34068 = vmatpush3.xpose.msra.mxu1 %v27016_v1  ;;  %34069 = vmatprep.mubr.msk.f32.mxu1 %vm37171_vm1, %v41039_v34 }
0x290a   :  { %34072 = vmatprep.subr.mxu1 %v41039_v34 }
0x2910   :  { %34070 = vmatmul.mubr.f32.vlgmr.msra.gmra.mrb[58].mxu1 %v40477_v54 }
0x2911   :  { %34073 = vmatpush3.xpose.msra.mxu1 %v26938_v42  ;;  %34074 = vmatprep.mubr.msk.f32.mxu1 %vm37171_vm1, %v41039_v34 }
0x2912   :  { %34107 = vmatprep.subr.mxu1 %v41039_v34 }
0x2918   :  { %34075 = vmatmul.mubr.f32.vlgmr.msra.gmra.mrb[58].mxu1 %v40477_v54 }
0x2919   :  { %34109 = vmatprep.mubr.msk.f32.mxu1 %vm37171_vm1, %v41039_v34 }
0x2993   :  { %v26024_v53 = vpop.f32.mrb[54].mxu0 }
0x2994   :  { %v33986_v50 = vpop.f32.mrb[55].mxu0 }
0x29bf   :  { %v26476_v59 = vpop.f32.mrb[56].mxu1  ;;  %v26929_v56 = vpop.f32.mrb[56].mxu0 }
0x29c0   :  { %v28813_v47 = vrot.slane %v26476_v59, 7  ;;  %v27383_v40 = vmul.f32 0.17677669, %v26929_v56  ;;  %v34016_v55 = vpop.f32.mrb[57].mxu1  ;;  %v34046_v22 = vpop.f32.mrb[57].mxu0  ;;  %v41067_v59 = vld [vmem:[#allocation26_spill] sm:$0xff] }
0x29c2   :  { %v27385_v43 = vsel %vm25552_vm3, %v27383_v40, -inf  ;;  %v40574_v25 = vsel %vm28322_vm5, %v28813_v47, %v26024_v53  ;;  %v28315_v47 = vld [vmem:[#allocation11 + $0x20] sm:$0xff] }
0x29c3   :  { %27386 = vmax.xlane.f32.xlu1 %v27385_v43  ;;  %v28327_v55 = vand.u32 4294901760, %v28315_v47 }
0x29c5   :  { %v40645_v43 = vsub.f32 %v28315_v47, %v28327_v55 }
0x29d4   :  { %27407 = vrot.lane.b32.xlu1 %v40399_v10, %s37172_s5 }
0x29d8   :  { %24022 = vperm.xlu1 %36794, %v40331_v32  }
0x29dc   :  { %24027 = vperm.xlu1 %36794, %v40329_v41  }
0x29eb   :  { %v27379_v24 = vpop.f32.mrb[58].mxu1 }
0x29ec   :  { %v27384_v3 = vmul.f32 0.17677669, %v27379_v24  ;;  %v34076_v21 = vpop.f32.mrb[59].mxu1 }
0x29ed   :  { %v28318_v21 = vld [vmem:[#allocation11 + $0x38] sm:$0xff] }
0x29ee   :  { %v27388_v35 = vsel %vm25552_vm3, %v27384_v3, -inf }
0x29ef   :  { %27389 = vmax.xlane.f32.xlu0 %v27388_v35  ;;  %v28408_v35 = vand.u32 4294901760, %v40645_v43 }
0x2a50   :  { %v27387_v33 = vpop.xlane.xlu1 %27386 }
0x2a51   :  { %v27391_v41 = vsub.f32 %v27383_v40, %v27387_v33  ;;  %v28316_v40 = vld [vmem:[#allocation11 + $0x28] sm:$0xff] }
0x2a52   :  { %v28330_v22 = vand.u32 4294901760, %v28316_v40 }
0x2a53   :  { %v27393_v13 = vmul.f32 1.442695, %v27391_v41 }
0x2a54   :  { %v27408_v4 = vpop.permute.xlu1 %27407  ;;  %v40647_v24 = vsub.f32 %v28316_v40, %v28330_v22 }
0x2a55   :  { %v40581_v57 = vand.u32 4294901760, %v27408_v4 }
0x2a56   :  { %v28415_v33 = vand.u32 4294901760, %v40647_v24 }
0x2a57   :  { %34078 = vmatpush3.msra.mxu0 %v40581_v57  ;;  %v27491_v8 = vsub.f32 %v27408_v4, %v40581_v57 }
0x2a58   :  { %v24023_v17 = vpop.permute.xlu1 %24022  ;;  %34082 = vmatprep.subr.mxu0 %v41039_v34 }
0x2a59   :  { %v27492_v9 = vand.u32 4294901760, %v27491_v8 }
0x2a5b   :  { %v27493_v0 = vsub.f32 %v27491_v8, %v27492_v9 }
0x2a5c   :  { %v24028_v10 = vpop.permute.xlu1 %24027 }
0x2a5d   :  { %v24031_v32 = vmul.f32 %v40323_v48, %v24028_v10  ;;  %v24030_v48 = vmul.f32 %v40325_v5, %v24023_v17  ;;  %v27494_v1 = vand.u32 4294901760, %v27493_v0  ;;  %v28409_v17 = vsub.f32 %v40645_v43, %v28408_v35 }
0x2a5e   :  { %v28416_v10 = vsub.f32 %v40647_v24, %v28415_v33 }
0x2a5f   :  { %24046 = vrot.lane.b32.xlu1 %v24031_v32, %s37170_s4 }
0x2a7c   :  { %v27390_v38 = vpop.xlane.xlu0 %27389 }
0x2a7d   :  { %v27392_v60 = vsub.f32 %v27384_v3, %v27390_v38  ;;  %v28317_v3 = vld [vmem:[#allocation11 + $0x30] sm:$0xff]  ;;  %v28410_v38 = vand.u32 4294901760, %v28409_v17 }
0x2a7e   :  { %v28333_v4 = vand.u32 4294901760, %v28317_v3 }
0x2a7f   :  { %v27395_v49 = vmul.f32 1.442695, %v27392_v60  ;;  %v28417_v60 = vand.u32 4294901760, %v28416_v10 }
0x2a80   :  { %v40653_v32 = vsub.f32 %v28317_v3, %v28333_v4 }
0x2a81   :  { %36911 = vpow2.f32 %v27395_v49 }
0x2a82   :  { %36913 = vpow2.f32 %v27393_v13  ;;  %v28422_v13 = vand.u32 4294901760, %v40653_v32 }
0x2a8b   :  { %v36912_v27 = vpop.eup %36911 }
0x2a8c   :  { %v27400_v19 = vsel %vm25552_vm3, %v36912_v27, 0.0  ;;  %v36914_v44 = vpop.eup %36913 }
0x2a8d   :  { %27401 = vadd.xlane.f32.xlu0 %v27400_v19  ;;  %v27397_v29 = vsel %vm25552_vm3, %v36914_v44, 0.0  ;;  %v28423_v19 = vsub.f32 %v40653_v32, %v28422_v13 }
0x2a91   :  { %27398 = vadd.xlane.f32.xlu0 %v27397_v29  ;;  %v28424_v29 = vand.u32 4294901760, %v28423_v19  ;;  %v29320_v19 = vld [vmem:[#allocation13 + $0x8] sm:$0xff] }
0x2aa7   :  { %27859 = vrot.lane.b32.xlu0 %v40397_v2, %s37172_s5 }
0x2aab   :  { %24044 = vrot.lane.b32.xlu0 %v24030_v48, %s37170_s4 }
0x2ad1   :  { %v24047_v39 = vpop.permute.xlu1 %24046 }
0x2ad2   :  { %24056 = vrot.lane.b32.xlu1 %v24047_v39, %s37170_s4 }
0x2b1a   :  { %v27402_v14 = vpop.xlane.xlu0 %27401 }
0x2b1b   :  { %36915 = vrcp.f32 %v27402_v14  ;;  %v35968_v14 = vpack.c.bf16 %v28330_v22, %v28327_v55 }
0x2b1e   :  { %v27399_v54 = vpop.xlane.xlu0 %27398 }
0x2b1f   :  { %36917 = vrcp.f32 %v27399_v54 }
0x2b22   :  { %v27860_v20 = vpop.permute.xlu0 %27859 }
0x2b23   :  { %v40594_v26 = vand.u32 4294901760, %v27860_v20 }
0x2b25   :  { %v36916_v11 = vpop.eup %36915  ;;  %34108 = vmatpush3.msra.mxu1 %v40594_v26  ;;  %v27943_v2 = vsub.f32 %v27860_v20, %v40594_v26  ;;  %v35980_v20 = vpack.c.bf16 %v40647_v24, %v40645_v43  ;;  %v28815_v24 = vsel %vm162_vm0, %v40574_v25, 0 }
0x2b26   :  { %v27406_v37 = vmul.f32 %v36916_v11, %v36912_v27  ;;  %v24045_v58 = vpop.permute.xlu0 %24044  ;;  %34112 = vmatprep.subr.mxu1 %v41039_v34  ;;  %v35974_v27 = vpack.c.bf16 %v28417_v60, %v28410_v38  ;;  %v35992_v11 = vpack.c.bf16 %v28415_v33, %v28408_v35  ;;  %v28886_v33 = vand.u32 4294901760, %v28815_v24 }
0x2b27   :  { %24052 = vrot.lane.b32.xlu0 %v24045_v58, %s37170_s4  ;;  %v27944_v23 = vand.u32 4294901760, %v27943_v2  ;;  %v40673_v58 = vld [vmem:[#allocation11 + $0x8] sm:$0xff] }
0x2b28   :  { %v27863_v5 = vsel %vm25578_vm4, %v27406_v37, 0 }
0x2b29   :  { %v36918_v30 = vpop.eup %36917  ;;  %v27931_v46 = vand.u32 4294901760, %v27863_v5  ;;  %v27945_v12 = vsub.f32 %v27943_v2, %v27944_v23 }
0x2b2a   :  { %v27404_v31 = vmul.f32 %v36918_v30, %v36914_v44 }
0x2b2b   :  { %v27932_v61 = vsub.f32 %v27863_v5, %v27931_v46  ;;  %v27946_v62 = vand.u32 4294901760, %v27945_v12 }
0x2b2c   :  { %v27411_v28 = vsel %vm25578_vm4, %v27404_v31, 0 }
0x2b2d   :  { %v27933_v63 = vand.u32 4294901760, %v27932_v61  ;;  %v27479_v6 = vand.u32 4294901760, %v27411_v28 }
0x2b2f   :  { %v27934_v51 = vsub.f32 %v27932_v61, %v27933_v63  ;;  %v27480_v16 = vsub.f32 %v27411_v28, %v27479_v6 }
0x2b31   :  { %v27935_v18 = vand.u32 4294901760, %v27934_v51  ;;  %v27481_v36 = vand.u32 4294901760, %v27480_v16 }
0x2b33   :  { %34110 = vmatmul.mubr.f32.vlgmr.msra.gmra.mrb[60].mxu1 %v27935_v18  ;;  %v27482_v42 = vsub.f32 %v27480_v16, %v27481_v36 }
0x2b34   :  { %34113 = vmatpush3.msra.mxu1 %v27946_v62  ;;  %34114 = vmatprep.mubr.msk.f32.mxu1 %vm37171_vm1, %v41039_v34 }
0x2b35   :  { %v27483_v52 = vand.u32 4294901760, %v27482_v42  ;;  %34117 = vmatprep.subr.mxu1 %v41039_v34 }
0x2b37   :  { %34080 = vmatmul.mubr.f32.vlgmr.msra.gmra.mrb[58].mxu0 %v27483_v52 }
0x2b38   :  { %34083 = vmatpush3.msra.mxu0 %v27494_v1  ;;  %34084 = vmatprep.mubr.msk.f32.mxu0 %vm37171_vm1, %v41039_v34 }
0x2b39   :  { %34087 = vmatprep.subr.mxu0 %v41039_v34 }
0x2b3b   :  { %34115 = vmatmul.mubr.f32.vlgmr.msra.gmra.mrb[60].mxu1 %v27931_v46 }
0x2b3c   :  { %34118 = vmatpush3.msra.mxu1 %v27943_v2  ;;  %34119 = vmatprep.mubr.msk.f32.mxu1 %vm37171_vm1, %v41039_v34  ;;  %v40671_v2 = vld [vmem:[#allocation11] sm:$0xff] }
0x2b3d   :  { %34122 = vmatprep.subr.mxu1 %v41039_v34 }
0x2b3f   :  { %34085 = vmatmul.mubr.f32.vlgmr.msra.gmra.mrb[58].mxu0 %v27479_v6 }
0x2b40   :  { %34088 = vmatpush3.msra.mxu0 %v27491_v8  ;;  %34089 = vmatprep.mubr.msk.f32.mxu0 %vm37171_vm1, %v41039_v34  ;;  %v28821_v8 = vand.u32 4294901760, %v40673_v58 }
0x2b41   :  { %34092 = vmatprep.subr.mxu0 %v41039_v34 }
0x2b42   :  { %v40691_v51 = vsub.f32 %v40673_v58, %v28821_v8 }
0x2b43   :  { %34120 = vmatmul.mubr.f32.vlgmr.msra.gmra.mrb[60].mxu1 %v27932_v61  ;;  %v40679_v61 = vld [vmem:[#allocation11 + $0x18] sm:$0xff] }
0x2b44   :  { %34123 = vmatpush3.msra.mxu1 %v40594_v26  ;;  %v24057_v7 = vpop.permute.xlu1 %24056  ;;  %34124 = vmatprep.mubr.msk.f32.mxu1 %vm37171_vm1, %v41039_v34  ;;  %v28827_v18 = vand.u32 4294901760, %v40679_v61  ;;  %v28906_v42 = vand.u32 4294901760, %v40691_v51 }
0x2b45   :  { %v24065_v53 = vadd.f32 %v24057_v7, %v41066_v45  ;;  %34127 = vmatprep.subr.mxu1 %v41039_v34 }
0x2b46   :  { %v40703_v1 = vsub.f32 %v40679_v61, %v28827_v18 }
0x2b47   :  { %29879 = vst.msk [vmem:[#allocation14 + $0x8] sm:$0xff] %vm162_vm0, %v24065_v53  ;;  %34090 = vmatmul.mubr.f32.vlgmr.msra.gmra.mrb[58].mxu0 %v27480_v16 }
0x2b48   :  { %34093 = vmatpush3.msra.mxu0 %v40581_v57  ;;  %34094 = vmatprep.mubr.msk.f32.mxu0 %vm37171_vm1, %v41039_v34 }
0x2b49   :  { %34097 = vmatprep.subr.mxu0 %v41039_v34 }
0x2b4b   :  { %34125 = vmatmul.mubr.f32.vlgmr.msra.gmra.mrb[60].mxu1 %v27933_v63 }
0x2b4c   :  { %34128 = vmatpush3.msra.mxu1 %v27944_v23  ;;  %34129 = vmatprep.mubr.msk.f32.mxu1 %vm37171_vm1, %v41039_v34  ;;  %v40677_v23 = vld [vmem:[#allocation11 + $0x10] sm:$0xff] }
0x2b4d   :  { %34132 = vmatprep.subr.mxu1 %v41039_v34  ;;  %v28824_v16 = vand.u32 4294901760, %v40677_v23 }
0x2b4f   :  { %34095 = vmatmul.mubr.f32.vlgmr.msra.gmra.mrb[58].mxu0 %v27481_v36  ;;  %v40700_v52 = vsub.f32 %v40677_v23, %v28824_v16  ;;  %v36007_v10 = vpack.c.bf16 %v28827_v18, %v28824_v16  ;;  %v29326_v23 = vld [vmem:[#allocation13 + $0x38] sm:$0xff] }
0x2b50   :  { %34098 = vmatpush3.msra.mxu0 %v27492_v9  ;;  %34099 = vmatprep.mubr.msk.f32.mxu0 %vm37171_vm1, %v41039_v34 }
0x2b51   :  { %34102 = vmatprep.subr.mxu0 %v41039_v34  ;;  %v36019_v60 = vpack.c.bf16 %v40703_v1, %v40700_v52 }
0x2b53   :  { %34130 = vmatmul.mubr.f32.vlgmr.msra.gmra.mrb[60].mxu1 %v27931_v46 }
0x2b54   :  { %34133 = vmatpush3.msra.mxu1 %v40594_v26  ;;  %34134 = vmatprep.mubr.msk.f32.mxu1 %vm37171_vm1, %v41039_v34 }
0x2b55   :  { %35973 = vmatprep.subr.bf16.mxu1 %v41038_v15 }
0x2b57   :  { %34100 = vmatmul.mubr.f32.vlgmr.msra.gmra.mrb[58].mxu0 %v27479_v6 }
0x2b58   :  { %34103 = vmatpush3.msra.mxu0 %v40581_v57  ;;  %34104 = vmatprep.mubr.msk.f32.mxu0 %vm37171_vm1, %v41039_v34  ;;  %v28336_v57 = vand.u32 4294901760, %v28318_v21 }
0x2b59   :  { %35967 = vmatprep.subr.bf16.mxu0 %v41038_v15 }
0x2b5a   :  { %v40655_v41 = vsub.f32 %v28318_v21, %v28336_v57  ;;  %v35971_v54 = vpack.c.bf16 %v28336_v57, %v28333_v4  ;;  %v28887_v4 = vsub.f32 %v28815_v24, %v28886_v33 }
0x2b5b   :  { %34135 = vmatmul.mubr.f32.vlgmr.msra.gmra.mrb[60].mxu1 %v27931_v46  ;;  %v28818_v46 = vand.u32 4294901760, %v40671_v2 }
0x2b5c   :  { %34156 = vmatprep.mubr.msk.f32.mxu1 %vm37171_vm1, %v41039_v34  ;;  %v28429_v49 = vand.u32 4294901760, %v40655_v41  ;;  %35975 = vmatpush3.bf16.msra.mxu1 %v35974_v27  ;;  %v35983_v26 = vpack.c.bf16 %v40655_v41, %v40653_v32  ;;  %v28888_v17 = vand.u32 4294901760, %v28887_v4  ;;  %v29319_v27 = vld [vmem:[#allocation13] sm:$0xff] }
0x2b5d   :  { %35976 = vmatprep.subr.bf16.mxu1 %v41038_v15  ;;  %v40685_v9 = vsub.f32 %v40671_v2, %v28818_v46  ;;  %v36004_v57 = vpack.c.bf16 %v28821_v8, %v28818_v46  ;;  %v29325_v46 = vld [vmem:[#allocation13 + $0x30] sm:$0xff] }
0x2b5e   :  { %v28430_v44 = vsub.f32 %v40655_v41, %v28429_v49  ;;  %v40669_v37 = vpack.c.bf16 %v28429_v49, %v28422_v13  ;;  %v28889_v32 = vsub.f32 %v28887_v4, %v28888_v17  ;;  %v29357_v61 = vand.u32 4294901760, %v29325_v46 }
0x2b5f   :  { %34105 = vmatmul.mubr.f32.vlgmr.msra.gmra.mrb[58].mxu0 %v27479_v6  ;;  %v28899_v62 = vand.u32 4294901760, %v40685_v9  ;;  %v36016_v41 = vpack.c.bf16 %v40691_v51, %v40685_v9 }
0x2b60   :  { %34145 = vmatprep.mubr.msk.f32.mxu0 %vm37171_vm1, %v41039_v34  ;;  %v28431_v48 = vand.u32 4294901760, %v28430_v44  ;;  %35969 = vmatpush3.bf16.msra.mxu0 %v35968_v14  ;;  %v28890_v38 = vand.u32 4294901760, %v28889_v32  ;;  %v29339_v44 = vand.u32 4294901760, %v29319_v27 }
0x2b61   :  { %35970 = vmatprep.subr.bf16.mxu0 %v41038_v15  ;;  %v28900_v53 = vsub.f32 %v40685_v9, %v28899_v62  ;;  %v36028_v13 = vpack.c.bf16 %v28906_v42, %v28899_v62 }
0x2b62   :  { %v35977_v39 = vpack.c.bf16 %v28431_v48, %v28424_v29  ;;  %v29342_v29 = vand.u32 4294901760, %v29320_v19 }
0x2b63   :  { %v28901_v40 = vand.u32 4294901760, %v28900_v53 }
0x2b64   :  { %35978 = vmatpush3.bf16.msra.mxu1 %v35977_v39  ;;  %35972 = vmatpush3.bf16.msra.mxu0 %v35971_v54  ;;  %v40777_v48 = vpack.c.bf16 %v29342_v29, %v29339_v44  ;;  %v29321_v39 = vld [vmem:[#allocation13 + $0x10] sm:$0xff] }
0x2b65   :  { %35985 = vmatprep.subr.bf16.mxu1 %v41038_v15  ;;  %35979 = vmatprep.subr.bf16.mxu0 %v41038_v15 }
0x2b99   :  { %v24053_v50 = vpop.permute.xlu0 %24052 }
0x2b9a   :  { %v24063_v56 = vadd.f32 %v24053_v50, %v41067_v59  ;;  %v28907_v50 = vsub.f32 %v40691_v51, %v28906_v42  ;;  %v28913_v59 = vand.u32 4294901760, %v40700_v52 }
0x2b9c   :  { %29878 = vst.msk [vmem:[#allocation14] sm:$0xff] %vm162_vm0, %v24063_v56  ;;  %v28920_v56 = vand.u32 4294901760, %v40703_v1  ;;  %v28908_v55 = vand.u32 4294901760, %v28907_v50  ;;  %v28914_v22 = vsub.f32 %v40700_v52, %v28913_v59 }
0x2b9e   :  { %v28921_v43 = vsub.f32 %v40703_v1, %v28920_v56  ;;  %v36010_v3 = vpack.c.bf16 %v28908_v55, %v28901_v40  ;;  %v28915_v21 = vand.u32 4294901760, %v28914_v22  ;;  %v36031_v49 = vpack.c.bf16 %v28920_v56, %v28913_v59 }
0x2ba0   :  { %v28922_v35 = vand.u32 4294901760, %v28921_v43 }
0x2ba2   :  { %v36013_v25 = vpack.c.bf16 %v28922_v35, %v28915_v21 }
0x2c2e   :  { %v28307_v5 = vpop.f32.mrb[60].mxu1 }
0x2c2f   :  { %v34136_v30 = vpop.f32.mrb[61].mxu1  ;;  %v28321_v31 = vrot.slane %v28307_v5, 7  ;;  %v29323_v5 = vld [vmem:[#allocation13 + $0x20] sm:$0xff] }
0x2c30   :  { %v29324_v30 = vld [vmem:[#allocation13 + $0x28] sm:$0xff]  ;;  %v29351_v8 = vand.u32 4294901760, %v29323_v5 }
0x2c32   :  { %v27855_v28 = vpop.f32.mrb[58].mxu0 }
0x2c33   :  { %v28323_v63 = vsel %vm28322_vm5, %v28321_v31, %v27855_v28  ;;  %v34106_v6 = vpop.f32.mrb[59].mxu0  ;;  %v29354_v31 = vand.u32 4294901760, %v29324_v30  ;;  %v29360_v28 = vand.u32 4294901760, %v29326_v23 }
0x2c34   :  { %v28324_v12 = vsel %vm162_vm0, %v28323_v63, 0  ;;  %v40795_v6 = vsub.f32 %v29323_v5, %v29351_v8 }
0x2c35   :  { %v28395_v36 = vand.u32 4294901760, %v28324_v12  ;;  %v40793_v63 = vpack.c.bf16 %v29354_v31, %v29351_v8  ;;  %v40797_v9 = vsub.f32 %v29324_v30, %v29354_v31  ;;  %v40801_v51 = vsub.f32 %v29326_v23, %v29360_v28 }
0x2c36   :  { %v40804_v16 = vpack.c.bf16 %v29360_v28, %v29357_v61 }
0x2c37   :  { %v28396_v0 = vsub.f32 %v28324_v12, %v28395_v36  ;;  %34157 = vmatmul.mubr.f32.vlgmr.msra.gmra.mrb[62].mxu1 %v28395_v36  ;;  %v40799_v12 = vsub.f32 %v29325_v46, %v29357_v61  ;;  %v29459_v40 = vand.u32 4294901760, %v40797_v9  ;;  %v29473_v35 = vand.u32 4294901760, %v40801_v51 }
0x2c38   :  { %35987 = vmatpush3.bf16.msra.mxu1 %v35968_v14  ;;  %34178 = vmatprep.mubr.msk.f32.mxu1 %vm37171_vm1, %v41039_v34 }
0x2c39   :  { %35988 = vmatprep.subr.bf16.mxu1 %v41038_v15  ;;  %v28397_v7 = vand.u32 4294901760, %v28396_v0  ;;  %v29460_v43 = vsub.f32 %v40797_v9, %v29459_v40  ;;  %v29466_v21 = vand.u32 4294901760, %v40799_v12 }
0x2c3b   :  { %v28398_v45 = vsub.f32 %v28396_v0, %v28397_v7  ;;  %v40847_v61 = vpack.c.bf16 %v29473_v35, %v29466_v21 }
0x2c3c   :  { %35990 = vmatpush3.bf16.msra.mxu1 %v35971_v54 }
0x2c3d   :  { %35997 = vmatprep.subr.bf16.mxu1 %v41038_v15  ;;  %v28399_v47 = vand.u32 4294901760, %v28398_v45 }
0x2c3f   :  { %34179 = vmatmul.mubr.f32.vlgmr.msra.gmra.mrb[64].mxu1 %v28397_v7  ;;  %34146 = vmatmul.mubr.f32.vlgmr.msra.gmra.mrb[60].mxu0 %v28399_v47  ;;  %v29452_v47 = vand.u32 4294901760, %v40795_v6 }
0x2c40   :  { %35981 = vmatpush3.bf16.msra.mxu0 %v35980_v20  ;;  %35999 = vmatpush3.bf16.msra.mxu1 %v35968_v14  ;;  %v29322_v14 = vld [vmem:[#allocation13 + $0x18] sm:$0xff] }
0x2c41   :  { %35982 = vmatprep.subr.bf16.mxu0 %v41038_v15  ;;  %36000 = vmatprep.subr.bf16.mxu1 %v41038_v15  ;;  %v29348_v20 = vand.u32 4294901760, %v29322_v14  ;;  %v29453_v22 = vsub.f32 %v40795_v6, %v29452_v47  ;;  %v40845_v23 = vpack.c.bf16 %v29459_v40, %v29452_v47 }
0x2c42   :  { %34167 = vmatprep.mubr.msk.f32.mxu0 %vm37171_vm1, %v41039_v34  ;;  %34200 = vmatprep.mubr.msk.f32.mxu1 %vm37171_vm1, %v41039_v34 }
0x2c43   :  { %v40789_v58 = vsub.f32 %v29322_v14, %v29348_v20  ;;  %v29454_v24 = vand.u32 4294901760, %v29453_v22 }
0x2c44   :  { %35984 = vmatpush3.bf16.msra.mxu0 %v35983_v26  ;;  %36002 = vmatpush3.bf16.msra.mxu1 %v35971_v54  ;;  %v29345_v54 = vand.u32 4294901760, %v29321_v39 }
0x2c45   :  { %35991 = vmatprep.subr.bf16.mxu0 %v41038_v15  ;;  %36009 = vmatprep.subr.bf16.mxu1 %v41038_v15  ;;  %v29445_v7 = vand.u32 4294901760, %v40789_v58 }
0x2c46   :  { %v40781_v26 = vpack.c.bf16 %v29348_v20, %v29345_v54  ;;  %v40787_v2 = vsub.f32 %v29321_v39, %v29345_v54 }
0x2c47   :  { %34168 = vmatmul.mubr.f32.vlgmr.msra.gmra.mrb[62].mxu0 %v28396_v0  ;;  %34201 = vmatmul.mubr.f32.vlgmr.msra.gmra.mrb[66].mxu1 %v28395_v36  ;;  %v29446_v50 = vsub.f32 %v40789_v58, %v29445_v7 }
0x2c48   :  { %35993 = vmatpush3.bf16.msra.mxu0 %v35992_v11  ;;  %36011 = vmatpush3.bf16.msra.mxu1 %v36010_v3  ;;  %v40783_v11 = vsub.f32 %v29319_v27, %v29339_v44  ;;  %v29438_v1 = vand.u32 4294901760, %v40787_v2  ;;  %v29461_v3 = vand.u32 4294901760, %v29460_v43 }
0x2c49   :  { %35994 = vmatprep.subr.bf16.mxu0 %v41038_v15  ;;  %36012 = vmatprep.subr.bf16.mxu1 %v41038_v15  ;;  %v29447_v56 = vand.u32 4294901760, %v29446_v50 }
0x2c4a   :  { %34189 = vmatprep.mubr.msk.f32.mxu0 %vm37171_vm1, %v41039_v34  ;;  %34222 = vmatprep.mubr.msk.f32.mxu1 %vm37171_vm1, %v41039_v34  ;;  %v29424_v18 = vand.u32 4294901760, %v40783_v11  ;;  %v29439_v53 = vsub.f32 %v40787_v2, %v29438_v1  ;;  %v40843_v54 = vpack.c.bf16 %v29445_v7, %v29438_v1 }
0x2c4c   :  { %35996 = vmatpush3.bf16.msra.mxu0 %v40669_v37  ;;  %36014 = vmatpush3.bf16.msra.mxu1 %v36013_v25  ;;  %v40785_v37 = vsub.f32 %v29320_v19, %v29342_v29  ;;  %v29425_v0 = vsub.f32 %v40783_v11, %v29424_v18  ;;  %v29440_v59 = vand.u32 4294901760, %v29439_v53  ;;  %v29467_v25 = vsub.f32 %v40799_v12, %v29466_v21 }
0x2c4d   :  { %36003 = vmatprep.subr.bf16.mxu0 %v41038_v15  ;;  %36021 = vmatprep.subr.bf16.mxu1 %v41038_v15 }
0x2c4e   :  { %v29426_v42 = vand.u32 4294901760, %v29425_v0  ;;  %v40821_v55 = vpack.c.bf16 %v29447_v56, %v29440_v59  ;;  %v36064_v32 = vpack.c.bf16 %v40785_v37, %v40783_v11 }
0x2c4f   :  { %34190 = vmatmul.mubr.f32.vlgmr.msra.gmra.mrb[64].mxu0 %v28395_v36  ;;  %34223 = vmatmul.mubr.f32.vlgmr.msra.gmra.mrb[68].mxu1 %v28886_v33  ;;  %v29431_v36 = vand.u32 4294901760, %v40785_v37 }
0x2c50   :  { %36005 = vmatpush3.bf16.msra.mxu0 %v36004_v57  ;;  %36023 = vmatpush3.bf16.msra.mxu1 %v36004_v57 }
0x2c51   :  { %36006 = vmatprep.subr.bf16.mxu0 %v41038_v15  ;;  %36024 = vmatprep.subr.bf16.mxu1 %v41038_v15  ;;  %v29432_v62 = vsub.f32 %v40785_v37, %v29431_v36  ;;  %v40841_v14 = vpack.c.bf16 %v29431_v36, %v29424_v18 }
0x2c52   :  { %34211 = vmatprep.mubr.msk.f32.mxu0 %vm37171_vm1, %v41039_v34  ;;  %34244 = vmatprep.mubr.msk.f32.mxu1 %vm37171_vm1, %v41039_v34 }
0x2c53   :  { %v29433_v52 = vand.u32 4294901760, %v29432_v62 }
0x2c54   :  { %36008 = vmatpush3.bf16.msra.mxu0 %v36007_v10  ;;  %36026 = vmatpush3.bf16.msra.mxu1 %v36007_v10 }
0x2c55   :  { %36015 = vmatprep.subr.bf16.mxu0 %v41038_v15  ;;  %36033 = vmatprep.subr.bf16.mxu1 %v41038_v15  ;;  %v40815_v45 = vpack.c.bf16 %v29433_v52, %v29426_v42 }
0x2c57   :  { %34212 = vmatmul.mubr.f32.vlgmr.msra.gmra.mrb[66].mxu0 %v28890_v38  ;;  %34245 = vmatmul.mubr.f32.vlgmr.msra.gmra.mrb[70].mxu1 %v28888_v17  ;;  %v36070_v38 = vpack.c.bf16 %v40797_v9, %v40795_v6 }
0x2c58   :  { %36017 = vmatpush3.bf16.msra.mxu0 %v36016_v41  ;;  %36035 = vmatpush3.bf16.msra.mxu1 %v36004_v57  ;;  %v29468_v57 = vand.u32 4294901760, %v29467_v25  ;;  %v36067_v41 = vpack.c.bf16 %v40789_v58, %v40787_v2  ;;  %v29947_v25 = vld [vmem:[%s40968_s14] ss:$0 sm:$0xff]  ;;  %s37176_s14 = smov [#allocation15]  }
0x2c59   :  { %36018 = vmatprep.subr.bf16.mxu0 %v41038_v15  ;;  %36036 = vmatprep.subr.bf16.mxu1 %v41038_v15  ;;  %s29897_s5 = sshll.u32 %s37176_s14, 4  ;;  %s29898_s5 = int_to_ptr.vmem [resolvable:$true] %s29897_s5 }
0x2c5a   :  { %34233 = vmatprep.mubr.msk.f32.mxu0 %vm37171_vm1, %v41039_v34  ;;  %34266 = vmatprep.mubr.msk.f32.mxu1 %vm37171_vm1, %v41039_v34  ;;  %s37079_s2 = scalar_lea.vmem %s29898_s5, 256  ;;  %p37084_p1 = scmp.lt.s32.totalorder %s29898_s5, %s29898_s5 }
0x2c5b   :  { %p37080_p0 = scmp.ne.s32.totalorder %s29898_s5, %s37079_s2  ;;  %p37085_p2 = scmp.lt.s32.totalorder %s37079_s2, %s37079_s2 }
0x2c5c   :  { %36020 = vmatpush3.bf16.msra.mxu0 %v36019_v60  ;;  %36038 = vmatpush3.bf16.msra.mxu1 %v36007_v10  ;;  %v36073_v60 = vpack.c.bf16 %v40801_v51, %v40799_v12 }
0x2c5d   :  { %36027 = vmatprep.subr.bf16.mxu0 %v41038_v15  ;;  %p37086_p3 = por %p37085_p2, %p37084_p1 }
0x2c5f   :  { %34234 = vmatmul.mubr.f32.vlgmr.msra.gmra.mrb[68].mxu0 %v28887_v4  ;;  %34267 = vmatmul.mubr.f32.vlgmr.msra.gmra.mrb[72].mxu1 %v28886_v33  ;;  %v29474_v4 = vsub.f32 %v40801_v51, %v29473_v35  ;;  %p37087_p4 = pnand %p37086_p3, %p37080_p0 }
0x2c60   :  { %36029 = vmatpush3.bf16.msra.mxu0 %v36028_v13  ;;  %34255 = vmatprep.mubr.msk.f32.mxu0 %vm37171_vm1, %v41039_v34 }
0x2c61   :  { %36030 = vmatprep.subr.bf16.mxu0 %v41038_v15  ;;  %v29475_v17 = vand.u32 4294901760, %v29474_v4 }
0x2c63   :  { %v40831_v10 = vpack.c.bf16 %v29475_v17, %v29468_v57 }
0x2c64   :  { %36032 = vmatpush3.bf16.msra.mxu0 %v36031_v49 }
0x2c65   :  { %36039 = vmatprep.subr.bf16.mxu0 %v41038_v15 }
0x2c67   :  { %34256 = vmatmul.mubr.f32.vlgmr.msra.gmra.mrb[70].mxu0 %v28886_v33  ;;  %v40827_v33 = vpack.c.bf16 %v29461_v3, %v29454_v24 }
0x2c68   :  { %34285 = vmatprep.mubr.msk.f32.mxu0 %vm37171_vm1, %v41039_v34  ;;  %36041 = vmatpush3.bf16.msra.mxu0 %v40777_v48 }
0x2c69   :  { %36042 = vmatprep.subr.bf16.mxu0 %v41038_v15 }
0x2c6c   :  { %36044 = vmatpush3.bf16.msra.mxu0 %v40781_v26 }
0x2c6d   :  { %36045 = vmatprep.subr.bf16.mxu0 %v41038_v15 }
0x2c70   :  { %36047 = vmatpush3.bf16.msra.mxu0 %v40793_v63 }
0x2c71   :  { %36048 = vmatprep.subr.bf16.mxu0 %v41038_v15 }
0x2c74   :  { %36050 = vmatpush3.bf16.msra.mxu0 %v40804_v16 }
0x2c75   :  { %36051 = vmatprep.subr.bf16.mxu0 %v41038_v15 }
0x2d0a   :  { %v28492_v13 = vpop.f32.mrb[62].mxu1 }
0x2d0b   :  { %v34158_v49 = vpop.f32.mrb[63].mxu1 }
0x2d12   :  { %v28649_v27 = vpop.f32.mrb[64].mxu1  ;;  %v28401_v19 = vpop.f32.mrb[60].mxu0 }
0x2d13   :  { %v28493_v44 = vadd.f32 %v28492_v13, %v28401_v19  ;;  %v34180_v29 = vpop.f32.mrb[65].mxu1  ;;  %v34147_v39 = vpop.f32.mrb[61].mxu0 }
0x2d1a   :  { %v28572_v20 = vpop.f32.mrb[62].mxu0  ;;  %v28807_v5 = vpop.f32.mrb[66].mxu1 }
0x2d1b   :  { %v28573_v30 = vadd.f32 %v28572_v20, %v28493_v44  ;;  %v34169_v46 = vpop.f32.mrb[63].mxu0  ;;  %v34202_v8 = vpop.f32.mrb[67].mxu1 }
0x2d1d   :  { %v28650_v31 = vadd.f32 %v28649_v27, %v28573_v30 }
0x2d22   :  { %v28732_v28 = vpop.f32.mrb[64].mxu0  ;;  %v28983_v0 = vpop.f32.mrb[68].mxu1 }
0x2d23   :  { %v28733_v62 = vadd.f32 %v28732_v28, %v28650_v31  ;;  %v34191_v42 = vpop.f32.mrb[65].mxu0  ;;  %v34224_v52 = vpop.f32.mrb[69].mxu1 }
0x2d25   :  { %v28808_v53 = vadd.f32 %v28807_v5, %v28733_v62 }
0x2d2a   :  { %v28892_v18 = vpop.f32.mrb[66].mxu0  ;;  %v29140_v36 = vpop.f32.mrb[70].mxu1 }
0x2d2b   :  { %v28893_v1 = vadd.f32 %v28892_v18, %v28808_v53  ;;  %v34213_v7 = vpop.f32.mrb[67].mxu0  ;;  %v34246_v50 = vpop.f32.mrb[71].mxu1 }
0x2d2d   :  { %v28984_v59 = vadd.f32 %v28983_v0, %v28893_v1 }
0x2d32   :  { %v29063_v56 = vpop.f32.mrb[68].mxu0  ;;  %v29298_v22 = vpop.f32.mrb[72].mxu1 }
0x2d33   :  { %v29064_v43 = vadd.f32 %v29063_v56, %v28984_v59  ;;  %v34235_v24 = vpop.f32.mrb[69].mxu0  ;;  %v34268_v47 = vpop.f32.mrb[73].mxu1 }
0x2d35   :  { %v29141_v40 = vadd.f32 %v29140_v36, %v29064_v43 }
0x2d3a   :  { %v29223_v3 = vpop.f32.mrb[70].mxu0 }
0x2d3b   :  { %v29224_v21 = vadd.f32 %v29223_v3, %v29141_v40  ;;  %v34257_v35 = vpop.f32.mrb[71].mxu0 }
0x2d3d   :  { %v29299_v4 = vadd.f32 %v29298_v22, %v29224_v21 }
0x2d3f   :  { %v29309_v57 = vadd.f32 %v29947_v25, %v29299_v4 }
0x2d41   :  { %v29310_v17 = vmul.f32 %v29309_v57, %v29309_v57 }
0x2d43   :  { %v29311_v13 = vmul.f32 %v29310_v17, %v29309_v57 }
0x2d45   :  { %v29312_v49 = vmul.f32 0.044715, %v29311_v13 }
0x2d47   :  { %v29313_v27 = vadd.f32 %v29312_v49, %v29309_v57 }
0x2d49   :  { %v29314_v19 = vmul.f32 0.7978846, %v29313_v27 }
0x2d4b   :  { %36919 = vtanh.f32 %v29314_v19 }
0x2d55   :  { %v36920_v44 = vpop.eup %36919 }
0x2d56   :  { %v29316_v29 = vadd.f32 1.0, %v36920_v44 }
0x2d58   :  { %v29317_v39 = vmul.f32 0.5, %v29316_v29 }
0x2d5a   :  { %v29318_v20 = vmul.f32 %v29317_v39, %v29309_v57 }
0x2d5c   :  { %v29336_v5 = vsel %vm29334_vm6, %v29318_v20, 0 }
0x2d5d   :  { %v29411_v30 = vand.u32 4294901760, %v29336_v5 }
0x2d5f   :  { %v29412_v46 = vsub.f32 %v29336_v5, %v29411_v30 }
0x2d61   :  { %v29413_v8 = vand.u32 4294901760, %v29412_v46 }
0x2d63   :  { %v29414_v31 = vsub.f32 %v29412_v46, %v29413_v8 }
0x2d65   :  { %v29415_v28 = vand.u32 4294901760, %v29414_v31 }
0x2d67   :  { %34286 = vmatmul.mubr.f32.vlgmr.msra.gmra.mrb[72].mxu0 %v29415_v28 }
0x2d68   :  { %36053 = vmatpush3.bf16.msra.mxu0 %v40815_v45  ;;  %34304 = vmatprep.mubr.msk.f32.mxu0 %vm37171_vm1, %v41039_v34 }
0x2d69   :  { %36054 = vmatprep.subr.bf16.mxu0 %v41038_v15 }
0x2d6c   :  { %36056 = vmatpush3.bf16.msra.mxu0 %v40821_v55 }
0x2d6d   :  { %36057 = vmatprep.subr.bf16.mxu0 %v41038_v15 }
0x2d70   :  { %36059 = vmatpush3.bf16.msra.mxu0 %v40827_v33 }
0x2d71   :  { %36060 = vmatprep.subr.bf16.mxu0 %v41038_v15 }
0x2d74   :  { %36062 = vmatpush3.bf16.msra.mxu0 %v40831_v10 }
0x2d75   :  { %36063 = vmatprep.subr.bf16.mxu0 %v41038_v15 }
0x2d77   :  { %34305 = vmatmul.mubr.f32.vlgmr.msra.gmra.mrb[72].mxu0 %v29411_v30 }
0x2d78   :  { %36065 = vmatpush3.bf16.msra.mxu0 %v36064_v32  ;;  %34323 = vmatprep.mubr.msk.f32.mxu0 %vm37171_vm1, %v41039_v34 }
0x2d79   :  { %36066 = vmatprep.subr.bf16.mxu0 %v41038_v15 }
0x2d7c   :  { %36068 = vmatpush3.bf16.msra.mxu0 %v36067_v41 }
0x2d7d   :  { %36069 = vmatprep.subr.bf16.mxu0 %v41038_v15 }
0x2d80   :  { %36071 = vmatpush3.bf16.msra.mxu0 %v36070_v38 }
0x2d81   :  { %36072 = vmatprep.subr.bf16.mxu0 %v41038_v15 }
0x2d84   :  { %36074 = vmatpush3.bf16.msra.mxu0 %v36073_v60 }
0x2d85   :  { %36075 = vmatprep.subr.bf16.mxu0 %v41038_v15 }
0x2d87   :  { %34324 = vmatmul.mubr.f32.vlgmr.msra.gmra.mrb[72].mxu0 %v29412_v46 }
0x2d88   :  { %36077 = vmatpush3.bf16.msra.mxu0 %v40777_v48  ;;  %34342 = vmatprep.mubr.msk.f32.mxu0 %vm37171_vm1, %v41039_v34 }
0x2d89   :  { %36078 = vmatprep.subr.bf16.mxu0 %v41038_v15 }
0x2d8c   :  { %36080 = vmatpush3.bf16.msra.mxu0 %v40781_v26 }
0x2d8d   :  { %36081 = vmatprep.subr.bf16.mxu0 %v41038_v15 }
0x2d90   :  { %36083 = vmatpush3.bf16.msra.mxu0 %v40793_v63 }
0x2d91   :  { %36084 = vmatprep.subr.bf16.mxu0 %v41038_v15 }
0x2d94   :  { %36086 = vmatpush3.bf16.msra.mxu0 %v40804_v16 }
0x2d95   :  { %36087 = vmatprep.subr.bf16.mxu0 %v41038_v15 }
0x2d97   :  { %34343 = vmatmul.mubr.f32.vlgmr.msra.gmra.mrb[72].mxu0 %v29413_v8 }
0x2d98   :  { %36089 = vmatpush3.bf16.msra.mxu0 %v40841_v14  ;;  %34361 = vmatprep.mubr.msk.f32.mxu0 %vm37171_vm1, %v41039_v34 }
0x2d99   :  { %36090 = vmatprep.subr.bf16.mxu0 %v41038_v15 }
0x2d9c   :  { %36092 = vmatpush3.bf16.msra.mxu0 %v40843_v54 }
0x2d9d   :  { %36093 = vmatprep.subr.bf16.mxu0 %v41038_v15 }
0x2da0   :  { %36095 = vmatpush3.bf16.msra.mxu0 %v40845_v23 }
0x2da1   :  { %36096 = vmatprep.subr.bf16.mxu0 %v41038_v15 }
0x2da4   :  { %36098 = vmatpush3.bf16.msra.mxu0 %v40847_v61 }
0x2da5   :  { %36099 = vmatprep.subr.bf16.mxu0 %v41038_v15 }
0x2da7   :  { %34362 = vmatmul.mubr.f32.vlgmr.msra.gmra.mrb[72].mxu0 %v29411_v30 }
0x2da8   :  { %36101 = vmatpush3.bf16.msra.mxu0 %v40777_v48  ;;  %34380 = vmatprep.mubr.msk.f32.mxu0 %vm37171_vm1, %v41039_v34 }
0x2da9   :  { %36102 = vmatprep.subr.bf16.mxu0 %v41038_v15 }
0x2dac   :  { %36104 = vmatpush3.bf16.msra.mxu0 %v40781_v26 }
0x2dad   :  { %36105 = vmatprep.subr.bf16.mxu0 %v41038_v15 }
0x2db0   :  { %36107 = vmatpush3.bf16.msra.mxu0 %v40793_v63 }
0x2db1   :  { %36108 = vmatprep.subr.bf16.mxu0 %v41038_v15 }
0x2db4   :  { %36110 = vmatpush3.bf16.msra.mxu0 %v40804_v16 }
0x2db7   :  { %34381 = vmatmul.mubr.f32.vlgmr.msra.gmra.mrb[72].mxu0 %v29411_v30 }
0x2db8   :  { %37090 = shalt.err (!%p37087_p4)
}
0x2db9   :  { %s37091_s20 = scalar_lea.hbm %s40972_s18, 256 }
0x2dba   :  { %p37092_p5 = scmp.ne.s32.totalorder %s40972_s18, %s37091_s20  ;;  %p37095_p6 = scmp.lt.u32.totalorder %s37091_s20, %s40972_s18 }
0x2dbc   :  { %p37097_p7 = pnand %p37095_p6, %p37092_p5 }
0x2dbe   :  { %37100 = shalt.err (!%p37097_p7)
}
0x2dbf   :  { %29903 = dma.vmem_to_hbm [thread:$0]  %s29898_s5, 256, %s40972_s18, [#allocation16], %s37159_s28, %s37159_s28, %s37160_s29  }
0x2dc0   :  { %s37101_s24 = scalar_lea.vmem %s29886_s30, 256  ;;  %p37106_p9 = scmp.lt.s32.totalorder %s29886_s30, %s29886_s30 }
0x2dc1   :  { %p37102_p8 = scmp.ne.s32.totalorder %s29886_s30, %s37101_s24  ;;  %p37107_p10 = scmp.lt.s32.totalorder %s37101_s24, %s37101_s24 }
0x2dc3   :  { %p37108_p11 = por %p37107_p10, %p37106_p9 }
0x2dc5   :  { %p37109_p12 = pnand %p37108_p11, %p37102_p8 }
0x2dc7   :  { %37112 = shalt.err (!%p37109_p12)
}
0x2dc8   :  { %s37113_s3 = scalar_lea.hbm %s40971_s17, 256 }
0x2dc9   :  { %p37114_p13 = scmp.ne.s32.totalorder %s40971_s17, %s37113_s3  ;;  %p37117_p0 = scmp.lt.u32.totalorder %s37113_s3, %s40971_s17 }
0x2dcb   :  { %p37119_p1 = pnand %p37117_p0, %p37114_p13 }
0x2dcd   :  { %37122 = shalt.err (!%p37119_p1)
}
0x2dce   :  { %29891 = dma.vmem_to_hbm [thread:$0]  %s29886_s30, 256, %s40971_s17, [#allocation4], %s37159_s28, %s37159_s28, %s37160_s29  }
0x2dcf   :  { %v29948_v15 = vld [vmem:[%s40970_s16] ss:$0 sm:$0xff]  ;;  %s37178_s4 = smov [#allocation17]  }
0x2dd0   :  { %s29910_s14 = sshll.u32 %s37178_s4, 4  ;;  %s29911_s14 = int_to_ptr.vmem [resolvable:$true] %s29910_s14 }
0x2dd1   :  { %s37123_s5 = scalar_lea.vmem %s29911_s14, 32  ;;  %p37128_p3 = scmp.lt.s32.totalorder %s29911_s14, %s29911_s14 }
0x2dd2   :  { %p37124_p2 = scmp.ne.s32.totalorder %s29911_s14, %s37123_s5  ;;  %p37129_p4 = scmp.lt.s32.totalorder %s37123_s5, %s37123_s5 }
0x2dd4   :  { %p37130_p5 = por %p37129_p4, %p37128_p3 }
0x2dd6   :  { %p37131_p6 = pnand %p37130_p5, %p37124_p2 }
0x2e8a   :  { %v29871_v34 = vpop.f32.mrb[72].mxu0 }
0x2e8b   :  { %v36123_v48 = vadd.f32 %v29948_v15, %v29871_v34  ;;  %v34382_v26 = vpop.f32.mrb[73].mxu0 }
0x2e8d   :  { %29875 = vst [vmem:[#allocation17] sm:$0x3] %v36123_v48 }
0x2e8e   :  { %37134 = shalt.err (!%p37131_p6)
}
0x2e8f   :  { %s41068_s28 = sld [smem:[#allocation32_spill]] }
0x2e95   :  { %s37135_s29 = scalar_lea.hbm %s41068_s28, 32 }
0x2e96   :  { %p37136_p7 = scmp.ne.s32.totalorder %s41068_s28, %s37135_s29  ;;  %p37139_p8 = scmp.lt.u32.totalorder %s37135_s29, %s41068_s28 }
0x2e98   :  { %p37141_p9 = pnand %p37139_p8, %p37136_p7 }
0x2e9a   :  { %37144 = shalt.err (!%p37141_p9)
}
0x2e9b   :  { %29913 = dma.vmem_to_hbm [thread:$0]  %s29911_s14, 32, %s41068_s28, [#allocation16]  }
0x2e9c   :  { %37153 = dma.done.wait [#allocation4], 256  }
0x2e9d   :  { %37154 = vsyncadd [#allocation4], 4294967040 }
0x2e9e   :  { %37155 = dma.done.wait [#allocation16], 288  }
0x2e9f   :  { %37156 = vsyncadd [#allocation16], 4294967008 }
0x2ea0   :  { %29923 = vsyncpa [#allocation3], 1 }
0x2ea1   :  { %29924 = vsyncpa [#allocation6], 1 }
0x2ea2   :  { %29925 = vsyncpa [#allocation9], 1 }
0x2ea3   :  { %29926 = vsyncpa [#allocation12], 1 }
0x2ea4   :  { %29927 = vsyncpa [#allocation4], 1 }
0x2ea5   :  { %29928 = vsyncpa [#allocation16], 1 }

</bundles_post_ra>
